<compile_context>
chip_gen: v5e
topology: v5e:2x2
jax: 0.10.0
libtpu: 0.0.40
codegen_flags: <defaults>
</compile_context>

<pallas_src>
import functools

import jax
import jax.numpy as jnp
from jax import lax
from jax.experimental import pallas as pl
from jax.experimental.pallas import tpu as pltpu


def _round_up(n, m):
    return ((n + m - 1) // m) * m


def _pad2(a, rows, cols, dtype):
    return jnp.zeros((rows, cols), dtype).at[:a.shape[0], :a.shape[1]].set(
        a.astype(dtype))


def _pad_bias(b, cols, dtype):
    return jnp.zeros((1, cols), dtype).at[0, :b.shape[0]].set(b.astype(dtype))


def attention_kernel(x_ref, wq_ref, bq_ref, wk_ref, bk_ref, wv_ref, bv_ref,
                     out_ref, q_scr, m_scr, l_scr, acc_scr,
                     *, causal, s_real, q_tile, k_tile):
    """One (batch tile, q tile, k tile) step of causal outer-product attention."""
    qi = pl.program_id(1)
    ki = pl.program_id(2)
    nk = pl.num_programs(2)

    @pl.when(ki == 0)
    def _init():
        # Q rows for this (batch, q) tile depend only on qi -> compute once per
        # q tile (bf16 MXU inputs, f32 accumulate, f32 bias add) and stash.
        q = jnp.dot(x_ref[...], wq_ref[...],
                    preferred_element_type=jnp.float32) + bq_ref[...]
        q_scr[...] = q
        m_scr[...] = jnp.full(m_scr.shape, -jnp.inf, jnp.float32)
        l_scr[...] = jnp.zeros(l_scr.shape, jnp.float32)
        acc_scr[...] = jnp.zeros(acc_scr.shape, jnp.float32)

    def _process_block():
        # K/V columns for this key block (bf16 MXU, f32 accumulate).
        k = jnp.dot(x_ref[...], wk_ref[...],
                    preferred_element_type=jnp.float32) + bk_ref[...]
        v = jnp.dot(x_ref[...], wv_ref[...],
                    preferred_element_type=jnp.float32) + bv_ref[...]
        q = q_scr[...]

        # scores[b,i,j] = q[b,i] * k[b,j]  (rank-1 outer product on the VPU).
        s = q[:, :, None] * k[:, None, :]            # (BT, q_tile, k_tile) f32

        # Single fused mask select: padded key columns + (optionally) causal.
        # Invariant: every row of every visited block keeps at least column
        # ki*k_tile (it is always < s_real and <= the row index), so no row is
        # fully -inf and the softmax denominator stays > 0.
        rows = qi * q_tile + lax.broadcasted_iota(jnp.int32, (q_tile, k_tile), 0)
        cols = ki * k_tile + lax.broadcasted_iota(jnp.int32, (q_tile, k_tile), 1)
        keep = cols < s_real
        if causal:
            keep = jnp.logical_and(keep, cols <= rows)
        s = jnp.where(keep[None], s, -jnp.inf)

        # Online softmax update; exp(-inf) = 0 zeroes masked probabilities, and
        # both row reductions are last-axis (XLU) sums -- no MXU contraction.
        m_prev = m_scr[...]
        m_new = jnp.maximum(m_prev, jnp.max(s, axis=-1))       # (BT, q_tile)
        alpha = jnp.exp(m_prev - m_new)                         # (BT, q_tile)
        p = jnp.exp(s - m_new[:, :, None])                      # (BT, q, k)
        l_scr[...] = alpha * l_scr[...] + jnp.sum(p, axis=-1)
        acc_scr[...] = alpha * acc_scr[...] + jnp.sum(p * v[:, None, :], axis=-1)
        m_scr[...] = m_new

    if causal:
        # Skip key blocks strictly above the diagonal of this q tile.
        pl.when(ki * k_tile < (qi + 1) * q_tile)(_process_block)
    else:
        _process_block()

    @pl.when(ki == nk - 1)
    def _finalize():
        out_ref[...] = (acc_scr[...] *
                        pl.reciprocal(l_scr[...], approx=True)
                        ).astype(out_ref.dtype)


def attention_forward(x, wq, bq, wk, bk, wv, bv, mask=True, b_tile=None):
    """x: (B, S). Weights stored pre-transposed as (S_in, S_out); biases (S,)."""
    B, S = x.shape
    q_tile = k_tile = 128
    S_pad = _round_up(max(S, 128), 128)            # lane-dense last dim

    # Generation-aware VMEM sizing: v5e/v6e have 128 MiB VMEM per core, v7x 64.
    try:
        vmem_cap = pltpu.get_tpu_info().vmem_capacity_bytes
    except Exception:                               # unknown backend: be safe
        vmem_cap = 64 * 1024 * 1024
    if vmem_cap >= 100 * 1024 * 1024:               # v5e / v6e (128 MiB)
        budget, vmem_limit = 80 * 1024 * 1024, 96 * 1024 * 1024
    else:                                           # v7x (64 MiB) or unknown
        budget, vmem_limit = 16 * 1024 * 1024, 32 * 1024 * 1024

    if b_tile is None:
        # ~4 live f32 (b_tile,128,128) slabs per step + double-buffered bf16 x.
        per_row = 4 * q_tile * k_tile * 4 + 4 * S_pad
        b_tile = max(8, min(128, (budget // per_row) // 8 * 8))
        b_tile = min(b_tile, _round_up(B, 8))       # don't over-pad tiny batches
    B_pad = _round_up(B, b_tile)

    bf16, f32 = jnp.bfloat16, jnp.float32
    x_pad = jnp.zeros((B_pad, S_pad), bf16).at[:B, :S].set(x.astype(bf16))
    wq_p = _pad2(wq, S_pad, S_pad, bf16)
    wk_p = _pad2(wk, S_pad, S_pad, bf16)
    wv_p = _pad2(wv, S_pad, S_pad, bf16)
    bq_p = _pad_bias(bq, S_pad, f32)
    bk_p = _pad_bias(bk, S_pad, f32)
    bv_p = _pad_bias(bv, S_pad, f32)

    kern = functools.partial(attention_kernel, causal=bool(mask), s_real=S,
                             q_tile=q_tile, k_tile=k_tile)

    grid = (B_pad // b_tile, S_pad // q_tile, S_pad // k_tile)

    cost = pl.CostEstimate(
        flops=2 * B_pad * S_pad * 3 * S_pad + 6 * B_pad * S_pad * S_pad,
        transcendentals=B_pad * S_pad * S_pad,
        bytes_accessed=(x_pad.size * 2 + 3 * S_pad * S_pad * 2
                        + 3 * S_pad * 4 + B_pad * S_pad * 4),
    )

    out_pad = pl.pallas_call(
        kern,
        out_shape=jax.ShapeDtypeStruct((B_pad, S_pad), jnp.float32),
        grid_spec=pltpu.PrefetchScalarGridSpec(
            num_scalar_prefetch=0,
            grid=grid,
            in_specs=[
                pl.BlockSpec((b_tile, S_pad), lambda bi, qi, ki: (bi, 0)),   # x
                pl.BlockSpec((S_pad, q_tile), lambda bi, qi, ki: (0, qi)),   # Wq
                pl.BlockSpec((1, q_tile), lambda bi, qi, ki: (0, qi)),       # bq
                pl.BlockSpec((S_pad, k_tile), lambda bi, qi, ki: (0, ki)),   # Wk
                pl.BlockSpec((1, k_tile), lambda bi, qi, ki: (0, ki)),       # bk
                pl.BlockSpec((S_pad, k_tile), lambda bi, qi, ki: (0, ki)),   # Wv
                pl.BlockSpec((1, k_tile), lambda bi, qi, ki: (0, ki)),       # bv
            ],
            out_specs=pl.BlockSpec((b_tile, q_tile), lambda bi, qi, ki: (bi, qi)),
            scratch_shapes=[
                pltpu.VMEM((b_tile, q_tile), jnp.float32),   # q tile
                pltpu.VMEM((b_tile, q_tile), jnp.float32),   # running max
                pltpu.VMEM((b_tile, q_tile), jnp.float32),   # running denom
                pltpu.VMEM((b_tile, q_tile), jnp.float32),   # running numer
            ],
        ),
        compiler_params=pltpu.CompilerParams(
            dimension_semantics=("parallel", "parallel", "arbitrary"),
            vmem_limit_bytes=vmem_limit,
        ),
        cost_estimate=cost,
    )(x_pad, wq_p, bq_p, wk_p, bk_p, wv_p, bv_p)

    return out_pad[:B, :S]


def _reference(x, wq, bq, wk, bk, wv, bv, mask=True):
    q = x @ wq + bq
    k = x @ wk + bk
    v = x @ wv + bv
    scores = q[:, :, None] * k[:, None, :]
    if mask:
        S = x.shape[1]
        tril = jnp.tril(jnp.ones((S, S)))
        scores = jnp.where(tril[None] == 0, -1e9, scores)
    attn = jax.nn.softmax(scores, axis=-1)
    return jnp.sum(attn * v[:, None, :], axis=-1)


def _make_case(key, B, S):
    ks = jax.random.split(key, 7)
    bound = 1.0 / (S ** 0.5)   # PyTorch nn.Linear default uniform bound
    x = jax.random.normal(ks[0], (B, S), jnp.float32)
    wq = jax.random.uniform(ks[1], (S, S), jnp.float32, -bound, bound)
    bq = jax.random.uniform(ks[2], (S,), jnp.float32, -bound, bound)
    wk = jax.random.uniform(ks[3], (S, S), jnp.float32, -bound, bound)
    bk = jax.random.uniform(ks[4], (S,), jnp.float32, -bound, bound)
    wv = jax.random.uniform(ks[5], (S, S), jnp.float32, -bound, bound)
    bv = jax.random.uniform(ks[6], (S,), jnp.float32, -bound, bound)
    return x, wq, bq, wk, bk, wv, bv


if __name__ == "__main__":
    key = jax.random.PRNGKey(0)
    k_small, k_big = jax.random.split(key, 2)

    # bf16 QKV matmul inputs -> compare against the f32 reference at a bf16-
    # appropriate tolerance (the softmax/normalization itself stays f32).
    TOL = dict(atol=5e-2, rtol=5e-2)

    # Small instance (single tile in every grid axis), masked + unmasked paths.
    args = _make_case(k_small, B=2, S=16)
    out = jax.block_until_ready(attention_forward(*args, mask=True))
    assert out.shape == (2, 16)
    assert jnp.allclose(out, _reference(*args, mask=True), **TOL), "mismatch (mask)"

    out_nm = jax.block_until_ready(attention_forward(*args, mask=False))
    assert jnp.allclose(out_nm, _reference(*args, mask=False), **TOL), \
        "mismatch (no mask)"

    # Module-default seq_len=200 with a ragged batch: exercises batch tiling,
    # q/k tiling, the causal block skip and the padded-row/column paths.
    args2 = _make_case(k_big, B=10, S=200)
    out2 = jax.block_until_ready(attention_forward(*args2, mask=True, b_tile=8))
    assert out2.shape == (10, 200)
    assert jnp.allclose(out2, _reference(*args2, mask=True), **TOL), \
        "mismatch (seq_len=200)"

    print("KERNEL_OK")
</pallas_src>

<mosaic_0001>
module attributes {stable_mosaic.version = 11 : i64} {
  func.func @attention_kernel(%arg0: i32, %arg1: i32, %arg2: i32, %arg3: memref<8x128xbf16, #tpu.memory_space<vmem>>, %arg4: memref<128x128xbf16, #tpu.memory_space<vmem>>, %arg5: memref<1x128xf32, #tpu.memory_space<vmem>>, %arg6: memref<128x128xbf16, #tpu.memory_space<vmem>>, %arg7: memref<1x128xf32, #tpu.memory_space<vmem>>, %arg8: memref<128x128xbf16, #tpu.memory_space<vmem>>, %arg9: memref<1x128xf32, #tpu.memory_space<vmem>>, %arg10: memref<8x128xf32, #tpu.memory_space<vmem>>, %arg11: memref<8x128xf32, #tpu.memory_space<vmem>>, %arg12: memref<8x128xf32, #tpu.memory_space<vmem>>, %arg13: memref<8x128xf32, #tpu.memory_space<vmem>>, %arg14: memref<8x128xf32, #tpu.memory_space<vmem>>) attributes {dimension_semantics = [#tpu.dimension_semantics<parallel>, #tpu.dimension_semantics<parallel>, #tpu.dimension_semantics<arbitrary>], iteration_bounds = array<i64: 1, 1, 1>, scalar_prefetch = 0 : i64, scratch_operands = 4 : i64, tpu.core_type = #tpu.core_type<tc>, window_params = [{transform_indices = @transform_0, window_bounds = array<i64: 8, 128>}, {transform_indices = @transform_1, window_bounds = array<i64: 128, 128>}, {transform_indices = @transform_2, window_bounds = array<i64: 1, 128>}, {transform_indices = @transform_3, window_bounds = array<i64: 128, 128>}, {transform_indices = @transform_4, window_bounds = array<i64: 1, 128>}, {transform_indices = @transform_5, window_bounds = array<i64: 128, 128>}, {transform_indices = @transform_6, window_bounds = array<i64: 1, 128>}, {transform_indices = @transform_7, window_bounds = array<i64: 8, 128>}]} {
    %c0_i32 = arith.constant 0 : i32
    %0 = arith.cmpi eq, %arg2, %c0_i32 : i32
    %1 = arith.extui %0 : i1 to i32
    %c0_i32_0 = arith.constant 0 : i32
    %2 = arith.cmpi ne, %1, %c0_i32_0 : i32
    scf.if %2 {
      %c0 = arith.constant 0 : index
      %c0_5 = arith.constant 0 : index
      %12 = vector.load %arg3[%c0, %c0_5] : memref<8x128xbf16, #tpu.memory_space<vmem>>, vector<8x128xbf16>
      %c0_6 = arith.constant 0 : index
      %c0_7 = arith.constant 0 : index
      %13 = vector.load %arg4[%c0_6, %c0_7] : memref<128x128xbf16, #tpu.memory_space<vmem>>, vector<128x128xbf16>
      %cst = arith.constant dense<0.000000e+00> : vector<8x128xf32>
      %14 = tpu.matmul %12, %13, %cst {dimension_numbers = #tpu.dot_dimension_numbers<[1], [0], [0], [1], [0, 0, 1, 1], [], []>} : vector<8x128xbf16>, vector<128x128xbf16>, vector<8x128xf32> -> vector<8x128xf32>
      %c0_8 = arith.constant 0 : index
      %c0_9 = arith.constant 0 : index
      %15 = vector.load %arg5[%c0_8, %c0_9] : memref<1x128xf32, #tpu.memory_space<vmem>>, vector<1x128xf32>
      %16 = vector.broadcast %15 : vector<1x128xf32> to vector<8x128xf32>
      %17 = arith.addf %14, %16 : vector<8x128xf32>
      %c0_10 = arith.constant 0 : index
      %c0_11 = arith.constant 0 : index
      %18 = vector.load %arg11[%c0_10, %c0_11] : memref<8x128xf32, #tpu.memory_space<vmem>>, vector<8x128xf32>
      tpu.vector_store %arg11[%c0_10, %c0_11], %17 {strides = array<i32>} : memref<8x128xf32, #tpu.memory_space<vmem>>, vector<8x128xf32>,
      %cst_12 = arith.constant 0xFF800000 : f32
      %19 = vector.broadcast %cst_12 : f32 to vector<8x128xf32>
      %c0_13 = arith.constant 0 : index
      %c0_14 = arith.constant 0 : index
      %20 = vector.load %arg12[%c0_13, %c0_14] : memref<8x128xf32, #tpu.memory_space<vmem>>, vector<8x128xf32>
      tpu.vector_store %arg12[%c0_13, %c0_14], %19 {strides = array<i32>} : memref<8x128xf32, #tpu.memory_space<vmem>>, vector<8x128xf32>,
      %cst_15 = arith.constant 0.000000e+00 : f32
      %21 = vector.broadcast %cst_15 : f32 to vector<8x128xf32>
      %c0_16 = arith.constant 0 : index
      %c0_17 = arith.constant 0 : index
      %22 = vector.load %arg13[%c0_16, %c0_17] : memref<8x128xf32, #tpu.memory_space<vmem>>, vector<8x128xf32>
      tpu.vector_store %arg13[%c0_16, %c0_17], %21 {strides = array<i32>} : memref<8x128xf32, #tpu.memory_space<vmem>>, vector<8x128xf32>,
      %cst_18 = arith.constant 0.000000e+00 : f32
      %23 = vector.broadcast %cst_18 : f32 to vector<8x128xf32>
      %c0_19 = arith.constant 0 : index
      %c0_20 = arith.constant 0 : index
      %24 = vector.load %arg14[%c0_19, %c0_20] : memref<8x128xf32, #tpu.memory_space<vmem>>, vector<8x128xf32>
      tpu.vector_store %arg14[%c0_19, %c0_20], %23 {strides = array<i32>} : memref<8x128xf32, #tpu.memory_space<vmem>>, vector<8x128xf32>,
    } else {
    }
    %c128_i32 = arith.constant 128 : i32
    %3 = arith.muli %arg2, %c128_i32 : i32
    %c1_i32 = arith.constant 1 : i32
    %4 = arith.addi %arg1, %c1_i32 : i32
    %c128_i32_1 = arith.constant 128 : i32
    %5 = arith.muli %4, %c128_i32_1 : i32
    %6 = arith.cmpi slt, %3, %5 : i32
    %7 = arith.extui %6 : i1 to i32
    %c0_i32_2 = arith.constant 0 : i32
    %8 = arith.cmpi ne, %7, %c0_i32_2 : i32
    scf.if %8 {
      %c0 = arith.constant 0 : index
      %c0_5 = arith.constant 0 : index
      %12 = vector.load %arg3[%c0, %c0_5] : memref<8x128xbf16, #tpu.memory_space<vmem>>, vector<8x128xbf16>
      %c0_6 = arith.constant 0 : index
      %c0_7 = arith.constant 0 : index
      %13 = vector.load %arg6[%c0_6, %c0_7] : memref<128x128xbf16, #tpu.memory_space<vmem>>, vector<128x128xbf16>
      %cst = arith.constant dense<0.000000e+00> : vector<8x128xf32>
      %14 = tpu.matmul %12, %13, %cst {dimension_numbers = #tpu.dot_dimension_numbers<[1], [0], [0], [1], [0, 0, 1, 1], [], []>} : vector<8x128xbf16>, vector<128x128xbf16>, vector<8x128xf32> -> vector<8x128xf32>
      %c0_8 = arith.constant 0 : index
      %c0_9 = arith.constant 0 : index
      %15 = vector.load %arg7[%c0_8, %c0_9] : memref<1x128xf32, #tpu.memory_space<vmem>>, vector<1x128xf32>
      %16 = vector.broadcast %15 : vector<1x128xf32> to vector<8x128xf32>
      %17 = arith.addf %14, %16 : vector<8x128xf32>
      %c0_10 = arith.constant 0 : index
      %c0_11 = arith.constant 0 : index
      %18 = vector.load %arg3[%c0_10, %c0_11] : memref<8x128xbf16, #tpu.memory_space<vmem>>, vector<8x128xbf16>
      %c0_12 = arith.constant 0 : index
      %c0_13 = arith.constant 0 : index
      %19 = vector.load %arg8[%c0_12, %c0_13] : memref<128x128xbf16, #tpu.memory_space<vmem>>, vector<128x128xbf16>
      %cst_14 = arith.constant dense<0.000000e+00> : vector<8x128xf32>
      %20 = tpu.matmul %18, %19, %cst_14 {dimension_numbers = #tpu.dot_dimension_numbers<[1], [0], [0], [1], [0, 0, 1, 1], [], []>} : vector<8x128xbf16>, vector<128x128xbf16>, vector<8x128xf32> -> vector<8x128xf32>
      %c0_15 = arith.constant 0 : index
      %c0_16 = arith.constant 0 : index
      %21 = vector.load %arg9[%c0_15, %c0_16] : memref<1x128xf32, #tpu.memory_space<vmem>>, vector<1x128xf32>
      %22 = vector.broadcast %21 : vector<1x128xf32> to vector<8x128xf32>
      %23 = arith.addf %20, %22 : vector<8x128xf32>
      %c0_17 = arith.constant 0 : index
      %c0_18 = arith.constant 0 : index
      %24 = vector.load %arg11[%c0_17, %c0_18] : memref<8x128xf32, #tpu.memory_space<vmem>>, vector<8x128xf32>
      %25 = vector.shape_cast %24 : vector<8x128xf32> to vector<8x128x1xf32>
      %26 = vector.shape_cast %17 : vector<8x128xf32> to vector<8x1x128xf32>
      %27 = vector.broadcast %25 : vector<8x128x1xf32> to vector<8x128x128xf32>
      %28 = vector.broadcast %26 : vector<8x1x128xf32> to vector<8x128x128xf32>
      %29 = arith.mulf %27, %28 : vector<8x128x128xf32>
      %c128_i32_19 = arith.constant 128 : i32
      %30 = arith.muli %arg1, %c128_i32_19 : i32
      %31 = tpu.iota {dimensions = array<i32: 0>} : vector<128x128xi32>
      %32 = vector.broadcast %30 : i32 to vector<128x128xi32>
      %33 = arith.addi %32, %31 : vector<128x128xi32>
      %c128_i32_20 = arith.constant 128 : i32
      %34 = arith.muli %arg2, %c128_i32_20 : i32
      %35 = tpu.iota {dimensions = array<i32: 1>} : vector<128x128xi32>
      %36 = vector.broadcast %34 : i32 to vector<128x128xi32>
      %37 = arith.addi %36, %35 : vector<128x128xi32>
      %c16_i32 = arith.constant 16 : i32
      %38 = vector.broadcast %c16_i32 : i32 to vector<128x128xi32>
      %39 = arith.cmpi slt, %37, %38 : vector<128x128xi32>
      %40 = arith.cmpi sle, %37, %33 : vector<128x128xi32>
      %41 = arith.andi %39, %40 : vector<128x128xi1>
      %42 = vector.shape_cast %41 : vector<128x128xi1> to vector<1x128x128xi1>
      %cst_21 = arith.constant 0xFF800000 : f32
      %43 = vector.shape_cast %42 : vector<1x128x128xi1> to vector<1x128x128xi1>
      %44 = vector.broadcast %43 : vector<1x128x128xi1> to vector<8x128x128xi1>
      %45 = vector.broadcast %cst_21 : f32 to vector<8x128x128xf32>
      %46 = arith.select %44, %29, %45 : vector<8x128x128xi1>, vector<8x128x128xf32>
      %c0_22 = arith.constant 0 : index
      %c0_23 = arith.constant 0 : index
      %47 = vector.load %arg12[%c0_22, %c0_23] : memref<8x128xf32, #tpu.memory_space<vmem>>, vector<8x128xf32>
      %cst_24 = arith.constant dense<0xFF800000> : vector<8x128xf32>
      %48 = vector.multi_reduction <maximumf>, %46, %cst_24 [2] : vector<8x128x128xf32> to vector<8x128xf32>
      %49 = arith.maximumf %47, %48 : vector<8x128xf32>
      %50 = arith.subf %47, %49 : vector<8x128xf32>
      %51 = math.exp %50 : vector<8x128xf32>
      %52 = vector.shape_cast %49 : vector<8x128xf32> to vector<8x128x1xf32>
      %53 = vector.broadcast %52 : vector<8x128x1xf32> to vector<8x128x128xf32>
      %54 = arith.subf %46, %53 : vector<8x128x128xf32>
      %55 = math.exp %54 : vector<8x128x128xf32>
      %c0_25 = arith.constant 0 : index
      %c0_26 = arith.constant 0 : index
      %56 = vector.load %arg13[%c0_25, %c0_26] : memref<8x128xf32, #tpu.memory_space<vmem>>, vector<8x128xf32>
      %57 = arith.mulf %51, %56 : vector<8x128xf32>
      %cst_27 = arith.constant dense<0.000000e+00> : vector<8x128xf32>
      %58 = vector.multi_reduction <add>, %55, %cst_27 [2] : vector<8x128x128xf32> to vector<8x128xf32>
      %59 = arith.addf %57, %58 : vector<8x128xf32>
      %c0_28 = arith.constant 0 : index
      %c0_29 = arith.constant 0 : index
      %60 = vector.load %arg13[%c0_28, %c0_29] : memref<8x128xf32, #tpu.memory_space<vmem>>, vector<8x128xf32>
      tpu.vector_store %arg13[%c0_28, %c0_29], %59 {strides = array<i32>} : memref<8x128xf32, #tpu.memory_space<vmem>>, vector<8x128xf32>,
      %c0_30 = arith.constant 0 : index
      %c0_31 = arith.constant 0 : index
      %61 = vector.load %arg14[%c0_30, %c0_31] : memref<8x128xf32, #tpu.memory_space<vmem>>, vector<8x128xf32>
      %62 = arith.mulf %51, %61 : vector<8x128xf32>
      %63 = vector.shape_cast %23 : vector<8x128xf32> to vector<8x1x128xf32>
      %64 = vector.broadcast %63 : vector<8x1x128xf32> to vector<8x128x128xf32>
      %65 = arith.mulf %55, %64 : vector<8x128x128xf32>
      %cst_32 = arith.constant dense<0.000000e+00> : vector<8x128xf32>
      %66 = vector.multi_reduction <add>, %65, %cst_32 [2] : vector<8x128x128xf32> to vector<8x128xf32>
      %67 = arith.addf %62, %66 : vector<8x128xf32>
      %c0_33 = arith.constant 0 : index
      %c0_34 = arith.constant 0 : index
      %68 = vector.load %arg14[%c0_33, %c0_34] : memref<8x128xf32, #tpu.memory_space<vmem>>, vector<8x128xf32>
      tpu.vector_store %arg14[%c0_33, %c0_34], %67 {strides = array<i32>} : memref<8x128xf32, #tpu.memory_space<vmem>>, vector<8x128xf32>,
      %c0_35 = arith.constant 0 : index
      %c0_36 = arith.constant 0 : index
      %69 = vector.load %arg12[%c0_35, %c0_36] : memref<8x128xf32, #tpu.memory_space<vmem>>, vector<8x128xf32>
      tpu.vector_store %arg12[%c0_35, %c0_36], %49 {strides = array<i32>} : memref<8x128xf32, #tpu.memory_space<vmem>>, vector<8x128xf32>,
    } else {
    }
    %c0_i32_3 = arith.constant 0 : i32
    %9 = arith.cmpi eq, %arg2, %c0_i32_3 : i32
    %10 = arith.extui %9 : i1 to i32
    %c0_i32_4 = arith.constant 0 : i32
    %11 = arith.cmpi ne, %10, %c0_i32_4 : i32
    scf.if %11 {
      %c0 = arith.constant 0 : index
      %c0_5 = arith.constant 0 : index
      %12 = vector.load %arg14[%c0, %c0_5] : memref<8x128xf32, #tpu.memory_space<vmem>>, vector<8x128xf32>
      %c0_6 = arith.constant 0 : index
      %c0_7 = arith.constant 0 : index
      %13 = vector.load %arg13[%c0_6, %c0_7] : memref<8x128xf32, #tpu.memory_space<vmem>>, vector<8x128xf32>
      %14 = tpu.reciprocal %13 {approx = true} : vector<8x128xf32> -> vector<8x128xf32>
      %15 = arith.mulf %12, %14 : vector<8x128xf32>
      %c0_8 = arith.constant 0 : index
      %c0_9 = arith.constant 0 : index
      %16 = vector.load %arg10[%c0_8, %c0_9] : memref<8x128xf32, #tpu.memory_space<vmem>>, vector<8x128xf32>
      tpu.vector_store %arg10[%c0_8, %c0_9], %15 {strides = array<i32>} : memref<8x128xf32, #tpu.memory_space<vmem>>, vector<8x128xf32>,
    } else {
    }
    return
  }
  func.func @transform_0(%arg0: i32, %arg1: i32, %arg2: i32) -> (i32, i32) {
    %c0_i32 = arith.constant 0 : i32
    %c0_i32_0 = arith.constant 0 : i32
    return %arg0, %c0_i32 : i32, i32
  }
  func.func @transform_1(%arg0: i32, %arg1: i32, %arg2: i32) -> (i32, i32) {
    %c0_i32 = arith.constant 0 : i32
    %c0_i32_0 = arith.constant 0 : i32
    return %c0_i32, %arg1 : i32, i32
  }
  func.func @transform_2(%arg0: i32, %arg1: i32, %arg2: i32) -> (i32, i32) {
    %c0_i32 = arith.constant 0 : i32
    %c0_i32_0 = arith.constant 0 : i32
    return %c0_i32, %arg1 : i32, i32
  }
  func.func @transform_3(%arg0: i32, %arg1: i32, %arg2: i32) -> (i32, i32) {
    %c0_i32 = arith.constant 0 : i32
    %c0_i32_0 = arith.constant 0 : i32
    return %c0_i32, %arg2 : i32, i32
  }
  func.func @transform_4(%arg0: i32, %arg1: i32, %arg2: i32) -> (i32, i32) {
    %c0_i32 = arith.constant 0 : i32
    %c0_i32_0 = arith.constant 0 : i32
    return %c0_i32, %arg2 : i32, i32
  }
  func.func @transform_5(%arg0: i32, %arg1: i32, %arg2: i32) -> (i32, i32) {
    %c0_i32 = arith.constant 0 : i32
    %c0_i32_0 = arith.constant 0 : i32
    return %c0_i32, %arg2 : i32, i32
  }
  func.func @transform_6(%arg0: i32, %arg1: i32, %arg2: i32) -> (i32, i32) {
    %c0_i32 = arith.constant 0 : i32
    %c0_i32_0 = arith.constant 0 : i32
    return %c0_i32, %arg2 : i32, i32
  }
  func.func @transform_7(%arg0: i32, %arg1: i32, %arg2: i32) -> (i32, i32) {
    %c0_i32 = arith.constant 0 : i32
    return %arg0, %arg1 : i32, i32
  }
}

</mosaic_0001>

<bundles_post_ra>
// kernel: tpu_custom_call.1
= control target key start
LH: loop header
LB: loop body
LE: loop exit
PB: predicated region body
PF: predicated region fallthrough
CT: control target
= control target key end

     0   :  { %12 = vsyncpa [#allocation7], 0  ;;  %s10299_s0 = inlined_call_operand.hbm [shape: bf16[8,128], index: 0, kind: input, shape index: {}]   ;;  %s10300_s1 = inlined_call_operand.hbm [shape: bf16[128,128], index: 1, kind: input, shape index: {}]   ;;  %s10301_s2 = inlined_call_operand.vmem [shape: f32[1,128], index: 2, kind: input, shape index: {}]   ;;  %s10302_s3 = inlined_call_operand.hbm [shape: bf16[128,128], index: 3, kind: input, shape index: {}]   ;;  %s10303_s4 = inlined_call_operand.vmem [shape: f32[1,128], index: 4, kind: input, shape index: {}]   ;;  %s10304_s5 = inlined_call_operand.hbm [shape: bf16[128,128], index: 5, kind: input, shape index: {}]   ;;  %s10305_s6 = inlined_call_operand.vmem [shape: f32[1,128], index: 6, kind: input, shape index: {}]   ;;  %s10306_s7 = inlined_call_operand.hbm [shape: f32[8,128], index: 7, kind: output, shape index: {}]  }
   0x1   :  { %13 = vsyncpa [#allocation10], 0 }
   0x2   :  { %14 = vsyncpa [#allocation13], 0  ;;  %s31_s26 = sshll.u32 %s10300_s1, 4  ;;  %s32_s26 = int_to_ptr.hbm [resolvable:$true] %s31_s26 }
   0x3   :  { %15 = vsyncpa [#allocation8], 0  ;;  %s5577_s27 = smov [#allocation9]   ;;  %s21_s8 = sshll.u32 %s10299_s0, 4  ;;  %s22_s8 = int_to_ptr.hbm [resolvable:$true] %s21_s8 }
   0x4   :  { %s33_s28 = sshll.u32 %s5577_s27, 4  ;;  %s5578_s9 = smov 64   ;;  %s34_s28 = int_to_ptr.vmem [resolvable:$true] %s33_s28 }
   0x5   :  { %s5579_s10 = smov 4   ;;  %s5580_s11 = smov [#allocation6]  }
   0x6   :  { %39 = dma.hbm_to_vmem [thread:$0]  %s32_s26, 1024, %s34_s28, [#allocation10], %s5578_s9, %s5578_s9, %s5579_s10  }
   0x7   :  { %s23_s12 = sshll.u32 %s5580_s11, 4  ;;  %s46_s15 = sshll.u32 %s10302_s3, 4  ;;  %s24_s12 = int_to_ptr.vmem [resolvable:$true] %s23_s12  ;;  %s47_s15 = int_to_ptr.hbm [resolvable:$true] %s46_s15 }
   0x8   :  { %26 = dma.hbm_to_vmem [thread:$0]  %s22_s8, 64, %s24_s12, [#allocation7]  }
   0x9   :  { %s61_s17 = sshll.u32 %s10304_s5, 4  ;;  %s5581_s18 = smov [#allocation11]   ;;  %s62_s17 = int_to_ptr.hbm [resolvable:$true] %s61_s17 }
   0xa   :  { %s48_s19 = sshll.u32 %s5581_s18, 4  ;;  %s5582_s0 = smov [#allocation12]   ;;  %s49_s19 = int_to_ptr.vmem [resolvable:$true] %s48_s19 }
   0xb   :  { %54 = dma.hbm_to_vmem [thread:$0]  %s47_s15, 1024, %s49_s19, [#allocation10], %s5578_s9, %s5578_s9, %s5579_s10  }
   0xc   :  { %s63_s20 = sshll.u32 %s5582_s0, 4  ;;  %s64_s20 = int_to_ptr.vmem [resolvable:$true] %s63_s20 }
   0xd   :  { %69 = dma.hbm_to_vmem [thread:$0]  %s62_s17, 1024, %s64_s20, [#allocation13], %s5578_s9, %s5578_s9, %s5579_s10  }
   0xe   :  { %5569 = dma.done.wait [#allocation7], 64  }
   0xf   :  { %5570 = vsyncadd [#allocation7], 4294967232 }
  0x10   :  { %5571 = dma.done.wait [#allocation10], 2048  }
  0x11   :  { %5572 = vsyncadd [#allocation10], 4294965248 }
  0x12   :  { %5573 = dma.done.wait [#allocation13], 1024  }
  0x13   :  { %5574 = vsyncadd [#allocation13], 4294966272  ;;  %v4922_v0 = vld [vmem:[#allocation9 + $0x38] sm:$0xff]  ;;  %v4921_v1 = vld [vmem:[#allocation9 + $0x30] sm:$0xff]  ;;  %v350_v3 = vlaneseq  ;;  %s4807_s26 = sshll.u32 %s10306_s7, 4  ;;  %s4808_s26 = int_to_ptr.hbm [resolvable:$true] %s4807_s26 }
  0x14   :  { %161 = vmatpush.bf16.msra.mxu0 %v4922_v0  ;;  %v4930_v2 = vld [vmem:[#allocation11 + $0x38] sm:$0xff]  ;;  %v4929_v4 = vld [vmem:[#allocation11 + $0x30] sm:$0xff]  ;;  %v4920_v5 = vld [vmem:[#allocation9 + $0x28] sm:$0xff] }
  0x15   :  { %254 = vmatpush.bf16.msra.mxu1 %v4930_v2  ;;  %v5637_v6 = vshrl.u32 %v350_v3, 7  ;;  %v4928_v9 = vld [vmem:[#allocation11 + $0x28] sm:$0xff]  ;;  %v4919_v10 = vld [vmem:[#allocation9 + $0x20] sm:$0xff]  ;;  %v4918_v12 = vld [vmem:[#allocation9 + $0x18] sm:$0xff] }
  0x16   :  { %v4927_v11 = vld [vmem:[#allocation11 + $0x20] sm:$0xff]  ;;  %v4926_v13 = vld [vmem:[#allocation11 + $0x18] sm:$0xff]  ;;  %v4917_v14 = vld [vmem:[#allocation9 + $0x10] sm:$0xff] }
  0x17   :  { %10646 = vst [vmem:[#allocation19_spill] sm:$0xff] %v5637_v6  ;;  %4946 = vset.pattern.permute.xlu0 %v5637_v6  ;;  %v5641_v7 = vadd.s32 32, %v5637_v6  ;;  %v5644_v8 = vadd.s32 16, %v5637_v6  ;;  %v4925_v15 = vld [vmem:[#allocation11 + $0x10] sm:$0xff]  ;;  %v4916_v16 = vld [vmem:[#allocation9 + $0x8] sm:$0xff]  ;;  %v4915_v18 = vld [vmem:[#allocation9] sm:$0xff] }
  0x18   :  { %162 = vmatpush.bf16.msra.mxu0 %v4921_v1  ;;  %v4924_v17 = vld [vmem:[#allocation11 + $0x8] sm:$0xff]  ;;  %v4923_v19 = vld [vmem:[#allocation11] sm:$0xff]  ;;  %v92_v20 = vld [vmem:[#allocation6] sm:$0xf]  ;;  %v5660_v27 = vadd.s32 40, %v5637_v6  ;;  %v5663_v28 = vadd.s32 24, %v5637_v6 }
  0x19   :  { %10647 = vst [vmem:[#allocation20_spill] sm:$0xff] %v5641_v7  ;;  %255 = vmatpush.bf16.msra.mxu1 %v4929_v4  ;;  %4949 = vset.pattern.permute.xlu2 %v5641_v7  ;;  %v185_v21 = vld [vmem:[#allocation6] sm:$0xf]  ;;  %v5666_v29 = vadd.s32 64, %v5637_v6  ;;  %v5675_v30 = vadd.s32 56, %v5637_v6  ;;  %v5678_v31 = vadd.s32 48, %v5637_v6 }
  0x1a   :  { %10648 = vst [vmem:[#allocation21_spill] sm:$0xff] %v5644_v8  ;;  %4947 = vset.pattern.permute.xlu1 %v5644_v8  ;;  %v5185_v22 = vld [vmem:[%s10301_s2] ss:$0 sm:$0xff]  ;;  %v5690_v33 = vadd.s32 80, %v5637_v6  ;;  %v5693_v34 = vadd.s32 72, %v5637_v6  ;;  %v5704_v36 = vadd.s32 96, %v5637_v6 }
  0x1b   :  { %10649 = vst [vmem:[#allocation22_spill] sm:$0xff] %v5660_v27  ;;  %v5707_v37 = vadd.s32 88, %v5637_v6  ;;  %v5716_v39 = vadd.s32 120, %v5637_v6  ;;  %v5719_v40 = vadd.s32 112, %v5637_v6  ;;  %v5728_v41 = vadd.s32 8, %v5637_v6 }
  0x1c   :  { %163 = vmatpush.bf16.msra.mxu0 %v4920_v5  ;;  %10650 = vst [vmem:[#allocation23_spill] sm:$0xff] %v5663_v28  ;;  %v5770_v45 = vadd.s32 104, %v5637_v6  ;;  %v5186_v1 = vld [vmem:[%s10303_s4] ss:$0 sm:$0xff]  ;;  %v5870_v5 = vand.u32 127, %v350_v3 }
  0x1d   :  { %256 = vmatpush.bf16.msra.mxu1 %v4928_v9  ;;  %10651 = vst [vmem:[#allocation24_spill] sm:$0xff] %v5666_v29 }
  0x1e   :  { %10652 = vst [vmem:[#allocation25_spill] sm:$0xff] %v5675_v30  ;;  %vm1317_vm0 = vcmp.le.s32.totalorder %v5870_v5, %v5637_v6  ;;  %vm1316_vm1 = vcmp.lt.s32.totalorder %v5870_v5, 16  ;;  %vm1321_vm3 = vcmp.le.s32.totalorder %v5870_v5, %v5641_v7  ;;  %vm1324_vm5 = vcmp.le.s32.totalorder %v5870_v5, %v5675_v30 }
  0x1f   :  { %10653 = vst [vmem:[#allocation26_spill] sm:$0xff] %v5678_v31  ;;  %vm5887_vm2 = vmand %vm1316_vm1, %vm1317_vm0  ;;  %vm1327_vm7 = vcmp.le.s32.totalorder %v5870_v5, %v5690_v33  ;;  %vm1330_vm9 = vcmp.le.s32.totalorder %v5870_v5, %v5770_v45  ;;  %vm1320_vm11 = vcmp.le.s32.totalorder %v5870_v5, %v5663_v28  ;;  %vm1323_vm13 = vcmp.le.s32.totalorder %v5870_v5, %v5678_v31 }
  0x20   :  { %164 = vmatpush.bf16.msra.mxu0 %v4919_v10  ;;  %10654 = vst [vmem:[#allocation27_spill] sm:$0xff] %v5690_v33  ;;  %vm5909_vm4 = vmand %vm1316_vm1, %vm1321_vm3  ;;  %vm1326_vm15 = vcmp.le.s32.totalorder %v5870_v5, %v5693_v34  ;;  %vm1329_vm3 = vcmp.le.s32.totalorder %v5870_v5, %v5704_v36 }
  0x21   :  { %257 = vmatpush.bf16.msra.mxu1 %v4927_v11  ;;  %10655 = vst [vmem:[#allocation28_spill] sm:$0xff] %v5693_v34  ;;  %vm5927_vm6 = vmand %vm1316_vm1, %vm1324_vm5 }
  0x22   :  { %10656 = vst [vmem:[#allocation29_spill] sm:$0xff] %v5704_v36  ;;  %vm5947_vm8 = vmand %vm1316_vm1, %vm1327_vm7  ;;  %vm1332_vm7 = vcmp.le.s32.totalorder %v5870_v5, %v5716_v39 }
  0x23   :  { %10657 = vst [vmem:[#allocation30_spill] sm:$0xff] %v5707_v37  ;;  %vm5967_vm10 = vmand %vm1316_vm1, %vm1330_vm9 }
  0x24   :  { %165 = vmatpush.bf16.msra.mxu0 %v4918_v12  ;;  %10658 = vst [vmem:[#allocation31_spill] sm:$0xff] %v5716_v39  ;;  %vm6006_vm12 = vmand %vm1316_vm1, %vm1320_vm11  ;;  %vm1319_vm11 = vcmp.le.s32.totalorder %v5870_v5, %v5644_v8 }
  0x25   :  { %258 = vmatpush.bf16.msra.mxu1 %v4926_v13  ;;  %10659 = vst [vmem:[#allocation32_spill] sm:$0xff] %v5719_v40  ;;  %vm6026_vm14 = vmand %vm1316_vm1, %vm1323_vm13 }
  0x26   :  { %10660 = vst [vmem:[#allocation33_spill] sm:$0xff] %v5728_v41  ;;  %vm6046_vm0 = vmand %vm1316_vm1, %vm1326_vm15  ;;  %vm1322_vm15 = vcmp.le.s32.totalorder %v5870_v5, %v5660_v27 }
  0x27   :  { %10661 = vst [vmem:[#allocation34_spill] sm:$0xff] %v5770_v45  ;;  %vm6064_vm5 = vmand %vm1316_vm1, %vm1329_vm3 }
  0x28   :  { %166 = vmatpush.bf16.msra.mxu0 %v4917_v14  ;;  %10667 = vst [vmem:[#allocation40_spill] sm:$0xff] %v5870_v5  ;;  %vm6085_vm9 = vmand %vm1316_vm1, %vm1332_vm7  ;;  %vm1325_vm7 = vcmp.le.s32.totalorder %v5870_v5, %v5666_v29 }
  0x29   :  { %259 = vmatpush.bf16.msra.mxu1 %v4925_v15  ;;  %vm6107_vm13 = vmand %vm1316_vm1, %vm1319_vm11 }
  0x2a   :  { %vm6127_vm3 = vmand %vm1316_vm1, %vm1322_vm15  ;;  %vm1328_vm15 = vcmp.le.s32.totalorder %v5870_v5, %v5707_v37 }
  0x2b   :  { %vm6149_vm11 = vmand %vm1316_vm1, %vm1325_vm7 }
  0x2c   :  { %167 = vmatpush.bf16.msra.mxu0 %v4916_v16  ;;  %vm6167_vm7 = vmand %vm1316_vm1, %vm1328_vm15 }
  0x2d   :  { %260 = vmatpush.bf16.msra.mxu1 %v4924_v17 }
  0x30   :  { %168 = vmatpush.bf16.msra.mxu0 %v4915_v18 }
  0x31   :  { %261 = vmatpush.bf16.msra.mxu1 %v4923_v19 }
  0x33   :  { %169 = vmatmul.bf16.vlgmr.msra.gmra.mxu0 %v92_v20 }
  0x34   :  { %262 = vmatmul.bf16.vlgmr.msra.gmra.mxu1 %v185_v21 }
  0xb0   :  { %v170_v23 = vpop.f32.mrf.mxu0 }
  0xb1   :  { %v5651_v24 = vadd.f32 %v5185_v22, %v170_v23  ;;  %v5701_v35 = vpop.f32.mrf.mxu1 }
  0xb2   :  { %v5865_v4 = vadd.f32 %v5186_v1, %v5701_v35 }
  0xb3   :  { %v5654_v25 = vperm.slane %v5651_v24, 0  ;;  %v5684_v32 = vperm.slane %v5651_v24, 3  ;;  %v5734_v42 = vperm.slane %v5651_v24, 1  ;;  %v5737_v43 = vperm.slane %v5651_v24, 4 }
  0xb4   :  { %v5758_v44 = vperm.slane %v5651_v24, 5  ;;  %v543_v46 = vperm.slane %v5651_v24, 2  ;;  %v5788_v47 = vperm.slane %v5651_v24, 6  ;;  %v5807_v48 = vperm.slane %v5651_v24, 7 }
  0xb5   :  { %378 = vperm.xlu2 %4949, %v5654_v25   ;;  %366 = vperm.xlu1 %4947, %v5654_v25   ;;  %v5877_v11 = vperm.slane %v5865_v4, 0 }
  0xb6   :  { %354 = vperm.xlu0 %4946, %v5654_v25  }
  0xb8   :  { %v172_v26 = vpop.f32.mrf.mxu0 }
  0xb9   :  { %v265_v38 = vpop.f32.mrf.mxu1 }
  0xbd   :  { %4950 = vset.pattern.permute.xlu2 %v5660_v27  ;;  %4948 = vset.pattern.permute.xlu1 %v5663_v28 }
  0xbe   :  { %4953 = vset.pattern.permute.xlu0 %v5666_v29 }
  0xc5   :  { %384 = vperm.xlu2 %4950, %v5654_v25   ;;  %372 = vperm.xlu1 %4948, %v5654_v25  }
  0xc6   :  { %402 = vperm.xlu0 %4953, %v5654_v25  }
  0xcd   :  { %4952 = vset.pattern.permute.xlu2 %v5675_v30  ;;  %4951 = vset.pattern.permute.xlu1 %v5678_v31 }
  0xce   :  { %4986 = vset.pattern.permute.xlu0 %v5637_v6 }
  0xd5   :  { %396 = vperm.xlu2 %4952, %v5654_v25   ;;  %390 = vperm.xlu1 %4951, %v5654_v25  }
  0xd6   :  { %645 = vperm.xlu0 %4986, %v5684_v32  }
  0xdd   :  { %4955 = vset.pattern.permute.xlu2 %v5690_v33  ;;  %4954 = vset.pattern.permute.xlu1 %v5693_v34 }
  0xde   :  { %4991 = vset.pattern.permute.xlu0 %v5660_v27 }
  0xe5   :  { %414 = vperm.xlu2 %4955, %v5654_v25   ;;  %408 = vperm.xlu1 %4954, %v5654_v25  }
  0xe6   :  { %675 = vperm.xlu0 %4991, %v5684_v32  }
  0xed   :  { %4957 = vset.pattern.permute.xlu2 %v5704_v36  ;;  %4956 = vset.pattern.permute.xlu1 %v5707_v37 }
  0xee   :  { %4996 = vset.pattern.permute.xlu0 %v5690_v33 }
  0xf5   :  { %426 = vperm.xlu2 %4957, %v5654_v25   ;;  %420 = vperm.xlu1 %4956, %v5654_v25  }
  0xf6   :  { %705 = vperm.xlu0 %4996, %v5684_v32  }
  0xfd   :  { %4959 = vset.pattern.permute.xlu2 %v5716_v39  ;;  %4958 = vset.pattern.permute.xlu1 %v5719_v40 }
  0xfe   :  { %5001 = vset.pattern.permute.xlu0 %v5716_v39 }
 0x105   :  { %444 = vperm.xlu2 %4959, %v5654_v25   ;;  %438 = vperm.xlu1 %4958, %v5654_v25  }
 0x106   :  { %735 = vperm.xlu0 %5001, %v5684_v32  }
 0x10d   :  { %4961 = vset.pattern.permute.xlu2 %v5728_v41  ;;  %4960 = vset.pattern.permute.xlu1 %v5637_v6 }
 0x10e   :  { %5006 = vset.pattern.permute.xlu0 %v5641_v7 }
 0x10f   :  { %v379_v54 = vpop.permute.xlu2 %378 }
 0x110   :  { %v1153_v18 = vmul.f32 %v5877_v11, %v379_v54 }
 0x112   :  { %v5919_v21 = vsel %vm5909_vm4, %v1153_v18, -inf  ;;  %v1126_v18 = vrot.slane %v5865_v4, 1 }
 0x113   :  { %10674 = vst [vmem:[#allocation43_spill] sm:$0xff] %v5919_v21 }
 0x115   :  { %457 = vperm.xlu2 %4961, %v5734_v42   ;;  %451 = vperm.xlu1 %4960, %v5734_v42  }
 0x116   :  { %766 = vperm.xlu0 %5006, %v5737_v43  }
 0x11d   :  { %4963 = vset.pattern.permute.xlu2 %v5641_v7  ;;  %4962 = vset.pattern.permute.xlu1 %v5663_v28 }
 0x11e   :  { %5011 = vset.pattern.permute.xlu0 %v5693_v34 }
 0x11f   :  { %v5843_v57 = vpop.permute.xlu2 %384 }
 0x125   :  { %475 = vperm.xlu2 %4963, %v5734_v42   ;;  %469 = vperm.xlu1 %4962, %v5734_v42  }
 0x126   :  { %796 = vperm.xlu0 %5011, %v5737_v43  }
 0x127   :  { %v5837_v55 = vpop.permute.xlu1 %366 }
 0x128   :  { %v355_v49 = vpop.permute.xlu0 %354 }
 0x129   :  { %v1149_v13 = vmul.f32 %v5877_v11, %v355_v49 }
 0x12b   :  { %v5897_v15 = vsel %vm5887_vm2, %v1149_v13, -inf }
 0x12c   :  { %10671 = vst [vmem:[#allocation42_spill] sm:$0xff] %v5897_v15 }
 0x12d   :  { %4965 = vset.pattern.permute.xlu2 %v5678_v31  ;;  %4964 = vset.pattern.permute.xlu1 %v5660_v27 }
 0x12e   :  { %5016 = vset.pattern.permute.xlu0 %v5719_v40 }
 0x12f   :  { %v397_v60 = vpop.permute.xlu2 %396 }
 0x130   :  { %v1156_v24 = vmul.f32 %v5877_v11, %v397_v60 }
 0x135   :  { %487 = vperm.xlu2 %4965, %v5734_v42   ;;  %481 = vperm.xlu1 %4964, %v5734_v42  }
 0x136   :  { %826 = vperm.xlu0 %5016, %v5737_v43  }
 0x137   :  { %v5845_v58 = vpop.permute.xlu1 %372 }
 0x138   :  { %v5818_v50 = vpop.permute.xlu0 %402 }
 0x13d   :  { %4967 = vset.pattern.permute.xlu2 %v5693_v34  ;;  %4966 = vset.pattern.permute.xlu1 %v5666_v29 }
 0x13e   :  { %5021 = vset.pattern.permute.xlu0 %v5663_v28 }
 0x13f   :  { %v415_v63 = vpop.permute.xlu2 %414 }
 0x140   :  { %v1159_v38 = vmul.f32 %v5877_v11, %v415_v63 }
 0x142   :  { %v5955_v54 = vsel %vm5947_vm8, %v1159_v38, -inf }
 0x143   :  { %10682 = vst [vmem:[#allocation47_spill] sm:$0xff] %v5955_v54 }
 0x145   :  { %505 = vperm.xlu2 %4967, %v5734_v42   ;;  %499 = vperm.xlu1 %4966, %v5734_v42  }
 0x146   :  { %857 = vperm.xlu0 %5021, %v5758_v44  }
 0x147   :  { %v5851_v61 = vpop.permute.xlu1 %390 }
 0x148   :  { %v5823_v51 = vpop.permute.xlu0 %645 }
 0x149   :  { %10662 = vst [vmem:[#allocation35_spill] sm:$0xff] %v5823_v51 }
 0x14d   :  { %4969 = vset.pattern.permute.xlu2 %v5707_v37  ;;  %4968 = vset.pattern.permute.xlu1 %v5690_v33 }
 0x14e   :  { %5026 = vset.pattern.permute.xlu0 %v5666_v29 }
 0x14f   :  { %v5872_v9 = vpop.permute.xlu2 %426 }
 0x155   :  { %517 = vperm.xlu2 %4969, %v5734_v42   ;;  %511 = vperm.xlu1 %4968, %v5734_v42  }
 0x156   :  { %887 = vperm.xlu0 %5026, %v5758_v44  }
 0x157   :  { %v5857_v0 = vpop.permute.xlu1 %408 }
 0x158   :  { %v5828_v52 = vpop.permute.xlu0 %675 }
 0x159   :  { %10663 = vst [vmem:[#allocation36_spill] sm:$0xff] %v5828_v52 }
 0x15d   :  { %4971 = vset.pattern.permute.xlu2 %v5719_v40  ;;  %4970 = vset.pattern.permute.xlu1 %v5770_v45 }
 0x15e   :  { %5027 = vset.pattern.permute.xlu0 %v5770_v45 }
 0x15f   :  { %v5893_v14 = vpop.permute.xlu2 %444 }
 0x165   :  { %535 = vperm.xlu2 %4971, %v5734_v42   ;;  %529 = vperm.xlu1 %4970, %v5734_v42  }
 0x166   :  { %432 = vperm.xlu0 %5027, %v5654_v25  }
 0x167   :  { %v5874_v10 = vpop.permute.xlu1 %420 }
 0x168   :  { %v5832_v53 = vpop.permute.xlu0 %705 }
 0x16d   :  { %4973 = vset.pattern.permute.xlu2 %v5637_v6  ;;  %4972 = vset.pattern.permute.xlu1 %v5716_v39 }
 0x16e   :  { %917 = vperm.xlu0 %5027, %v5758_v44  }
 0x16f   :  { %v5915_v20 = vpop.permute.xlu2 %457 }
 0x175   :  { %548 = vperm.xlu2 %4973, %v543_v46   ;;  %541 = vperm.xlu1 %4972, %v5734_v42  }
 0x176   :  { %5032 = vset.pattern.permute.xlu0 %v5644_v8 }
 0x177   :  { %v5899_v16 = vpop.permute.xlu1 %438 }
 0x178   :  { %v5839_v56 = vpop.permute.xlu0 %735 }
 0x179   :  { %10664 = vst [vmem:[#allocation37_spill] sm:$0xff] %v5839_v56 }
 0x17d   :  { %4975 = vset.pattern.permute.xlu2 %v5663_v28  ;;  %4974 = vset.pattern.permute.xlu1 %v5644_v8 }
 0x17e   :  { %463 = vperm.xlu0 %5032, %v5734_v42  }
 0x17f   :  { %v5933_v26 = vpop.permute.xlu2 %475 }
 0x180   :  { %10677 = vst [vmem:[#allocation44_spill] sm:$0xff] %v5933_v26 }
 0x185   :  { %566 = vperm.xlu2 %4975, %v543_v46   ;;  %560 = vperm.xlu1 %4974, %v543_v46  }
 0x186   :  { %948 = vperm.xlu0 %5032, %v5788_v47  }
 0x187   :  { %v452_v22 = vpop.permute.xlu1 %451 }
 0x188   :  { %v5847_v59 = vpop.permute.xlu0 %766 }
 0x189   :  { %10665 = vst [vmem:[#allocation38_spill] sm:$0xff] %v5847_v59 }
 0x18d   :  { %4977 = vset.pattern.permute.xlu2 %v5660_v27  ;;  %4976 = vset.pattern.permute.xlu1 %v5641_v7 }
 0x18e   :  { %5037 = vset.pattern.permute.xlu0 %v5675_v30 }
 0x18f   :  { %v488_v49 = vpop.permute.xlu2 %487 }
 0x195   :  { %578 = vperm.xlu2 %4977, %v543_v46   ;;  %572 = vperm.xlu1 %4976, %v543_v46  }
 0x196   :  { %493 = vperm.xlu0 %5037, %v5734_v42  }
 0x197   :  { %v470_v35 = vpop.permute.xlu1 %469 }
 0x198   :  { %v5853_v62 = vpop.permute.xlu0 %796 }
 0x19d   :  { %4979 = vset.pattern.permute.xlu2 %v5666_v29  ;;  %4978 = vset.pattern.permute.xlu1 %v5675_v30 }
 0x19e   :  { %978 = vperm.xlu0 %5037, %v5788_v47  }
 0x1a5   :  { %596 = vperm.xlu2 %4979, %v543_v46   ;;  %590 = vperm.xlu1 %4978, %v543_v46  }
 0x1a6   :  { %5042 = vset.pattern.permute.xlu0 %v5704_v36 }
 0x1a7   :  { %v5957_v60 = vpop.permute.xlu1 %481 }
 0x1a8   :  { %v5862_v2 = vpop.permute.xlu0 %826  ;;  %10683 = vst [vmem:[#allocation48_spill] sm:$0xff] %v5957_v60  ;;  %v1128_v60 = vrot.slane %v5865_v4, 3 }
 0x1a9   :  { %10666 = vst [vmem:[#allocation39_spill] sm:$0xff] %v5862_v2 }
 0x1ad   :  { %4981 = vset.pattern.permute.xlu2 %v5690_v33  ;;  %4980 = vset.pattern.permute.xlu1 %v5693_v34 }
 0x1ae   :  { %523 = vperm.xlu0 %5042, %v5734_v42  }
 0x1b5   :  { %608 = vperm.xlu2 %4981, %v543_v46   ;;  %602 = vperm.xlu1 %4980, %v543_v46  }
 0x1b6   :  { %1008 = vperm.xlu0 %5042, %v5788_v47  }
 0x1b8   :  { %v5881_v12 = vpop.permute.xlu0 %857 }
 0x1b9   :  { %10668 = vst [vmem:[#allocation41_spill] sm:$0xff] %v5881_v12 }
 0x1bd   :  { %4983 = vset.pattern.permute.xlu2 %v5770_v45  ;;  %4982 = vset.pattern.permute.xlu1 %v5704_v36 }
 0x1be   :  { %5047 = vset.pattern.permute.xlu0 %v5678_v31 }
 0x1c5   :  { %626 = vperm.xlu2 %4983, %v543_v46   ;;  %620 = vperm.xlu1 %4982, %v543_v46  }
 0x1c6   :  { %584 = vperm.xlu0 %5047, %v543_v46  }
 0x1c8   :  { %v5904_v17 = vpop.permute.xlu0 %887 }
 0x1cd   :  { %4985 = vset.pattern.permute.xlu2 %v5716_v39  ;;  %4984 = vset.pattern.permute.xlu1 %v5719_v40 }
 0x1ce   :  { %1069 = vperm.xlu0 %5047, %v5807_v48  }
 0x1d5   :  { %638 = vperm.xlu2 %4985, %v543_v46   ;;  %632 = vperm.xlu1 %4984, %v543_v46  }
 0x1d6   :  { %5056 = vset.pattern.permute.xlu0 %v5707_v37 }
 0x1d8   :  { %v433_v23 = vpop.permute.xlu0 %432 }
 0x1d9   :  { %v1162_v63 = vmul.f32 %v5877_v11, %v433_v23  ;;  %v5978_v23 = vpop.permute.xlu1 %499 }
 0x1da   :  { %10688 = vst [vmem:[#allocation51_spill] sm:$0xff] %v5978_v23 }
 0x1db   :  { %v5976_v38 = vsel %vm5967_vm10, %v1162_v63, -inf }
 0x1dc   :  { %10687 = vst [vmem:[#allocation50_spill] sm:$0xff] %v5976_v38 }
 0x1dd   :  { %4988 = vset.pattern.permute.xlu2 %v5644_v8  ;;  %4987 = vset.pattern.permute.xlu1 %v5728_v41 }
 0x1de   :  { %614 = vperm.xlu0 %5056, %v543_v46  }
 0x1e0   :  { %v5943_v42 = vpop.permute.xlu0 %917 }
 0x1e1   :  { %10679 = vst [vmem:[#allocation46_spill] sm:$0xff] %v5943_v42  ;;  %v5994_v42 = vpop.permute.xlu1 %511 }
 0x1e2   :  { %10692 = vst [vmem:[#allocation55_spill] sm:$0xff] %v5994_v42 }
 0x1e5   :  { %657 = vperm.xlu2 %4988, %v5684_v32   ;;  %651 = vperm.xlu1 %4987, %v5684_v32  }
 0x1e6   :  { %1099 = vperm.xlu0 %5056, %v5807_v48  }
 0x1ed   :  { %4990 = vset.pattern.permute.xlu2 %v5641_v7  ;;  %4989 = vset.pattern.permute.xlu1 %v5663_v28 }
 0x1ee   :  { %5061 = vset.pattern.permute.xlu0 %v5728_v41 }
 0x1f0   :  { %v5963_v1 = vpop.permute.xlu0 %463 }
 0x1f1   :  { %10684 = vst [vmem:[#allocation49_spill] sm:$0xff] %v5963_v1 }
 0x1f5   :  { %669 = vperm.xlu2 %4990, %v5684_v32   ;;  %663 = vperm.xlu1 %4989, %v5684_v32  }
 0x1f6   :  { %360 = vperm.xlu0 %5061, %v5654_v25  }
 0x1fd   :  { %4993 = vset.pattern.permute.xlu2 %v5675_v30  ;;  %4992 = vset.pattern.permute.xlu1 %v5678_v31 }
 0x1fe   :  { %554 = vperm.xlu0 %5061, %v543_v46  }
 0x205   :  { %687 = vperm.xlu2 %4993, %v5684_v32   ;;  %681 = vperm.xlu1 %4992, %v5684_v32  }
 0x206   :  { %1039 = vperm.xlu0 %5061, %v5807_v48  }
 0x20d   :  { %4995 = vset.pattern.permute.xlu2 %v5693_v34  ;;  %4994 = vset.pattern.permute.xlu1 %v5666_v29 }
 0x215   :  { %699 = vperm.xlu2 %4995, %v5684_v32   ;;  %693 = vperm.xlu1 %4994, %v5684_v32  }
 0x21d   :  { %4998 = vset.pattern.permute.xlu2 %v5704_v36  ;;  %4997 = vset.pattern.permute.xlu1 %v5707_v37 }
 0x225   :  { %717 = vperm.xlu2 %4998, %v5684_v32   ;;  %711 = vperm.xlu1 %4997, %v5684_v32  }
 0x22d   :  { %5000 = vset.pattern.permute.xlu2 %v5719_v40  ;;  %4999 = vset.pattern.permute.xlu1 %v5770_v45 }
 0x230   :  { %1510 = vmax.xlane.f32.xlu0 %v5897_v15  ;;  %v5981_v15 = vperm.slane %v1126_v18, 0 }
 0x232   :  { %v1168_v18 = vmul.f32 %v5981_v15, %v470_v35 }
 0x234   :  { %v6014_v35 = vsel %vm6006_vm12, %v1168_v18, -inf }
 0x235   :  { %729 = vperm.xlu2 %5000, %v5684_v32   ;;  %723 = vperm.xlu1 %4999, %v5684_v32   ;;  %v5937_v32 = vsel %vm5927_vm6, %v1156_v24, -inf  ;;  %v506_v24 = vpop.permute.xlu2 %505  ;;  %10697 = vst [vmem:[#allocation58_spill] sm:$0xff] %v6014_v35 }
 0x236   :  { %10678 = vst [vmem:[#allocation45_spill] sm:$0xff] %v5937_v32  ;;  %v1174_v59 = vmul.f32 %v5981_v15, %v506_v24 }
 0x238   :  { %1518 = vmax.xlane.f32.xlu0 %v5919_v21 }
 0x23d   :  { %5003 = vset.pattern.permute.xlu2 %v5728_v41  ;;  %5002 = vset.pattern.permute.xlu1 %v5637_v6  ;;  %v5988_v21 = vpop.permute.xlu2 %517 }
 0x23e   :  { %10690 = vst [vmem:[#allocation53_spill] sm:$0xff] %v5988_v21 }
 0x240   :  { %1524 = vmax.xlane.f32.xlu0 %v5937_v32  ;;  %v5986_v32 = vpop.permute.xlu0 %948 }
 0x241   :  { %10689 = vst [vmem:[#allocation52_spill] sm:$0xff] %v5986_v32  ;;  %v1171_v32 = vmul.f32 %v5981_v15, %v488_v49 }
 0x245   :  { %748 = vperm.xlu2 %5003, %v5737_v43   ;;  %742 = vperm.xlu1 %5002, %v5737_v43  }
 0x248   :  { %1530 = vmax.xlane.f32.xlu0 %v5955_v54  ;;  %v1165_v54 = vmul.f32 %v5981_v15, %v452_v22  ;;  %v6002_v22 = vpop.permute.xlu0 %493 }
 0x249   :  { %10693 = vst [vmem:[#allocation56_spill] sm:$0xff] %v6002_v22 }
 0x24a   :  { %v5992_v63 = vsel %vm5887_vm2, %v1165_v54, -inf }
 0x24b   :  { %10691 = vst [vmem:[#allocation54_spill] sm:$0xff] %v5992_v63 }
 0x24d   :  { %5005 = vset.pattern.permute.xlu2 %v5663_v28  ;;  %5004 = vset.pattern.permute.xlu1 %v5644_v8 }
 0x250   :  { %1536 = vmax.xlane.f32.xlu0 %v5976_v38  ;;  %v6010_v38 = vpop.permute.xlu2 %535  ;;  %v6036_v2 = vpop.permute.xlu0 %978 }
 0x251   :  { %10696 = vst [vmem:[#allocation57_spill] sm:$0xff] %v6010_v38  ;;  %v1127_v38 = vrot.slane %v5865_v4, 2 }
 0x253   :  { %v6096_v21 = vperm.slane %v1127_v38, 0 }
 0x255   :  { %760 = vperm.xlu2 %5005, %v5737_v43   ;;  %754 = vperm.xlu1 %5004, %v5737_v43   ;;  %10716 = vst [vmem:[#allocation69_spill] sm:$0xff] %v6096_v21 }
 0x258   :  { %1542 = vmax.xlane.f32.xlu0 %v5992_v63  ;;  %v6016_v63 = vpop.permute.xlu1 %529  ;;  %v6030_v18 = vpop.permute.xlu2 %548 }
 0x259   :  { %10698 = vst [vmem:[#allocation59_spill] sm:$0xff] %v6016_v63  ;;  %v524_v52 = vpop.permute.xlu0 %523 }
 0x25a   :  { %10701 = vst [vmem:[#allocation60_spill] sm:$0xff] %v6030_v18  ;;  %v1177_v51 = vmul.f32 %v5981_v15, %v524_v52 }
 0x25c   :  { %v6070_v18 = vsel %vm6064_vm5, %v1177_v51, -inf }
 0x25d   :  { %5008 = vset.pattern.permute.xlu2 %v5678_v31  ;;  %5007 = vset.pattern.permute.xlu1 %v5660_v27  ;;  %10709 = vst [vmem:[#allocation64_spill] sm:$0xff] %v6070_v18 }
 0x260   :  { %1548 = vmax.xlane.f32.xlu0 %v6014_v35  ;;  %v6034_v35 = vsel %vm6026_vm14, %v1171_v32, -inf  ;;  %v542_v49 = vpop.permute.xlu1 %541  ;;  %v6050_v32 = vpop.permute.xlu2 %566 }
 0x261   :  { %10702 = vst [vmem:[#allocation61_spill] sm:$0xff] %v6034_v35  ;;  %v1180_v52 = vmul.f32 %v5981_v15, %v542_v49  ;;  %v6081_v63 = vpop.permute.xlu0 %1008 }
 0x262   :  { %10705 = vst [vmem:[#allocation62_spill] sm:$0xff] %v6050_v32 }
 0x263   :  { %10711 = vst [vmem:[#allocation66_spill] sm:$0xff] %v6081_v63  ;;  %v6091_v49 = vsel %vm6085_vm9, %v1180_v52, -inf }
 0x264   :  { %10714 = vst [vmem:[#allocation67_spill] sm:$0xff] %v6091_v49 }
 0x265   :  { %778 = vperm.xlu2 %5008, %v5737_v43   ;;  %772 = vperm.xlu1 %5007, %v5737_v43  }
 0x268   :  { %1554 = vmax.xlane.f32.xlu0 %v6034_v35  ;;  %v6054_v35 = vsel %vm6046_vm0, %v1174_v59, -inf  ;;  %v561_v24 = vpop.permute.xlu1 %560  ;;  %v579_v59 = vpop.permute.xlu2 %578 }
 0x269   :  { %10706 = vst [vmem:[#allocation63_spill] sm:$0xff] %v6054_v35  ;;  %v1183_v42 = vmul.f32 %v6096_v21, %v561_v24  ;;  %v6103_v63 = vpop.permute.xlu0 %584 }
 0x26a   :  { %10717 = vst [vmem:[#allocation70_spill] sm:$0xff] %v6103_v63 }
 0x26b   :  { %v6115_v38 = vsel %vm6107_vm13, %v1183_v42, -inf }
 0x26c   :  { %10721 = vst [vmem:[#allocation72_spill] sm:$0xff] %v6115_v38 }
 0x26d   :  { %5010 = vset.pattern.permute.xlu2 %v5666_v29  ;;  %5009 = vset.pattern.permute.xlu1 %v5675_v30 }
 0x270   :  { %1560 = vmax.xlane.f32.xlu0 %v6054_v35  ;;  %v6072_v35 = vpop.permute.xlu1 %572 }
 0x271   :  { %10710 = vst [vmem:[#allocation65_spill] sm:$0xff] %v6072_v35 }
 0x275   :  { %790 = vperm.xlu2 %5010, %v5737_v43   ;;  %784 = vperm.xlu1 %5009, %v5737_v43  }
 0x278   :  { %1566 = vmax.xlane.f32.xlu0 %v6070_v18  ;;  %v597_v18 = vpop.permute.xlu2 %596  ;;  %v6093_v35 = vpop.permute.xlu1 %590 }
 0x279   :  { %10715 = vst [vmem:[#allocation68_spill] sm:$0xff] %v6093_v35  ;;  %v1186_v35 = vmul.f32 %v6096_v21, %v579_v59  ;;  %v1189_v63 = vmul.f32 %v6096_v21, %v597_v18 }
 0x27d   :  { %5013 = vset.pattern.permute.xlu2 %v5707_v37  ;;  %5012 = vset.pattern.permute.xlu1 %v5690_v33 }
 0x280   :  { %1572 = vmax.xlane.f32.xlu0 %v6091_v49  ;;  %v6111_v49 = vpop.permute.xlu2 %608  ;;  %v6117_v24 = vpop.permute.xlu1 %602 }
 0x281   :  { %10720 = vst [vmem:[#allocation71_spill] sm:$0xff] %v6111_v49 }
 0x282   :  { %10722 = vst [vmem:[#allocation73_spill] sm:$0xff] %v6117_v24  ;;  %v6139_v24 = vpop.permute.xlu0 %1069 }
 0x285   :  { %808 = vperm.xlu2 %5013, %v5737_v43   ;;  %802 = vperm.xlu1 %5012, %v5737_v43  }
 0x288   :  { %1578 = vmax.xlane.f32.xlu0 %v6115_v38  ;;  %v6131_v42 = vpop.permute.xlu2 %626  ;;  %v6135_v38 = vsel %vm6127_vm3, %v1186_v35, -inf  ;;  %v6137_v59 = vpop.permute.xlu1 %620  ;;  %v10728_v35 = vmov 0 }
 0x289   :  { %10725 = vst [vmem:[#allocation74_spill] sm:$0xff] %v6131_v42  ;;  %v10729_v35 = vsel %vm6149_vm11, 4294967295, %v10728_v35 }
 0x28a   :  { %10726 = vst [vmem:[#allocation75_spill] sm:$0xff] %v6135_v38 }
 0x28b   :  { %10727 = vst [vmem:[#allocation76_spill] sm:$0xff] %v6137_v59  ;;  %v615_v59 = vpop.permute.xlu0 %614 }
 0x28c   :  { %v1192_v23 = vmul.f32 %v6096_v21, %v615_v59 }
 0x28d   :  { %5015 = vset.pattern.permute.xlu2 %v5770_v45  ;;  %5014 = vset.pattern.permute.xlu1 %v5704_v36 }
 0x290   :  { %1584 = vmax.xlane.f32.xlu0 %v6135_v38  ;;  %v6153_v42 = vpop.permute.xlu2 %638  ;;  %v6157_v38 = vsel %vm6149_vm11, %v1189_v63, -inf  ;;  %v633_v18 = vpop.permute.xlu1 %632  ;;  %v6173_v63 = vsel %vm6167_vm7, %v1192_v23, -inf  ;;  %vm1331_vm11 = vcmp.le.s32.totalorder %v5870_v5, %v5719_v40 }
 0x291   :  { %10730 = vst [vmem:[#allocation77_spill] sm:$0xff] %v6153_v42  ;;  %v10732_v42 = vmov 0  ;;  %v1195_v22 = vmul.f32 %v6096_v21, %v633_v18  ;;  %vm6186_vm15 = vmand %vm1316_vm1, %vm1331_vm11  ;;  %v6197_v21 = vperm.slane %v1128_v60, 0 }
 0x292   :  { %10731 = vst [vmem:[#allocation78_spill] sm:$0xff] %v6157_v38  ;;  %v10733_v42 = vsel %vm6167_vm7, 4294967295, %v10732_v42  ;;  %vm1318_vm7 = vcmp.le.s32.totalorder %v5870_v5, %v5728_v41 }
 0x293   :  { %10734 = vst [vmem:[#allocation79_spill] sm:$0xff] %v6173_v63  ;;  %vm6206_vm11 = vmand %vm1316_vm1, %vm1318_vm7  ;;  %vm10767_vm1 = vnez %v10729_v35  ;;  %vm10772_vm7 = vnez %v10733_v42 }
 0x295   :  { %820 = vperm.xlu2 %5015, %v5737_v43   ;;  %814 = vperm.xlu1 %5014, %v5737_v43  }
 0x298   :  { %1590 = vmax.xlane.f32.xlu0 %v6157_v38  ;;  %v6175_v38 = vpop.permute.xlu2 %657  ;;  %v652_v59 = vpop.permute.xlu1 %651 }
 0x299   :  { %10735 = vst [vmem:[#allocation80_spill] sm:$0xff] %v6175_v38  ;;  %v1198_v26 = vmul.f32 %v6197_v21, %v652_v59 }
 0x29d   :  { %5018 = vset.pattern.permute.xlu2 %v5637_v6  ;;  %5017 = vset.pattern.permute.xlu1 %v5716_v39 }
 0x2a0   :  { %1596 = vmax.xlane.f32.xlu0 %v6173_v63  ;;  %v6192_v63 = vsel %vm6186_vm15, %v1195_v22, -inf  ;;  %v670_v18 = vpop.permute.xlu2 %669  ;;  %v6194_v38 = vpop.permute.xlu1 %663  ;;  %v6212_v22 = vsel %vm6206_vm11, %v1198_v26, -inf }
 0x2a1   :  { %10738 = vst [vmem:[#allocation81_spill] sm:$0xff] %v6192_v63  ;;  %v1201_v59 = vmul.f32 %v6197_v21, %v670_v18 }
 0x2a2   :  { %10739 = vst [vmem:[#allocation82_spill] sm:$0xff] %v6194_v38 }
 0x2a3   :  { %10742 = vst [vmem:[#allocation83_spill] sm:$0xff] %v6212_v22  ;;  %v6222_v5 = vsel %vm5909_vm4, %v1201_v59, -inf }
 0x2a4   :  { %10743 = vst [vmem:[#allocation84_spill] sm:$0xff] %v6222_v5 }
 0x2a5   :  { %839 = vperm.xlu2 %5018, %v5758_v44   ;;  %832 = vperm.xlu1 %5017, %v5737_v43  }
 0x2a8   :  { %1602 = vmax.xlane.f32.xlu0 %v6192_v63  ;;  %v688_v60 = vpop.permute.xlu2 %687  ;;  %v6214_v63 = vpop.permute.xlu1 %681 }
 0x2a9   :  { %v1204_v26 = vmul.f32 %v6197_v21, %v688_v60 }
 0x2ab   :  { %v6234_v18 = vsel %vm5927_vm6, %v1204_v26, -inf }
 0x2ac   :  { %10746 = vst [vmem:[#allocation87_spill] sm:$0xff] %v6234_v18 }
 0x2ad   :  { %5020 = vset.pattern.permute.xlu2 %v5644_v8  ;;  %5019 = vset.pattern.permute.xlu1 %v5728_v41 }
 0x2b0   :  { %1608 = vmax.xlane.f32.xlu0 %v6212_v22  ;;  %v6224_v38 = vpop.permute.xlu2 %699  ;;  %v6226_v1 = vpop.permute.xlu1 %693 }
 0x2b1   :  { %10744 = vst [vmem:[#allocation85_spill] sm:$0xff] %v6224_v38  ;;  %v1207_v38 = vmul.f32 %v6197_v21, %v5832_v53 }
 0x2b2   :  { %10745 = vst [vmem:[#allocation86_spill] sm:$0xff] %v6226_v1 }
 0x2b3   :  { %v6247_v60 = vsel %vm5947_vm8, %v1207_v38, -inf }
 0x2b4   :  { %10749 = vst [vmem:[#allocation90_spill] sm:$0xff] %v6247_v60 }
 0x2b5   :  { %851 = vperm.xlu2 %5020, %v5758_v44   ;;  %845 = vperm.xlu1 %5019, %v5758_v44  }
 0x2b8   :  { %1614 = vmax.xlane.f32.xlu0 %v6222_v5  ;;  %v6236_v22 = vpop.permute.xlu2 %717  ;;  %v6238_v59 = vpop.permute.xlu1 %711 }
 0x2b9   :  { %10747 = vst [vmem:[#allocation88_spill] sm:$0xff] %v6236_v22 }
 0x2ba   :  { %10748 = vst [vmem:[#allocation89_spill] sm:$0xff] %v6238_v59 }
 0x2bd   :  { %5023 = vset.pattern.permute.xlu2 %v5660_v27  ;;  %5022 = vset.pattern.permute.xlu1 %v5641_v7 }
 0x2c0   :  { %1620 = vmax.xlane.f32.xlu0 %v6234_v18  ;;  %v6249_v5 = vpop.permute.xlu2 %729  ;;  %v724_v26 = vpop.permute.xlu1 %723  ;;  %v1129_v18 = vrot.slane %v5865_v4, 4 }
 0x2c1   :  { %10750 = vst [vmem:[#allocation91_spill] sm:$0xff] %v6249_v5  ;;  %v1210_v22 = vmul.f32 %v6197_v21, %v724_v26 }
 0x2c2   :  { %v6263_v5 = vperm.slane %v1129_v18, 0 }
 0x2c3   :  { %v6258_v53 = vsel %vm5967_vm10, %v1210_v22, -inf }
 0x2c4   :  { %10751 = vst [vmem:[#allocation92_spill] sm:$0xff] %v6258_v53 }
 0x2c5   :  { %869 = vperm.xlu2 %5023, %v5758_v44   ;;  %863 = vperm.xlu1 %5022, %v5758_v44  }
 0x2c8   :  { %1626 = vmax.xlane.f32.xlu0 %v6247_v60  ;;  %v6260_v59 = vpop.permute.xlu2 %748  ;;  %v743_v38 = vpop.permute.xlu1 %742 }
 0x2c9   :  { %v1213_v60 = vmul.f32 %v6263_v5, %v743_v38 }
 0x2cb   :  { %v6270_v26 = vsel %vm5887_vm2, %v1213_v60, -inf }
 0x2cc   :  { %10752 = vst [vmem:[#allocation93_spill] sm:$0xff] %v6270_v26 }
 0x2cd   :  { %5025 = vset.pattern.permute.xlu2 %v5675_v30  ;;  %5024 = vset.pattern.permute.xlu1 %v5678_v31 }
 0x2d0   :  { %1632 = vmax.xlane.f32.xlu0 %v6258_v53  ;;  %v761_v1 = vpop.permute.xlu2 %760  ;;  %v6284_v60 = vpop.permute.xlu1 %754 }
 0x2d1   :  { %v1216_v22 = vmul.f32 %v6263_v5, %v761_v1 }
 0x2d3   :  { %v6278_v18 = vsel %vm6006_vm12, %v1216_v22, -inf  ;;  %v1222_v22 = vmul.f32 %v6263_v5, %v5853_v62 }
 0x2d4   :  { %10753 = vst [vmem:[#allocation94_spill] sm:$0xff] %v6278_v18 }
 0x2d5   :  { %881 = vperm.xlu2 %5025, %v5758_v44   ;;  %875 = vperm.xlu1 %5024, %v5758_v44  }
 0x2d8   :  { %1638 = vmax.xlane.f32.xlu0 %v6270_v26  ;;  %v779_v38 = vpop.permute.xlu2 %778 }
 0x2d9   :  { %v1219_v53 = vmul.f32 %v6263_v5, %v779_v38  ;;  %v6295_v38 = vpop.permute.xlu1 %772 }
 0x2da   :  { %10755 = vst [vmem:[#allocation96_spill] sm:$0xff] %v6295_v38 }
 0x2db   :  { %v6288_v1 = vsel %vm6026_vm14, %v1219_v53, -inf }
 0x2dc   :  { %10754 = vst [vmem:[#allocation95_spill] sm:$0xff] %v6288_v1 }
 0x2dd   :  { %5029 = vset.pattern.permute.xlu2 %v5690_v33  ;;  %5028 = vset.pattern.permute.xlu1 %v5693_v34 }
 0x2e0   :  { %1644 = vmax.xlane.f32.xlu0 %v6278_v18  ;;  %v6299_v18 = vsel %vm6046_vm0, %v1222_v22, -inf }
 0x2e1   :  { %10756 = vst [vmem:[#allocation97_spill] sm:$0xff] %v6299_v18 }
 0x2e5   :  { %899 = vperm.xlu2 %5029, %v5758_v44   ;;  %893 = vperm.xlu1 %5028, %v5758_v44  }
 0x2e7   :  { %v6304_v53 = vpop.permute.xlu1 %784 }
 0x2e8   :  { %1650 = vmax.xlane.f32.xlu0 %v6288_v1  ;;  %10757 = vst [vmem:[#allocation98_spill] sm:$0xff] %v6304_v53  ;;  %v6306_v1 = vpop.permute.xlu2 %790 }
 0x2e9   :  { %10758 = vst [vmem:[#allocation99_spill] sm:$0xff] %v6306_v1 }
 0x2ed   :  { %5031 = vset.pattern.permute.xlu2 %v5704_v36  ;;  %5030 = vset.pattern.permute.xlu1 %v5707_v37 }
 0x2f0   :  { %1656 = vmax.xlane.f32.xlu0 %v6299_v18  ;;  %v6312_v26 = vpop.permute.xlu2 %808 }
 0x2f1   :  { %10760 = vst [vmem:[#allocation101_spill] sm:$0xff] %v6312_v26 }
 0x2f5   :  { %911 = vperm.xlu2 %5031, %v5758_v44   ;;  %905 = vperm.xlu1 %5030, %v5758_v44  }
 0x2f7   :  { %v6310_v62 = vpop.permute.xlu1 %802 }
 0x2f8   :  { %10759 = vst [vmem:[#allocation100_spill] sm:$0xff] %v6310_v62  ;;  %v6321_v1 = vpop.permute.xlu2 %820 }
 0x2f9   :  { %10762 = vst [vmem:[#allocation103_spill] sm:$0xff] %v6321_v1 }
 0x2fd   :  { %5034 = vset.pattern.permute.xlu2 %v5716_v39  ;;  %5033 = vset.pattern.permute.xlu1 %v5719_v40 }
 0x300   :  { %v6326_v26 = vpop.permute.xlu2 %839 }
 0x301   :  { %10763 = vst [vmem:[#allocation104_spill] sm:$0xff] %v6326_v26 }
 0x305   :  { %929 = vperm.xlu2 %5034, %v5758_v44   ;;  %923 = vperm.xlu1 %5033, %v5758_v44  }
 0x307   :  { %v815_v22 = vpop.permute.xlu1 %814 }
 0x308   :  { %v1225_v18 = vmul.f32 %v6263_v5, %v815_v22  ;;  %v1130_v22 = vrot.slane %v5865_v4, 5 }
 0x30a   :  { %v6319_v53 = vsel %vm6064_vm5, %v1225_v18, -inf  ;;  %v6337_v62 = vperm.slane %v1130_v22, 0 }
 0x30b   :  { %10761 = vst [vmem:[#allocation102_spill] sm:$0xff] %v6319_v53  ;;  %1662 = vmax.xlane.f32.xlu0 %v6319_v53 }
 0x30d   :  { %5036 = vset.pattern.permute.xlu2 %v5728_v41  ;;  %5035 = vset.pattern.permute.xlu1 %v5637_v6 }
 0x30f   :  { %v852_v53 = vpop.permute.xlu2 %851 }
 0x310   :  { %v1231_v26 = vmul.f32 %v6337_v62, %v852_v53 }
 0x312   :  { %v6344_v38 = vsel %vm6107_vm13, %v1231_v26, -inf  ;;  %v1237_v26 = vmul.f32 %v6337_v62, %v5904_v17 }
 0x313   :  { %10765 = vst [vmem:[#allocation106_spill] sm:$0xff] %v6344_v38 }
 0x314   :  { %v6361_v53 = vsel %vm10767_vm1, %v1237_v26, -inf }
 0x315   :  { %942 = vperm.xlu2 %5036, %v5788_v47   ;;  %936 = vperm.xlu1 %5035, %v5788_v47   ;;  %10768 = vst [vmem:[#allocation108_spill] sm:$0xff] %v6361_v53 }
 0x317   :  { %v833_v44 = vpop.permute.xlu1 %832 }
 0x318   :  { %v1228_v18 = vmul.f32 %v6263_v5, %v833_v44 }
 0x31a   :  { %v6334_v1 = vsel %vm6085_vm9, %v1228_v18, -inf }
 0x31b   :  { %10764 = vst [vmem:[#allocation105_spill] sm:$0xff] %v6334_v1  ;;  %1668 = vmax.xlane.f32.xlu0 %v6334_v1 }
 0x31d   :  { %5039 = vset.pattern.permute.xlu2 %v5641_v7  ;;  %5038 = vset.pattern.permute.xlu1 %v5663_v28 }
 0x31f   :  { %v870_v44 = vpop.permute.xlu2 %869 }
 0x320   :  { %v1234_v22 = vmul.f32 %v6337_v62, %v870_v44 }
 0x322   :  { %v6352_v18 = vsel %vm6127_vm3, %v1234_v22, -inf }
 0x323   :  { %1674 = vmax.xlane.f32.xlu0 %v6344_v38  ;;  %10766 = vst [vmem:[#allocation107_spill] sm:$0xff] %v6352_v18 }
 0x325   :  { %960 = vperm.xlu2 %5039, %v5788_v47   ;;  %954 = vperm.xlu1 %5038, %v5788_v47  }
 0x327   :  { %v6370_v44 = vpop.permute.xlu1 %845 }
 0x32b   :  { %1680 = vmax.xlane.f32.xlu0 %v6352_v18 }
 0x32d   :  { %5041 = vset.pattern.permute.xlu2 %v5678_v31  ;;  %5040 = vset.pattern.permute.xlu1 %v5660_v27 }
 0x32f   :  { %v6380_v26 = vpop.permute.xlu2 %881 }
 0x330   :  { %10769 = vst [vmem:[#allocation109_spill] sm:$0xff] %v6380_v26 }
 0x333   :  { %1686 = vmax.xlane.f32.xlu0 %v6361_v53 }
 0x335   :  { %972 = vperm.xlu2 %5041, %v5788_v47   ;;  %966 = vperm.xlu1 %5040, %v5788_v47  }
 0x337   :  { %v6374_v17 = vpop.permute.xlu1 %863 }
 0x33d   :  { %5044 = vset.pattern.permute.xlu2 %v5693_v34  ;;  %5043 = vset.pattern.permute.xlu1 %v5666_v29 }
 0x33f   :  { %v6386_v18 = vpop.permute.xlu2 %899 }
 0x340   :  { %10771 = vst [vmem:[#allocation111_spill] sm:$0xff] %v6386_v18 }
 0x345   :  { %990 = vperm.xlu2 %5044, %v5788_v47   ;;  %984 = vperm.xlu1 %5043, %v5788_v47  }
 0x347   :  { %v6378_v22 = vpop.permute.xlu1 %875 }
 0x34d   :  { %5046 = vset.pattern.permute.xlu2 %v5707_v37  ;;  %5045 = vset.pattern.permute.xlu1 %v5690_v33 }
 0x34f   :  { %v6395_v31 = vpop.permute.xlu2 %911 }
 0x350   :  { %10774 = vst [vmem:[#allocation113_spill] sm:$0xff] %v6395_v31 }
 0x355   :  { %1002 = vperm.xlu2 %5046, %v5788_v47   ;;  %996 = vperm.xlu1 %5045, %v5788_v47  }
 0x357   :  { %v6384_v53 = vpop.permute.xlu1 %893 }
 0x358   :  { %10770 = vst [vmem:[#allocation110_spill] sm:$0xff] %v6384_v53 }
 0x35d   :  { %5049 = vset.pattern.permute.xlu2 %v5719_v40  ;;  %5048 = vset.pattern.permute.xlu1 %v5770_v45 }
 0x35f   :  { %v6400_v18 = vpop.permute.xlu2 %929 }
 0x360   :  { %10775 = vst [vmem:[#allocation114_spill] sm:$0xff] %v6400_v18 }
 0x365   :  { %1020 = vperm.xlu2 %5049, %v5788_v47   ;;  %1014 = vperm.xlu1 %5048, %v5788_v47  }
 0x367   :  { %v906_v38 = vpop.permute.xlu1 %905 }
 0x368   :  { %v1240_v1 = vmul.f32 %v6337_v62, %v906_v38  ;;  %v1131_v38 = vrot.slane %v5865_v4, 6 }
 0x36a   :  { %v6393_v37 = vsel %vm10772_vm7, %v1240_v1, -inf  ;;  %v6411_v26 = vperm.slane %v1131_v38, 0 }
 0x36b   :  { %10773 = vst [vmem:[#allocation112_spill] sm:$0xff] %v6393_v37  ;;  %1692 = vmax.xlane.f32.xlu0 %v6393_v37 }
 0x36d   :  { %5051 = vset.pattern.permute.xlu2 %v5637_v6  ;;  %5050 = vset.pattern.permute.xlu1 %v5716_v39 }
 0x36f   :  { %v943_v37 = vpop.permute.xlu2 %942 }
 0x375   :  { %1033 = vperm.xlu2 %5051, %v5807_v48   ;;  %1026 = vperm.xlu1 %5050, %v5788_v47   ;;  %v1246_v47 = vmul.f32 %v6411_v26, %v943_v37  ;;  %v1252_v37 = vmul.f32 %v6411_v26, %v6036_v2 }
 0x377   :  { %v924_v53 = vpop.permute.xlu1 %923  ;;  %v6418_v18 = vsel %vm6206_vm11, %v1246_v47, -inf  ;;  %v6435_v47 = vsel %vm5927_vm6, %v1252_v37, -inf }
 0x378   :  { %v1243_v1 = vmul.f32 %v6337_v62, %v924_v53  ;;  %10777 = vst [vmem:[#allocation116_spill] sm:$0xff] %v6418_v18 }
 0x379   :  { %10779 = vst [vmem:[#allocation118_spill] sm:$0xff] %v6435_v47 }
 0x37a   :  { %v6408_v31 = vsel %vm6186_vm15, %v1243_v1, -inf }
 0x37b   :  { %10776 = vst [vmem:[#allocation115_spill] sm:$0xff] %v6408_v31  ;;  %1698 = vmax.xlane.f32.xlu0 %v6408_v31 }
 0x37d   :  { %5053 = vset.pattern.permute.xlu2 %v5663_v28  ;;  %5052 = vset.pattern.permute.xlu1 %v5644_v8 }
 0x37f   :  { %v961_v53 = vpop.permute.xlu2 %960 }
 0x380   :  { %v1249_v38 = vmul.f32 %v6411_v26, %v961_v53 }
 0x382   :  { %v6426_v1 = vsel %vm5909_vm4, %v1249_v38, -inf }
 0x383   :  { %1704 = vmax.xlane.f32.xlu0 %v6418_v18  ;;  %10778 = vst [vmem:[#allocation117_spill] sm:$0xff] %v6426_v1 }
 0x385   :  { %1051 = vperm.xlu2 %5053, %v5807_v48   ;;  %1045 = vperm.xlu1 %5052, %v5807_v48  }
 0x387   :  { %v6444_v53 = vpop.permute.xlu1 %936 }
 0x38b   :  { %1710 = vmax.xlane.f32.xlu0 %v6426_v1 }
 0x38d   :  { %5055 = vset.pattern.permute.xlu2 %v5660_v27  ;;  %5054 = vset.pattern.permute.xlu1 %v5641_v7 }
 0x38f   :  { %v6454_v37 = vpop.permute.xlu2 %972 }
 0x393   :  { %1716 = vmax.xlane.f32.xlu0 %v6435_v47 }
 0x395   :  { %1063 = vperm.xlu2 %5055, %v5807_v48   ;;  %1057 = vperm.xlu1 %5054, %v5807_v48  }
 0x397   :  { %v6448_v2 = vpop.permute.xlu1 %954 }
 0x39d   :  { %5058 = vset.pattern.permute.xlu2 %v5666_v29  ;;  %5057 = vset.pattern.permute.xlu1 %v5675_v30  ;;  %v10807_v29 = vld [vmem:[#allocation55_spill] sm:$0xff] }
 0x39f   :  { %v6460_v1 = vpop.permute.xlu2 %990 }
 0x3a5   :  { %1081 = vperm.xlu2 %5058, %v5807_v48   ;;  %1075 = vperm.xlu1 %5057, %v5807_v48  }
 0x3a7   :  { %v6452_v38 = vpop.permute.xlu1 %966 }
 0x3a8   :  { %v1250_v3 = vmul.f32 %v6411_v26, %v6452_v38 }
 0x3ad   :  { %5060 = vset.pattern.permute.xlu2 %v5690_v33  ;;  %5059 = vset.pattern.permute.xlu1 %v5693_v34 }
 0x3af   :  { %v6469_v8 = vpop.permute.xlu2 %1002 }
 0x3b0   :  { %v1256_v12 = vmul.f32 %v6411_v26, %v6469_v8 }
 0x3b5   :  { %1093 = vperm.xlu2 %5060, %v5807_v48   ;;  %1087 = vperm.xlu1 %5059, %v5807_v48  }
 0x3b7   :  { %v6458_v47 = vpop.permute.xlu1 %984 }
 0x3b8   :  { %v1253_v54 = vmul.f32 %v6411_v26, %v6458_v47 }
 0x3bd   :  { %5063 = vset.pattern.permute.xlu2 %v5770_v45  ;;  %5062 = vset.pattern.permute.xlu1 %v5704_v36 }
 0x3bf   :  { %v6474_v36 = vpop.permute.xlu2 %1020 }
 0x3c0   :  { %v1259_v56 = vmul.f32 %v6411_v26, %v6474_v36 }
 0x3c5   :  { %1111 = vperm.xlu2 %5063, %v5807_v48   ;;  %1105 = vperm.xlu1 %5062, %v5807_v48  }
 0x3c7   :  { %v997_v18 = vpop.permute.xlu1 %996 }
 0x3c8   :  { %v1255_v31 = vmul.f32 %v6411_v26, %v997_v18  ;;  %v1132_v18 = vrot.slane %v5865_v4, 7 }
 0x3ca   :  { %v6467_v34 = vsel %vm5947_vm8, %v1255_v31, -inf }
 0x3cb   :  { %10780 = vst [vmem:[#allocation119_spill] sm:$0xff] %v6467_v34  ;;  %1722 = vmax.xlane.f32.xlu0 %v6467_v34 }
 0x3cd   :  { %5065 = vset.pattern.permute.xlu2 %v5716_v39  ;;  %5064 = vset.pattern.permute.xlu1 %v5719_v40  ;;  %v6485_v39 = vperm.slane %v1132_v18, 0  ;;  %v6503_v40 = vpop.permute.xlu0 %1099 }
 0x3cf   :  { %v1034_v34 = vpop.permute.xlu2 %1033  ;;  %v1267_v18 = vmul.f32 %v6485_v39, %v6139_v24 }
 0x3d5   :  { %1123 = vperm.xlu2 %5065, %v5807_v48   ;;  %1117 = vperm.xlu1 %5064, %v5807_v48   ;;  %v1261_v48 = vmul.f32 %v6485_v39, %v1034_v34  ;;  %v6507_v34 = vsel %vm6026_vm14, %v1267_v18, -inf  ;;  %v1152_v18 = vmul.f32 %v5877_v11, %v5845_v58  ;;  %v1155_v58 = vmul.f32 %v5877_v11, %v5851_v61 }
 0x3d6   :  { %10784 = vst [vmem:[#allocation123_spill] sm:$0xff] %v6507_v34  ;;  %v1158_v61 = vmul.f32 %v5877_v11, %v5857_v0  ;;  %v1161_v0 = vmul.f32 %v5877_v11, %v5872_v9  ;;  %v1164_v9 = vmul.f32 %v5877_v11, %v5893_v14  ;;  %v10797_v14 = vld [vmem:[#allocation49_spill] sm:$0xff] }
 0x3d7   :  { %v1015_v45 = vpop.permute.xlu1 %1014  ;;  %v6492_v4 = vsel %vm5887_vm2, %v1261_v48, -inf  ;;  %v361_v48 = vpop.permute.xlu0 %360 }
 0x3d8   :  { %v1258_v31 = vmul.f32 %v6411_v26, %v1015_v45  ;;  %10782 = vst [vmem:[#allocation121_spill] sm:$0xff] %v6492_v4 }
 0x3da   :  { %v6482_v33 = vsel %vm5967_vm10, %v1258_v31, -inf }
 0x3db   :  { %10781 = vst [vmem:[#allocation120_spill] sm:$0xff] %v6482_v33  ;;  %1728 = vmax.xlane.f32.xlu0 %v6482_v33 }
 0x3dd   :  { %5067 = vset.pattern.permute.xlu2 %v5728_v41  ;;  %5066 = vset.pattern.permute.xlu1 %v5637_v6 }
 0x3df   :  { %v1052_v45 = vpop.permute.xlu2 %1051 }
 0x3e0   :  { %v1264_v31 = vmul.f32 %v6485_v39, %v1052_v45  ;;  %v1151_v45 = vmul.f32 %v5877_v11, %v5837_v55  ;;  %v1154_v55 = vmul.f32 %v5877_v11, %v5843_v57  ;;  %v1157_v57 = vmul.f32 %v5877_v11, %v5818_v50 }
 0x3e1   :  { %v1160_v50 = vmul.f32 %v5877_v11, %v5874_v10  ;;  %v1163_v10 = vmul.f32 %v5877_v11, %v5899_v16  ;;  %v1166_v16 = vmul.f32 %v5981_v15, %v5915_v20  ;;  %v1167_v20 = vmul.f32 %v5981_v15, %v10797_v14  ;;  %v10803_v14 = vld [vmem:[#allocation56_spill] sm:$0xff] }
 0x3e2   :  { %v6498_v33 = vsel %vm6006_vm12, %v1264_v31, -inf  ;;  %v1150_v31 = vmul.f32 %v5877_v11, %v361_v48  ;;  %v6529_v48 = vsel %vm6006_vm12, %v1152_v18, -inf  ;;  %v6547_v18 = vsel %vm6026_vm14, %v1155_v58, -inf }
 0x3e3   :  { %1734 = vmax.xlane.f32.xlu0 %v6492_v4  ;;  %10783 = vst [vmem:[#allocation122_spill] sm:$0xff] %v6498_v33  ;;  %v6565_v58 = vsel %vm6046_vm0, %v1158_v61, -inf }
 0x3e4   :  { %v6520_v24 = vsel %vm6206_vm11, %v1150_v31, -inf  ;;  %10787 = vst [vmem:[#allocation126_spill] sm:$0xff] %v6529_v48  ;;  %v6536_v31 = vpop.permute.xlu0 %554 }
 0x3e5   :  { %10786 = vst [vmem:[#allocation125_spill] sm:$0xff] %v6520_v24 }
 0x3e6   :  { %10789 = vst [vmem:[#allocation128_spill] sm:$0xff] %v6547_v18 }
 0x3e7   :  { %10791 = vst [vmem:[#allocation130_spill] sm:$0xff] %v6565_v58 }
 0x3eb   :  { %1740 = vmax.xlane.f32.xlu0 %v6498_v33  ;;  %v6515_v33 = vsel %vm6107_vm13, %v1151_v45, -inf  ;;  %v6534_v45 = vsel %vm6127_vm3, %v1154_v55, -inf  ;;  %v6552_v55 = vsel %vm10767_vm1, %v1157_v57, -inf  ;;  %v6570_v57 = vsel %vm10772_vm7, %v1160_v50, -inf }
 0x3ec   :  { %10785 = vst [vmem:[#allocation124_spill] sm:$0xff] %v6515_v33  ;;  %v6590_v50 = vsel %vm6186_vm15, %v1163_v10, -inf  ;;  %v6610_v10 = vsel %vm6206_vm11, %v1166_v16, -inf }
 0x3ed   :  { %10788 = vst [vmem:[#allocation127_spill] sm:$0xff] %v6534_v45 }
 0x3ee   :  { %10790 = vst [vmem:[#allocation129_spill] sm:$0xff] %v6552_v55 }
 0x3ef   :  { %10792 = vst [vmem:[#allocation131_spill] sm:$0xff] %v6570_v57  ;;  %v6581_v61 = vpop.permute.xlu2 %1063 }
 0x3f0   :  { %10794 = vst [vmem:[#allocation133_spill] sm:$0xff] %v6590_v50 }
 0x3f1   :  { %10796 = vst [vmem:[#allocation135_spill] sm:$0xff] %v6610_v10 }
 0x3f3   :  { %1746 = vmax.xlane.f32.xlu0 %v6507_v34  ;;  %v6538_v34 = vpop.permute.xlu1 %1026 }
 0x3fe   :  { %1514 = vmax.xlane.f32.xlu2 %v6515_v33  ;;  %v6554_v33 = vpop.permute.xlu1 %1045 }
 0x3ff   :  { %1512 = vmax.xlane.f32.xlu1 %v6520_v24 }
 0x406   :  { %1516 = vmax.xlane.f32.xlu2 %v6529_v48  ;;  %v10798_v48 = vld [vmem:[#allocation44_spill] sm:$0xff] }
 0x407   :  { %1520 = vmax.xlane.f32.xlu1 %v6534_v45  ;;  %v6559_v45 = vpop.permute.xlu0 %1039  ;;  %v1169_v24 = vmul.f32 %v5981_v15, %v10798_v48  ;;  %v10802_v48 = vld [vmem:[#allocation48_spill] sm:$0xff] }
 0x408   :  { %v1262_v36 = vmul.f32 %v6485_v39, %v6559_v45 }
 0x40e   :  { %1522 = vmax.xlane.f32.xlu2 %v6547_v18  ;;  %v6572_v18 = vpop.permute.xlu1 %1057 }
 0x40f   :  { %1526 = vmax.xlane.f32.xlu1 %v6552_v55  ;;  %v6577_v55 = vpop.xlane.xlu0 %1510  ;;  %v1265_v45 = vmul.f32 %v6485_v39, %v6572_v18 }
 0x411   :  { %v7246_v43 = vsel %vm5909_vm4, %v1265_v45, -inf }
 0x412   :  { %10967 = vst [vmem:[#allocation210_spill] sm:$0xff] %v7246_v43 }
 0x416   :  { %1528 = vmax.xlane.f32.xlu2 %v6565_v58  ;;  %v6585_v58 = vsel %vm6064_vm5, %v1161_v0, -inf  ;;  %v6601_v0 = vpop.permute.xlu2 %1081 }
 0x417   :  { %1532 = vmax.xlane.f32.xlu1 %v6570_v57  ;;  %10793 = vst [vmem:[#allocation132_spill] sm:$0xff] %v6585_v58  ;;  %v6592_v57 = vpop.permute.xlu1 %1075  ;;  %v6599_v4 = vpop.xlane.xlu0 %1518 }
 0x41e   :  { %1534 = vmax.xlane.f32.xlu2 %v6585_v58  ;;  %v6605_v58 = vsel %vm6085_vm9, %v1164_v9, -inf }
 0x41f   :  { %1538 = vmax.xlane.f32.xlu1 %v6590_v50  ;;  %10795 = vst [vmem:[#allocation134_spill] sm:$0xff] %v6605_v58  ;;  %v6625_v16 = vpop.xlane.xlu0 %1524 }
 0x426   :  { %1540 = vmax.xlane.f32.xlu2 %v6605_v58  ;;  %v6622_v58 = vpop.permute.xlu2 %1093 }
 0x427   :  { %v1088_v50 = vpop.permute.xlu1 %1087  ;;  %1544 = vmax.xlane.f32.xlu1 %v6610_v10  ;;  %v6629_v10 = vsel %vm6107_vm13, %v1167_v20, -inf  ;;  %v1271_v49 = vmul.f32 %v6485_v39, %v6622_v58 }
 0x428   :  { %v1270_v11 = vmul.f32 %v6485_v39, %v1088_v50  ;;  %10800 = vst [vmem:[#allocation44_spill] sm:$0xff] %v6629_v10  ;;  %v6634_v50 = vsel %vm5909_vm4, %v1169_v24, -inf }
 0x429   :  { %10801 = vst [vmem:[#allocation136_spill] sm:$0xff] %v6634_v50  ;;  %v7284_v25 = vsel %vm5947_vm8, %v1271_v49, -inf }
 0x42a   :  { %v6620_v9 = vsel %vm6046_vm0, %v1270_v11, -inf  ;;  %v1170_v11 = vmul.f32 %v5981_v15, %v10802_v48  ;;  %10975 = vst [vmem:[#allocation218_spill] sm:$0xff] %v7284_v25 }
 0x42b   :  { %10799 = vst [vmem:[#allocation49_spill] sm:$0xff] %v6620_v9  ;;  %1752 = vmax.xlane.f32.xlu0 %v6620_v9  ;;  %v1172_v9 = vmul.f32 %v5981_v15, %v10803_v14  ;;  %v10806_v14 = vld [vmem:[#allocation51_spill] sm:$0xff] }
 0x42c   :  { %v6645_v20 = vsel %vm6127_vm3, %v1170_v11, -inf  ;;  %v1173_v30 = vmul.f32 %v5981_v15, %v10806_v14  ;;  %v1175_v11 = vmul.f32 %v5981_v15, %v10807_v29  ;;  %v10811_v29 = vld [vmem:[#allocation53_spill] sm:$0xff] }
 0x42d   :  { %10804 = vst [vmem:[#allocation48_spill] sm:$0xff] %v6645_v20  ;;  %v6650_v24 = vsel %vm5927_vm6, %v1172_v9, -inf }
 0x42e   :  { %1546 = vmax.xlane.f32.xlu2 %v6629_v10  ;;  %v6641_v41 = vpop.permute.xlu2 %1111  ;;  %10805 = vst [vmem:[#allocation56_spill] sm:$0xff] %v6650_v24  ;;  %v6652_v10 = vpop.xlane.xlu0 %1530  ;;  %v6667_v9 = vsel %vm10767_vm1, %v1173_v30, -inf }
 0x42f   :  { %1550 = vmax.xlane.f32.xlu1 %v6634_v50  ;;  %10809 = vst [vmem:[#allocation55_spill] sm:$0xff] %v6667_v9  ;;  %v1274_v35 = vmul.f32 %v6485_v39, %v6641_v41 }
 0x431   :  { %v7304_v46 = vsel %vm5967_vm10, %v1274_v35, -inf }
 0x432   :  { %10979 = vst [vmem:[#allocation222_spill] sm:$0xff] %v7304_v46 }
 0x436   :  { %1552 = vmax.xlane.f32.xlu2 %v6645_v20  ;;  %v1124_v6 = vpop.permute.xlu2 %1123  ;;  %v6678_v14 = vpop.xlane.xlu0 %1536 }
 0x437   :  { %v1106_v50 = vpop.permute.xlu1 %1105  ;;  %1556 = vmax.xlane.f32.xlu1 %v6650_v24  ;;  %v1276_v24 = vmul.f32 %v6485_v39, %v1124_v6  ;;  %10812 = vst [vmem:[#allocation53_spill] sm:$0xff] %v6678_v14 }
 0x438   :  { %v1273_v48 = vmul.f32 %v6485_v39, %v1106_v50  ;;  %v6673_v50 = vsel %vm5947_vm8, %v1175_v11, -inf }
 0x439   :  { %10810 = vst [vmem:[#allocation137_spill] sm:$0xff] %v6673_v50  ;;  %v6684_v30 = vsel %vm6085_vm9, %v1276_v24, -inf  ;;  %v10819_v24 = vld [vmem:[#allocation69_spill] sm:$0xff] }
 0x43a   :  { %v6662_v20 = vsel %vm6064_vm5, %v1273_v48, -inf  ;;  %v1176_v48 = vmul.f32 %v5981_v15, %v10811_v29  ;;  %v10817_v29 = vld [vmem:[#allocation57_spill] sm:$0xff] }
 0x43b   :  { %10808 = vst [vmem:[#allocation51_spill] sm:$0xff] %v6662_v20  ;;  %1758 = vmax.xlane.f32.xlu0 %v6662_v20  ;;  %v10813_v20 = vld [vmem:[#allocation59_spill] sm:$0xff] }
 0x43c   :  { %v1178_v27 = vmul.f32 %v5981_v15, %v10813_v20  ;;  %10814 = vst [vmem:[#allocation59_spill] sm:$0xff] %v6684_v30  ;;  %v6689_v6 = vsel %vm10772_vm7, %v1176_v48, -inf  ;;  %v1179_v20 = vmul.f32 %v5981_v15, %v10817_v29  ;;  %v1182_v15 = vmul.f32 %v10819_v24, %v6536_v31  ;;  %v10822_v29 = vld [vmem:[#allocation62_spill] sm:$0xff] }
 0x43d   :  { %10815 = vst [vmem:[#allocation138_spill] sm:$0xff] %v6689_v6 }
 0x43e   :  { %1558 = vmax.xlane.f32.xlu2 %v6667_v9  ;;  %v6694_v11 = vsel %vm5967_vm10, %v1178_v27, -inf  ;;  %v6701_v28 = vpop.xlane.xlu0 %1542  ;;  %v6705_v48 = vsel %vm6186_vm15, %v1179_v20, -inf  ;;  %v6721_v20 = vsel %vm6206_vm11, %v1182_v15, -inf }
 0x43f   :  { %1562 = vmax.xlane.f32.xlu1 %v6673_v50  ;;  %10816 = vst [vmem:[#allocation139_spill] sm:$0xff] %v6694_v11  ;;  %v10818_v50 = vld [vmem:[#allocation60_spill] sm:$0xff] }
 0x440   :  { %v1181_v9 = vmul.f32 %v10819_v24, %v10818_v50  ;;  %10820 = vst [vmem:[#allocation57_spill] sm:$0xff] %v6705_v48  ;;  %v1184_v50 = vmul.f32 %v10819_v24, %v10822_v29 }
 0x441   :  { %10824 = vst [vmem:[#allocation62_spill] sm:$0xff] %v6721_v20 }
 0x442   :  { %v6710_v27 = vsel %vm5887_vm2, %v1181_v9, -inf  ;;  %v6726_v9 = vsel %vm6006_vm12, %v1184_v50, -inf }
 0x443   :  { %1764 = vmax.xlane.f32.xlu0 %v6684_v30  ;;  %10821 = vst [vmem:[#allocation60_spill] sm:$0xff] %v6710_v27 }
 0x444   :  { %10825 = vst [vmem:[#allocation140_spill] sm:$0xff] %v6726_v9 }
 0x446   :  { %1564 = vmax.xlane.f32.xlu2 %v6689_v6  ;;  %v6717_v30 = vpop.xlane.xlu0 %1548 }
 0x447   :  { %1568 = vmax.xlane.f32.xlu1 %v6694_v11  ;;  %10823 = vst [vmem:[#allocation69_spill] sm:$0xff] %v6717_v30  ;;  %v10827_v11 = vld [vmem:[#allocation70_spill] sm:$0xff]  ;;  %v6765_v7 = vpop.permute.xlu1 %1117 }
 0x448   :  { %v1187_v29 = vmul.f32 %v10819_v24, %v10827_v11 }
 0x44a   :  { %v6740_v15 = vsel %vm6026_vm14, %v1187_v29, -inf }
 0x44b   :  { %10829 = vst [vmem:[#allocation70_spill] sm:$0xff] %v6740_v15 }
 0x44e   :  { %1570 = vmax.xlane.f32.xlu2 %v6705_v48  ;;  %v6742_v50 = vpop.xlane.xlu0 %1554 }
 0x44f   :  { %1574 = vmax.xlane.f32.xlu1 %v6710_v27  ;;  %v10826_v27 = vld [vmem:[#allocation65_spill] sm:$0xff]  ;;  %10830 = vst [vmem:[#allocation141_spill] sm:$0xff] %v6742_v50 }
 0x450   :  { %v1185_v31 = vmul.f32 %v10819_v24, %v10826_v27 }
 0x452   :  { %v6735_v48 = vsel %vm5909_vm4, %v1185_v31, -inf }
 0x453   :  { %10828 = vst [vmem:[#allocation65_spill] sm:$0xff] %v6735_v48 }
 0x456   :  { %1576 = vmax.xlane.f32.xlu2 %v6721_v20  ;;  %v10832_v20 = vld [vmem:[#allocation73_spill] sm:$0xff]  ;;  %v6761_v6 = vpop.xlane.xlu0 %1560 }
 0x457   :  { %1580 = vmax.xlane.f32.xlu1 %v6726_v9  ;;  %v10831_v9 = vld [vmem:[#allocation68_spill] sm:$0xff]  ;;  %v1190_v11 = vmul.f32 %v10819_v24, %v10832_v20 }
 0x458   :  { %v1188_v27 = vmul.f32 %v10819_v24, %v10831_v9  ;;  %v10837_v9 = vld [vmem:[#allocation76_spill] sm:$0xff] }
 0x459   :  { %v6756_v29 = vsel %vm6046_vm0, %v1190_v11, -inf  ;;  %v1193_v20 = vmul.f32 %v10819_v24, %v10837_v9  ;;  %v10841_v9 = vld [vmem:[#allocation77_spill] sm:$0xff] }
 0x45a   :  { %v6751_v31 = vsel %vm5927_vm6, %v1188_v27, -inf  ;;  %10834 = vst [vmem:[#allocation73_spill] sm:$0xff] %v6756_v29 }
 0x45b   :  { %10833 = vst [vmem:[#allocation68_spill] sm:$0xff] %v6751_v31  ;;  %v6774_v11 = vsel %vm6064_vm5, %v1193_v20, -inf }
 0x45c   :  { %10839 = vst [vmem:[#allocation142_spill] sm:$0xff] %v6774_v11 }
 0x45e   :  { %1582 = vmax.xlane.f32.xlu2 %v6735_v48  ;;  %v10835_v48 = vld [vmem:[#allocation71_spill] sm:$0xff] }
 0x45f   :  { %1586 = vmax.xlane.f32.xlu1 %v6740_v15  ;;  %v1191_v15 = vmul.f32 %v10819_v24, %v10835_v48  ;;  %10836 = vst [vmem:[#allocation71_spill] sm:$0xff] %v6761_v6  ;;  %v10840_v48 = vld [vmem:[#allocation74_spill] sm:$0xff]  ;;  %v1196_v6 = vmul.f32 %v10819_v24, %v10841_v9  ;;  %v10846_v9 = vld [vmem:[#allocation80_spill] sm:$0xff] }
 0x461   :  { %v6769_v27 = vsel %vm5947_vm8, %v1191_v15, -inf  ;;  %v6785_v15 = vpop.xlane.xlu0 %1566  ;;  %v6794_v20 = vsel %vm6085_vm9, %v1196_v6, -inf }
 0x462   :  { %10838 = vst [vmem:[#allocation76_spill] sm:$0xff] %v6769_v27 }
 0x463   :  { %10842 = vst [vmem:[#allocation74_spill] sm:$0xff] %v6785_v15  ;;  %v1199_v15 = vmul.f32 %v6197_v21, %v10846_v9 }
 0x464   :  { %10844 = vst [vmem:[#allocation143_spill] sm:$0xff] %v6794_v20 }
 0x465   :  { %v6814_v6 = vsel %vm6107_vm13, %v1199_v15, -inf }
 0x466   :  { %1588 = vmax.xlane.f32.xlu2 %v6751_v31  ;;  %10850 = vst [vmem:[#allocation145_spill] sm:$0xff] %v6814_v6 }
 0x467   :  { %1592 = vmax.xlane.f32.xlu1 %v6756_v29  ;;  %v1194_v29 = vmul.f32 %v10819_v24, %v10840_v48  ;;  %v10845_v48 = vld [vmem:[#allocation35_spill] sm:$0xff] }
 0x46e   :  { %1594 = vmax.xlane.f32.xlu2 %v6769_v27  ;;  %v6789_v27 = vsel %vm5967_vm10, %v1194_v29, -inf  ;;  %v6805_v29 = vpop.xlane.xlu0 %1572 }
 0x46f   :  { %1598 = vmax.xlane.f32.xlu1 %v6774_v11  ;;  %10843 = vst [vmem:[#allocation77_spill] sm:$0xff] %v6789_v27  ;;  %v1197_v11 = vmul.f32 %v6197_v21, %v10845_v48  ;;  %v10851_v48 = vld [vmem:[#allocation82_spill] sm:$0xff] }
 0x470   :  { %10848 = vst [vmem:[#allocation80_spill] sm:$0xff] %v6805_v29 }
 0x471   :  { %v6779_v31 = vpop.xlane.xlu2 %1514 }
 0x472   :  { %v6783_v50 = vpop.xlane.xlu1 %1512 }
 0x476   :  { %1600 = vmax.xlane.f32.xlu2 %v6789_v27  ;;  %v6809_v27 = vsel %vm5887_vm2, %v1197_v11, -inf }
 0x477   :  { %1604 = vmax.xlane.f32.xlu1 %v6794_v20  ;;  %10849 = vst [vmem:[#allocation144_spill] sm:$0xff] %v6809_v27  ;;  %v1200_v20 = vmul.f32 %v6197_v21, %v10851_v48  ;;  %v1203_v48 = vmul.f32 %v6197_v21, %v6214_v63  ;;  %v10862_v63 = vld [vmem:[#allocation85_spill] sm:$0xff] }
 0x479   :  { %v6799_v24 = vpop.xlane.xlu2 %1516  ;;  %v6827_v11 = vsel %vm6006_vm12, %v1200_v20, -inf }
 0x47a   :  { %v6803_v30 = vpop.xlane.xlu1 %1520 }
 0x47b   :  { %10847 = vst [vmem:[#allocation35_spill] sm:$0xff] %v6803_v30  ;;  %v10852_v30 = vld [vmem:[#allocation36_spill] sm:$0xff] }
 0x47c   :  { %v1202_v29 = vmul.f32 %v6197_v21, %v10852_v30  ;;  %10854 = vst [vmem:[#allocation36_spill] sm:$0xff] %v6827_v11 }
 0x47e   :  { %1606 = vmax.xlane.f32.xlu2 %v6809_v27  ;;  %v6832_v15 = vsel %vm6127_vm3, %v1202_v29, -inf  ;;  %v10858_v27 = vld [vmem:[#allocation86_spill] sm:$0xff] }
 0x47f   :  { %1610 = vmax.xlane.f32.xlu1 %v6814_v6  ;;  %10855 = vst [vmem:[#allocation146_spill] sm:$0xff] %v6832_v15  ;;  %v6834_v6 = vpop.xlane.xlu0 %1578 }
 0x480   :  { %10856 = vst [vmem:[#allocation147_spill] sm:$0xff] %v6834_v6 }
 0x481   :  { %v6819_v9 = vpop.xlane.xlu2 %1522 }
 0x482   :  { %v6823_v14 = vpop.xlane.xlu1 %1526 }
 0x483   :  { %10853 = vst [vmem:[#allocation82_spill] sm:$0xff] %v6823_v14  ;;  %v1205_v14 = vmul.f32 %v6197_v21, %v10858_v27 }
 0x485   :  { %v6852_v29 = vsel %vm10767_vm1, %v1205_v14, -inf }
 0x486   :  { %1612 = vmax.xlane.f32.xlu2 %v6827_v11  ;;  %v6847_v11 = vsel %vm6026_vm14, %v1203_v48, -inf  ;;  %10861 = vst [vmem:[#allocation150_spill] sm:$0xff] %v6852_v29 }
 0x487   :  { %1616 = vmax.xlane.f32.xlu1 %v6832_v15  ;;  %10860 = vst [vmem:[#allocation149_spill] sm:$0xff] %v6847_v11  ;;  %v1206_v15 = vmul.f32 %v6197_v21, %v10862_v63  ;;  %v10869_v63 = vld [vmem:[#allocation88_spill] sm:$0xff] }
 0x489   :  { %v6839_v30 = vpop.xlane.xlu2 %1528 }
 0x48a   :  { %10857 = vst [vmem:[#allocation148_spill] sm:$0xff] %v6839_v30  ;;  %v6843_v20 = vpop.xlane.xlu1 %1532  ;;  %v6857_v30 = vpop.xlane.xlu0 %1584 }
 0x48b   :  { %10859 = vst [vmem:[#allocation86_spill] sm:$0xff] %v6843_v20  ;;  %v10865_v20 = vld [vmem:[#allocation89_spill] sm:$0xff] }
 0x48c   :  { %10863 = vst [vmem:[#allocation85_spill] sm:$0xff] %v6857_v30  ;;  %v1208_v6 = vmul.f32 %v6197_v21, %v10865_v20  ;;  %v10871_v20 = vld [vmem:[#allocation91_spill] sm:$0xff] }
 0x48e   :  { %1618 = vmax.xlane.f32.xlu2 %v6847_v11  ;;  %v6867_v11 = vsel %vm6046_vm0, %v1206_v15, -inf  ;;  %v6872_v14 = vsel %vm10772_vm7, %v1208_v6, -inf }
 0x48f   :  { %1622 = vmax.xlane.f32.xlu1 %v6852_v29  ;;  %10867 = vst [vmem:[#allocation152_spill] sm:$0xff] %v6867_v11  ;;  %v1209_v29 = vmul.f32 %v6197_v21, %v10869_v63  ;;  %v10875_v63 = vld [vmem:[#allocation37_spill] sm:$0xff] }
 0x490   :  { %10868 = vst [vmem:[#allocation153_spill] sm:$0xff] %v6872_v14 }
 0x491   :  { %v6859_v27 = vpop.xlane.xlu2 %1534 }
 0x492   :  { %10864 = vst [vmem:[#allocation151_spill] sm:$0xff] %v6859_v27  ;;  %v6863_v48 = vpop.xlane.xlu1 %1538  ;;  %v6883_v15 = vpop.xlane.xlu0 %1590 }
 0x493   :  { %10866 = vst [vmem:[#allocation89_spill] sm:$0xff] %v6863_v48  ;;  %v1211_v48 = vmul.f32 %v6197_v21, %v10871_v20 }
 0x494   :  { %10872 = vst [vmem:[#allocation91_spill] sm:$0xff] %v6883_v15 }
 0x495   :  { %v6892_v6 = vsel %vm6186_vm15, %v1211_v48, -inf }
 0x496   :  { %1624 = vmax.xlane.f32.xlu2 %v6867_v11  ;;  %v6887_v11 = vsel %vm6064_vm5, %v1209_v29, -inf  ;;  %10874 = vst [vmem:[#allocation155_spill] sm:$0xff] %v6892_v6 }
 0x497   :  { %1628 = vmax.xlane.f32.xlu1 %v6872_v14  ;;  %10873 = vst [vmem:[#allocation154_spill] sm:$0xff] %v6887_v11  ;;  %v1212_v14 = vmul.f32 %v6197_v21, %v10875_v63  ;;  %v1215_v21 = vmul.f32 %v6263_v5, %v6284_v60  ;;  %v10880_v63 = vld [vmem:[#allocation38_spill] sm:$0xff]  ;;  %v10885_v60 = vld [vmem:[#allocation96_spill] sm:$0xff] }
 0x499   :  { %v6877_v27 = vpop.xlane.xlu2 %1540 }
 0x49a   :  { %10870 = vst [vmem:[#allocation88_spill] sm:$0xff] %v6877_v27  ;;  %v6881_v30 = vpop.xlane.xlu1 %1544  ;;  %v1214_v27 = vmul.f32 %v6263_v5, %v6260_v59  ;;  %v6903_v29 = vpop.xlane.xlu0 %1596 }
 0x49b   :  { %10876 = vst [vmem:[#allocation37_spill] sm:$0xff] %v6903_v29 }
 0x49c   :  { %v6912_v48 = vsel %vm6206_vm11, %v1214_v27, -inf }
 0x49d   :  { %10878 = vst [vmem:[#allocation157_spill] sm:$0xff] %v6912_v48 }
 0x49e   :  { %1630 = vmax.xlane.f32.xlu2 %v6887_v11  ;;  %v6907_v11 = vsel %vm6085_vm9, %v1212_v14, -inf  ;;  %v6925_v14 = vsel %vm6107_vm13, %v1215_v21, -inf }
 0x49f   :  { %1634 = vmax.xlane.f32.xlu1 %v6892_v6  ;;  %10877 = vst [vmem:[#allocation156_spill] sm:$0xff] %v6907_v11  ;;  %v1217_v6 = vmul.f32 %v6263_v5, %v10880_v63 }
 0x4a0   :  { %10882 = vst [vmem:[#allocation159_spill] sm:$0xff] %v6925_v14 }
 0x4a1   :  { %v6897_v20 = vpop.xlane.xlu2 %1546  ;;  %v6930_v27 = vsel %vm5909_vm4, %v1217_v6, -inf }
 0x4a2   :  { %v6901_v15 = vpop.xlane.xlu1 %1550  ;;  %10883 = vst [vmem:[#allocation160_spill] sm:$0xff] %v6930_v27 }
 0x4a6   :  { %1636 = vmax.xlane.f32.xlu2 %v6907_v11  ;;  %v1218_v11 = vmul.f32 %v6263_v5, %v10885_v60  ;;  %v10891_v60 = vld [vmem:[#allocation99_spill] sm:$0xff] }
 0x4a7   :  { %1640 = vmax.xlane.f32.xlu1 %v6912_v48  ;;  %v6932_v48 = vpop.xlane.xlu0 %1602 }
 0x4a8   :  { %10884 = vst [vmem:[#allocation161_spill] sm:$0xff] %v6932_v48 }
 0x4a9   :  { %v6917_v59 = vpop.xlane.xlu2 %1552 }
 0x4aa   :  { %10879 = vst [vmem:[#allocation158_spill] sm:$0xff] %v6917_v59  ;;  %v6921_v29 = vpop.xlane.xlu1 %1556 }
 0x4ab   :  { %10881 = vst [vmem:[#allocation38_spill] sm:$0xff] %v6921_v29  ;;  %v10887_v29 = vld [vmem:[#allocation98_spill] sm:$0xff] }
 0x4ac   :  { %v1220_v59 = vmul.f32 %v6263_v5, %v10887_v29 }
 0x4ae   :  { %1642 = vmax.xlane.f32.xlu2 %v6925_v14  ;;  %v6945_v14 = vsel %vm6127_vm3, %v1218_v11, -inf  ;;  %v6950_v6 = vsel %vm5927_vm6, %v1220_v59, -inf }
 0x4af   :  { %1646 = vmax.xlane.f32.xlu1 %v6930_v27  ;;  %10889 = vst [vmem:[#allocation162_spill] sm:$0xff] %v6945_v14  ;;  %v1221_v27 = vmul.f32 %v6263_v5, %v10891_v60  ;;  %v10898_v60 = vld [vmem:[#allocation101_spill] sm:$0xff] }
 0x4b0   :  { %10890 = vst [vmem:[#allocation163_spill] sm:$0xff] %v6950_v6 }
 0x4b1   :  { %v6937_v63 = vpop.xlane.xlu2 %1558 }
 0x4b2   :  { %10886 = vst [vmem:[#allocation96_spill] sm:$0xff] %v6937_v63  ;;  %v6941_v21 = vpop.xlane.xlu1 %1562  ;;  %v6955_v63 = vpop.xlane.xlu0 %1608 }
 0x4b3   :  { %10888 = vst [vmem:[#allocation98_spill] sm:$0xff] %v6941_v21  ;;  %v10894_v21 = vld [vmem:[#allocation100_spill] sm:$0xff] }
 0x4b4   :  { %10892 = vst [vmem:[#allocation99_spill] sm:$0xff] %v6955_v63  ;;  %v1223_v48 = vmul.f32 %v6263_v5, %v10894_v21  ;;  %v10900_v21 = vld [vmem:[#allocation103_spill] sm:$0xff] }
 0x4b6   :  { %1648 = vmax.xlane.f32.xlu2 %v6945_v14  ;;  %v6965_v14 = vsel %vm10767_vm1, %v1221_v27, -inf  ;;  %v6970_v59 = vsel %vm5947_vm8, %v1223_v48, -inf }
 0x4b7   :  { %1652 = vmax.xlane.f32.xlu1 %v6950_v6  ;;  %10896 = vst [vmem:[#allocation165_spill] sm:$0xff] %v6965_v14  ;;  %v1224_v6 = vmul.f32 %v6263_v5, %v10898_v60  ;;  %v10905_v60 = vld [vmem:[#allocation39_spill] sm:$0xff] }
 0x4b8   :  { %10897 = vst [vmem:[#allocation166_spill] sm:$0xff] %v6970_v59 }
 0x4b9   :  { %v6957_v29 = vpop.xlane.xlu2 %1564 }
 0x4ba   :  { %10893 = vst [vmem:[#allocation164_spill] sm:$0xff] %v6957_v29  ;;  %v6961_v11 = vpop.xlane.xlu1 %1568  ;;  %v6981_v27 = vpop.xlane.xlu0 %1614 }
 0x4bb   :  { %10895 = vst [vmem:[#allocation100_spill] sm:$0xff] %v6961_v11  ;;  %v1226_v11 = vmul.f32 %v6263_v5, %v10900_v21 }
 0x4bc   :  { %10902 = vst [vmem:[#allocation167_spill] sm:$0xff] %v6981_v27 }
 0x4bd   :  { %v6990_v48 = vsel %vm5967_vm10, %v1226_v11, -inf }
 0x4be   :  { %1654 = vmax.xlane.f32.xlu2 %v6965_v14  ;;  %v6985_v14 = vsel %vm10772_vm7, %v1224_v6, -inf  ;;  %10904 = vst [vmem:[#allocation169_spill] sm:$0xff] %v6990_v48 }
 0x4bf   :  { %1658 = vmax.xlane.f32.xlu1 %v6970_v59  ;;  %10903 = vst [vmem:[#allocation168_spill] sm:$0xff] %v6985_v14  ;;  %v1227_v59 = vmul.f32 %v6263_v5, %v10905_v60  ;;  %v1230_v5 = vmul.f32 %v6337_v62, %v6370_v44  ;;  %v10912_v60 = vld [vmem:[#allocation41_spill] sm:$0xff]  ;;  %v1233_v44 = vmul.f32 %v6337_v62, %v6374_v17 }
 0x4c0   :  { %v10920_v17 = vld [vmem:[#allocation109_spill] sm:$0xff] }
 0x4c1   :  { %v6975_v29 = vpop.xlane.xlu2 %1570 }
 0x4c2   :  { %10899 = vst [vmem:[#allocation101_spill] sm:$0xff] %v6975_v29  ;;  %v6979_v63 = vpop.xlane.xlu1 %1574  ;;  %v10906_v29 = vld [vmem:[#allocation104_spill] sm:$0xff]  ;;  %v7001_v6 = vpop.xlane.xlu0 %1620 }
 0x4c3   :  { %10901 = vst [vmem:[#allocation103_spill] sm:$0xff] %v6979_v63  ;;  %v1229_v63 = vmul.f32 %v6337_v62, %v10906_v29 }
 0x4c4   :  { %10908 = vst [vmem:[#allocation104_spill] sm:$0xff] %v7001_v6 }
 0x4c5   :  { %v7010_v11 = vsel %vm5887_vm2, %v1229_v63, -inf }
 0x4c6   :  { %1660 = vmax.xlane.f32.xlu2 %v6985_v14  ;;  %v7005_v14 = vsel %vm6186_vm15, %v1227_v59, -inf  ;;  %10910 = vst [vmem:[#allocation171_spill] sm:$0xff] %v7010_v11  ;;  %v7023_v59 = vsel %vm6206_vm11, %v1230_v5, -inf }
 0x4c7   :  { %1664 = vmax.xlane.f32.xlu1 %v6990_v48  ;;  %10909 = vst [vmem:[#allocation170_spill] sm:$0xff] %v7005_v14  ;;  %v1232_v48 = vmul.f32 %v6337_v62, %v10912_v60 }
 0x4c8   :  { %10914 = vst [vmem:[#allocation173_spill] sm:$0xff] %v7023_v59 }
 0x4c9   :  { %v6995_v21 = vpop.xlane.xlu2 %1576  ;;  %v7028_v63 = vsel %vm6006_vm12, %v1232_v48, -inf }
 0x4ca   :  { %v6999_v27 = vpop.xlane.xlu1 %1580  ;;  %10915 = vst [vmem:[#allocation174_spill] sm:$0xff] %v7028_v63 }
 0x4cb   :  { %10907 = vst [vmem:[#allocation39_spill] sm:$0xff] %v6999_v27 }
 0x4ce   :  { %1666 = vmax.xlane.f32.xlu2 %v7005_v14  ;;  %v1235_v14 = vmul.f32 %v6337_v62, %v6378_v22 }
 0x4cf   :  { %1670 = vmax.xlane.f32.xlu1 %v7010_v11  ;;  %v7030_v11 = vpop.xlane.xlu0 %1626 }
 0x4d0   :  { %v7048_v48 = vsel %vm6026_vm14, %v1235_v14, -inf }
 0x4d1   :  { %v7015_v29 = vpop.xlane.xlu2 %1582  ;;  %10919 = vst [vmem:[#allocation178_spill] sm:$0xff] %v7048_v48 }
 0x4d2   :  { %10911 = vst [vmem:[#allocation172_spill] sm:$0xff] %v7015_v29  ;;  %v7019_v27 = vpop.xlane.xlu1 %1586 }
 0x4d3   :  { %10913 = vst [vmem:[#allocation41_spill] sm:$0xff] %v7019_v27 }
 0x4d6   :  { %1672 = vmax.xlane.f32.xlu2 %v7023_v59  ;;  %v7043_v59 = vsel %vm5909_vm4, %v1233_v44, -inf  ;;  %vm1901_vm4 = vcmask 195712  }
 0x4d7   :  { %1676 = vmax.xlane.f32.xlu1 %v7028_v63  ;;  %10918 = vst [vmem:[#allocation177_spill] sm:$0xff] %v7043_v59  ;;  %v1236_v63 = vmul.f32 %v6337_v62, %v10920_v17  ;;  %v10926_v17 = vld [vmem:[#allocation111_spill] sm:$0xff] }
 0x4d9   :  { %v7035_v60 = vpop.xlane.xlu2 %1588 }
 0x4da   :  { %10916 = vst [vmem:[#allocation175_spill] sm:$0xff] %v7035_v60  ;;  %v7039_v5 = vpop.xlane.xlu1 %1592  ;;  %v7053_v60 = vpop.xlane.xlu0 %1632 }
 0x4db   :  { %10917 = vst [vmem:[#allocation176_spill] sm:$0xff] %v7039_v5  ;;  %v10922_v5 = vld [vmem:[#allocation110_spill] sm:$0xff] }
 0x4dc   :  { %v1238_v27 = vmul.f32 %v6337_v62, %v10922_v5  ;;  %v10928_v5 = vld [vmem:[#allocation113_spill] sm:$0xff] }
 0x4de   :  { %1678 = vmax.xlane.f32.xlu2 %v7043_v59  ;;  %v7063_v59 = vsel %vm5927_vm6, %v1236_v63, -inf  ;;  %v7068_v14 = vsel %vm6046_vm0, %v1238_v27, -inf }
 0x4df   :  { %1682 = vmax.xlane.f32.xlu1 %v7048_v48  ;;  %10924 = vst [vmem:[#allocation179_spill] sm:$0xff] %v7063_v59  ;;  %v1239_v48 = vmul.f32 %v6337_v62, %v10926_v17  ;;  %v10933_v17 = vld [vmem:[#allocation46_spill] sm:$0xff] }
 0x4e0   :  { %10925 = vst [vmem:[#allocation180_spill] sm:$0xff] %v7068_v14 }
 0x4e1   :  { %v7055_v22 = vpop.xlane.xlu2 %1594 }
 0x4e2   :  { %10921 = vst [vmem:[#allocation109_spill] sm:$0xff] %v7055_v22  ;;  %v7059_v44 = vpop.xlane.xlu1 %1598  ;;  %v7079_v63 = vpop.xlane.xlu0 %1638 }
 0x4e3   :  { %10923 = vst [vmem:[#allocation110_spill] sm:$0xff] %v7059_v44  ;;  %v1241_v44 = vmul.f32 %v6337_v62, %v10928_v5 }
 0x4e4   :  { %10930 = vst [vmem:[#allocation181_spill] sm:$0xff] %v7079_v63 }
 0x4e5   :  { %v7088_v27 = vsel %vm6064_vm5, %v1241_v44, -inf }
 0x4e6   :  { %1684 = vmax.xlane.f32.xlu2 %v7063_v59  ;;  %v7083_v59 = vsel %vm5947_vm8, %v1239_v48, -inf  ;;  %10932 = vst [vmem:[#allocation183_spill] sm:$0xff] %v7088_v27  ;;  %vm10645_vm8 = vcmask 326912  }
 0x4e7   :  { %1688 = vmax.xlane.f32.xlu1 %v7068_v14  ;;  %10931 = vst [vmem:[#allocation182_spill] sm:$0xff] %v7083_v59  ;;  %v1242_v14 = vmul.f32 %v6337_v62, %v10933_v17  ;;  %v1245_v17 = vmul.f32 %v6411_v26, %v6444_v53  ;;  %v1248_v53 = vmul.f32 %v6411_v26, %v6448_v2 }
 0x4e9   :  { %v7073_v22 = vpop.xlane.xlu2 %1600 }
 0x4ea   :  { %10927 = vst [vmem:[#allocation111_spill] sm:$0xff] %v7073_v22  ;;  %v7077_v29 = vpop.xlane.xlu1 %1604  ;;  %v7099_v48 = vpop.xlane.xlu0 %1644 }
 0x4eb   :  { %10929 = vst [vmem:[#allocation113_spill] sm:$0xff] %v7077_v29  ;;  %v10934_v29 = vld [vmem:[#allocation114_spill] sm:$0xff]  ;;  %v11033_v6 = vld [vmem:[#allocation181_spill] sm:$0xff] }
 0x4ec   :  { %v1244_v22 = vmul.f32 %v6337_v62, %v10934_v29  ;;  %v10938_v29 = vld [vmem:[#allocation52_spill] sm:$0xff] }
 0x4ee   :  { %1690 = vmax.xlane.f32.xlu2 %v7083_v59  ;;  %v7103_v59 = vsel %vm5967_vm10, %v1242_v14, -inf  ;;  %v7108_v44 = vsel %vm6085_vm9, %v1244_v22, -inf  ;;  %v7121_v14 = vsel %vm5887_vm2, %v1245_v17, -inf  ;;  %vm1897_vm2 = vcmask 130112  }
 0x4ef   :  { %1694 = vmax.xlane.f32.xlu1 %v7088_v27  ;;  %10936 = vst [vmem:[#allocation114_spill] sm:$0xff] %v7103_v59  ;;  %v1247_v27 = vmul.f32 %v6411_v26, %v10938_v29  ;;  %vm10644_vm10 = vcmask 392512  }
 0x4f0   :  { %10937 = vst [vmem:[#allocation184_spill] sm:$0xff] %v7108_v44 }
 0x4f1   :  { %v7093_v5 = vpop.xlane.xlu2 %1606  ;;  %10940 = vst [vmem:[#allocation185_spill] sm:$0xff] %v7121_v14  ;;  %v7126_v22 = vsel %vm6107_vm13, %v1247_v27, -inf  ;;  %v7146_v27 = vsel %vm6127_vm3, %v1250_v3, -inf  ;;  %v7166_v3 = vsel %vm10767_vm1, %v1253_v54, -inf  ;;  %v7186_v54 = vsel %vm10772_vm7, %v1256_v12, -inf }
 0x4f2   :  { %v7097_v63 = vpop.xlane.xlu1 %1610  ;;  %10941 = vst [vmem:[#allocation186_spill] sm:$0xff] %v7126_v22  ;;  %v7206_v12 = vsel %vm6186_vm15, %v1259_v56, -inf  ;;  %v7226_v56 = vsel %vm6206_vm11, %v1262_v36, -inf  ;;  %v1268_v36 = vmul.f32 %v6485_v39, %v6592_v57  ;;  %vm1949_vm11 = vcmask 982912  }
 0x4f3   :  { %10935 = vst [vmem:[#allocation46_spill] sm:$0xff] %v7097_v63 }
 0x4f4   :  { %10945 = vst [vmem:[#allocation190_spill] sm:$0xff] %v7146_v27  ;;  %v7264_v19 = vsel %vm5927_vm6, %v1268_v36, -inf  ;;  %vm1905_vm6 = vcmask 261312  }
 0x4f5   :  { %10949 = vst [vmem:[#allocation194_spill] sm:$0xff] %v7166_v3 }
 0x4f6   :  { %1696 = vmax.xlane.f32.xlu2 %v7103_v59  ;;  %10953 = vst [vmem:[#allocation198_spill] sm:$0xff] %v7186_v54 }
 0x4f7   :  { %1700 = vmax.xlane.f32.xlu1 %v7108_v44  ;;  %v7128_v44 = vpop.xlane.xlu0 %1650  ;;  %10959 = vst [vmem:[#allocation202_spill] sm:$0xff] %v7206_v12 }
 0x4f8   :  { %10963 = vst [vmem:[#allocation206_spill] sm:$0xff] %v7226_v56 }
 0x4f9   :  { %v7113_v62 = vpop.xlane.xlu2 %1612  ;;  %10971 = vst [vmem:[#allocation214_spill] sm:$0xff] %v7264_v19 }
 0x4fa   :  { %v7117_v63 = vpop.xlane.xlu1 %1616 }
 0x4fb   :  { %10939 = vst [vmem:[#allocation52_spill] sm:$0xff] %v7117_v63 }
 0x4fe   :  { %1702 = vmax.xlane.f32.xlu2 %v7121_v14  ;;  %v7141_v14 = vsel %vm6006_vm12, %v1248_v53, -inf  ;;  %vm10643_vm12 = vcmask 458112  }
 0x4ff   :  { %1706 = vmax.xlane.f32.xlu1 %v7126_v22  ;;  %10944 = vst [vmem:[#allocation189_spill] sm:$0xff] %v7141_v14  ;;  %v7149_v2 = vpop.xlane.xlu0 %1656  ;;  %v1251_v22 = vmul.f32 %v6411_v26, %v6454_v37 }
 0x501   :  { %v7133_v29 = vpop.xlane.xlu2 %1618 }
 0x502   :  { %10942 = vst [vmem:[#allocation187_spill] sm:$0xff] %v7133_v29  ;;  %v7137_v17 = vpop.xlane.xlu1 %1622 }
 0x503   :  { %10943 = vst [vmem:[#allocation188_spill] sm:$0xff] %v7137_v17 }
 0x506   :  { %1708 = vmax.xlane.f32.xlu2 %v7141_v14  ;;  %v7161_v14 = vsel %vm6026_vm14, %v1251_v22, -inf  ;;  %vm10494_vm14 = vcmask 523712  }
 0x507   :  { %1712 = vmax.xlane.f32.xlu1 %v7146_v27  ;;  %10948 = vst [vmem:[#allocation193_spill] sm:$0xff] %v7161_v14  ;;  %v7169_v37 = vpop.xlane.xlu0 %1662  ;;  %v1254_v27 = vmul.f32 %v6411_v26, %v6460_v1  ;;  %v10954_v1 = vld [vmem:[#allocation66_spill] sm:$0xff] }
 0x509   :  { %v7153_v38 = vpop.xlane.xlu2 %1624 }
 0x50a   :  { %10946 = vst [vmem:[#allocation191_spill] sm:$0xff] %v7153_v38  ;;  %v7157_v53 = vpop.xlane.xlu1 %1628 }
 0x50b   :  { %10947 = vst [vmem:[#allocation192_spill] sm:$0xff] %v7157_v53 }
 0x50e   :  { %1714 = vmax.xlane.f32.xlu2 %v7161_v14  ;;  %v7181_v14 = vsel %vm6046_vm0, %v1254_v27, -inf  ;;  %vm10493_vm0 = vcmask 589312  }
 0x50f   :  { %1718 = vmax.xlane.f32.xlu1 %v7166_v3  ;;  %10952 = vst [vmem:[#allocation197_spill] sm:$0xff] %v7181_v14  ;;  %v1257_v3 = vmul.f32 %v6411_v26, %v10954_v1  ;;  %v7191_v59 = vpop.xlane.xlu0 %1668  ;;  %v1260_v1 = vmul.f32 %v6411_v26, %v6538_v34  ;;  %v1263_v26 = vmul.f32 %v6485_v39, %v6554_v33 }
 0x510   :  { %10955 = vst [vmem:[#allocation66_spill] sm:$0xff] %v7191_v59  ;;  %v1266_v33 = vmul.f32 %v6485_v39, %v6581_v61  ;;  %v1269_v61 = vmul.f32 %v6485_v39, %v6601_v0  ;;  %v1272_v0 = vmul.f32 %v6485_v39, %v6503_v40  ;;  %v1275_v40 = vmul.f32 %v6485_v39, %v6765_v7 }
 0x511   :  { %v7173_v47 = vpop.xlane.xlu2 %1630 }
 0x512   :  { %10950 = vst [vmem:[#allocation195_spill] sm:$0xff] %v7173_v47  ;;  %v7177_v22 = vpop.xlane.xlu1 %1634  ;;  %v7259_v52 = vsel %vm6127_vm3, %v1266_v33, -inf  ;;  %v7279_v33 = vsel %vm10767_vm1, %v1269_v61, -inf  ;;  %v7317_v42 = vsel %vm6186_vm15, %v1275_v40, -inf  ;;  %v4938_v40 = vld [vmem:[#allocation12 + $0x38] sm:$0xff]  ;;  %vm1941_vm3 = vcmask 851712  }
 0x513   :  { %10951 = vst [vmem:[#allocation196_spill] sm:$0xff] %v7177_v22  ;;  %335 = vmatpush.bf16.msra.mxu2 %v4938_v40  ;;  %v10993_v40 = vld [vmem:[#allocation40_spill] sm:$0xff]  ;;  %vm1945_vm15 = vcmask 917312   ;;  %vm1953_vm1 = vcmask 1048512  }
 0x514   :  { %10970 = vst [vmem:[#allocation213_spill] sm:$0xff] %v7259_v52  ;;  %v7351_v47 = vadd.s32 4294967288, %v10993_v40  ;;  %v7368_v53 = vadd.s32 4294967272, %v10993_v40 }
 0x515   :  { %10974 = vst [vmem:[#allocation217_spill] sm:$0xff] %v7279_v33 }
 0x516   :  { %1720 = vmax.xlane.f32.xlu2 %v7181_v14  ;;  %v7201_v14 = vsel %vm6064_vm5, %v1257_v3, -inf  ;;  %v7221_v3 = vsel %vm6085_vm9, %v1260_v1, -inf  ;;  %v7241_v1 = vsel %vm6107_vm13, %v1263_v26, -inf  ;;  %10981 = vst [vmem:[#allocation224_spill] sm:$0xff] %v7317_v42  ;;  %vm10490_vm5 = vcmask 654912  }
 0x517   :  { %1724 = vmax.xlane.f32.xlu1 %v7186_v54  ;;  %10958 = vst [vmem:[#allocation201_spill] sm:$0xff] %v7201_v14  ;;  %v7217_v32 = vpop.xlane.xlu0 %1674  ;;  %vm10492_vm9 = vcmask 720512   ;;  %vm10491_vm13 = vcmask 786112  }
 0x518   :  { %10962 = vst [vmem:[#allocation205_spill] sm:$0xff] %v7221_v3 }
 0x519   :  { %v7193_v8 = vpop.xlane.xlu2 %1636  ;;  %10966 = vst [vmem:[#allocation209_spill] sm:$0xff] %v7241_v1 }
 0x51a   :  { %10956 = vst [vmem:[#allocation199_spill] sm:$0xff] %v7193_v8  ;;  %v7197_v27 = vpop.xlane.xlu1 %1640 }
 0x51b   :  { %10957 = vst [vmem:[#allocation200_spill] sm:$0xff] %v7197_v27  ;;  %v11027_v27 = vld [vmem:[#allocation99_spill] sm:$0xff] }
 0x51c   :  { %10994 = vst [vmem:[#allocation236_spill] sm:$0xff] %v7351_v47 }
 0x51d   :  { %10999 = vst [vmem:[#allocation241_spill] sm:$0xff] %v7368_v53 }
 0x51e   :  { %1726 = vmax.xlane.f32.xlu2 %v7201_v14 }
 0x51f   :  { %1730 = vmax.xlane.f32.xlu1 %v7206_v12  ;;  %v7237_v51 = vpop.xlane.xlu0 %1680 }
 0x521   :  { %v7211_v54 = vpop.xlane.xlu2 %1642 }
 0x522   :  { %10960 = vst [vmem:[#allocation203_spill] sm:$0xff] %v7211_v54  ;;  %v7215_v8 = vpop.xlane.xlu1 %1646 }
 0x523   :  { %10961 = vst [vmem:[#allocation204_spill] sm:$0xff] %v7215_v8 }
 0x526   :  { %1732 = vmax.xlane.f32.xlu2 %v7221_v3  ;;  %v4936_v3 = vld [vmem:[#allocation12 + $0x28] sm:$0xff] }
 0x527   :  { %1736 = vmax.xlane.f32.xlu1 %v7226_v56  ;;  %v7266_v26 = vpop.xlane.xlu0 %1686 }
 0x529   :  { %v7231_v34 = vpop.xlane.xlu2 %1648 }
 0x52a   :  { %10964 = vst [vmem:[#allocation207_spill] sm:$0xff] %v7231_v34  ;;  %v7235_v12 = vpop.xlane.xlu1 %1652 }
 0x52b   :  { %10965 = vst [vmem:[#allocation208_spill] sm:$0xff] %v7235_v12 }
 0x52e   :  { %1738 = vmax.xlane.f32.xlu2 %v7241_v1 }
 0x52f   :  { %1742 = vmax.xlane.f32.xlu1 %v7246_v43  ;;  %v7286_v36 = vpop.xlane.xlu0 %1692 }
 0x531   :  { %v7251_v18 = vpop.xlane.xlu2 %1654 }
 0x532   :  { %10968 = vst [vmem:[#allocation211_spill] sm:$0xff] %v7251_v18  ;;  %v7255_v56 = vpop.xlane.xlu1 %1658 }
 0x533   :  { %10969 = vst [vmem:[#allocation212_spill] sm:$0xff] %v7255_v56  ;;  %v7362_v56 = vadd.s32 4294967264, %v10993_v40 }
 0x535   :  { %10997 = vst [vmem:[#allocation239_spill] sm:$0xff] %v7362_v56  ;;  %v1908_v38 = vperm.slane %v6599_v4, %v7362_v56  ;;  %v7401_v4 = vadd.s32 4294967256, %v10993_v40 }
 0x536   :  { %1744 = vmax.xlane.f32.xlu2 %v7259_v52  ;;  %v4937_v52 = vld [vmem:[#allocation12 + $0x30] sm:$0xff] }
 0x537   :  { %1748 = vmax.xlane.f32.xlu1 %v7264_v19  ;;  %v7299_v19 = vsel %vm10772_vm7, %v1272_v0, -inf  ;;  %v7306_v49 = vpop.xlane.xlu0 %1698  ;;  %336 = vmatpush.bf16.msra.mxu2 %v4937_v52  ;;  %v1896_v52 = vperm.slane %v6783_v50, %v7351_v47  ;;  %v7374_v50 = vadd.s32 4294967280, %v10993_v40  ;;  %11005 = vst [vmem:[#allocation247_spill] sm:$0xff] %v7401_v4  ;;  %vm2172_vm7 = vcmask 1041409  }
 0x538   :  { %10978 = vst [vmem:[#allocation221_spill] sm:$0xff] %v7299_v19 }
 0x539   :  { %v7271_v57 = vpop.xlane.xlu2 %1660  ;;  %11001 = vst [vmem:[#allocation243_spill] sm:$0xff] %v7374_v50  ;;  %v1900_v12 = vperm.slane %v6779_v31, %v7374_v50  ;;  %v1956_v31 = vperm.slane %v6881_v30, %v7351_v47  ;;  %v7414_v30 = vadd.s32 4294967200, %v10993_v40 }
 0x53a   :  { %10972 = vst [vmem:[#allocation215_spill] sm:$0xff] %v7271_v57  ;;  %v7275_v45 = vpop.xlane.xlu1 %1664  ;;  %v1894_v57 = vperm.slane %v6577_v55, %v10993_v40  ;;  %v1904_v55 = vperm.slane %v6799_v24, %v7368_v53  ;;  %v7393_v24 = vadd.s32 4294967248, %v10993_v40 }
 0x53b   :  { %10973 = vst [vmem:[#allocation216_spill] sm:$0xff] %v7275_v45  ;;  %337 = vmatpush.bf16.msra.mxu2 %v4936_v3  ;;  %v4933_v3 = vld [vmem:[#allocation12 + $0x10] sm:$0xff] }
 0x53c   :  { %11003 = vst [vmem:[#allocation245_spill] sm:$0xff] %v7393_v24  ;;  %v1916_v29 = vperm.slane %v6819_v9, %v7393_v24 }
 0x53d   :  { %11008 = vst [vmem:[#allocation250_spill] sm:$0xff] %v7414_v30 }
 0x53e   :  { %1750 = vmax.xlane.f32.xlu2 %v7279_v33 }
 0x53f   :  { %1754 = vmax.xlane.f32.xlu1 %v7284_v25  ;;  %v7320_v13 = vpop.xlane.xlu0 %1704 }
 0x541   :  { %v7291_v58 = vpop.xlane.xlu2 %1666 }
 0x542   :  { %10976 = vst [vmem:[#allocation219_spill] sm:$0xff] %v7291_v58  ;;  %v7295_v61 = vpop.xlane.xlu1 %1670  ;;  %v4935_v58 = vld [vmem:[#allocation12 + $0x20] sm:$0xff] }
 0x543   :  { %10977 = vst [vmem:[#allocation220_spill] sm:$0xff] %v7295_v61  ;;  %338 = vmatpush.bf16.msra.mxu2 %v4935_v58  ;;  %v7365_v58 = vadd.s32 4294967240, %v10993_v40  ;;  %v11024_v61 = vld [vmem:[#allocation91_spill] sm:$0xff] }
 0x545   :  { %10998 = vst [vmem:[#allocation240_spill] sm:$0xff] %v7365_v58 }
 0x546   :  { %1756 = vmax.xlane.f32.xlu2 %v7299_v19 }
 0x547   :  { %1760 = vmax.xlane.f32.xlu1 %v7304_v46  ;;  %v7330_v7 = vpop.xlane.xlu0 %1710 }
 0x549   :  { %v7311_v41 = vpop.xlane.xlu2 %1672 }
 0x54a   :  { %v7313_v25 = vpop.xlane.xlu1 %1676 }
 0x54b   :  { %10980 = vst [vmem:[#allocation223_spill] sm:$0xff] %v7313_v25 }
 0x54e   :  { %1762 = vmax.xlane.f32.xlu2 %v7317_v42 }
 0x54f   :  { %v7336_v23 = vpop.xlane.xlu0 %1716 }
 0x551   :  { %v7322_v0 = vpop.xlane.xlu2 %1678 }
 0x552   :  { %10982 = vst [vmem:[#allocation225_spill] sm:$0xff] %v7322_v0  ;;  %v7324_v35 = vpop.xlane.xlu1 %1682 }
 0x553   :  { %10983 = vst [vmem:[#allocation226_spill] sm:$0xff] %v7324_v35 }
 0x557   :  { %v7342_v1 = vpop.xlane.xlu0 %1722 }
 0x559   :  { %v7326_v46 = vpop.xlane.xlu2 %1684 }
 0x55a   :  { %10984 = vst [vmem:[#allocation227_spill] sm:$0xff] %v7326_v46  ;;  %v7328_v19 = vpop.xlane.xlu1 %1688  ;;  %v1920_v46 = vperm.slane %v6625_v16, %v7365_v58 }
 0x55b   :  { %10985 = vst [vmem:[#allocation228_spill] sm:$0xff] %v7328_v19  ;;  %v1898_v19 = vsel %vm1897_vm2, %v1896_v52, %v1894_v57  ;;  %v1958_v57 = vperm.slane %v6897_v20, %v7374_v50  ;;  %v11011_v20 = vld [vmem:[#allocation69_spill] sm:$0xff] }
 0x55c   :  { %v1902_v52 = vsel %vm1901_vm4, %v1900_v12, %v1898_v19  ;;  %v1955_v12 = vperm.slane %v6701_v28, %v10993_v40  ;;  %v7411_v19 = vadd.s32 4294967224, %v10993_v40  ;;  %v1960_v17 = vperm.slane %v11011_v20, %v7368_v53  ;;  %v11013_v28 = vld [vmem:[#allocation35_spill] sm:$0xff] }
 0x55d   :  { %v1906_v16 = vsel %vm1905_vm6, %v1904_v55, %v1902_v52  ;;  %v11010_v55 = vld [vmem:[#allocation53_spill] sm:$0xff]  ;;  %v1912_v34 = vperm.slane %v11013_v28, %v7401_v4  ;;  %v7433_v52 = vadd.s32 4294967208, %v10993_v40  ;;  %v7436_v20 = vadd.s32 4294967184, %v10993_v40 }
 0x55e   :  { %11007 = vst [vmem:[#allocation249_spill] sm:$0xff] %v7411_v19  ;;  %v1910_v8 = vsel %vm10645_vm8, %v1908_v38, %v1906_v16  ;;  %v11016_v28 = vld [vmem:[#allocation141_spill] sm:$0xff]  ;;  %v11017_v38 = vld [vmem:[#allocation71_spill] sm:$0xff] }
 0x55f   :  { %v7348_v45 = vpop.xlane.xlu0 %1728  ;;  %11014 = vst [vmem:[#allocation69_spill] sm:$0xff] %v7433_v52 }
 0x560   :  { %10992 = vst [vmem:[#allocation235_spill] sm:$0xff] %v7348_v45 }
 0x561   :  { %v7332_v39 = vpop.xlane.xlu2 %1690  ;;  %11015 = vst [vmem:[#allocation35_spill] sm:$0xff] %v7436_v20 }
 0x562   :  { %10986 = vst [vmem:[#allocation229_spill] sm:$0xff] %v7332_v39  ;;  %v7334_v43 = vpop.xlane.xlu1 %1694  ;;  %v4932_v39 = vld [vmem:[#allocation12 + $0x8] sm:$0xff] }
 0x563   :  { %10987 = vst [vmem:[#allocation230_spill] sm:$0xff] %v7334_v43  ;;  %v4934_v43 = vld [vmem:[#allocation12 + $0x18] sm:$0xff] }
 0x564   :  { %339 = vmatpush.bf16.msra.mxu2 %v4934_v43  ;;  %v7371_v43 = vadd.s32 4294967216, %v10993_v40 }
 0x566   :  { %11000 = vst [vmem:[#allocation242_spill] sm:$0xff] %v7371_v43 }
 0x567   :  { %v7379_v18 = vpop.xlane.xlu0 %1734 }
 0x568   :  { %340 = vmatpush.bf16.msra.mxu2 %v4933_v3  ;;  %v7388_v3 = vadd.s32 4294967192, %v10993_v40 }
 0x569   :  { %v7338_v42 = vpop.xlane.xlu2 %1696 }
 0x56a   :  { %10988 = vst [vmem:[#allocation231_spill] sm:$0xff] %v7338_v42  ;;  %v7340_v33 = vpop.xlane.xlu1 %1700 }
 0x56b   :  { %10989 = vst [vmem:[#allocation232_spill] sm:$0xff] %v7340_v33 }
 0x56c   :  { %11002 = vst [vmem:[#allocation244_spill] sm:$0xff] %v7388_v3  ;;  %341 = vmatpush.bf16.msra.mxu2 %v4932_v39  ;;  %v7417_v39 = vadd.s32 4294967176, %v10993_v40 }
 0x56e   :  { %11009 = vst [vmem:[#allocation251_spill] sm:$0xff] %v7417_v39 }
 0x56f   :  { %v7454_v16 = vpop.xlane.xlu0 %1740 }
 0x571   :  { %v7344_v14 = vpop.xlane.xlu2 %1702 }
 0x572   :  { %10990 = vst [vmem:[#allocation233_spill] sm:$0xff] %v7344_v14  ;;  %v7346_v22 = vpop.xlane.xlu1 %1706  ;;  %v11021_v14 = vld [vmem:[#allocation85_spill] sm:$0xff] }
 0x573   :  { %10991 = vst [vmem:[#allocation234_spill] sm:$0xff] %v7346_v22  ;;  %v1966_v22 = vperm.slane %v11016_v28, %v7393_v24  ;;  %v5448_v28 = vld [vmem:[#allocation6] sm:$0xf] }
 0x579   :  { %v7353_v42 = vpop.xlane.xlu2 %1708 }
 0x57a   :  { %10995 = vst [vmem:[#allocation237_spill] sm:$0xff] %v7353_v42  ;;  %v7357_v33 = vpop.xlane.xlu1 %1712  ;;  %v1957_v42 = vsel %vm1897_vm2, %v1956_v31, %v1955_v12  ;;  %v11020_v12 = vld [vmem:[#allocation147_spill] sm:$0xff] }
 0x57b   :  { %10996 = vst [vmem:[#allocation238_spill] sm:$0xff] %v7357_v33  ;;  %v1959_v0 = vsel %vm1901_vm4, %v1958_v57, %v1957_v42  ;;  %v1989_v63 = vperm.slane %v11020_v12, %v7374_v50  ;;  %v1914_v42 = vsel %vm10644_vm10, %v1912_v34, %v1910_v8  ;;  %v1962_v57 = vperm.slane %v6901_v15, %v7362_v56  ;;  %v11032_v34 = vld [vmem:[#allocation103_spill] sm:$0xff] }
 0x57c   :  { %v1918_v25 = vsel %vm10643_vm12, %v1916_v29, %v1914_v42  ;;  %v1961_v31 = vsel %vm1905_vm6, %v1960_v17, %v1959_v0  ;;  %v11029_v17 = vld [vmem:[#allocation167_spill] sm:$0xff]  ;;  %v1987_v15 = vperm.slane %v6995_v21, %v7351_v47 }
 0x57d   :  { %v1922_v54 = vsel %vm10494_vm14, %v1920_v46, %v1918_v25  ;;  %v11035_v46 = vld [vmem:[#allocation96_spill] sm:$0xff] }
 0x581   :  { %v7398_v33 = vpop.xlane.xlu2 %1714 }
 0x582   :  { %11004 = vst [vmem:[#allocation246_spill] sm:$0xff] %v7398_v33  ;;  %v7406_v35 = vpop.xlane.xlu1 %1718  ;;  %v4931_v33 = vld [vmem:[#allocation12] sm:$0xff] }
 0x583   :  { %11006 = vst [vmem:[#allocation248_spill] sm:$0xff] %v7406_v35  ;;  %v7424_v35 = vadd.s32 4294967232, %v10993_v40  ;;  %342 = vmatpush.bf16.msra.mxu2 %v4931_v33  ;;  %v11022_v33 = vld [vmem:[#allocation158_spill] sm:$0xff] }
 0x584   :  { %v1964_v12 = vperm.slane %v11022_v33, %v7401_v4 }
 0x585   :  { %11012 = vst [vmem:[#allocation53_spill] sm:$0xff] %v7424_v35  ;;  %v1970_v25 = vperm.slane %v11035_v46, %v7424_v35 }
 0x586   :  { %343 = vmatmul.bf16.vlgmr.msra.gmra.mxu2 %v5448_v28  ;;  %v11031_v28 = vld [vmem:[#allocation148_spill] sm:$0xff] }
 0x587   :  { %v1928_v29 = vperm.slane %v11031_v28, %v7411_v19  ;;  %v11034_v28 = vld [vmem:[#allocation38_spill] sm:$0xff] }
 0x589   :  { %v7460_v9 = vpop.xlane.xlu2 %1720 }
 0x58a   :  { %11023 = vst [vmem:[#allocation141_spill] sm:$0xff] %v7460_v9  ;;  %v7470_v42 = vpop.xlane.xlu1 %1724  ;;  %v11030_v9 = vld [vmem:[#allocation82_spill] sm:$0xff] }
 0x58b   :  { %11028 = vst [vmem:[#allocation71_spill] sm:$0xff] %v7470_v42  ;;  %v1924_v8 = vperm.slane %v11030_v9, %v7424_v35  ;;  %v1963_v42 = vsel %vm10645_vm8, %v1962_v57, %v1961_v31  ;;  %v1986_v9 = vperm.slane %v11032_v34, %v10993_v40  ;;  %v1968_v34 = vperm.slane %v11034_v28, %v7365_v58  ;;  %v7526_v31 = vpop.xlane.xlu0 %1746 }
 0x58c   :  { %v1965_v33 = vsel %vm10644_vm10, %v1964_v12, %v1963_v42 }
 0x58d   :  { %v1926_v12 = vsel %vm10493_vm0, %v1924_v8, %v1922_v54  ;;  %v1988_v42 = vsel %vm1897_vm2, %v1987_v15, %v1986_v9  ;;  %v1967_v0 = vsel %vm10643_vm12, %v1966_v22, %v1965_v33  ;;  %v11036_v8 = vld [vmem:[#allocation39_spill] sm:$0xff] }
 0x58e   :  { %v1930_v21 = vsel %vm10490_vm5, %v1928_v29, %v1926_v12  ;;  %v1991_v15 = vperm.slane %v11036_v8, %v7368_v53  ;;  %v11037_v29 = vld [vmem:[#allocation86_spill] sm:$0xff]  ;;  %v1990_v46 = vsel %vm1901_vm4, %v1989_v63, %v1988_v42  ;;  %v11038_v12 = vld [vmem:[#allocation172_spill] sm:$0xff]  ;;  %v11040_v8 = vperm.slane %v6652_v10, %v7371_v43  ;;  %v11041_v22 = vld [vmem:[#allocation151_spill] sm:$0xff] }
 0x58f   :  { %v1936_v33 = vperm.slane %v11037_v29, %v7433_v52  ;;  %v1993_v28 = vperm.slane %v11038_v12, %v7362_v56  ;;  %v1940_v59 = vperm.slane %v11041_v22, %v7414_v30  ;;  %v1969_v29 = vsel %vm10494_vm14, %v1968_v34, %v1967_v0 }
 0x590   :  { %v1934_v54 = vsel %vm10492_vm9, %v11040_v8, %v1930_v21  ;;  %v1971_v12 = vsel %vm10493_vm0, %v1970_v25, %v1969_v29  ;;  %v2111_v10 = vperm.slane %v7320_v13, %v7351_v47  ;;  %v1992_v0 = vsel %vm1905_vm6, %v1991_v15, %v1990_v46  ;;  %v11042_v8 = vld [vmem:[#allocation98_spill] sm:$0xff]  ;;  %v11044_v15 = vld [vmem:[#allocation164_spill] sm:$0xff] }
 0x591   :  { %v7515_v9 = vpop.xlane.xlu2 %1726  ;;  %v1938_v22 = vsel %vm10491_vm13, %v1936_v33, %v1934_v54  ;;  %v1974_v42 = vperm.slane %v11042_v8, %v7371_v43  ;;  %v1994_v25 = vsel %vm10645_vm8, %v1993_v28, %v1992_v0  ;;  %v11043_v13 = vperm.slane %v11017_v38, %v7411_v19  ;;  %v11045_v33 = vld [vmem:[#allocation41_spill] sm:$0xff]  ;;  %v11060_v38 = vld [vmem:[#allocation74_spill] sm:$0xff] }
 0x592   :  { %v7524_v57 = vpop.xlane.xlu1 %1730  ;;  %v1942_v29 = vsel %vm1941_vm3, %v1940_v59, %v1938_v22  ;;  %v1976_v46 = vperm.slane %v11044_v15, %v7433_v52  ;;  %v1997_v28 = vperm.slane %v11045_v33, %v7393_v24  ;;  %v2017_v59 = vperm.slane %v7093_v5, %v10993_v40 }
 0x593   :  { %11039 = vst [vmem:[#allocation147_spill] sm:$0xff] %v7524_v57  ;;  %v1973_v57 = vsel %vm10490_vm5, %v11043_v13, %v1971_v12  ;;  %v11046_v12 = vld [vmem:[#allocation89_spill] sm:$0xff]  ;;  %v11047_v22 = vperm.slane %v11021_v14, %v7401_v4  ;;  %v11048_v13 = vld [vmem:[#allocation175_spill] sm:$0xff]  ;;  %v11050_v5 = vperm.slane %v11010_v55, %v7388_v3  ;;  %v2080_v33 = vperm.slane %v7311_v41, %v7351_v47 }
 0x594   :  { %v1948_v0 = vperm.slane %v11046_v12, %v7436_v20  ;;  %v1999_v15 = vperm.slane %v11048_v13, %v7365_v58  ;;  %v1975_v12 = vsel %vm10492_vm9, %v1974_v42, %v1973_v57  ;;  %v11051_v13 = vld [vmem:[#allocation46_spill] sm:$0xff]  ;;  %v2022_v42 = vperm.slane %v7113_v62, %v7368_v53  ;;  %v11055_v41 = vld [vmem:[#allocation203_spill] sm:$0xff] }
 0x595   :  { %v1996_v8 = vsel %vm10644_vm10, %v11047_v22, %v1994_v25  ;;  %v1946_v34 = vsel %vm1945_vm15, %v11050_v5, %v1942_v29  ;;  %v7589_v25 = vpop.xlane.xlu0 %1752  ;;  %v1977_v22 = vsel %vm10491_vm13, %v1976_v46, %v1975_v12  ;;  %v2020_v21 = vperm.slane %v11051_v13, %v7374_v50  ;;  %v11053_v5 = vld [vmem:[#allocation200_spill] sm:$0xff] }
 0x596   :  { %v1998_v55 = vsel %vm10643_vm12, %v1997_v28, %v1996_v8  ;;  %v11052_v29 = vperm.slane %v11027_v27, %v7351_v47  ;;  %v2049_v14 = vperm.slane %v11053_v5, %v7351_v47  ;;  %v7606_v46 = vsel %vm1949_vm11, %v1948_v0, %v1946_v34  ;;  %v11056_v28 = vld [vmem:[#allocation220_spill] sm:$0xff]  ;;  %v11059_v34 = vld [vmem:[#allocation233_spill] sm:$0xff] }
 0x597   :  { %11054 = vst [vmem:[#allocation158_spill] sm:$0xff] %v7606_v46  ;;  %v2000_v12 = vsel %vm10494_vm14, %v1999_v15, %v1998_v55  ;;  %v2051_v13 = vperm.slane %v11055_v41, %v7374_v50  ;;  %v2079_v8 = vperm.slane %v11056_v28, %v10993_v40  ;;  %v2110_v0 = vperm.slane %v11059_v34, %v10993_v40  ;;  %v11062_v41 = vld [vmem:[#allocation176_spill] sm:$0xff]  ;;  %v11064_v27 = vld [vmem:[#allocation109_spill] sm:$0xff] }
 0x598   :  { %v2019_v57 = vsel %vm1897_vm2, %v11052_v29, %v2017_v59  ;;  %v11058_v29 = vld [vmem:[#allocation100_spill] sm:$0xff]  ;;  %v11061_v15 = vperm.slane %v11060_v38, %v7414_v30  ;;  %v2003_v28 = vperm.slane %v11062_v41, %v7411_v19  ;;  %v11063_v62 = vperm.slane %v11024_v61, %v7424_v35  ;;  %v11071_v41 = vld [vmem:[#allocation237_spill] sm:$0xff] }
 0x599   :  { %v7578_v54 = vpop.xlane.xlu2 %1732  ;;  %v1980_v5 = vperm.slane %v11058_v29, %v7388_v3  ;;  %v2021_v46 = vsel %vm1901_vm4, %v2020_v21, %v2019_v57  ;;  %v2081_v59 = vsel %vm1897_vm2, %v2080_v33, %v2079_v8  ;;  %v2005_v34 = vperm.slane %v11064_v27, %v7371_v43  ;;  %v11067_v57 = vld [vmem:[#allocation223_spill] sm:$0xff] }
 0x59a   :  { %11049 = vst [vmem:[#allocation85_spill] sm:$0xff] %v7578_v54  ;;  %v1737_v63 = vpop.xlane.xlu1 %1736  ;;  %v1979_v55 = vsel %vm1941_vm3, %v11061_v15, %v1977_v22  ;;  %v2002_v29 = vsel %vm10493_vm0, %v11063_v62, %v2000_v12  ;;  %v2023_v54 = vsel %vm1905_vm6, %v2022_v42, %v2021_v46  ;;  %v11065_v38 = vperm.slane %v11033_v6, %v10993_v40  ;;  %v11066_v15 = vld [vmem:[#allocation52_spill] sm:$0xff]  ;;  %v11068_v12 = vld [vmem:[#allocation234_spill] sm:$0xff]  ;;  %v11070_v6 = vld [vmem:[#allocation225_spill] sm:$0xff] }
 0x59b   :  { %v2026_v21 = vperm.slane %v11066_v15, %v7401_v4  ;;  %v2084_v61 = vperm.slane %v11067_v57, %v7368_v53  ;;  %v2113_v8 = vperm.slane %v11068_v12, %v7374_v50  ;;  %v11069_v42 = vperm.slane %v7217_v32, %v7374_v50  ;;  %v11073_v57 = vld [vmem:[#allocation187_spill] sm:$0xff]  ;;  %v11074_v32 = vld [vmem:[#allocation204_spill] sm:$0xff] }
 0x59c   :  { %v2050_v22 = vsel %vm1897_vm2, %v2049_v14, %v11065_v38  ;;  %v2086_v14 = vperm.slane %v11070_v6, %v7362_v56  ;;  %v2112_v27 = vsel %vm1897_vm2, %v2111_v10, %v2110_v0  ;;  %v2028_v12 = vperm.slane %v11073_v57, %v7393_v24 }
 0x59d   :  { %v2052_v33 = vsel %vm1901_vm4, %v2051_v13, %v2050_v22  ;;  %v2083_v46 = vsel %vm1901_vm4, %v11069_v42, %v2081_v59  ;;  %v2115_v13 = vperm.slane %v11071_v41, %v7368_v53  ;;  %v11072_v22 = vperm.slane %v11029_v17, %v7362_v56  ;;  %v11076_v41 = vld [vmem:[#allocation207_spill] sm:$0xff] }
 0x59e   :  { %v2055_v59 = vperm.slane %v11074_v32, %v7362_v56  ;;  %v2142_v42 = vperm.slane %v1737_v63, %v7351_v47  ;;  %v1981_v6 = vsel %vm1945_vm15, %v1980_v5, %v1979_v55  ;;  %v11075_v10 = vperm.slane %v7099_v48, %v7368_v53 }
 0x59f   :  { %v2025_v15 = vsel %vm10645_vm8, %v11072_v22, %v2023_v54  ;;  %v2057_v17 = vperm.slane %v11076_v41, %v7401_v4  ;;  %v11077_v22 = vld [vmem:[#allocation101_spill] sm:$0xff]  ;;  %v2004_v45 = vsel %vm10490_vm5, %v2003_v28, %v2002_v29  ;;  %v2085_v32 = vsel %vm1905_vm6, %v2084_v61, %v2083_v46  ;;  %v11081_v61 = vld [vmem:[#allocation238_spill] sm:$0xff] }
 0x5a0   :  { %v2054_v0 = vsel %vm1905_vm6, %v11075_v10, %v2052_v33  ;;  %v1982_v57 = vperm.slane %v11077_v22, %v7436_v20  ;;  %v2114_v63 = vsel %vm1901_vm4, %v2113_v8, %v2112_v27  ;;  %v2006_v5 = vsel %vm10492_vm9, %v2005_v34, %v2004_v45  ;;  %v11080_v34 = vld [vmem:[#allocation226_spill] sm:$0xff] }
 0x5a1   :  { %v1739_v62 = vpop.xlane.xlu2 %1738  ;;  %v2027_v48 = vsel %vm10644_vm10, %v2026_v21, %v2025_v15  ;;  %v2087_v55 = vsel %vm10645_vm8, %v2086_v14, %v2085_v32  ;;  %v2116_v33 = vsel %vm1905_vm6, %v2115_v13, %v2114_v63  ;;  %v2056_v22 = vsel %vm10645_vm8, %v2055_v59, %v2054_v0  ;;  %v11083_v13 = vld [vmem:[#allocation227_spill] sm:$0xff]  ;;  %v11085_v59 = vld [vmem:[#allocation246_spill] sm:$0xff] }
 0x5a2   :  { %v1743_v38 = vpop.xlane.xlu1 %1742  ;;  %v2144_v54 = vperm.slane %v1739_v62, %v7374_v50  ;;  %v2029_v10 = vsel %vm10643_vm12, %v2028_v12, %v2027_v48  ;;  %v11078_v62 = vld [vmem:[#allocation188_spill] sm:$0xff]  ;;  %v11079_v28 = vperm.slane %v7379_v18, %v10993_v40  ;;  %v2058_v45 = vsel %vm10644_vm10, %v2057_v17, %v2056_v22  ;;  %v11088_v32 = vld [vmem:[#allocation191_spill] sm:$0xff]  ;;  %v11172_v50 = vld [vmem:[#allocation54_spill] sm:$0xff] }
 0x5a3   :  { %v2032_v41 = vperm.slane %v11078_v62, %v7424_v35  ;;  %v2090_v21 = vperm.slane %v11080_v34, %v7393_v24  ;;  %v2119_v8 = vperm.slane %v11081_v61, %v7401_v4  ;;  %v11082_v14 = vperm.slane %v7237_v51, %v7401_v4  ;;  %v11086_v17 = vld [vmem:[#allocation104_spill] sm:$0xff] }
 0x5a4   :  { %v2143_v29 = vsel %vm1897_vm2, %v2142_v42, %v11079_v28  ;;  %v2092_v18 = vperm.slane %v11083_v13, %v7365_v58  ;;  %v11084_v15 = vperm.slane %v7330_v7, %v7362_v56  ;;  %v2121_v42 = vperm.slane %v11085_v59, %v7393_v24  ;;  %v11089_v48 = vld [vmem:[#allocation208_spill] sm:$0xff]  ;;  %v11091_v28 = vld [vmem:[#allocation211_spill] sm:$0xff] }
 0x5a5   :  { %v2145_v46 = vsel %vm1901_vm4, %v2144_v54, %v2143_v29  ;;  %v2089_v27 = vsel %vm10644_vm10, %v11082_v14, %v2087_v55  ;;  %v11087_v54 = vperm.slane %v11086_v17, %v7365_v58  ;;  %v2034_v63 = vperm.slane %v11088_v32, %v7411_v19 }
 0x5a6   :  { %v2118_v12 = vsel %vm10645_vm8, %v11084_v15, %v2116_v33  ;;  %v2061_v55 = vperm.slane %v11089_v48, %v7365_v58  ;;  %v2148_v7 = vperm.slane %v1743_v38, %v7362_v56  ;;  %v11090_v33 = vperm.slane %v7128_v44, %v7393_v24  ;;  %v11093_v38 = vld [vmem:[#allocation110_spill] sm:$0xff]  ;;  %v11100_v48 = vld [vmem:[#allocation229_spill] sm:$0xff] }
 0x5a7   :  { %v2031_v51 = vsel %vm10494_vm14, %v11087_v54, %v2029_v10  ;;  %v2063_v29 = vperm.slane %v11091_v28, %v7424_v35  ;;  %v11092_v10 = vperm.slane %v7454_v16, %v7368_v53  ;;  %v1983_v14 = vsel %vm1949_vm11, %v1982_v57, %v1981_v6  ;;  %v11096_v6 = vld [vmem:[#allocation111_spill] sm:$0xff] }
 0x5a8   :  { %v2060_v22 = vsel %vm10643_vm12, %v11090_v33, %v2058_v45  ;;  %v2009_v13 = vperm.slane %v11093_v38, %v7414_v30  ;;  %v2091_v15 = vsel %vm10643_vm12, %v2090_v21, %v2089_v27  ;;  %v2120_v44 = vsel %vm10644_vm10, %v2119_v8, %v2118_v12  ;;  %v11094_v45 = vld [vmem:[#allocation37_spill] sm:$0xff]  ;;  %v11097_v12 = vld [vmem:[#allocation228_spill] sm:$0xff] }
 0x5a9   :  { %v1745_v0 = vpop.xlane.xlu2 %1744  ;;  %v2147_v34 = vsel %vm1905_vm6, %v11092_v10, %v2145_v46  ;;  %v11095_v59 = vperm.slane %v11094_v45, %v7433_v52  ;;  %v2033_v16 = vsel %vm10493_vm0, %v2032_v41, %v2031_v51  ;;  %v2093_v46 = vsel %vm10494_vm14, %v2092_v18, %v2091_v15  ;;  %v11098_v41 = vld [vmem:[#allocation248_spill] sm:$0xff] }
 0x5aa   :  { %v1749_v62 = vpop.xlane.xlu1 %1748  ;;  %v2150_v61 = vperm.slane %v1745_v0, %v7401_v4  ;;  %v2122_v0 = vsel %vm10643_vm12, %v2121_v42, %v2120_v44  ;;  %v2011_v57 = vperm.slane %v11096_v6, %v7388_v3  ;;  %v2035_v54 = vsel %vm10490_vm5, %v2034_v63, %v2033_v16  ;;  %v7751_v42 = vpop.xlane.xlu0 %1758  ;;  %v11170_v4 = vld [vmem:[#allocation50_spill] sm:$0xff] }
 0x5ab   :  { %v2008_v17 = vsel %vm10491_vm13, %v11095_v59, %v2006_v5  ;;  %v2062_v21 = vsel %vm10494_vm14, %v2061_v55, %v2060_v22  ;;  %v2149_v8 = vsel %vm10645_vm8, %v2148_v7, %v2147_v34  ;;  %v2096_v5 = vperm.slane %v11097_v12, %v7411_v19  ;;  %v11102_v22 = vld [vmem:[#allocation141_spill] sm:$0xff]  ;;  %v11107_v59 = vld [vmem:[#allocation215_spill] sm:$0xff] }
 0x5ac   :  { %v2064_v27 = vsel %vm10493_vm0, %v2063_v29, %v2062_v21  ;;  %v2125_v51 = vperm.slane %v11098_v41, %v7424_v35  ;;  %v2151_v18 = vsel %vm10644_vm10, %v2150_v61, %v2149_v8  ;;  %v11099_v32 = vperm.slane %v7266_v26, %v7424_v35  ;;  %v11104_v26 = vld [vmem:[#allocation192_spill] sm:$0xff] }
 0x5ad   :  { %v2098_v55 = vperm.slane %v11100_v48, %v7371_v43  ;;  %v11101_v7 = vperm.slane %v7336_v23, %v7365_v58  ;;  %v2127_v28 = vperm.slane %v11102_v22, %v7411_v19  ;;  %v11103_v29 = vperm.slane %v7030_v11, %v7371_v43  ;;  %v11105_v61 = vld [vmem:[#allocation212_spill] sm:$0xff]  ;;  %v11115_v22 = vld [vmem:[#allocation231_spill] sm:$0xff] }
 0x5ae   :  { %v2095_v63 = vsel %vm10493_vm0, %v11099_v32, %v2093_v46  ;;  %v2038_v34 = vperm.slane %v11104_v26, %v7433_v52  ;;  %v2067_v38 = vperm.slane %v11105_v61, %v7371_v43  ;;  %v2154_v15 = vperm.slane %v1749_v62, %v7365_v58 }
 0x5af   :  { %v2124_v33 = vsel %vm10494_vm14, %v11101_v7, %v2122_v0  ;;  %v2037_v10 = vsel %vm10492_vm9, %v11103_v29, %v2035_v54  ;;  %v11106_v23 = vperm.slane %v7149_v2, %v7411_v19  ;;  %v2069_v16 = vperm.slane %v11107_v59, %v7433_v52  ;;  %v11109_v54 = vld [vmem:[#allocation80_spill] sm:$0xff] }
 0x5b0   :  { %v11108_v11 = vperm.slane %v7526_v31, %v7393_v24  ;;  %v2164_v62 = vperm.slane %v7751_v42, %v7414_v30  ;;  %v11110_v21 = vperm.slane %v11109_v54, %v7417_v39  ;;  %v2097_v8 = vsel %vm10490_vm5, %v2096_v5, %v2095_v63  ;;  %v11111_v31 = vld [vmem:[#allocation195_spill] sm:$0xff] }
 0x5b1   :  { %v1751_v44 = vpop.xlane.xlu2 %1750  ;;  %v2066_v45 = vsel %vm10490_vm5, %v11106_v23, %v2064_v27  ;;  %v2126_v27 = vsel %vm10493_vm0, %v2125_v51, %v2124_v33  ;;  %v2010_v12 = vsel %vm1941_vm3, %v2009_v13, %v2008_v17  ;;  %v2040_v41 = vperm.slane %v11111_v31, %v7414_v30  ;;  %v11112_v13 = vld [vmem:[#allocation230_spill] sm:$0xff]  ;;  %v11113_v63 = vld [vmem:[#allocation71_spill] sm:$0xff]  ;;  %v11119_v23 = vld [vmem:[#allocation161_spill] sm:$0xff] }
 0x5b2   :  { %v2153_v46 = vsel %vm10643_vm12, %v11108_v11, %v2151_v18  ;;  %v2156_v0 = vperm.slane %v1751_v44, %v7424_v35  ;;  %v1755_v6 = vpop.xlane.xlu1 %1754  ;;  %v1985_v2 = vsel %vm1953_vm1, %v11110_v21, %v1983_v14  ;;  %v2099_v18 = vsel %vm10492_vm9, %v2098_v55, %v2097_v8 }
 0x5b3   :  { %v2128_v32 = vsel %vm10490_vm5, %v2127_v28, %v2126_v27  ;;  %v2012_v42 = vsel %vm1945_vm15, %v2011_v57, %v2010_v12  ;;  %v2039_v48 = vsel %vm10491_vm13, %v2038_v34, %v2037_v10  ;;  %v2068_v14 = vsel %vm10492_vm9, %v2067_v38, %v2066_v45  ;;  %v11117_v34 = vld [vmem:[#allocation113_spill] sm:$0xff] }
 0x5b4   :  { %v2155_v5 = vsel %vm10494_vm14, %v2154_v15, %v2153_v46  ;;  %v2070_v51 = vsel %vm10491_vm13, %v2069_v16, %v2068_v14  ;;  %v2102_v17 = vperm.slane %v11112_v13, %v7414_v30  ;;  %v2131_v7 = vperm.slane %v11113_v63, %v7433_v52  ;;  %v11122_v16 = vld [vmem:[#allocation219_spill] sm:$0xff] }
 0x5b5   :  { %v2157_v55 = vsel %vm10493_vm0, %v2156_v0, %v2155_v5  ;;  %v11114_v57 = vperm.slane %v7286_v36, %v7433_v52  ;;  %v2104_v28 = vperm.slane %v11115_v22, %v7388_v3  ;;  %v11116_v29 = vperm.slane %v7342_v1, %v7371_v43  ;;  %v11118_v36 = vld [vmem:[#allocation216_spill] sm:$0xff]  ;;  %v11130_v22 = vld [vmem:[#allocation235_spill] sm:$0xff] }
 0x5b6   :  { %v2133_v26 = vperm.slane %v7515_v9, %v7414_v30  ;;  %v2015_v61 = vperm.slane %v11117_v34, %v7417_v39  ;;  %v2041_v38 = vsel %vm1941_vm3, %v2040_v41, %v2039_v48  ;;  %v2073_v15 = vperm.slane %v11118_v36, %v7388_v3  ;;  %v11126_v41 = vld [vmem:[#allocation199_spill] sm:$0xff]  ;;  %v11133_v34 = vld [vmem:[#allocation158_spill] sm:$0xff] }
 0x5b7   :  { %v2101_v33 = vsel %vm10491_vm13, %v11114_v57, %v2099_v18  ;;  %v2130_v10 = vsel %vm10492_vm9, %v11116_v29, %v2128_v32  ;;  %v2160_v44 = vperm.slane %v1755_v6, %v7371_v43  ;;  %v11120_v45 = vperm.slane %v11119_v23, %v7436_v20  ;;  %v11124_v6 = vld [vmem:[#allocation196_spill] sm:$0xff]  ;;  %v11167_v43 = vld [vmem:[#allocation47_spill] sm:$0xff] }
 0x5b8   :  { %v11121_v59 = vperm.slane %v7169_v37, %v7414_v30  ;;  %v2075_v11 = vperm.slane %v11122_v16, %v7436_v20  ;;  %v11123_v46 = vperm.slane %v7589_v25, %v7411_v19  ;;  %v2044_v21 = vperm.slane %v11124_v6, %v7436_v20 }
 0x5b9   :  { %v2014_v1 = vsel %vm1949_vm11, %v11120_v45, %v2012_v42  ;;  %v1757_v54 = vpop.xlane.xlu2 %1756  ;;  %v2103_v8 = vsel %vm1941_vm3, %v2102_v17, %v2101_v33  ;;  %v2132_v27 = vsel %vm10491_vm13, %v2131_v7, %v2130_v10  ;;  %v11125_v12 = vperm.slane %v7053_v60, %v7388_v3  ;;  %v11127_v60 = vld [vmem:[#allocation232_spill] sm:$0xff]  ;;  %v11128_v17 = vld [vmem:[#allocation147_spill] sm:$0xff]  ;;  %v11132_v10 = vld [vmem:[#allocation85_spill] sm:$0xff] }
 0x5ba   :  { %v2072_v9 = vsel %vm1941_vm3, %v11121_v59, %v2070_v51  ;;  %v2159_v0 = vsel %vm10490_vm5, %v11123_v46, %v2157_v55  ;;  %v2162_v37 = vperm.slane %v1757_v54, %v7433_v52  ;;  %v2046_v25 = vperm.slane %v11126_v41, %v7417_v39  ;;  %v1761_v5 = vpop.xlane.xlu1 %1760  ;;  %v11136_v45 = vld [vmem:[#allocation66_spill] sm:$0xff]  ;;  %v11163_v52 = vld [vmem:[#allocation43_spill] sm:$0xff] }
 0x5bb   :  { %v2043_v31 = vsel %vm1945_vm15, %v11125_v12, %v2041_v38  ;;  %v2105_v18 = vsel %vm1945_vm15, %v2104_v28, %v2103_v8  ;;  %v2134_v32 = vsel %vm1941_vm3, %v2133_v26, %v2132_v27  ;;  %vm10495_vm5 = vcmask 1042434  }
 0x5bc   :  { %v2016_v42 = vsel %vm1953_vm1, %v2015_v61, %v2014_v1  ;;  %v2074_v48 = vsel %vm1945_vm15, %v2073_v15, %v2072_v9  ;;  %v2161_v14 = vsel %vm10492_vm9, %v2160_v44, %v2159_v0  ;;  %v2108_v13 = vperm.slane %v11127_v60, %v7417_v39  ;;  %v11134_v61 = vld [vmem:[#allocation88_spill] sm:$0xff]  ;;  %v1765_v44 = vpop.xlane.xlu0 %1764 }
 0x5bd   :  { %v2076_v51 = vsel %vm1949_vm11, %v2075_v11, %v2074_v48  ;;  %v2137_v63 = vperm.slane %v11128_v17, %v7436_v20  ;;  %v2163_v7 = vsel %vm10491_vm13, %v2162_v37, %v2161_v14  ;;  %v2045_v55 = vsel %vm1949_vm11, %v2044_v21, %v2043_v31  ;;  %v11141_v48 = vld [vmem:[#allocation23_spill] sm:$0xff]  ;;  %v11142_v14 = vld [vmem:[#allocation30_spill] sm:$0xff]  ;;  %v11145_v60 = vld [vmem:[#allocation24_spill] sm:$0xff] }
 0x5be   :  { %v11129_v57 = vperm.slane %v7306_v49, %v7436_v20  ;;  %v11131_v28 = vperm.slane %v11130_v22, %v7388_v3  ;;  %v2139_v26 = vperm.slane %v11132_v10, %v7417_v39  ;;  %v11135_v38 = vperm.slane %v11134_v61, %v7417_v39  ;;  %v11151_v22 = vld [vmem:[#allocation31_spill] sm:$0xff]  ;;  %v11153_v10 = vld [vmem:[#allocation33_spill] sm:$0xff]  ;;  %v11155_v61 = vld [vmem:[#allocation32_spill] sm:$0xff] }
 0x5bf   :  { %vm2176_vm13 = vcmask 1043459   ;;  %v2047_v15 = vsel %vm1953_vm1, %v2046_v25, %v2045_v55  ;;  %v2166_v49 = vperm.slane %v1761_v5, %v7388_v3  ;;  %v11137_v1 = vperm.slane %v11136_v45, %v7417_v39  ;;  %v11143_v5 = vld [vmem:[#allocation22_spill] sm:$0xff] }
 0x5c0   :  { %v2107_v33 = vsel %vm1949_vm11, %v11129_v57, %v2105_v18  ;;  %v2136_v29 = vsel %vm1945_vm15, %v11131_v28, %v2134_v32  ;;  %v1954_v36 = vsel %vm1953_vm1, %v11135_v38, %v11133_v34  ;;  %vm2178_vm9 = vcmask 1044484   ;;  %v11139_v32 = vld [vmem:[#allocation26_spill] sm:$0xff]  ;;  %v11150_v57 = vld [vmem:[#allocation29_spill] sm:$0xff]  ;;  %v11154_v34 = vld [vmem:[#allocation28_spill] sm:$0xff] }
 0x5c1   :  { %v2173_v23 = vsel %vm2172_vm7, %v1985_v2, %v1954_v36  ;;  %v2078_v59 = vsel %vm1953_vm1, %v11137_v1, %v2076_v51  ;;  %v2165_v9 = vsel %vm1941_vm3, %v2164_v62, %v2163_v7  ;;  %vm10642_vm0 = vcmask 1045509   ;;  %v1763_v0 = vpop.xlane.xlu2 %1762  ;;  %v11144_v51 = vld [vmem:[#allocation19_spill] sm:$0xff]  ;;  %v11149_v55 = vld [vmem:[#allocation34_spill] sm:$0xff] }
 0x5c2   :  { %v2175_v16 = vsel %vm10495_vm5, %v2016_v42, %v2173_v23  ;;  %v2109_v11 = vsel %vm1953_vm1, %v2108_v13, %v2107_v33  ;;  %v2138_v46 = vsel %vm1949_vm11, %v2137_v63, %v2136_v29  ;;  %vm10641_vm14 = vcmask 1046534   ;;  %v11140_v42 = vld [vmem:[#allocation20_spill] sm:$0xff]  ;;  %v11146_v13 = vld [vmem:[#allocation25_spill] sm:$0xff]  ;;  %v11147_v63 = vld [vmem:[#allocation27_spill] sm:$0xff] }
 0x5c3   :  { %v2177_v54 = vsel %vm2176_vm13, %v2047_v15, %v2175_v16  ;;  %v2140_v2 = vsel %vm1953_vm1, %v2139_v26, %v2138_v46  ;;  %v2168_v6 = vperm.slane %v1763_v0, %v7436_v20  ;;  %v2170_v21 = vperm.slane %v1765_v44, %v7417_v39  ;;  %v11152_v29 = vld [vmem:[#allocation21_spill] sm:$0xff] }
 0x5c4   :  { %v2179_v8 = vsel %vm2178_vm9, %v2078_v59, %v2177_v54  ;;  %v2167_v62 = vsel %vm1945_vm15, %v2166_v49, %v2165_v9  ;;  %vm10640_vm5 = vcmask 1047559  }
 0x5c5   :  { %v2181_v27 = vsel %vm10642_vm0, %v2109_v11, %v2179_v8  ;;  %v2169_v37 = vsel %vm1949_vm11, %v2168_v6, %v2167_v62 }
 0x5c6   :  { %v2183_v12 = vsel %vm10641_vm14, %v2140_v2, %v2181_v27  ;;  %v2171_v31 = vsel %vm1953_vm1, %v2170_v21, %v2169_v37  ;;  %vm11594_vm14 = vcmask 589312  }
 0x5c7   :  { %v7900_v41 = vsel %vm10640_vm5, %v2171_v31, %v2183_v12  ;;  %v11162_v31 = vld [vmem:[#allocation125_spill] sm:$0xff]  ;;  %vm11591_vm5 = vcmask 523712  }
 0x5c8   :  { %11138 = vst [vmem:[#allocation91_spill] sm:$0xff] %v7900_v41  ;;  %v7903_v25 = vperm.slane %v7900_v41, 0  ;;  %v7906_v18 = vperm.slane %v7900_v41, 3  ;;  %v7927_v17 = vperm.slane %v7900_v41, 4  ;;  %v2288_v28 = vperm.slane %v7900_v41, 1 }
 0x5c9   :  { %v7956_v26 = vperm.slane %v7900_v41, 5  ;;  %v7975_v38 = vperm.slane %v7900_v41, 6  ;;  %v2385_v36 = vperm.slane %v7900_v41, 2  ;;  %v7998_v49 = vperm.slane %v7900_v41, 7 }
 0x5ca   :  { %2493 = vperm.xlu0 %5061, %v7906_v18   ;;  %2202 = vperm.xlu2 %5067, %v7903_v25  }
 0x5cb   :  { %2196 = vperm.xlu1 %5066, %v7903_v25  }
 0x5d2   :  { %5110 = vset.pattern.permute.xlu0 %v11139_v32  ;;  %5069 = vset.pattern.permute.xlu2 %v11140_v42 }
 0x5d3   :  { %5068 = vset.pattern.permute.xlu1 %v11141_v48 }
 0x5da   :  { %2523 = vperm.xlu0 %5110, %v7906_v18   ;;  %2220 = vperm.xlu2 %5069, %v7903_v25  }
 0x5db   :  { %2214 = vperm.xlu1 %5068, %v7903_v25  }
 0x5e2   :  { %5115 = vset.pattern.permute.xlu0 %v11142_v14  ;;  %5071 = vset.pattern.permute.xlu2 %v11139_v32 }
 0x5e3   :  { %5070 = vset.pattern.permute.xlu1 %v11143_v5 }
 0x5ea   :  { %2553 = vperm.xlu0 %5115, %v7906_v18   ;;  %2232 = vperm.xlu2 %5071, %v7903_v25  }
 0x5eb   :  { %2226 = vperm.xlu1 %5070, %v7903_v25  }
 0x5f2   :  { %5120 = vset.pattern.permute.xlu0 %v11144_v51  ;;  %5073 = vset.pattern.permute.xlu2 %v11145_v60 }
 0x5f3   :  { %5072 = vset.pattern.permute.xlu1 %v11146_v13 }
 0x5fa   :  { %2584 = vperm.xlu0 %5120, %v7927_v17   ;;  %2244 = vperm.xlu2 %5073, %v7903_v25  }
 0x5fb   :  { %2238 = vperm.xlu1 %5072, %v7903_v25  }
 0x602   :  { %5125 = vset.pattern.permute.xlu0 %v11143_v5  ;;  %5075 = vset.pattern.permute.xlu2 %v11142_v14 }
 0x603   :  { %5074 = vset.pattern.permute.xlu1 %v11147_v63 }
 0x609   :  { %v7938_v7 = vpop.f32.mrf.mxu2 }
 0x60a   :  { %2614 = vperm.xlu0 %5125, %v7927_v17   ;;  %2262 = vperm.xlu2 %5075, %v7903_v25   ;;  %11148 = vst [vmem:[#allocation99_spill] sm:$0xff] %v7938_v7 }
 0x60b   :  { %2256 = vperm.xlu1 %5074, %v7903_v25  }
 0x611   :  { %v346_v33 = vpop.f32.mrf.mxu2 }
 0x612   :  { %5130 = vset.pattern.permute.xlu0 %v11147_v63  ;;  %5077 = vset.pattern.permute.xlu2 %v11149_v55 }
 0x613   :  { %5076 = vset.pattern.permute.xlu1 %v11150_v57 }
 0x61a   :  { %2644 = vperm.xlu0 %5130, %v7927_v17   ;;  %2274 = vperm.xlu2 %5077, %v7903_v25  }
 0x61b   :  { %2268 = vperm.xlu1 %5076, %v7903_v25  }
 0x622   :  { %5135 = vset.pattern.permute.xlu0 %v11151_v22  ;;  %5079 = vset.pattern.permute.xlu2 %v11144_v51 }
 0x623   :  { %5078 = vset.pattern.permute.xlu1 %v11151_v22 }
 0x624   :  { %v2203_v9 = vpop.permute.xlu2 %2202 }
 0x62a   :  { %2674 = vperm.xlu0 %5135, %v7927_v17   ;;  %2293 = vperm.xlu2 %5079, %v2288_v28  }
 0x62b   :  { %2286 = vperm.xlu1 %5078, %v7903_v25  }
 0x632   :  { %5140 = vset.pattern.permute.xlu0 %v11140_v42  ;;  %5081 = vset.pattern.permute.xlu2 %v11152_v29 }
 0x633   :  { %5080 = vset.pattern.permute.xlu1 %v11153_v10 }
 0x634   :  { %v2221_v46 = vpop.permute.xlu2 %2220 }
 0x635   :  { %v2971_v35 = vsub.f32 %v11163_v52, %v2221_v46 }
 0x637   :  { %v3103_v39 = vmul.f32 1.442695, %v2971_v35 }
 0x63a   :  { %2705 = vperm.xlu0 %5140, %v7956_v26   ;;  %2305 = vperm.xlu2 %5081, %v2288_v28  }
 0x63b   :  { %2299 = vperm.xlu1 %5080, %v2288_v28  }
 0x63c   :  { %v7995_v15 = vpop.permute.xlu0 %2493 }
 0x63d   :  { %v8020_v16 = vpop.permute.xlu1 %2196 }
 0x642   :  { %5141 = vset.pattern.permute.xlu0 %v11154_v34  ;;  %5083 = vset.pattern.permute.xlu2 %v11143_v5 }
 0x643   :  { %5082 = vset.pattern.permute.xlu1 %v11140_v42 }
 0x644   :  { %v8032_v2 = vpop.permute.xlu2 %2232 }
 0x64a   :  { %2250 = vperm.xlu0 %5141, %v7903_v25   ;;  %2323 = vperm.xlu2 %5083, %v2288_v28  }
 0x64b   :  { %2317 = vperm.xlu1 %5082, %v2288_v28  }
 0x64c   :  { %v8003_v44 = vpop.permute.xlu0 %2523 }
 0x64d   :  { %11156 = vst [vmem:[#allocation167_spill] sm:$0xff] %v8003_v44  ;;  %v8025_v0 = vpop.permute.xlu1 %2214 }
 0x652   :  { %2735 = vperm.xlu0 %5141, %v7956_v26   ;;  %5085 = vset.pattern.permute.xlu2 %v11146_v13 }
 0x653   :  { %5084 = vset.pattern.permute.xlu1 %v11139_v32 }
 0x654   :  { %v8041_v8 = vpop.permute.xlu2 %2244 }
 0x65a   :  { %5146 = vset.pattern.permute.xlu0 %v11155_v61  ;;  %2335 = vperm.xlu2 %5085, %v2288_v28  }
 0x65b   :  { %2329 = vperm.xlu1 %5084, %v2288_v28  }
 0x65c   :  { %v8006_v23 = vpop.permute.xlu0 %2553 }
 0x65d   :  { %11157 = vst [vmem:[#allocation82_spill] sm:$0xff] %v8006_v23  ;;  %v8034_v6 = vpop.permute.xlu1 %2226 }
 0x662   :  { %2280 = vperm.xlu0 %5146, %v7903_v25   ;;  %5087 = vset.pattern.permute.xlu2 %v11147_v63 }
 0x663   :  { %5086 = vset.pattern.permute.xlu1 %v11154_v34 }
 0x664   :  { %v8047_v37 = vpop.permute.xlu2 %2262 }
 0x66a   :  { %2765 = vperm.xlu0 %5146, %v7956_v26   ;;  %2353 = vperm.xlu2 %5087, %v2288_v28  }
 0x66b   :  { %2347 = vperm.xlu1 %5086, %v2288_v28  }
 0x66c   :  { %v8010_v45 = vpop.permute.xlu0 %2584 }
 0x66d   :  { %v2239_v62 = vpop.permute.xlu1 %2238 }
 0x672   :  { %5151 = vset.pattern.permute.xlu0 %v11141_v48  ;;  %5089 = vset.pattern.permute.xlu2 %v11150_v57 }
 0x673   :  { %5088 = vset.pattern.permute.xlu1 %v11142_v14 }
 0x67a   :  { %2311 = vperm.xlu0 %5151, %v2288_v28   ;;  %2365 = vperm.xlu2 %5089, %v2288_v28  }
 0x67b   :  { %2359 = vperm.xlu1 %5088, %v2288_v28  }
 0x67c   :  { %v8013_v1 = vpop.permute.xlu0 %2614 }
 0x67d   :  { %11158 = vst [vmem:[#allocation148_spill] sm:$0xff] %v8013_v1  ;;  %v2257_v12 = vpop.permute.xlu1 %2256  ;;  %v11186_v1 = vld [vmem:[#allocation72_spill] sm:$0xff] }
 0x67e   :  { %v2977_v58 = vsub.f32 %v11167_v43, %v2257_v12 }
 0x682   :  { %2796 = vperm.xlu0 %5151, %v7975_v38   ;;  %5091 = vset.pattern.permute.xlu2 %v11151_v22 }
 0x683   :  { %5090 = vset.pattern.permute.xlu1 %v11155_v61 }
 0x68a   :  { %5156 = vset.pattern.permute.xlu0 %v11145_v60  ;;  %2383 = vperm.xlu2 %5091, %v2288_v28  }
 0x68b   :  { %2377 = vperm.xlu1 %5090, %v2288_v28  }
 0x68c   :  { %v8018_v59 = vpop.permute.xlu0 %2644 }
 0x68d   :  { %11159 = vst [vmem:[#allocation103_spill] sm:$0xff] %v8018_v59  ;;  %v8054_v20 = vpop.permute.xlu1 %2268 }
 0x692   :  { %2341 = vperm.xlu0 %5156, %v2288_v28   ;;  %5093 = vset.pattern.permute.xlu2 %v11153_v10 }
 0x693   :  { %5092 = vset.pattern.permute.xlu1 %v11144_v51 }
 0x69a   :  { %2826 = vperm.xlu0 %5156, %v7975_v38   ;;  %2396 = vperm.xlu2 %5093, %v2385_v36  }
 0x69b   :  { %2390 = vperm.xlu1 %5092, %v2385_v36  }
 0x69c   :  { %v8023_v11 = vpop.permute.xlu0 %2674 }
 0x69d   :  { %v8059_v19 = vpop.permute.xlu1 %2286 }
 0x6a2   :  { %5161 = vset.pattern.permute.xlu0 %v11149_v55  ;;  %5095 = vset.pattern.permute.xlu2 %v11140_v42 }
 0x6a3   :  { %5094 = vset.pattern.permute.xlu1 %v11141_v48 }
 0x6aa   :  { %2371 = vperm.xlu0 %5161, %v2288_v28   ;;  %2414 = vperm.xlu2 %5095, %v2385_v36  }
 0x6ab   :  { %2408 = vperm.xlu1 %5094, %v2385_v36  }
 0x6ac   :  { %v8030_v54 = vpop.permute.xlu0 %2705 }
 0x6ad   :  { %11160 = vst [vmem:[#allocation181_spill] sm:$0xff] %v8030_v54  ;;  %v8071_v35 = vpop.permute.xlu1 %2299 }
 0x6b2   :  { %2856 = vperm.xlu0 %5161, %v7975_v38   ;;  %5097 = vset.pattern.permute.xlu2 %v11139_v32 }
 0x6b3   :  { %5096 = vset.pattern.permute.xlu1 %v11143_v5 }
 0x6ba   :  { %5166 = vset.pattern.permute.xlu0 %v11152_v29  ;;  %2426 = vperm.xlu2 %5097, %v2385_v36  }
 0x6bb   :  { %2420 = vperm.xlu1 %5096, %v2385_v36  }
 0x6bc   :  { %v8039_v21 = vpop.permute.xlu0 %2250 }
 0x6c2   :  { %2208 = vperm.xlu0 %5166, %v7903_v25   ;;  %5099 = vset.pattern.permute.xlu2 %v11154_v34  ;;  %v2968_v25 = vsub.f32 %v11162_v31, %v2203_v9  ;;  %v11165_v31 = vld [vmem:[#allocation45_spill] sm:$0xff] }
 0x6c3   :  { %5098 = vset.pattern.permute.xlu1 %v11145_v60 }
 0x6c4   :  { %v8045_v27 = vpop.permute.xlu0 %2735  ;;  %v3097_v28 = vmul.f32 1.442695, %v2968_v25  ;;  %v2974_v25 = vsub.f32 %v11165_v31, %v2239_v62  ;;  %v8081_v62 = vpop.permute.xlu1 %2317 }
 0x6c5   :  { %11161 = vst [vmem:[#allocation38_spill] sm:$0xff] %v8045_v27 }
 0x6c6   :  { %5188 = vpow2.f32 %v3097_v28  ;;  %v3109_v28 = vmul.f32 1.442695, %v2974_v25 }
 0x6c7   :  { %5190 = vpow2.f32 %v3103_v39  ;;  %v3115_v39 = vmul.f32 1.442695, %v2977_v58 }
 0x6c8   :  { %5192 = vpow2.f32 %v3109_v28 }
 0x6c9   :  { %5194 = vpow2.f32 %v3115_v39  ;;  %v11174_v39 = vld [vmem:[#allocation58_spill] sm:$0xff] }
 0x6ca   :  { %2402 = vperm.xlu0 %5166, %v2385_v36   ;;  %2444 = vperm.xlu2 %5099, %v2385_v36  }
 0x6cb   :  { %2438 = vperm.xlu1 %5098, %v2385_v36  }
 0x6cc   :  { %v8064_v9 = vpop.eup %5188 }
 0x6cd   :  { %11164 = vst [vmem:[#allocation96_spill] sm:$0xff] %v8064_v9  ;;  %v8074_v46 = vpop.eup %5190  ;;  %v2330_v58 = vpop.permute.xlu1 %2329 }
 0x6ce   :  { %11166 = vst [vmem:[#allocation39_spill] sm:$0xff] %v8074_v46  ;;  %v8084_v31 = vpop.eup %5192 }
 0x6cf   :  { %11168 = vst [vmem:[#allocation86_spill] sm:$0xff] %v8084_v31  ;;  %v8094_v12 = vpop.eup %5194 }
 0x6d0   :  { %11171 = vst [vmem:[#allocation151_spill] sm:$0xff] %v8094_v12 }
 0x6d2   :  { %2887 = vperm.xlu0 %5166, %v7998_v49   ;;  %5101 = vset.pattern.permute.xlu2 %v11142_v14 }
 0x6d3   :  { %5100 = vset.pattern.permute.xlu1 %v11147_v63 }
 0x6d4   :  { %v8052_v33 = vpop.permute.xlu0 %2280 }
 0x6da   :  { %5171 = vset.pattern.permute.xlu0 %v11146_v13  ;;  %2456 = vperm.xlu2 %5101, %v2385_v36  }
 0x6db   :  { %2450 = vperm.xlu1 %5100, %v2385_v36  }
 0x6dc   :  { %v8061_v24 = vpop.permute.xlu0 %2765 }
 0x6e2   :  { %2432 = vperm.xlu0 %5171, %v2385_v36   ;;  %5103 = vset.pattern.permute.xlu2 %v11155_v61 }
 0x6e3   :  { %5102 = vset.pattern.permute.xlu1 %v11149_v55 }
 0x6ea   :  { %2917 = vperm.xlu0 %5171, %v7998_v49   ;;  %2474 = vperm.xlu2 %5103, %v2385_v36  }
 0x6eb   :  { %2468 = vperm.xlu1 %5102, %v2385_v36  }
 0x6ec   :  { %v2312_v52 = vpop.permute.xlu0 %2311 }
 0x6f2   :  { %5176 = vset.pattern.permute.xlu0 %v11150_v57  ;;  %5105 = vset.pattern.permute.xlu2 %v11144_v51 }
 0x6f3   :  { %5104 = vset.pattern.permute.xlu1 %v11151_v22 }
 0x6f4   :  { %v8087_v25 = vpop.permute.xlu0 %2796 }
 0x6f5   :  { %11169 = vst [vmem:[#allocation172_spill] sm:$0xff] %v8087_v25 }
 0x6fa   :  { %2462 = vperm.xlu0 %5176, %v2385_v36   ;;  %2487 = vperm.xlu2 %5105, %v7906_v18  }
 0x6fb   :  { %2480 = vperm.xlu1 %5104, %v2385_v36   ;;  %v2275_v36 = vpop.permute.xlu2 %2274 }
 0x6fc   :  { %v2980_v53 = vsub.f32 %v11170_v4, %v2275_v36 }
 0x6fe   :  { %v3121_v28 = vmul.f32 1.442695, %v2980_v53  ;;  %v2348_v53 = vpop.permute.xlu1 %2347 }
 0x700   :  { %5196 = vpow2.f32 %v3121_v28 }
 0x702   :  { %2947 = vperm.xlu0 %5176, %v7998_v49   ;;  %5107 = vset.pattern.permute.xlu2 %v11141_v48 }
 0x703   :  { %5106 = vset.pattern.permute.xlu1 %v11152_v29  ;;  %v2294_v30 = vpop.permute.xlu2 %2293 }
 0x704   :  { %v8097_v47 = vpop.permute.xlu0 %2341  ;;  %v2983_v40 = vsub.f32 %v11172_v50, %v2294_v30  ;;  %v11177_v30 = vld [vmem:[#allocation61_spill] sm:$0xff] }
 0x706   :  { %v3127_v41 = vmul.f32 1.442695, %v2983_v40  ;;  %v8104_v36 = vpop.eup %5196  ;;  %v8111_v50 = vpop.permute.xlu1 %2359 }
 0x707   :  { %11173 = vst [vmem:[#allocation98_spill] sm:$0xff] %v8104_v36 }
 0x708   :  { %5198 = vpow2.f32 %v3127_v41 }
 0x70a   :  { %2505 = vperm.xlu2 %5107, %v7906_v18   ;;  %5184 = vset.pattern.permute.xlu0 %v11151_v22 }
 0x70b   :  { %2499 = vperm.xlu1 %5106, %v7906_v18   ;;  %v8069_v3 = vpop.permute.xlu2 %2305 }
 0x70e   :  { %v8114_v40 = vpop.eup %5198 }
 0x70f   :  { %11176 = vst [vmem:[#allocation41_spill] sm:$0xff] %v8114_v40 }
 0x712   :  { %5109 = vset.pattern.permute.xlu2 %v11143_v5 }
 0x713   :  { %5108 = vset.pattern.permute.xlu1 %v11140_v42  ;;  %v8079_v56 = vpop.permute.xlu2 %2323 }
 0x71a   :  { %2517 = vperm.xlu2 %5109, %v7906_v18  }
 0x71b   :  { %2511 = vperm.xlu1 %5108, %v7906_v18   ;;  %v8091_v43 = vpop.permute.xlu2 %2335 }
 0x722   :  { %5112 = vset.pattern.permute.xlu2 %v11145_v60 }
 0x723   :  { %5111 = vset.pattern.permute.xlu1 %v11146_v13  ;;  %v8101_v4 = vpop.permute.xlu2 %2353 }
 0x72a   :  { %2535 = vperm.xlu2 %5112, %v7906_v18  }
 0x72b   :  { %2529 = vperm.xlu1 %5111, %v7906_v18   ;;  %v2366_v28 = vpop.permute.xlu2 %2365 }
 0x72c   :  { %3355 = vadd.xlane.f32.xlu0 %v8064_v9  ;;  %v2989_v9 = vsub.f32 %v11177_v30, %v2330_v58 }
 0x732   :  { %5114 = vset.pattern.permute.xlu2 %v11147_v63 }
 0x733   :  { %5113 = vset.pattern.permute.xlu1 %v11154_v34 }
 0x734   :  { %3361 = vadd.xlane.f32.xlu0 %v8074_v46  ;;  %v8109_v46 = vpop.permute.xlu0 %2826 }
 0x735   :  { %11175 = vst [vmem:[#allocation164_spill] sm:$0xff] %v8109_v46  ;;  %v11179_v46 = vld [vmem:[#allocation63_spill] sm:$0xff] }
 0x73a   :  { %2547 = vperm.xlu2 %5114, %v7906_v18  }
 0x73b   :  { %2541 = vperm.xlu1 %5113, %v7906_v18  }
 0x73c   :  { %3367 = vadd.xlane.f32.xlu0 %v8084_v31  ;;  %v2986_v31 = vsub.f32 %v11174_v39, %v2312_v52  ;;  %v8119_v41 = vpop.permute.xlu0 %2371  ;;  %v3139_v52 = vmul.f32 1.442695, %v2989_v9  ;;  %v2384_v39 = vpop.permute.xlu2 %2383 }
 0x742   :  { %5117 = vset.pattern.permute.xlu2 %v11149_v55 }
 0x743   :  { %5116 = vset.pattern.permute.xlu1 %v11150_v57 }
 0x744   :  { %3373 = vadd.xlane.f32.xlu0 %v8094_v12  ;;  %v3133_v12 = vmul.f32 1.442695, %v2986_v31  ;;  %v8129_v25 = vpop.permute.xlu0 %2856 }
 0x746   :  { %5200 = vpow2.f32 %v3133_v12  ;;  %v8131_v12 = vpop.permute.xlu2 %2396 }
 0x747   :  { %5202 = vpow2.f32 %v3139_v52 }
 0x74a   :  { %2565 = vperm.xlu2 %5117, %v7906_v18  }
 0x74b   :  { %2559 = vperm.xlu1 %5116, %v7906_v18  }
 0x74c   :  { %3379 = vadd.xlane.f32.xlu0 %v8104_v36  ;;  %v8121_v36 = vpop.permute.xlu1 %2377  ;;  %v8124_v31 = vpop.eup %5200 }
 0x74d   :  { %11178 = vst [vmem:[#allocation89_spill] sm:$0xff] %v8124_v31  ;;  %v8136_v30 = vpop.eup %5202  ;;  %v8141_v52 = vpop.permute.xlu0 %2208 }
 0x74e   :  { %11180 = vst [vmem:[#allocation175_spill] sm:$0xff] %v8136_v30 }
 0x752   :  { %5119 = vset.pattern.permute.xlu2 %v11151_v22 }
 0x753   :  { %5118 = vset.pattern.permute.xlu1 %v11155_v61 }
 0x754   :  { %3385 = vadd.xlane.f32.xlu0 %v8114_v40  ;;  %v2992_v40 = vsub.f32 %v11179_v46, %v2348_v53  ;;  %v8133_v9 = vpop.permute.xlu1 %2390  ;;  %v8143_v53 = vpop.permute.xlu2 %2414 }
 0x756   :  { %v3145_v58 = vmul.f32 1.442695, %v2992_v40 }
 0x758   :  { %5204 = vpow2.f32 %v3145_v58 }
 0x75a   :  { %2577 = vperm.xlu2 %5119, %v7906_v18  }
 0x75b   :  { %2571 = vperm.xlu1 %5118, %v7906_v18   ;;  %v11181_v18 = vld [vmem:[#allocation64_spill] sm:$0xff] }
 0x75c   :  { %3391 = vadd.xlane.f32.xlu0 %v8124_v31  ;;  %v2995_v31 = vsub.f32 %v11181_v18, %v2366_v28  ;;  %v8145_v40 = vpop.permute.xlu1 %2408  ;;  %v8153_v58 = vpop.permute.xlu2 %2426 }
 0x75d   :  { %11184 = vst [vmem:[#allocation200_spill] sm:$0xff] %v8153_v58 }
 0x75e   :  { %v3151_v46 = vmul.f32 1.442695, %v2995_v31  ;;  %v8148_v27 = vpop.eup %5204  ;;  %v2403_v31 = vpop.permute.xlu0 %2402 }
 0x75f   :  { %11182 = vst [vmem:[#allocation46_spill] sm:$0xff] %v8148_v27  ;;  %v3001_v23 = vsub.f32 %v11186_v1, %v2403_v31  ;;  %v11191_v1 = vld [vmem:[#allocation78_spill] sm:$0xff] }
 0x760   :  { %5206 = vpow2.f32 %v3151_v46 }
 0x762   :  { %5122 = vset.pattern.permute.xlu2 %v11152_v29 }
 0x763   :  { %5121 = vset.pattern.permute.xlu1 %v11153_v10 }
 0x764   :  { %3397 = vadd.xlane.f32.xlu0 %v8136_v30  ;;  %v11183_v30 = vld [vmem:[#allocation67_spill] sm:$0xff]  ;;  %v2421_v18 = vpop.permute.xlu1 %2420  ;;  %v8161_v46 = vpop.permute.xlu2 %2444 }
 0x765   :  { %v2998_v54 = vsub.f32 %v11183_v30, %v2384_v39  ;;  %11187 = vst [vmem:[#allocation220_spill] sm:$0xff] %v8161_v46  ;;  %v11189_v30 = vld [vmem:[#allocation75_spill] sm:$0xff] }
 0x766   :  { %v8156_v59 = vpop.eup %5206  ;;  %v3004_v44 = vsub.f32 %v11189_v30, %v2421_v18 }
 0x767   :  { %v3157_v28 = vmul.f32 1.442695, %v2998_v54  ;;  %11185 = vst [vmem:[#allocation203_spill] sm:$0xff] %v8156_v59 }
 0x768   :  { %v3169_v7 = vmul.f32 1.442695, %v3004_v44 }
 0x769   :  { %5208 = vpow2.f32 %v3157_v28 }
 0x76a   :  { %2596 = vperm.xlu2 %5122, %v7927_v17  }
 0x76b   :  { %2590 = vperm.xlu1 %5121, %v7927_v17  }
 0x76c   :  { %3403 = vadd.xlane.f32.xlu0 %v8148_v27  ;;  %v3163_v27 = vmul.f32 1.442695, %v3001_v23  ;;  %v2439_v39 = vpop.permute.xlu1 %2438 }
 0x76d   :  { %v3007_v31 = vsub.f32 %v11191_v1, %v2439_v39  ;;  %v11197_v1 = vld [vmem:[#allocation81_spill] sm:$0xff] }
 0x76e   :  { %5210 = vpow2.f32 %v3163_v27  ;;  %v11194_v27 = vld [vmem:[#allocation79_spill] sm:$0xff] }
 0x76f   :  { %v8164_v54 = vpop.eup %5208  ;;  %5212 = vpow2.f32 %v3169_v7  ;;  %v3175_v46 = vmul.f32 1.442695, %v3007_v31 }
 0x770   :  { %11188 = vst [vmem:[#allocation100_spill] sm:$0xff] %v8164_v54 }
 0x771   :  { %5214 = vpow2.f32 %v3175_v46 }
 0x772   :  { %5124 = vset.pattern.permute.xlu2 %v11140_v42 }
 0x773   :  { %5123 = vset.pattern.permute.xlu1 %v11141_v48 }
 0x774   :  { %3409 = vadd.xlane.f32.xlu0 %v8156_v59  ;;  %v2457_v59 = vpop.permute.xlu2 %2456  ;;  %v8169_v28 = vpop.permute.xlu1 %2450 }
 0x775   :  { %v8172_v23 = vpop.eup %5210  ;;  %v3010_v18 = vsub.f32 %v11194_v27, %v2457_v59  ;;  %v11200_v27 = vld [vmem:[#allocation83_spill] sm:$0xff] }
 0x776   :  { %11190 = vst [vmem:[#allocation233_spill] sm:$0xff] %v8172_v23  ;;  %v8180_v44 = vpop.eup %5212 }
 0x777   :  { %11193 = vst [vmem:[#allocation176_spill] sm:$0xff] %v8180_v44  ;;  %v3181_v30 = vmul.f32 1.442695, %v3010_v18  ;;  %v8190_v39 = vpop.eup %5214  ;;  %v3016_v18 = vsub.f32 %v11200_v27, %v7995_v15  ;;  %v11206_v27 = vld [vmem:[#allocation87_spill] sm:$0xff] }
 0x778   :  { %11196 = vst [vmem:[#allocation52_spill] sm:$0xff] %v8190_v39 }
 0x779   :  { %5216 = vpow2.f32 %v3181_v30  ;;  %v3193_v30 = vmul.f32 1.442695, %v3016_v18 }
 0x77a   :  { %2608 = vperm.xlu2 %5124, %v7927_v17  }
 0x77b   :  { %2602 = vperm.xlu1 %5123, %v7927_v17  }
 0x77c   :  { %3415 = vadd.xlane.f32.xlu0 %v8164_v54  ;;  %v2475_v54 = vpop.permute.xlu2 %2474  ;;  %v8177_v58 = vpop.permute.xlu1 %2468 }
 0x77d   :  { %11192 = vst [vmem:[#allocation74_spill] sm:$0xff] %v8177_v58  ;;  %v3013_v31 = vsub.f32 %v11197_v1, %v2475_v54 }
 0x77f   :  { %v8200_v46 = vpop.eup %5216 }
 0x780   :  { %11199 = vst [vmem:[#allocation234_spill] sm:$0xff] %v8200_v46 }
 0x782   :  { %5127 = vset.pattern.permute.xlu2 %v11146_v13 }
 0x783   :  { %5126 = vset.pattern.permute.xlu1 %v11139_v32 }
 0x784   :  { %3421 = vadd.xlane.f32.xlu0 %v8172_v23  ;;  %v8185_v23 = vpop.permute.xlu2 %2487  ;;  %v8187_v7 = vpop.permute.xlu1 %2480 }
 0x785   :  { %11195 = vst [vmem:[#allocation109_spill] sm:$0xff] %v8187_v7 }
 0x78a   :  { %2626 = vperm.xlu2 %5127, %v7927_v17  }
 0x78b   :  { %2620 = vperm.xlu1 %5126, %v7927_v17  }
 0x78c   :  { %3427 = vadd.xlane.f32.xlu0 %v8180_v44  ;;  %v3187_v44 = vmul.f32 1.442695, %v3013_v31  ;;  %v8195_v58 = vpop.permute.xlu2 %2505  ;;  %v8197_v59 = vpop.permute.xlu1 %2499  ;;  %v11203_v31 = vld [vmem:[#allocation84_spill] sm:$0xff] }
 0x78d   :  { %11198 = vst [vmem:[#allocation223_spill] sm:$0xff] %v8197_v59 }
 0x78e   :  { %5218 = vpow2.f32 %v3187_v44 }
 0x78f   :  { %5220 = vpow2.f32 %v3193_v30 }
 0x792   :  { %5129 = vset.pattern.permute.xlu2 %v11154_v34 }
 0x793   :  { %5128 = vset.pattern.permute.xlu1 %v11145_v60 }
 0x794   :  { %3433 = vadd.xlane.f32.xlu0 %v8190_v39  ;;  %v8206_v39 = vpop.permute.xlu2 %2517  ;;  %v2512_v54 = vpop.permute.xlu1 %2511 }
 0x795   :  { %11201 = vst [vmem:[#allocation225_spill] sm:$0xff] %v8206_v39  ;;  %v8209_v1 = vpop.eup %5218  ;;  %v3019_v59 = vsub.f32 %v11203_v31, %v2512_v54 }
 0x796   :  { %11202 = vst [vmem:[#allocation237_spill] sm:$0xff] %v8209_v1  ;;  %v8217_v44 = vpop.eup %5220 }
 0x797   :  { %11205 = vst [vmem:[#allocation204_spill] sm:$0xff] %v8217_v44 }
 0x79a   :  { %2638 = vperm.xlu2 %5129, %v7927_v17  }
 0x79b   :  { %2632 = vperm.xlu1 %5128, %v7927_v17  }
 0x79c   :  { %3439 = vadd.xlane.f32.xlu0 %v8200_v46  ;;  %v3199_v46 = vmul.f32 1.442695, %v3019_v59  ;;  %v8214_v7 = vpop.permute.xlu2 %2535  ;;  %v11208_v59 = vld [vmem:[#allocation90_spill] sm:$0xff] }
 0x79d   :  { %11204 = vst [vmem:[#allocation187_spill] sm:$0xff] %v8214_v7  ;;  %v2530_v15 = vpop.permute.xlu1 %2529 }
 0x79e   :  { %5222 = vpow2.f32 %v3199_v46  ;;  %v3022_v18 = vsub.f32 %v11206_v27, %v2530_v15  ;;  %v11210_v15 = vld [vmem:[#allocation92_spill] sm:$0xff] }
 0x7a0   :  { %v3205_v39 = vmul.f32 1.442695, %v3022_v18 }
 0x7a2   :  { %5132 = vset.pattern.permute.xlu2 %v11150_v57  ;;  %5224 = vpow2.f32 %v3205_v39  ;;  %v11212_v39 = vld [vmem:[#allocation93_spill] sm:$0xff] }
 0x7a3   :  { %5131 = vset.pattern.permute.xlu1 %v11142_v14 }
 0x7a4   :  { %3445 = vadd.xlane.f32.xlu0 %v8209_v1  ;;  %v2548_v1 = vpop.permute.xlu2 %2547  ;;  %v8223_v30 = vpop.eup %5222 }
 0x7a5   :  { %11207 = vst [vmem:[#allocation207_spill] sm:$0xff] %v8223_v30  ;;  %v3025_v54 = vsub.f32 %v11208_v59, %v2548_v1  ;;  %v3031_v1 = vsub.f32 %v11212_v39, %v8010_v45 }
 0x7a7   :  { %v3211_v31 = vmul.f32 1.442695, %v3025_v54  ;;  %v3223_v59 = vmul.f32 1.442695, %v3031_v1  ;;  %v11219_v1 = vld [vmem:[#allocation94_spill] sm:$0xff] }
 0x7a8   :  { %v8229_v46 = vpop.eup %5224 }
 0x7a9   :  { %11209 = vst [vmem:[#allocation101_spill] sm:$0xff] %v8229_v46  ;;  %5226 = vpow2.f32 %v3211_v31 }
 0x7aa   :  { %2656 = vperm.xlu2 %5132, %v7927_v17  }
 0x7ab   :  { %2650 = vperm.xlu1 %5131, %v7927_v17  }
 0x7ac   :  { %3451 = vadd.xlane.f32.xlu0 %v8217_v44  ;;  %v2566_v7 = vpop.permute.xlu2 %2565 }
 0x7ad   :  { %v3028_v27 = vsub.f32 %v11210_v15, %v2566_v7  ;;  %v8246_v7 = vpop.permute.xlu1 %2541 }
 0x7af   :  { %v3217_v18 = vmul.f32 1.442695, %v3028_v27 }
 0x7b1   :  { %5228 = vpow2.f32 %v3217_v18 }
 0x7b2   :  { %5134 = vset.pattern.permute.xlu2 %v11155_v61  ;;  %5230 = vpow2.f32 %v3223_v59 }
 0x7b3   :  { %5133 = vset.pattern.permute.xlu1 %v11149_v55 }
 0x7b4   :  { %3457 = vadd.xlane.f32.xlu0 %v8223_v30  ;;  %v8235_v30 = vpop.eup %5226  ;;  %v8259_v15 = vpop.permute.xlu2 %2577 }
 0x7b5   :  { %11211 = vst [vmem:[#allocation188_spill] sm:$0xff] %v8235_v30 }
 0x7b6   :  { %11216 = vst [vmem:[#allocation246_spill] sm:$0xff] %v8259_v15 }
 0x7ba   :  { %2668 = vperm.xlu2 %5134, %v7927_v17  }
 0x7bb   :  { %2662 = vperm.xlu1 %5133, %v7927_v17   ;;  %v8242_v17 = vpop.eup %5228 }
 0x7bc   :  { %3463 = vadd.xlane.f32.xlu0 %v8229_v46  ;;  %11213 = vst [vmem:[#allocation226_spill] sm:$0xff] %v8242_v17  ;;  %v8249_v54 = vpop.eup %5230 }
 0x7bd   :  { %11214 = vst [vmem:[#allocation238_spill] sm:$0xff] %v8249_v54  ;;  %v8253_v45 = vpop.permute.xlu1 %2559 }
 0x7c2   :  { %5137 = vset.pattern.permute.xlu2 %v11153_v10 }
 0x7c3   :  { %5136 = vset.pattern.permute.xlu1 %v11144_v51 }
 0x7c4   :  { %3469 = vadd.xlane.f32.xlu0 %v8235_v30  ;;  %v8265_v18 = vpop.permute.xlu2 %2596 }
 0x7c5   :  { %11218 = vst [vmem:[#allocation191_spill] sm:$0xff] %v8265_v18 }
 0x7ca   :  { %2687 = vperm.xlu2 %5137, %v7956_v26  }
 0x7cb   :  { %2681 = vperm.xlu1 %5136, %v7956_v26  }
 0x7cc   :  { %3475 = vadd.xlane.f32.xlu0 %v8242_v17 }
 0x7cd   :  { %v8257_v31 = vpop.permute.xlu1 %2571 }
 0x7ce   :  { %11215 = vst [vmem:[#allocation227_spill] sm:$0xff] %v8257_v31 }
 0x7d2   :  { %5139 = vset.pattern.permute.xlu2 %v11141_v48 }
 0x7d3   :  { %5138 = vset.pattern.permute.xlu1 %v11152_v29 }
 0x7d4   :  { %3481 = vadd.xlane.f32.xlu0 %v8249_v54  ;;  %v8270_v54 = vpop.permute.xlu2 %2608 }
 0x7d5   :  { %11220 = vst [vmem:[#allocation208_spill] sm:$0xff] %v8270_v54 }
 0x7da   :  { %2699 = vperm.xlu2 %5139, %v7956_v26  }
 0x7db   :  { %2693 = vperm.xlu1 %5138, %v7956_v26  }
 0x7dd   :  { %v8263_v27 = vpop.permute.xlu1 %2590 }
 0x7de   :  { %11217 = vst [vmem:[#allocation104_spill] sm:$0xff] %v8263_v27 }
 0x7e2   :  { %5143 = vset.pattern.permute.xlu2 %v11139_v32 }
 0x7e3   :  { %5142 = vset.pattern.permute.xlu1 %v11143_v5 }
 0x7e4   :  { %v8274_v30 = vpop.permute.xlu2 %2626 }
 0x7e5   :  { %11221 = vst [vmem:[#allocation211_spill] sm:$0xff] %v8274_v30 }
 0x7ea   :  { %2717 = vperm.xlu2 %5143, %v7956_v26  }
 0x7eb   :  { %2711 = vperm.xlu1 %5142, %v7956_v26  }
 0x7ed   :  { %v2603_v39 = vpop.permute.xlu1 %2602 }
 0x7ee   :  { %v3034_v59 = vsub.f32 %v11219_v1, %v2603_v39  ;;  %v11223_v39 = vld [vmem:[#allocation95_spill] sm:$0xff] }
 0x7f0   :  { %v3229_v17 = vmul.f32 1.442695, %v3034_v59 }
 0x7f2   :  { %5232 = vpow2.f32 %v3229_v17  ;;  %5145 = vset.pattern.permute.xlu2 %v11145_v60  ;;  %v11224_v17 = vld [vmem:[#allocation97_spill] sm:$0xff] }
 0x7f3   :  { %5144 = vset.pattern.permute.xlu1 %v11146_v13 }
 0x7f4   :  { %v2639_v54 = vpop.permute.xlu2 %2638 }
 0x7f5   :  { %v3040_v27 = vsub.f32 %v11224_v17, %v2639_v54 }
 0x7f7   :  { %v3241_v30 = vmul.f32 1.442695, %v3040_v27 }
 0x7f8   :  { %v8276_v46 = vpop.eup %5232 }
 0x7f9   :  { %11222 = vst [vmem:[#allocation110_spill] sm:$0xff] %v8276_v46  ;;  %3487 = vadd.xlane.f32.xlu0 %v8276_v46  ;;  %v11226_v46 = vld [vmem:[#allocation102_spill] sm:$0xff] }
 0x7fa   :  { %2729 = vperm.xlu2 %5145, %v7956_v26  }
 0x7fb   :  { %2723 = vperm.xlu1 %5144, %v7956_v26  }
 0x7fd   :  { %v2621_v44 = vpop.permute.xlu1 %2620 }
 0x7fe   :  { %v3037_v1 = vsub.f32 %v11223_v39, %v2621_v44  ;;  %v11228_v39 = vld [vmem:[#allocation105_spill] sm:$0xff] }
 0x7ff   :  { %v3046_v27 = vsub.f32 %v11228_v39, %v8023_v11 }
 0x800   :  { %v3235_v59 = vmul.f32 1.442695, %v3037_v1 }
 0x802   :  { %5234 = vpow2.f32 %v3235_v59  ;;  %5148 = vset.pattern.permute.xlu2 %v11142_v14 }
 0x803   :  { %5147 = vset.pattern.permute.xlu1 %v11147_v63  ;;  %5236 = vpow2.f32 %v3241_v30  ;;  %v3253_v30 = vmul.f32 1.442695, %v3046_v27 }
 0x804   :  { %v2657_v31 = vpop.permute.xlu2 %2656 }
 0x805   :  { %v3043_v15 = vsub.f32 %v11226_v46, %v2657_v31 }
 0x807   :  { %v3247_v44 = vmul.f32 1.442695, %v3043_v15 }
 0x808   :  { %v8285_v18 = vpop.eup %5234 }
 0x809   :  { %11225 = vst [vmem:[#allocation37_spill] sm:$0xff] %v8285_v18  ;;  %3493 = vadd.xlane.f32.xlu0 %v8285_v18  ;;  %v8291_v54 = vpop.eup %5236  ;;  %5238 = vpow2.f32 %v3247_v44  ;;  %v11233_v44 = vld [vmem:[#allocation106_spill] sm:$0xff] }
 0x80a   :  { %2747 = vperm.xlu2 %5148, %v7956_v26   ;;  %11227 = vst [vmem:[#allocation111_spill] sm:$0xff] %v8291_v54  ;;  %5240 = vpow2.f32 %v3253_v30 }
 0x80b   :  { %2741 = vperm.xlu1 %5147, %v7956_v26  }
 0x80d   :  { %v8310_v11 = vpop.permute.xlu1 %2632 }
 0x80f   :  { %v8298_v1 = vpop.eup %5238 }
 0x810   :  { %11229 = vst [vmem:[#allocation228_spill] sm:$0xff] %v8298_v1  ;;  %v8303_v46 = vpop.eup %5240 }
 0x811   :  { %3499 = vadd.xlane.f32.xlu0 %v8291_v54  ;;  %11230 = vst [vmem:[#allocation248_spill] sm:$0xff] %v8303_v46 }
 0x812   :  { %5150 = vset.pattern.permute.xlu2 %v11149_v55 }
 0x813   :  { %5149 = vset.pattern.permute.xlu1 %v11150_v57 }
 0x814   :  { %v8320_v59 = vpop.permute.xlu2 %2668 }
 0x819   :  { %3505 = vadd.xlane.f32.xlu0 %v8298_v1 }
 0x81a   :  { %2759 = vperm.xlu2 %5150, %v7956_v26  }
 0x81b   :  { %2753 = vperm.xlu1 %5149, %v7956_v26  }
 0x81d   :  { %v8314_v31 = vpop.permute.xlu1 %2650 }
 0x821   :  { %3511 = vadd.xlane.f32.xlu0 %v8303_v46 }
 0x822   :  { %5153 = vset.pattern.permute.xlu2 %v11144_v51 }
 0x823   :  { %5152 = vset.pattern.permute.xlu1 %v11151_v22 }
 0x824   :  { %v8326_v17 = vpop.permute.xlu2 %2687 }
 0x82a   :  { %2778 = vperm.xlu2 %5153, %v7975_v38  }
 0x82b   :  { %2771 = vperm.xlu1 %5152, %v7956_v26  }
 0x82d   :  { %v8318_v15 = vpop.permute.xlu1 %2662 }
 0x82e   :  { %11231 = vst [vmem:[#allocation229_spill] sm:$0xff] %v8318_v15 }
 0x832   :  { %5155 = vset.pattern.permute.xlu2 %v11152_v29 }
 0x833   :  { %5154 = vset.pattern.permute.xlu1 %v11153_v10 }
 0x834   :  { %v8331_v27 = vpop.permute.xlu2 %2699 }
 0x835   :  { %11234 = vst [vmem:[#allocation192_spill] sm:$0xff] %v8331_v27 }
 0x83a   :  { %2790 = vperm.xlu2 %5155, %v7975_v38  }
 0x83b   :  { %2784 = vperm.xlu1 %5154, %v7975_v38  }
 0x83d   :  { %v8324_v26 = vpop.permute.xlu1 %2681 }
 0x83e   :  { %11232 = vst [vmem:[#allocation141_spill] sm:$0xff] %v8324_v26 }
 0x842   :  { %5158 = vset.pattern.permute.xlu2 %v11143_v5 }
 0x843   :  { %5157 = vset.pattern.permute.xlu1 %v11140_v42 }
 0x844   :  { %v8335_v46 = vpop.permute.xlu2 %2717 }
 0x845   :  { %11235 = vst [vmem:[#allocation212_spill] sm:$0xff] %v8335_v46 }
 0x84a   :  { %2808 = vperm.xlu2 %5158, %v7975_v38  }
 0x84b   :  { %2802 = vperm.xlu1 %5157, %v7975_v38  }
 0x84d   :  { %v2694_v29 = vpop.permute.xlu1 %2693 }
 0x84e   :  { %v3049_v39 = vsub.f32 %v11233_v44, %v2694_v29  ;;  %v11237_v29 = vld [vmem:[#allocation107_spill] sm:$0xff] }
 0x850   :  { %v3259_v30 = vmul.f32 1.442695, %v3049_v39 }
 0x852   :  { %5242 = vpow2.f32 %v3259_v30  ;;  %5160 = vset.pattern.permute.xlu2 %v11146_v13  ;;  %v11238_v30 = vld [vmem:[#allocation108_spill] sm:$0xff] }
 0x853   :  { %5159 = vset.pattern.permute.xlu1 %v11139_v32 }
 0x854   :  { %v2730_v18 = vpop.permute.xlu2 %2729 }
 0x855   :  { %v3055_v27 = vsub.f32 %v11238_v30, %v2730_v18 }
 0x857   :  { %v3271_v13 = vmul.f32 1.442695, %v3055_v27 }
 0x858   :  { %v8337_v1 = vpop.eup %5242 }
 0x859   :  { %11236 = vst [vmem:[#allocation215_spill] sm:$0xff] %v8337_v1  ;;  %3517 = vadd.xlane.f32.xlu0 %v8337_v1  ;;  %v11240_v1 = vld [vmem:[#allocation112_spill] sm:$0xff] }
 0x85a   :  { %2820 = vperm.xlu2 %5160, %v7975_v38  }
 0x85b   :  { %2814 = vperm.xlu1 %5159, %v7975_v38  }
 0x85d   :  { %v2712_v54 = vpop.permute.xlu1 %2711 }
 0x85e   :  { %v3052_v44 = vsub.f32 %v11237_v29, %v2712_v54  ;;  %v11242_v29 = vld [vmem:[#allocation115_spill] sm:$0xff] }
 0x85f   :  { %v3061_v27 = vsub.f32 %v11242_v29, %v8061_v24 }
 0x860   :  { %v3265_v39 = vmul.f32 1.442695, %v3052_v44 }
 0x861   :  { %v3283_v44 = vmul.f32 1.442695, %v3061_v27 }
 0x862   :  { %5244 = vpow2.f32 %v3265_v39  ;;  %5163 = vset.pattern.permute.xlu2 %v11147_v63 }
 0x863   :  { %5162 = vset.pattern.permute.xlu1 %v11154_v34  ;;  %5246 = vpow2.f32 %v3271_v13 }
 0x864   :  { %v2748_v46 = vpop.permute.xlu2 %2747 }
 0x865   :  { %v3058_v15 = vsub.f32 %v11240_v1, %v2748_v46 }
 0x867   :  { %v3277_v54 = vmul.f32 1.442695, %v3058_v15 }
 0x868   :  { %v8346_v26 = vpop.eup %5244 }
 0x869   :  { %11239 = vst [vmem:[#allocation80_spill] sm:$0xff] %v8346_v26  ;;  %3523 = vadd.xlane.f32.xlu0 %v8346_v26  ;;  %v8352_v18 = vpop.eup %5246  ;;  %5248 = vpow2.f32 %v3277_v54 }
 0x86a   :  { %2838 = vperm.xlu2 %5163, %v7975_v38   ;;  %11241 = vst [vmem:[#allocation195_spill] sm:$0xff] %v8352_v18  ;;  %5250 = vpow2.f32 %v3283_v44  ;;  %v11247_v44 = vld [vmem:[#allocation117_spill] sm:$0xff] }
 0x86b   :  { %2832 = vperm.xlu1 %5162, %v7975_v38  }
 0x86d   :  { %v8371_v24 = vpop.permute.xlu1 %2723 }
 0x86f   :  { %v8359_v39 = vpop.eup %5248 }
 0x870   :  { %11243 = vst [vmem:[#allocation230_spill] sm:$0xff] %v8359_v39  ;;  %v8364_v1 = vpop.eup %5250 }
 0x871   :  { %3529 = vadd.xlane.f32.xlu0 %v8352_v18  ;;  %11244 = vst [vmem:[#allocation71_spill] sm:$0xff] %v8364_v1 }
 0x872   :  { %5165 = vset.pattern.permute.xlu2 %v11150_v57 }
 0x873   :  { %5164 = vset.pattern.permute.xlu1 %v11142_v14 }
 0x874   :  { %v8381_v15 = vpop.permute.xlu2 %2759 }
 0x879   :  { %3535 = vadd.xlane.f32.xlu0 %v8359_v39 }
 0x87a   :  { %2850 = vperm.xlu2 %5165, %v7975_v38  }
 0x87b   :  { %2844 = vperm.xlu1 %5164, %v7975_v38  }
 0x87d   :  { %v8375_v57 = vpop.permute.xlu1 %2741 }
 0x881   :  { %3541 = vadd.xlane.f32.xlu0 %v8364_v1 }
 0x882   :  { %5168 = vset.pattern.permute.xlu2 %v11151_v22 }
 0x883   :  { %5167 = vset.pattern.permute.xlu1 %v11155_v61 }
 0x884   :  { %v8387_v30 = vpop.permute.xlu2 %2778 }
 0x88a   :  { %2868 = vperm.xlu2 %5168, %v7975_v38  }
 0x88b   :  { %2862 = vperm.xlu1 %5167, %v7975_v38  }
 0x88d   :  { %v8379_v46 = vpop.permute.xlu1 %2753 }
 0x892   :  { %5170 = vset.pattern.permute.xlu2 %v11153_v10  ;;  %v11245_v10 = vld [vmem:[#allocation116_spill] sm:$0xff] }
 0x893   :  { %5169 = vset.pattern.permute.xlu1 %v11144_v51 }
 0x894   :  { %v8392_v54 = vpop.permute.xlu2 %2790 }
 0x89a   :  { %2881 = vperm.xlu2 %5170, %v7998_v49  }
 0x89b   :  { %2875 = vperm.xlu1 %5169, %v7998_v49  }
 0x89d   :  { %v8385_v38 = vpop.permute.xlu1 %2771 }
 0x8a2   :  { %5173 = vset.pattern.permute.xlu2 %v11140_v42 }
 0x8a3   :  { %5172 = vset.pattern.permute.xlu1 %v11141_v48 }
 0x8a4   :  { %v8396_v42 = vpop.permute.xlu2 %2808 }
 0x8aa   :  { %2899 = vperm.xlu2 %5173, %v7998_v49  }
 0x8ab   :  { %2893 = vperm.xlu1 %5172, %v7998_v49  }
 0x8ad   :  { %v2785_v51 = vpop.permute.xlu1 %2784 }
 0x8ae   :  { %v3064_v13 = vsub.f32 %v11245_v10, %v2785_v51 }
 0x8b0   :  { %v3289_v29 = vmul.f32 1.442695, %v3064_v13 }
 0x8b2   :  { %5252 = vpow2.f32 %v3289_v29  ;;  %5175 = vset.pattern.permute.xlu2 %v11139_v32  ;;  %v11248_v29 = vld [vmem:[#allocation118_spill] sm:$0xff] }
 0x8b3   :  { %5174 = vset.pattern.permute.xlu1 %v11143_v5 }
 0x8b4   :  { %v2821_v10 = vpop.permute.xlu2 %2820 }
 0x8b5   :  { %v3070_v1 = vsub.f32 %v11248_v29, %v2821_v10 }
 0x8b7   :  { %v3301_v32 = vmul.f32 1.442695, %v3070_v1 }
 0x8b8   :  { %v8398_v48 = vpop.eup %5252 }
 0x8b9   :  { %11246 = vst [vmem:[#allocation231_spill] sm:$0xff] %v8398_v48  ;;  %3547 = vadd.xlane.f32.xlu0 %v8398_v48  ;;  %v11250_v48 = vld [vmem:[#allocation119_spill] sm:$0xff] }
 0x8ba   :  { %2911 = vperm.xlu2 %5175, %v7998_v49  }
 0x8bb   :  { %2905 = vperm.xlu1 %5174, %v7998_v49  }
 0x8bd   :  { %v2803_v27 = vpop.permute.xlu1 %2802 }
 0x8be   :  { %v3067_v51 = vsub.f32 %v11247_v44, %v2803_v27  ;;  %v8413_v27 = vpop.permute.xlu0 %2887 }
 0x8bf   :  { %11251 = vst [vmem:[#allocation216_spill] sm:$0xff] %v8413_v27 }
 0x8c0   :  { %v3295_v13 = vmul.f32 1.442695, %v3067_v51 }
 0x8c2   :  { %5254 = vpow2.f32 %v3295_v13  ;;  %5178 = vset.pattern.permute.xlu2 %v11154_v34 }
 0x8c3   :  { %5177 = vset.pattern.permute.xlu1 %v11145_v60  ;;  %5256 = vpow2.f32 %v3301_v32  ;;  %v11253_v60 = vld [vmem:[#allocation120_spill] sm:$0xff] }
 0x8c4   :  { %v2839_v5 = vpop.permute.xlu2 %2838  ;;  %v3076_v34 = vsub.f32 %v11253_v60, %v8129_v25 }
 0x8c5   :  { %v3073_v18 = vsub.f32 %v11250_v48, %v2839_v5 }
 0x8c6   :  { %v8422_v1 = vpop.permute.xlu0 %2432  ;;  %v3313_v48 = vmul.f32 1.442695, %v3076_v34 }
 0x8c7   :  { %v3307_v44 = vmul.f32 1.442695, %v3073_v18 }
 0x8c8   :  { %v8407_v39 = vpop.eup %5254 }
 0x8c9   :  { %11249 = vst [vmem:[#allocation113_spill] sm:$0xff] %v8407_v39  ;;  %3553 = vadd.xlane.f32.xlu0 %v8407_v39  ;;  %v8415_v51 = vpop.eup %5256  ;;  %5258 = vpow2.f32 %v3307_v44  ;;  %v11259_v44 = vld [vmem:[#allocation42_spill] sm:$0xff]  ;;  %v11262_v39 = vld [vmem:[#allocation121_spill] sm:$0xff] }
 0x8ca   :  { %2929 = vperm.xlu2 %5178, %v7998_v49   ;;  %11252 = vst [vmem:[#allocation161_spill] sm:$0xff] %v8415_v51  ;;  %5260 = vpow2.f32 %v3313_v48  ;;  %v2967_v60 = vsub.f32 %v11259_v44, %v8020_v16  ;;  %v11264_v16 = vld [vmem:[#allocation128_spill] sm:$0xff] }
 0x8cb   :  { %2923 = vperm.xlu1 %5177, %v7998_v49   ;;  %v2973_v44 = vsub.f32 %v11264_v16, %v8032_v2  ;;  %v11270_v2 = vld [vmem:[#allocation130_spill] sm:$0xff] }
 0x8ce   :  { %v8429_v18 = vpop.permute.xlu0 %2917 }
 0x8cf   :  { %v8424_v10 = vpop.eup %5258  ;;  %11255 = vst [vmem:[#allocation196_spill] sm:$0xff] %v8429_v18 }
 0x8d0   :  { %11254 = vst [vmem:[#allocation219_spill] sm:$0xff] %v8424_v10  ;;  %v8431_v25 = vpop.eup %5260 }
 0x8d1   :  { %3559 = vadd.xlane.f32.xlu0 %v8415_v51  ;;  %11256 = vst [vmem:[#allocation199_spill] sm:$0xff] %v8431_v25 }
 0x8d2   :  { %5180 = vset.pattern.permute.xlu2 %v11142_v14 }
 0x8d3   :  { %5179 = vset.pattern.permute.xlu1 %v11147_v63  ;;  %v8440_v63 = vpop.permute.xlu1 %2814 }
 0x8d6   :  { %v8436_v14 = vpop.permute.xlu0 %2462 }
 0x8d9   :  { %3565 = vadd.xlane.f32.xlu0 %v8424_v10 }
 0x8da   :  { %2941 = vperm.xlu2 %5180, %v7998_v49  }
 0x8db   :  { %2935 = vperm.xlu1 %5179, %v7998_v49  }
 0x8dd   :  { %v8445_v29 = vpop.permute.xlu1 %2832 }
 0x8de   :  { %v8442_v13 = vpop.permute.xlu0 %2947 }
 0x8e1   :  { %3571 = vadd.xlane.f32.xlu0 %v8431_v25  ;;  %v11260_v25 = vld [vmem:[#allocation126_spill] sm:$0xff] }
 0x8e2   :  { %5182 = vset.pattern.permute.xlu2 %v11155_v61  ;;  %v2970_v10 = vsub.f32 %v11260_v25, %v8025_v0  ;;  %v11265_v0 = vld [vmem:[#allocation124_spill] sm:$0xff] }
 0x8e3   :  { %5181 = vset.pattern.permute.xlu1 %v11149_v55  ;;  %v8452_v55 = vpop.permute.xlu2 %2850  ;;  %v2969_v25 = vsub.f32 %v11265_v0, %v8141_v52  ;;  %v11271_v52 = vld [vmem:[#allocation127_spill] sm:$0xff]  ;;  %v11272_v0 = vld [vmem:[#allocation122_spill] sm:$0xff] }
 0x8e4   :  { %v2972_v16 = vsub.f32 %v11271_v52, %v8034_v6  ;;  %v11275_v6 = vld [vmem:[#allocation132_spill] sm:$0xff] }
 0x8e6   :  { %v8447_v32 = vpop.xlane.xlu0 %3355 }
 0x8e7   :  { %11257 = vst [vmem:[#allocation232_spill] sm:$0xff] %v8447_v32 }
 0x8ea   :  { %2959 = vperm.xlu2 %5182, %v7998_v49  }
 0x8eb   :  { %2953 = vperm.xlu1 %5181, %v7998_v49   ;;  %v8460_v48 = vpop.permute.xlu2 %2868 }
 0x8ed   :  { %v8450_v61 = vpop.permute.xlu1 %2844 }
 0x8ee   :  { %v8454_v5 = vpop.xlane.xlu0 %3361 }
 0x8ef   :  { %11258 = vst [vmem:[#allocation147_spill] sm:$0xff] %v8454_v5  ;;  %v3101_v5 = vmul.f32 1.442695, %v2970_v10  ;;  %v3107_v10 = vmul.f32 1.442695, %v2973_v44 }
 0x8f3   :  { %5183 = vset.pattern.permute.xlu1 %v11151_v22  ;;  %v3095_v22 = vmul.f32 1.442695, %v2967_v60 }
 0x8f4   :  { %v8467_v32 = vpop.permute.xlu2 %2881 }
 0x8f5   :  { %5262 = vpow2.f32 %v3095_v22 }
 0x8f6   :  { %v8464_v51 = vpop.xlane.xlu0 %3367 }
 0x8f7   :  { %11261 = vst [vmem:[#allocation235_spill] sm:$0xff] %v8464_v51 }
 0x8fb   :  { %2965 = vperm.xlu1 %5183, %v7998_v49   ;;  %v8469_v27 = vpop.eup %5262 }
 0x8fc   :  { %11263 = vst [vmem:[#allocation85_spill] sm:$0xff] %v8469_v27 }
 0x8fd   :  { %v8458_v34 = vpop.permute.xlu1 %2862 }
 0x8fe   :  { %v8476_v60 = vpop.xlane.xlu0 %3373 }
 0x8ff   :  { %11266 = vst [vmem:[#allocation158_spill] sm:$0xff] %v8476_v60 }
 0x904   :  { %v8478_v22 = vpop.permute.xlu2 %2899 }
 0x905   :  { %11267 = vst [vmem:[#allocation88_spill] sm:$0xff] %v8478_v22 }
 0x90d   :  { %v2876_v49 = vpop.permute.xlu1 %2875 }
 0x90e   :  { %v3079_v26 = vsub.f32 %v11262_v39, %v2876_v49 }
 0x910   :  { %v3319_v18 = vmul.f32 1.442695, %v3079_v26 }
 0x912   :  { %5264 = vpow2.f32 %v3319_v18  ;;  %v3099_v18 = vmul.f32 1.442695, %v2969_v25  ;;  %v3105_v25 = vmul.f32 1.442695, %v2972_v16  ;;  %v11277_v16 = vld [vmem:[#allocation49_spill] sm:$0xff] }
 0x913   :  { %3353 = vadd.xlane.f32.xlu2 %v8469_v27  ;;  %5266 = vpow2.f32 %v3101_v5  ;;  %v2976_v5 = vsub.f32 %v11270_v2, %v8039_v21 }
 0x914   :  { %5268 = vpow2.f32 %v3107_v10  ;;  %v2912_v51 = vpop.permute.xlu2 %2911 }
 0x915   :  { %5270 = vpow2.f32 %v3099_v18  ;;  %v3113_v44 = vmul.f32 1.442695, %v2976_v5  ;;  %v2979_v18 = vsub.f32 %v11275_v6, %v8054_v20 }
 0x918   :  { %v8480_v39 = vpop.eup %5264 }
 0x919   :  { %11268 = vst [vmem:[#allocation66_spill] sm:$0xff] %v8480_v39  ;;  %3577 = vadd.xlane.f32.xlu0 %v8480_v39  ;;  %v8483_v26 = vpop.eup %5266  ;;  %v8491_v39 = vpop.xlane.xlu0 %3379 }
 0x91a   :  { %11269 = vst [vmem:[#allocation26_spill] sm:$0xff] %v8483_v26  ;;  %v8493_v22 = vpop.eup %5268 }
 0x91b   :  { %3359 = vadd.xlane.f32.xlu2 %v8483_v26  ;;  %11273 = vst [vmem:[#allocation20_spill] sm:$0xff] %v8491_v39  ;;  %v11274_v26 = vld [vmem:[#allocation123_spill] sm:$0xff]  ;;  %v8497_v21 = vpop.eup %5270 }
 0x91c   :  { %v3085_v10 = vsub.f32 %v11274_v26, %v2912_v51  ;;  %v3119_v51 = vmul.f32 1.442695, %v2979_v18 }
 0x91d   :  { %v2894_v49 = vpop.permute.xlu1 %2893 }
 0x91e   :  { %v3082_v60 = vsub.f32 %v11272_v0, %v2894_v49  ;;  %v3331_v5 = vmul.f32 1.442695, %v3085_v10  ;;  %v11280_v10 = vld [vmem:[#allocation131_spill] sm:$0xff] }
 0x91f   :  { %v2978_v6 = vsub.f32 %v11280_v10, %v8047_v37 }
 0x920   :  { %v3325_v27 = vmul.f32 1.442695, %v3082_v60  ;;  %v11276_v60 = vld [vmem:[#allocation129_spill] sm:$0xff] }
 0x921   :  { %v2975_v2 = vsub.f32 %v11276_v60, %v8041_v8  ;;  %v8510_v0 = vpop.xlane.xlu0 %3385  ;;  %v11279_v8 = vld [vmem:[#allocation134_spill] sm:$0xff] }
 0x922   :  { %5272 = vpow2.f32 %v3325_v27  ;;  %11278 = vst [vmem:[#allocation23_spill] sm:$0xff] %v8510_v0 }
 0x923   :  { %3365 = vadd.xlane.f32.xlu2 %v8493_v22  ;;  %5274 = vpow2.f32 %v3113_v44  ;;  %v3111_v26 = vmul.f32 1.442695, %v2975_v2 }
 0x924   :  { %5276 = vpow2.f32 %v3105_v25  ;;  %v2930_v49 = vpop.permute.xlu2 %2929  ;;  %v2982_v25 = vsub.f32 %v11279_v8, %v8059_v19  ;;  %v11285_v8 = vld [vmem:[#allocation133_spill] sm:$0xff] }
 0x925   :  { %3357 = vadd.xlane.f32.xlu1 %v8497_v21  ;;  %5278 = vpow2.f32 %v3331_v5  ;;  %v3088_v20 = vsub.f32 %v11277_v16, %v2930_v49  ;;  %v3117_v49 = vmul.f32 1.442695, %v2978_v6 }
 0x926   :  { %5280 = vpow2.f32 %v3119_v51  ;;  %v3125_v2 = vmul.f32 1.442695, %v2982_v25  ;;  %v11282_v51 = vld [vmem:[#allocation51_spill] sm:$0xff]  ;;  %v2981_v25 = vsub.f32 %v11285_v8, %v8052_v33 }
 0x927   :  { %5282 = vpow2.f32 %v3111_v26  ;;  %v3337_v18 = vmul.f32 1.442695, %v3088_v20  ;;  %v3091_v16 = vsub.f32 %v11282_v51, %v8442_v13  ;;  %v11283_v26 = vld [vmem:[#allocation44_spill] sm:$0xff]  ;;  %v11288_v33 = vld [vmem:[#allocation135_spill] sm:$0xff] }
 0x928   :  { %v8504_v52 = vpop.eup %5272  ;;  %v2985_v37 = vsub.f32 %v11283_v26, %v8069_v3  ;;  %v3123_v51 = vmul.f32 1.442695, %v2981_v25 }
 0x929   :  { %3583 = vadd.xlane.f32.xlu0 %v8504_v52  ;;  %v8507_v27 = vpop.eup %5274  ;;  %5284 = vpow2.f32 %v3337_v18  ;;  %v8532_v20 = vpop.xlane.xlu0 %3391  ;;  %v3343_v10 = vmul.f32 1.442695, %v3091_v16  ;;  %v2984_v16 = vsub.f32 %v11288_v33, %v8071_v35  ;;  %v11292_v35 = vld [vmem:[#allocation136_spill] sm:$0xff] }
 0x92a   :  { %v8513_v44 = vpop.eup %5276  ;;  %5286 = vpow2.f32 %v3125_v2  ;;  %11284 = vst [vmem:[#allocation22_spill] sm:$0xff] %v8532_v20  ;;  %v3131_v13 = vmul.f32 1.442695, %v2985_v37  ;;  %v11287_v2 = vld [vmem:[#allocation48_spill] sm:$0xff] }
 0x92b   :  { %3371 = vadd.xlane.f32.xlu2 %v8507_v27  ;;  %v8520_v60 = vpop.eup %5278  ;;  %5288 = vpow2.f32 %v3117_v49  ;;  %v2988_v49 = vsub.f32 %v11287_v2, %v8079_v56  ;;  %v11291_v56 = vld [vmem:[#allocation55_spill] sm:$0xff] }
 0x92c   :  { %11281 = vst [vmem:[#allocation30_spill] sm:$0xff] %v8520_v60  ;;  %v8523_v5 = vpop.eup %5280  ;;  %5290 = vpow2.f32 %v3343_v10  ;;  %v3129_v10 = vmul.f32 1.442695, %v2984_v16  ;;  %v2991_v2 = vsub.f32 %v11291_v56, %v8097_v47 }
 0x92d   :  { %3363 = vadd.xlane.f32.xlu1 %v8513_v44  ;;  %v8528_v19 = vpop.eup %5282  ;;  %5292 = vpow2.f32 %v3131_v13  ;;  %v3137_v8 = vmul.f32 1.442695, %v2988_v49  ;;  %v8574_v47 = vpop.permute.xlu1 %2905 }
 0x92e   :  { %5294 = vpow2.f32 %v3123_v51  ;;  %v2987_v51 = vsub.f32 %v11292_v35, %v8081_v62  ;;  %v3143_v49 = vmul.f32 1.442695, %v2991_v2  ;;  %v11295_v62 = vld [vmem:[#allocation56_spill] sm:$0xff] }
 0x92f   :  { %v8537_v6 = vpop.eup %5284  ;;  %5296 = vpow2.f32 %v3137_v8  ;;  %v11294_v8 = vld [vmem:[#allocation138_spill] sm:$0xff] }
 0x930   :  { %11286 = vst [vmem:[#allocation19_spill] sm:$0xff] %v8537_v6  ;;  %v8540_v18 = vpop.eup %5286  ;;  %5298 = vpow2.f32 %v3129_v10  ;;  %v3135_v16 = vmul.f32 1.442695, %v2987_v51  ;;  %v2994_v20 = vsub.f32 %v11294_v8, %v8111_v50  ;;  %v2990_v10 = vsub.f32 %v11295_v62, %v8091_v43  ;;  %v11298_v50 = vld [vmem:[#allocation57_spill] sm:$0xff] }
 0x931   :  { %3589 = vadd.xlane.f32.xlu0 %v8520_v60  ;;  %v8543_v3 = vpop.eup %5288  ;;  %v8550_v26 = vpop.xlane.xlu0 %3397  ;;  %5300 = vpow2.f32 %v3143_v49  ;;  %v2997_v49 = vsub.f32 %v11298_v50, %v8121_v36  ;;  %v11299_v43 = vld [vmem:[#allocation137_spill] sm:$0xff] }
 0x932   :  { %11289 = vst [vmem:[#allocation24_spill] sm:$0xff] %v8550_v26  ;;  %v8552_v37 = vpop.eup %5290  ;;  %5302 = vpow2.f32 %v3135_v16  ;;  %v3149_v56 = vmul.f32 1.442695, %v2994_v20  ;;  %v3141_v35 = vmul.f32 1.442695, %v2990_v10  ;;  %v2993_v20 = vsub.f32 %v11299_v43, %v8101_v4  ;;  %v11302_v4 = vld [vmem:[#allocation139_spill] sm:$0xff] }
 0x933   :  { %3377 = vadd.xlane.f32.xlu2 %v8523_v5  ;;  %11290 = vst [vmem:[#allocation25_spill] sm:$0xff] %v8552_v37  ;;  %v8555_v25 = vpop.eup %5292  ;;  %v3155_v16 = vmul.f32 1.442695, %v2997_v49 }
 0x934   :  { %v8558_v13 = vpop.eup %5294  ;;  %5304 = vpow2.f32 %v3149_v56  ;;  %v3147_v10 = vmul.f32 1.442695, %v2993_v20  ;;  %v11300_v56 = vld [vmem:[#allocation62_spill] sm:$0xff] }
 0x935   :  { %3369 = vadd.xlane.f32.xlu1 %v8528_v19  ;;  %5306 = vpow2.f32 %v3141_v35  ;;  %v3000_v60 = vsub.f32 %v11300_v56, %v8131_v12  ;;  %v2996_v35 = vsub.f32 %v11302_v4, %v8119_v41  ;;  %v11304_v12 = vld [vmem:[#allocation65_spill] sm:$0xff] }
 0x936   :  { %5308 = vpow2.f32 %v3155_v16  ;;  %v3003_v16 = vsub.f32 %v11304_v12, %v8143_v53  ;;  %v11308_v53 = vld [vmem:[#allocation68_spill] sm:$0xff] }
 0x937   :  { %5310 = vpow2.f32 %v3147_v10  ;;  %v3161_v49 = vmul.f32 1.442695, %v3000_v60  ;;  %v3153_v20 = vmul.f32 1.442695, %v2996_v35  ;;  %v11305_v10 = vld [vmem:[#allocation60_spill] sm:$0xff]  ;;  %v3006_v12 = vsub.f32 %v11308_v53, %v8422_v1  ;;  %v11315_v53 = vld [vmem:[#allocation70_spill] sm:$0xff] }
 0x938   :  { %v3167_v60 = vmul.f32 1.442695, %v3003_v16 }
 0x939   :  { %3595 = vadd.xlane.f32.xlu0 %v8537_v6  ;;  %v8565_v33 = vpop.xlane.xlu0 %3403  ;;  %v8567_v6 = vpop.eup %5296  ;;  %5312 = vpow2.f32 %v3161_v49 }
 0x93a   :  { %11293 = vst [vmem:[#allocation27_spill] sm:$0xff] %v8565_v33  ;;  %v8570_v26 = vpop.eup %5298  ;;  %5314 = vpow2.f32 %v3153_v20 }
 0x93b   :  { %3383 = vadd.xlane.f32.xlu2 %v8540_v18  ;;  %v8579_v2 = vpop.eup %5300  ;;  %5316 = vpow2.f32 %v3167_v60  ;;  %v11313_v60 = vld [vmem:[#allocation76_spill] sm:$0xff] }
 0x93c   :  { %11296 = vst [vmem:[#allocation34_spill] sm:$0xff] %v8579_v2  ;;  %v8584_v33 = vpop.eup %5302 }
 0x93d   :  { %3375 = vadd.xlane.f32.xlu1 %v8543_v3  ;;  %v8588_v8 = vpop.permute.xlu1 %2923  ;;  %v8593_v62 = vpop.eup %5304 }
 0x941   :  { %3601 = vadd.xlane.f32.xlu0 %v8552_v37  ;;  %v8581_v51 = vpop.xlane.xlu0 %3409 }
 0x942   :  { %11297 = vst [vmem:[#allocation29_spill] sm:$0xff] %v8581_v51  ;;  %v8596_v51 = vpop.eup %5306 }
 0x943   :  { %3389 = vadd.xlane.f32.xlu2 %v8555_v25  ;;  %v8607_v43 = vpop.eup %5308 }
 0x944   :  { %11303 = vst [vmem:[#allocation21_spill] sm:$0xff] %v8607_v43  ;;  %v8610_v0 = vpop.eup %5310 }
 0x945   :  { %3381 = vadd.xlane.f32.xlu1 %v8558_v13  ;;  %v8621_v4 = vpop.eup %5312 }
 0x946   :  { %11307 = vst [vmem:[#allocation28_spill] sm:$0xff] %v8621_v4  ;;  %v8624_v49 = vpop.eup %5314 }
 0x949   :  { %v8600_v36 = vpop.xlane.xlu0 %3415 }
 0x94a   :  { %11301 = vst [vmem:[#allocation31_spill] sm:$0xff] %v8600_v36  ;;  %v2999_v36 = vsub.f32 %v11305_v10, %v8133_v9  ;;  %v11309_v9 = vld [vmem:[#allocation140_spill] sm:$0xff]  ;;  %v11310_v10 = vld [vmem:[#allocation59_spill] sm:$0xff] }
 0x94b   :  { %3395 = vadd.xlane.f32.xlu2 %v8567_v6  ;;  %v3002_v20 = vsub.f32 %v11309_v9, %v8145_v40  ;;  %v5187_v40 = vld [vmem:[%s10305_s6] ss:$0 sm:$0xff]  ;;  %v8647_v9 = vpop.permute.xlu2 %2941  ;;  %s5583_s6 = smov [#allocation14]  }
 0x94c   :  { %v3159_v35 = vmul.f32 1.442695, %v2999_v36  ;;  %s4805_s23 = sshll.u32 %s5583_s6, 4  ;;  %s4806_s23 = int_to_ptr.vmem [resolvable:$true] %s4805_s23 }
 0x94d   :  { %3387 = vadd.xlane.f32.xlu1 %v8570_v26  ;;  %v8602_v50 = vpop.permute.xlu1 %2935 }
 0x94e   :  { %5318 = vpow2.f32 %v3159_v35  ;;  %v3009_v35 = vsub.f32 %v11313_v60, %v8169_v28 }
 0x951   :  { %v8619_v41 = vpop.xlane.xlu0 %3421 }
 0x952   :  { %11306 = vst [vmem:[#allocation33_spill] sm:$0xff] %v8619_v41  ;;  %v3173_v41 = vmul.f32 1.442695, %v3006_v12 }
 0x953   :  { %3401 = vadd.xlane.f32.xlu2 %v8579_v2  ;;  %v8634_v2 = vpop.eup %5316 }
 0x954   :  { %11312 = vst [vmem:[#allocation125_spill] sm:$0xff] %v8634_v2  ;;  %v8637_v1 = vpop.eup %5318 }
 0x955   :  { %3393 = vadd.xlane.f32.xlu1 %v8584_v33 }
 0x959   :  { %v8632_v36 = vpop.xlane.xlu0 %3427 }
 0x95a   :  { %11311 = vst [vmem:[#allocation32_spill] sm:$0xff] %v8632_v36 }
 0x95b   :  { %3407 = vadd.xlane.f32.xlu2 %v8593_v62 }
 0x95d   :  { %3399 = vadd.xlane.f32.xlu1 %v8596_v51  ;;  %v8614_v56 = vpop.permute.xlu1 %2953 }
 0x961   :  { %v8657_v60 = vpop.xlane.xlu0 %3433 }
 0x962   :  { %11319 = vst [vmem:[#allocation47_spill] sm:$0xff] %v8657_v60 }
 0x963   :  { %3413 = vadd.xlane.f32.xlu2 %v8607_v43 }
 0x965   :  { %3405 = vadd.xlane.f32.xlu1 %v8610_v0 }
 0x969   :  { %v8681_v43 = vpop.xlane.xlu0 %3439 }
 0x96a   :  { %11326 = vst [vmem:[#allocation54_spill] sm:$0xff] %v8681_v43 }
 0x96b   :  { %3419 = vadd.xlane.f32.xlu2 %v8621_v4  ;;  %v3165_v4 = vmul.f32 1.442695, %v3002_v20  ;;  %v3179_v20 = vmul.f32 1.442695, %v3009_v35 }
 0x96d   :  { %3411 = vadd.xlane.f32.xlu1 %v8624_v49  ;;  %v2966_v39 = vpop.permute.xlu1 %2965 }
 0x96e   :  { %v3094_v16 = vsub.f32 %v11310_v10, %v2966_v39  ;;  %v11314_v39 = vld [vmem:[#allocation200_spill] sm:$0xff]  ;;  %v11317_v10 = vld [vmem:[#allocation99_spill] sm:$0xff] }
 0x96f   :  { %v3005_v12 = vsub.f32 %v11315_v53, %v11314_v39  ;;  %v11321_v39 = vld [vmem:[#allocation77_spill] sm:$0xff] }
 0x970   :  { %v3349_v37 = vmul.f32 1.442695, %v3094_v16  ;;  %v8652_v16 = vadd.f32 %v5187_v40, %v11317_v10  ;;  %v11322_v40 = vld [vmem:[#allocation220_spill] sm:$0xff]  ;;  %v11323_v10 = vld [vmem:[#allocation73_spill] sm:$0xff] }
 0x972   :  { %5320 = vpow2.f32 %v3349_v37  ;;  %v8665_v35 = vperm.slane %v8652_v16, 0 }
 0x973   :  { %3425 = vadd.xlane.f32.xlu2 %v8634_v2  ;;  %5322 = vpow2.f32 %v3173_v41  ;;  %v3171_v41 = vmul.f32 1.442695, %v3005_v12  ;;  %v8670_v12 = vpop.permute.xlu2 %2959 }
 0x974   :  { %5324 = vpow2.f32 %v3165_v4  ;;  %v11320_v4 = vld [vmem:[#allocation74_spill] sm:$0xff]  ;;  %v4023_v60 = vmul.f32 %v8497_v21, %v8665_v35 }
 0x975   :  { %3417 = vadd.xlane.f32.xlu1 %v8637_v1  ;;  %5326 = vpow2.f32 %v3179_v20  ;;  %v3012_v53 = vsub.f32 %v11321_v39, %v11320_v4  ;;  %v11325_v39 = vld [vmem:[#allocation144_spill] sm:$0xff]  ;;  %v11327_v21 = vld [vmem:[#allocation142_spill] sm:$0xff] }
 0x976   :  { %5328 = vpow2.f32 %v3171_v41  ;;  %v3015_v41 = vsub.f32 %v11325_v39, %v8185_v23  ;;  %v11331_v39 = vld [vmem:[#allocation143_spill] sm:$0xff] }
 0x978   :  { %v8649_v37 = vpop.eup %5320 }
 0x979   :  { %11316 = vst [vmem:[#allocation43_spill] sm:$0xff] %v8649_v37  ;;  %3607 = vadd.xlane.f32.xlu0 %v8649_v37  ;;  %v8655_v28 = vpop.eup %5322  ;;  %v3008_v37 = vsub.f32 %v11323_v10, %v11322_v40  ;;  %v3191_v40 = vmul.f32 1.442695, %v3015_v41  ;;  %v8702_v41 = vpop.xlane.xlu0 %3445 }
 0x97a   :  { %11318 = vst [vmem:[#allocation45_spill] sm:$0xff] %v8655_v28  ;;  %v8660_v36 = vpop.eup %5324 }
 0x97b   :  { %3431 = vadd.xlane.f32.xlu2 %v8655_v28  ;;  %v3185_v28 = vmul.f32 1.442695, %v3012_v53  ;;  %v8674_v20 = vpop.eup %5326  ;;  %v3177_v2 = vmul.f32 1.442695, %v3008_v37  ;;  %v3011_v53 = vsub.f32 %v11327_v21, %v8436_v14  ;;  %v4026_v37 = vmul.f32 %v8513_v44, %v8665_v35  ;;  %v11330_v14 = vld [vmem:[#allocation109_spill] sm:$0xff]  ;;  %11333 = vst [vmem:[#allocation63_spill] sm:$0xff] %v8702_v41 }
 0x97c   :  { %11324 = vst [vmem:[#allocation50_spill] sm:$0xff] %v8674_v20  ;;  %v8677_v4 = vpop.eup %5328  ;;  %v3014_v21 = vsub.f32 %v11331_v39, %v11330_v14  ;;  %v11337_v14 = vld [vmem:[#allocation223_spill] sm:$0xff]  ;;  %v11338_v39 = vld [vmem:[#allocation145_spill] sm:$0xff] }
 0x97d   :  { %3423 = vadd.xlane.f32.xlu1 %v8660_v36  ;;  %5330 = vpow2.f32 %v3185_v28  ;;  %v3017_v41 = vsub.f32 %v11338_v39, %v11337_v14 }
 0x97e   :  { %5332 = vpow2.f32 %v3177_v2  ;;  %v11329_v2 = vld [vmem:[#allocation36_spill] sm:$0xff] }
 0x97f   :  { %5334 = vpow2.f32 %v3191_v40  ;;  %v3018_v28 = vsub.f32 %v11329_v2, %v8195_v58  ;;  %v3189_v40 = vmul.f32 1.442695, %v3014_v21  ;;  %v11336_v2 = vld [vmem:[#allocation149_spill] sm:$0xff] }
 0x981   :  { %4153 = vadd.xlane.f32.xlu0 %v4023_v60 }
 0x983   :  { %3437 = vadd.xlane.f32.xlu2 %v8674_v20  ;;  %v8690_v10 = vpop.eup %5330  ;;  %v3183_v20 = vmul.f32 1.442695, %v3011_v53  ;;  %v4029_v53 = vmul.f32 %v8528_v19, %v8665_v35 }
 0x984   :  { %11328 = vst [vmem:[#allocation58_spill] sm:$0xff] %v8690_v10  ;;  %v8693_v23 = vpop.eup %5332 }
 0x985   :  { %3429 = vadd.xlane.f32.xlu1 %v8677_v4  ;;  %5336 = vpow2.f32 %v3183_v20  ;;  %v11335_v20 = vld [vmem:[#allocation167_spill] sm:$0xff] }
 0x986   :  { %v8686_v60 = vpop.xlane.xlu2 %3353  ;;  %v3021_v43 = vsub.f32 %v11336_v2, %v11335_v20  ;;  %v11342_v20 = vld [vmem:[#allocation152_spill] sm:$0xff] }
 0x987   :  { %v3024_v2 = vsub.f32 %v11342_v20, %v8246_v7 }
 0x988   :  { %v3203_v21 = vmul.f32 1.442695, %v3021_v43  ;;  %v11344_v43 = vld [vmem:[#allocation146_spill] sm:$0xff] }
 0x989   :  { %4159 = vadd.xlane.f32.xlu0 %v4026_v37  ;;  %v3197_v37 = vmul.f32 1.442695, %v3018_v28  ;;  %v4032_v28 = vmul.f32 %v8543_v3, %v8665_v35  ;;  %v11343_v3 = vld [vmem:[#allocation225_spill] sm:$0xff] }
 0x98a   :  { %v3020_v14 = vsub.f32 %v11344_v43, %v11343_v3 }
 0x98b   :  { %3443 = vadd.xlane.f32.xlu2 %v8690_v10  ;;  %v8706_v10 = vpop.eup %5334  ;;  %5338 = vpow2.f32 %v3197_v37  ;;  %v3195_v37 = vmul.f32 1.442695, %v3017_v41  ;;  %v3209_v41 = vmul.f32 1.442695, %v3024_v2  ;;  %v11350_v2 = vld [vmem:[#allocation187_spill] sm:$0xff] }
 0x98c   :  { %11334 = vst [vmem:[#allocation64_spill] sm:$0xff] %v8706_v10  ;;  %v8709_v58 = vpop.eup %5336  ;;  %5340 = vpow2.f32 %v3189_v40  ;;  %v3201_v7 = vmul.f32 1.442695, %v3020_v14 }
 0x98d   :  { %3435 = vadd.xlane.f32.xlu1 %v8693_v23  ;;  %5342 = vpow2.f32 %v3203_v21 }
 0x98e   :  { %v8700_v44 = vpop.xlane.xlu2 %3359  ;;  %5344 = vpow2.f32 %v3195_v37  ;;  %v11349_v37 = vld [vmem:[#allocation154_spill] sm:$0xff] }
 0x98f   :  { %11332 = vst [vmem:[#allocation61_spill] sm:$0xff] %v8700_v44  ;;  %5346 = vpow2.f32 %v3209_v41  ;;  %v3027_v43 = vsub.f32 %v11349_v37, %v8253_v45  ;;  %v11356_v37 = vld [vmem:[#allocation156_spill] sm:$0xff] }
 0x990   :  { %5348 = vpow2.f32 %v3201_v7  ;;  %v11355_v7 = vld [vmem:[#allocation246_spill] sm:$0xff] }
 0x991   :  { %4165 = vadd.xlane.f32.xlu0 %v4029_v53  ;;  %v8724_v44 = vpop.eup %5338 }
 0x992   :  { %11341 = vst [vmem:[#allocation75_spill] sm:$0xff] %v8724_v44  ;;  %v8727_v40 = vpop.eup %5340 }
 0x993   :  { %3449 = vadd.xlane.f32.xlu2 %v8706_v10  ;;  %v8722_v10 = vpop.xlane.xlu0 %3451  ;;  %v8741_v21 = vpop.eup %5342 }
 0x994   :  { %11340 = vst [vmem:[#allocation72_spill] sm:$0xff] %v8722_v10  ;;  %v8746_v3 = vpop.eup %5344  ;;  %v3030_v10 = vsub.f32 %v11356_v37, %v11355_v7  ;;  %v11363_v37 = vld [vmem:[#allocation191_spill] sm:$0xff] }
 0x995   :  { %3441 = vadd.xlane.f32.xlu1 %v8709_v58  ;;  %11347 = vst [vmem:[#allocation81_spill] sm:$0xff] %v8741_v21  ;;  %v8761_v41 = vpop.eup %5346 }
 0x996   :  { %v8716_v19 = vpop.xlane.xlu2 %3365  ;;  %11354 = vst [vmem:[#allocation90_spill] sm:$0xff] %v8761_v41 }
 0x997   :  { %11339 = vst [vmem:[#allocation67_spill] sm:$0xff] %v8716_v19 }
 0x998   :  { %v8720_v53 = vpop.xlane.xlu1 %3357 }
 0x999   :  { %4171 = vadd.xlane.f32.xlu0 %v4032_v28  ;;  %v4035_v28 = vmul.f32 %v8558_v13, %v8665_v35 }
 0x99b   :  { %3455 = vadd.xlane.f32.xlu2 %v8724_v44  ;;  %v3998_v44 = vrot.slane %v8652_v16, 1  ;;  %v8743_v20 = vpop.xlane.xlu0 %3457 }
 0x99c   :  { %11348 = vst [vmem:[#allocation83_spill] sm:$0xff] %v8743_v20 }
 0x99d   :  { %3447 = vadd.xlane.f32.xlu1 %v8727_v40  ;;  %v8750_v13 = vperm.slane %v3998_v44, 0  ;;  %v8764_v44 = vpop.eup %5348 }
 0x99e   :  { %v8734_v39 = vpop.xlane.xlu2 %3371 }
 0x99f   :  { %11345 = vst [vmem:[#allocation78_spill] sm:$0xff] %v8734_v39  ;;  %v4038_v14 = vmul.f32 %v8570_v26, %v8750_v13  ;;  %v11358_v26 = vld [vmem:[#allocation82_spill] sm:$0xff] }
 0x9a0   :  { %v8738_v19 = vpop.xlane.xlu1 %3363 }
 0x9a1   :  { %11346 = vst [vmem:[#allocation79_spill] sm:$0xff] %v8738_v19  ;;  %4177 = vadd.xlane.f32.xlu0 %v4035_v28  ;;  %v11351_v28 = vld [vmem:[#allocation150_spill] sm:$0xff] }
 0x9a2   :  { %v3023_v39 = vsub.f32 %v11351_v28, %v11350_v2 }
 0x9a3   :  { %3461 = vadd.xlane.f32.xlu2 %v8741_v21  ;;  %v3215_v21 = vmul.f32 1.442695, %v3027_v43  ;;  %v8768_v2 = vpop.xlane.xlu0 %3463  ;;  %v11359_v43 = vld [vmem:[#allocation153_spill] sm:$0xff] }
 0x9a4   :  { %v3207_v45 = vmul.f32 1.442695, %v3023_v39  ;;  %11357 = vst [vmem:[#allocation92_spill] sm:$0xff] %v8768_v2  ;;  %v3026_v28 = vsub.f32 %v11359_v43, %v11358_v26  ;;  %v4041_v39 = vmul.f32 %v8584_v33, %v8750_v13  ;;  %v11364_v26 = vld [vmem:[#allocation159_spill] sm:$0xff] }
 0x9a5   :  { %3453 = vadd.xlane.f32.xlu1 %v8746_v3  ;;  %5350 = vpow2.f32 %v3215_v21  ;;  %v11365_v43 = vld [vmem:[#allocation227_spill] sm:$0xff] }
 0x9a6   :  { %v8755_v19 = vpop.xlane.xlu2 %3377  ;;  %5352 = vpow2.f32 %v3207_v45  ;;  %v3213_v21 = vmul.f32 1.442695, %v3026_v28  ;;  %v3033_v45 = vsub.f32 %v11364_v26, %v11363_v37  ;;  %v11366_v33 = vld [vmem:[#allocation155_spill] sm:$0xff]  ;;  %v4044_v28 = vmul.f32 %v8596_v51, %v8750_v13  ;;  %v11371_v26 = vld [vmem:[#allocation148_spill] sm:$0xff]  ;;  %v11374_v51 = vld [vmem:[#allocation157_spill] sm:$0xff] }
 0x9a7   :  { %11352 = vst [vmem:[#allocation84_spill] sm:$0xff] %v8755_v19 }
 0x9a8   :  { %v8759_v20 = vpop.xlane.xlu1 %3369 }
 0x9a9   :  { %11353 = vst [vmem:[#allocation87_spill] sm:$0xff] %v8759_v20  ;;  %4183 = vadd.xlane.f32.xlu0 %v4038_v14 }
 0x9ab   :  { %3467 = vadd.xlane.f32.xlu2 %v8761_v41  ;;  %v3221_v41 = vmul.f32 1.442695, %v3030_v10  ;;  %v8779_v20 = vpop.eup %5350  ;;  %v3029_v10 = vsub.f32 %v11366_v33, %v11365_v43  ;;  %v11372_v43 = vld [vmem:[#allocation162_spill] sm:$0xff] }
 0x9ac   :  { %11362 = vst [vmem:[#allocation95_spill] sm:$0xff] %v8779_v20  ;;  %v8782_v7 = vpop.eup %5352  ;;  %v3036_v33 = vsub.f32 %v11372_v43, %v11371_v26  ;;  %v11380_v43 = vld [vmem:[#allocation160_spill] sm:$0xff] }
 0x9ad   :  { %3459 = vadd.xlane.f32.xlu1 %v8764_v44  ;;  %5354 = vpow2.f32 %v3221_v41  ;;  %v3219_v37 = vmul.f32 1.442695, %v3029_v10 }
 0x9ae   :  { %v8773_v14 = vpop.xlane.xlu2 %3383  ;;  %5356 = vpow2.f32 %v3213_v21  ;;  %v3233_v10 = vmul.f32 1.442695, %v3036_v33 }
 0x9af   :  { %11360 = vst [vmem:[#allocation93_spill] sm:$0xff] %v8773_v14 }
 0x9b0   :  { %v8777_v19 = vpop.xlane.xlu1 %3375 }
 0x9b1   :  { %11361 = vst [vmem:[#allocation94_spill] sm:$0xff] %v8777_v19  ;;  %4189 = vadd.xlane.f32.xlu0 %v4041_v39  ;;  %v8791_v39 = vpop.xlane.xlu0 %3469 }
 0x9b2   :  { %11368 = vst [vmem:[#allocation102_spill] sm:$0xff] %v8791_v39  ;;  %v11373_v39 = vld [vmem:[#allocation104_spill] sm:$0xff] }
 0x9b3   :  { %3473 = vadd.xlane.f32.xlu2 %v8779_v20  ;;  %v3227_v20 = vmul.f32 1.442695, %v3033_v45  ;;  %v8797_v41 = vpop.eup %5354  ;;  %v3032_v45 = vsub.f32 %v11374_v51, %v11373_v39  ;;  %v11378_v39 = vld [vmem:[#allocation165_spill] sm:$0xff] }
 0x9b4   :  { %11370 = vst [vmem:[#allocation106_spill] sm:$0xff] %v8797_v41  ;;  %v8800_v21 = vpop.eup %5356  ;;  %v3039_v26 = vsub.f32 %v11378_v39, %v8310_v11 }
 0x9b5   :  { %3465 = vadd.xlane.f32.xlu1 %v8782_v7  ;;  %5358 = vpow2.f32 %v3227_v20  ;;  %v3225_v20 = vmul.f32 1.442695, %v3032_v45 }
 0x9b6   :  { %v8789_v14 = vpop.xlane.xlu2 %3389  ;;  %5360 = vpow2.f32 %v3219_v37  ;;  %v3239_v45 = vmul.f32 1.442695, %v3039_v26  ;;  %v11386_v26 = vld [vmem:[#allocation211_spill] sm:$0xff] }
 0x9b7   :  { %11367 = vst [vmem:[#allocation97_spill] sm:$0xff] %v8789_v14  ;;  %5362 = vpow2.f32 %v3233_v10 }
 0x9b8   :  { %v8795_v19 = vpop.xlane.xlu1 %3381  ;;  %5364 = vpow2.f32 %v3225_v20  ;;  %v11384_v20 = vld [vmem:[#allocation168_spill] sm:$0xff] }
 0x9b9   :  { %11369 = vst [vmem:[#allocation105_spill] sm:$0xff] %v8795_v19  ;;  %4195 = vadd.xlane.f32.xlu0 %v4044_v28  ;;  %v4047_v28 = vmul.f32 %v8610_v0, %v8750_v13  ;;  %v11379_v0 = vld [vmem:[#allocation208_spill] sm:$0xff]  ;;  %5366 = vpow2.f32 %v3239_v45 }
 0x9ba   :  { %v3035_v33 = vsub.f32 %v11380_v43, %v11379_v0  ;;  %v3042_v43 = vsub.f32 %v11384_v20, %v8314_v31  ;;  %v11392_v20 = vld [vmem:[#allocation170_spill] sm:$0xff] }
 0x9bb   :  { %3479 = vadd.xlane.f32.xlu2 %v8797_v41  ;;  %v8813_v41 = vpop.xlane.xlu0 %3475  ;;  %v8815_v14 = vpop.eup %5358 }
 0x9bc   :  { %11376 = vst [vmem:[#allocation108_spill] sm:$0xff] %v8813_v41  ;;  %v8818_v37 = vpop.eup %5360  ;;  %v3231_v11 = vmul.f32 1.442695, %v3035_v33 }
 0x9bd   :  { %3471 = vadd.xlane.f32.xlu1 %v8800_v21  ;;  %11377 = vst [vmem:[#allocation112_spill] sm:$0xff] %v8815_v14  ;;  %v8832_v10 = vpop.eup %5362 }
 0x9be   :  { %v8807_v2 = vpop.xlane.xlu2 %3395  ;;  %11382 = vst [vmem:[#allocation116_spill] sm:$0xff] %v8832_v10  ;;  %v8837_v0 = vpop.eup %5364  ;;  %5368 = vpow2.f32 %v3231_v11 }
 0x9bf   :  { %11375 = vst [vmem:[#allocation107_spill] sm:$0xff] %v8807_v2  ;;  %v8852_v45 = vpop.eup %5366 }
 0x9c0   :  { %v8811_v19 = vpop.xlane.xlu1 %3387  ;;  %11390 = vst [vmem:[#allocation42_spill] sm:$0xff] %v8852_v45 }
 0x9c1   :  { %4201 = vadd.xlane.f32.xlu0 %v4047_v28  ;;  %v4050_v28 = vmul.f32 %v8624_v49, %v8750_v13 }
 0x9c3   :  { %3485 = vadd.xlane.f32.xlu2 %v8815_v14  ;;  %v3999_v14 = vrot.slane %v8652_v16, 2  ;;  %v8834_v39 = vpop.xlane.xlu0 %3481 }
 0x9c4   :  { %11383 = vst [vmem:[#allocation117_spill] sm:$0xff] %v8834_v39  ;;  %v8857_v11 = vpop.eup %5368 }
 0x9c5   :  { %3477 = vadd.xlane.f32.xlu1 %v8818_v37  ;;  %v8841_v49 = vperm.slane %v3999_v14, 0 }
 0x9c6   :  { %v8825_v51 = vpop.xlane.xlu2 %3401 }
 0x9c7   :  { %11381 = vst [vmem:[#allocation115_spill] sm:$0xff] %v8825_v51  ;;  %v4053_v33 = vmul.f32 %v8637_v1, %v8841_v49  ;;  %v11393_v1 = vld [vmem:[#allocation103_spill] sm:$0xff] }
 0x9c8   :  { %v8829_v2 = vpop.xlane.xlu1 %3393  ;;  %11385 = vst [vmem:[#allocation118_spill] sm:$0xff] %v8841_v49 }
 0x9c9   :  { %4207 = vadd.xlane.f32.xlu0 %v4050_v28  ;;  %v11387_v28 = vld [vmem:[#allocation163_spill] sm:$0xff] }
 0x9ca   :  { %v3038_v51 = vsub.f32 %v11387_v28, %v11386_v26  ;;  %v3045_v26 = vsub.f32 %v11392_v20, %v8320_v59 }
 0x9cb   :  { %3491 = vadd.xlane.f32.xlu2 %v8832_v10  ;;  %v3245_v10 = vmul.f32 1.442695, %v3042_v43  ;;  %v8854_v14 = vpop.xlane.xlu0 %3487  ;;  %v11394_v43 = vld [vmem:[#allocation166_spill] sm:$0xff] }
 0x9cc   :  { %v3237_v31 = vmul.f32 1.442695, %v3038_v51  ;;  %11391 = vst [vmem:[#allocation126_spill] sm:$0xff] %v8854_v14  ;;  %v3041_v28 = vsub.f32 %v11394_v43, %v11393_v1  ;;  %v4056_v51 = vmul.f32 %v8660_v36, %v8841_v49  ;;  %v11399_v36 = vld [vmem:[#allocation229_spill] sm:$0xff] }
 0x9cd   :  { %3483 = vadd.xlane.f32.xlu1 %v8837_v0  ;;  %5370 = vpow2.f32 %v3245_v10 }
 0x9ce   :  { %v8846_v41 = vpop.xlane.xlu2 %3407  ;;  %5372 = vpow2.f32 %v3237_v31  ;;  %v3243_v14 = vmul.f32 1.442695, %v3041_v28  ;;  %v11398_v31 = vld [vmem:[#allocation173_spill] sm:$0xff]  ;;  %v4059_v28 = vmul.f32 %v8677_v4, %v8841_v49 }
 0x9cf   :  { %11388 = vst [vmem:[#allocation119_spill] sm:$0xff] %v8846_v41  ;;  %v3251_v41 = vmul.f32 1.442695, %v3045_v26  ;;  %v3048_v20 = vsub.f32 %v11398_v31, %v8326_v17  ;;  %v11400_v26 = vld [vmem:[#allocation169_spill] sm:$0xff] }
 0x9d0   :  { %v8850_v39 = vpop.xlane.xlu1 %3399  ;;  %v3044_v1 = vsub.f32 %v11400_v26, %v11399_v36  ;;  %v11405_v31 = vld [vmem:[#allocation177_spill] sm:$0xff] }
 0x9d1   :  { %11389 = vst [vmem:[#allocation120_spill] sm:$0xff] %v8850_v39  ;;  %4213 = vadd.xlane.f32.xlu0 %v4053_v33  ;;  %5374 = vpow2.f32 %v3251_v41  ;;  %v11406_v4 = vld [vmem:[#allocation141_spill] sm:$0xff] }
 0x9d2   :  { %5376 = vpow2.f32 %v3243_v14  ;;  %v3249_v41 = vmul.f32 1.442695, %v3044_v1  ;;  %v11404_v14 = vld [vmem:[#allocation181_spill] sm:$0xff]  ;;  %v4062_v1 = vmul.f32 %v8693_v23, %v8841_v49 }
 0x9d3   :  { %3497 = vadd.xlane.f32.xlu2 %v8852_v45  ;;  %v8870_v45 = vpop.eup %5370  ;;  %v8872_v59 = vpop.xlane.xlu0 %3493 }
 0x9d4   :  { %11397 = vst [vmem:[#allocation124_spill] sm:$0xff] %v8870_v45  ;;  %v8875_v10 = vpop.eup %5372 }
 0x9d5   :  { %3489 = vadd.xlane.f32.xlu1 %v8857_v11 }
 0x9d6   :  { %v8864_v33 = vpop.xlane.xlu2 %3413 }
 0x9d7   :  { %11395 = vst [vmem:[#allocation121_spill] sm:$0xff] %v8864_v33 }
 0x9d8   :  { %v8868_v39 = vpop.xlane.xlu1 %3405 }
 0x9d9   :  { %11396 = vst [vmem:[#allocation128_spill] sm:$0xff] %v8868_v39  ;;  %4219 = vadd.xlane.f32.xlu0 %v4056_v51  ;;  %v3257_v51 = vmul.f32 1.442695, %v3048_v20  ;;  %v3051_v39 = vsub.f32 %v11405_v31, %v11404_v14  ;;  %v11407_v20 = vld [vmem:[#allocation171_spill] sm:$0xff] }
 0x9da   :  { %v3047_v26 = vsub.f32 %v11407_v20, %v11406_v4  ;;  %v11412_v4 = vld [vmem:[#allocation192_spill] sm:$0xff]  ;;  %v11413_v20 = vld [vmem:[#allocation174_spill] sm:$0xff] }
 0x9db   :  { %3503 = vadd.xlane.f32.xlu2 %v8870_v45  ;;  %v8888_v45 = vpop.eup %5374  ;;  %5378 = vpow2.f32 %v3257_v51  ;;  %v8895_v36 = vpop.xlane.xlu0 %3499  ;;  %v3050_v23 = vsub.f32 %v11413_v20, %v11412_v4  ;;  %v11418_v20 = vld [vmem:[#allocation212_spill] sm:$0xff] }
 0x9dc   :  { %11403 = vst [vmem:[#allocation122_spill] sm:$0xff] %v8888_v45  ;;  %v8891_v17 = vpop.eup %5376  ;;  %5380 = vpow2.f32 %v3249_v41  ;;  %v3255_v51 = vmul.f32 1.442695, %v3047_v26  ;;  %v11411_v41 = vld [vmem:[#allocation179_spill] sm:$0xff]  ;;  %v4065_v26 = vmul.f32 %v8709_v58, %v8841_v49  ;;  %v11419_v58 = vld [vmem:[#allocation178_spill] sm:$0xff] }
 0x9dd   :  { %3495 = vadd.xlane.f32.xlu1 %v8875_v10  ;;  %v3054_v31 = vsub.f32 %v11411_v41, %v8371_v24  ;;  %v3261_v24 = vmul.f32 1.442695, %v3050_v23 }
 0x9de   :  { %v8882_v43 = vpop.xlane.xlu2 %3419 }
 0x9df   :  { %11401 = vst [vmem:[#allocation130_spill] sm:$0xff] %v8882_v43 }
 0x9e0   :  { %v8886_v33 = vpop.xlane.xlu1 %3411 }
 0x9e1   :  { %11402 = vst [vmem:[#allocation127_spill] sm:$0xff] %v8886_v33  ;;  %4225 = vadd.xlane.f32.xlu0 %v4059_v28  ;;  %v8906_v43 = vpop.eup %5378 }
 0x9e2   :  { %11410 = vst [vmem:[#allocation129_spill] sm:$0xff] %v8906_v43  ;;  %v8909_v14 = vpop.eup %5380 }
 0x9e3   :  { %3509 = vadd.xlane.f32.xlu2 %v8888_v45  ;;  %v3263_v45 = vmul.f32 1.442695, %v3051_v39 }
 0x9e5   :  { %3501 = vadd.xlane.f32.xlu1 %v8891_v17  ;;  %5382 = vpow2.f32 %v3263_v45 }
 0x9e6   :  { %v8900_v28 = vpop.xlane.xlu2 %3425  ;;  %5384 = vpow2.f32 %v3255_v51  ;;  %v11417_v51 = vld [vmem:[#allocation182_spill] sm:$0xff] }
 0x9e7   :  { %11408 = vst [vmem:[#allocation123_spill] sm:$0xff] %v8900_v28  ;;  %v3057_v4 = vsub.f32 %v11417_v51, %v8375_v57 }
 0x9e8   :  { %v8904_v33 = vpop.xlane.xlu1 %3417 }
 0x9e9   :  { %11409 = vst [vmem:[#allocation132_spill] sm:$0xff] %v8904_v33  ;;  %4231 = vadd.xlane.f32.xlu0 %v4062_v1  ;;  %v8918_v1 = vpop.xlane.xlu0 %3505  ;;  %v3275_v23 = vmul.f32 1.442695, %v3057_v4  ;;  %v11426_v4 = vld [vmem:[#allocation38_spill] sm:$0xff] }
 0x9eb   :  { %3515 = vadd.xlane.f32.xlu2 %v8906_v43  ;;  %v3269_v43 = vmul.f32 1.442695, %v3054_v31  ;;  %v8924_v45 = vpop.eup %5382  ;;  %v3053_v31 = vsub.f32 %v11419_v58, %v11418_v20  ;;  %v11424_v20 = vld [vmem:[#allocation114_spill] sm:$0xff] }
 0x9ec   :  { %11416 = vst [vmem:[#allocation131_spill] sm:$0xff] %v8924_v45  ;;  %v8927_v41 = vpop.eup %5384  ;;  %v3060_v58 = vsub.f32 %v11424_v20, %v8381_v15 }
 0x9ed   :  { %3507 = vadd.xlane.f32.xlu1 %v8909_v14  ;;  %5386 = vpow2.f32 %v3269_v43  ;;  %v3267_v51 = vmul.f32 1.442695, %v3053_v31 }
 0x9ee   :  { %v8916_v39 = vpop.xlane.xlu2 %3431  ;;  %5388 = vpow2.f32 %v3261_v24 }
 0x9ef   :  { %11414 = vst [vmem:[#allocation49_spill] sm:$0xff] %v8916_v39  ;;  %5390 = vpow2.f32 %v3275_v23 }
 0x9f0   :  { %v8922_v28 = vpop.xlane.xlu1 %3423  ;;  %5392 = vpow2.f32 %v3267_v51 }
 0x9f1   :  { %11415 = vst [vmem:[#allocation134_spill] sm:$0xff] %v8922_v28  ;;  %4237 = vadd.xlane.f32.xlu0 %v4065_v26  ;;  %v4068_v26 = vmul.f32 %v8727_v40, %v8841_v49  ;;  %v8941_v43 = vpop.xlane.xlu0 %3511 }
 0x9f2   :  { %11422 = vst [vmem:[#allocation133_spill] sm:$0xff] %v8941_v43 }
 0x9f3   :  { %3521 = vadd.xlane.f32.xlu2 %v8924_v45  ;;  %v4000_v45 = vrot.slane %v8652_v16, 3  ;;  %v8943_v57 = vpop.eup %5386 }
 0x9f4   :  { %11423 = vst [vmem:[#allocation48_spill] sm:$0xff] %v8943_v57  ;;  %v8946_v24 = vpop.eup %5388 }
 0x9f5   :  { %3513 = vadd.xlane.f32.xlu1 %v8927_v41  ;;  %v8950_v40 = vperm.slane %v4000_v45, 0  ;;  %v8963_v15 = vpop.eup %5390 }
 0x9f6   :  { %v8934_v39 = vpop.xlane.xlu2 %3437  ;;  %11430 = vst [vmem:[#allocation138_spill] sm:$0xff] %v8963_v15  ;;  %v8966_v23 = vpop.eup %5392 }
 0x9f7   :  { %11420 = vst [vmem:[#allocation51_spill] sm:$0xff] %v8934_v39  ;;  %v11427_v39 = vld [vmem:[#allocation180_spill] sm:$0xff]  ;;  %v4071_v31 = vmul.f32 %v8746_v3, %v8950_v40  ;;  %v11432_v3 = vld [vmem:[#allocation183_spill] sm:$0xff] }
 0x9f8   :  { %v8938_v28 = vpop.xlane.xlu1 %3429  ;;  %11425 = vst [vmem:[#allocation135_spill] sm:$0xff] %v8950_v40  ;;  %v3059_v20 = vsub.f32 %v11432_v3, %v8379_v46  ;;  %v11436_v46 = vld [vmem:[#allocation189_spill] sm:$0xff] }
 0x9f9   :  { %11421 = vst [vmem:[#allocation44_spill] sm:$0xff] %v8938_v28  ;;  %4243 = vadd.xlane.f32.xlu0 %v4068_v26  ;;  %v3056_v28 = vsub.f32 %v11427_v39, %v11426_v4  ;;  %v8961_v33 = vpop.xlane.xlu0 %3517  ;;  %v11431_v39 = vld [vmem:[#allocation185_spill] sm:$0xff]  ;;  %v4074_v4 = vmul.f32 %v8764_v44, %v8950_v40  ;;  %v11437_v44 = vld [vmem:[#allocation184_spill] sm:$0xff] }
 0x9fa   :  { %v3063_v51 = vsub.f32 %v11431_v39, %v8387_v30  ;;  %v3279_v30 = vmul.f32 1.442695, %v3059_v20  ;;  %v11435_v39 = vld [vmem:[#allocation172_spill] sm:$0xff] }
 0x9fb   :  { %3527 = vadd.xlane.f32.xlu2 %v8943_v57  ;;  %v3281_v57 = vmul.f32 1.442695, %v3060_v58  ;;  %v3273_v45 = vmul.f32 1.442695, %v3056_v28  ;;  %v3066_v3 = vsub.f32 %v11436_v46, %v11435_v39 }
 0x9fc   :  { %v3287_v28 = vmul.f32 1.442695, %v3063_v51  ;;  %v3062_v51 = vsub.f32 %v11437_v44, %v8385_v38  ;;  %v11441_v38 = vld [vmem:[#allocation193_spill] sm:$0xff]  ;;  %v4080_v44 = vmul.f32 %v8800_v21, %v8950_v40  ;;  %v11447_v21 = vld [vmem:[#allocation190_spill] sm:$0xff] }
 0x9fd   :  { %3519 = vadd.xlane.f32.xlu1 %v8946_v24  ;;  %5394 = vpow2.f32 %v3281_v57  ;;  %v3293_v20 = vmul.f32 1.442695, %v3066_v3 }
 0x9fe   :  { %v8955_v26 = vpop.xlane.xlu2 %3443  ;;  %5396 = vpow2.f32 %v3273_v45 }
 0x9ff   :  { %11428 = vst [vmem:[#allocation55_spill] sm:$0xff] %v8955_v26  ;;  %5398 = vpow2.f32 %v3287_v28 }
 0xa00   :  { %v8959_v43 = vpop.xlane.xlu1 %3435  ;;  %5400 = vpow2.f32 %v3279_v30  ;;  %v3069_v30 = vsub.f32 %v11441_v38, %v8440_v63 }
 0xa01   :  { %11429 = vst [vmem:[#allocation136_spill] sm:$0xff] %v8959_v43  ;;  %4249 = vadd.xlane.f32.xlu0 %v4071_v31  ;;  %v3285_v43 = vmul.f32 1.442695, %v3062_v51  ;;  %5402 = vpow2.f32 %v3293_v20 }
 0xa02   :  { %v3299_v51 = vmul.f32 1.442695, %v3069_v30  ;;  %v3068_v30 = vsub.f32 %v11447_v21, %v8396_v42  ;;  %v11451_v42 = vld [vmem:[#allocation201_spill] sm:$0xff] }
 0xa03   :  { %3533 = vadd.xlane.f32.xlu2 %v8963_v15  ;;  %v8979_v15 = vpop.xlane.xlu0 %3523  ;;  %v8981_v57 = vpop.eup %5394  ;;  %5404 = vpow2.f32 %v3285_v43  ;;  %v3075_v21 = vsub.f32 %v11451_v42, %v8452_v55 }
 0xa04   :  { %11434 = vst [vmem:[#allocation57_spill] sm:$0xff] %v8981_v57  ;;  %v8984_v45 = vpop.eup %5396  ;;  %5406 = vpow2.f32 %v3299_v51  ;;  %v4001_v51 = vrot.slane %v8652_v16, 4 }
 0xa05   :  { %3525 = vadd.xlane.f32.xlu1 %v8966_v23 }
 0xa06   :  { %v8973_v58 = vpop.xlane.xlu2 %3449 }
 0xa08   :  { %v8977_v31 = vpop.xlane.xlu1 %3441 }
 0xa09   :  { %11433 = vst [vmem:[#allocation56_spill] sm:$0xff] %v8977_v31  ;;  %4255 = vadd.xlane.f32.xlu0 %v4074_v4  ;;  %v4077_v4 = vmul.f32 %v8782_v7, %v8950_v40  ;;  %v11442_v7 = vld [vmem:[#allocation186_spill] sm:$0xff] }
 0xa0a   :  { %v3065_v46 = vsub.f32 %v11442_v7, %v8392_v54  ;;  %v11446_v54 = vld [vmem:[#allocation197_spill] sm:$0xff] }
 0xa0b   :  { %3539 = vadd.xlane.f32.xlu2 %v8981_v57  ;;  %v8997_v57 = vpop.eup %5398  ;;  %v8999_v39 = vpop.xlane.xlu0 %3529  ;;  %v3072_v43 = vsub.f32 %v11446_v54, %v8445_v29  ;;  %v3297_v54 = vmul.f32 1.442695, %v3068_v30 }
 0xa0c   :  { %11440 = vst [vmem:[#allocation139_spill] sm:$0xff] %v8997_v57  ;;  %v9002_v28 = vpop.eup %5400  ;;  %v3291_v20 = vmul.f32 1.442695, %v3065_v46  ;;  %v4083_v46 = vmul.f32 %v8818_v37, %v8950_v40  ;;  %v11453_v37 = vld [vmem:[#allocation164_spill] sm:$0xff] }
 0xa0d   :  { %3531 = vadd.xlane.f32.xlu1 %v8984_v45 }
 0xa0e   :  { %v8991_v26 = vpop.xlane.xlu2 %3455  ;;  %5408 = vpow2.f32 %v3291_v20 }
 0xa0f   :  { %11438 = vst [vmem:[#allocation137_spill] sm:$0xff] %v8991_v26  ;;  %v11589_v26 = vld [vmem:[#allocation72_spill] sm:$0xff] }
 0xa10   :  { %v8995_v31 = vpop.xlane.xlu1 %3447 }
 0xa11   :  { %11439 = vst [vmem:[#allocation62_spill] sm:$0xff] %v8995_v31  ;;  %4261 = vadd.xlane.f32.xlu0 %v4077_v4  ;;  %v9041_v31 = vperm.slane %v4001_v51, 0 }
 0xa13   :  { %3545 = vadd.xlane.f32.xlu2 %v8997_v57  ;;  %v9015_v57 = vpop.eup %5402  ;;  %v9022_v38 = vpop.xlane.xlu0 %3535  ;;  %11452 = vst [vmem:[#allocation200_spill] sm:$0xff] %v9041_v31  ;;  %v4086_v30 = vmul.f32 %v8837_v0, %v9041_v31  ;;  %v11460_v0 = vld [vmem:[#allocation198_spill] sm:$0xff] }
 0xa14   :  { %11445 = vst [vmem:[#allocation68_spill] sm:$0xff] %v9015_v57  ;;  %v9018_v63 = vpop.eup %5404 }
 0xa15   :  { %3537 = vadd.xlane.f32.xlu1 %v9002_v28  ;;  %v9034_v29 = vpop.eup %5406 }
 0xa16   :  { %v9009_v3 = vpop.xlane.xlu2 %3461  ;;  %11450 = vst [vmem:[#allocation76_spill] sm:$0xff] %v9034_v29  ;;  %v9037_v20 = vpop.eup %5408 }
 0xa17   :  { %11443 = vst [vmem:[#allocation65_spill] sm:$0xff] %v9009_v3 }
 0xa18   :  { %v9013_v4 = vpop.xlane.xlu1 %3453 }
 0xa19   :  { %11444 = vst [vmem:[#allocation60_spill] sm:$0xff] %v9013_v4  ;;  %4267 = vadd.xlane.f32.xlu0 %v4080_v44  ;;  %v3305_v44 = vmul.f32 1.442695, %v3072_v43  ;;  %v11454_v43 = vld [vmem:[#allocation194_spill] sm:$0xff] }
 0xa1a   :  { %v3071_v40 = vsub.f32 %v11454_v43, %v11453_v37 }
 0xa1b   :  { %3551 = vadd.xlane.f32.xlu2 %v9015_v57  ;;  %5410 = vpow2.f32 %v3305_v44 }
 0xa1c   :  { %5412 = vpow2.f32 %v3297_v54  ;;  %v3303_v44 = vmul.f32 1.442695, %v3071_v40  ;;  %v11459_v54 = vld [vmem:[#allocation205_spill] sm:$0xff]  ;;  %v4089_v40 = vmul.f32 %v8857_v11, %v9041_v31  ;;  %v11465_v11 = vld [vmem:[#allocation202_spill] sm:$0xff] }
 0xa1d   :  { %3543 = vadd.xlane.f32.xlu1 %v9018_v63  ;;  %v3078_v42 = vsub.f32 %v11459_v54, %v8460_v48  ;;  %v11463_v54 = vld [vmem:[#allocation216_spill] sm:$0xff] }
 0xa1e   :  { %v9027_v7 = vpop.xlane.xlu2 %3467 }
 0xa1f   :  { %11448 = vst [vmem:[#allocation140_spill] sm:$0xff] %v9027_v7  ;;  %v9048_v7 = vpop.xlane.xlu0 %3541 }
 0xa20   :  { %v9031_v57 = vpop.xlane.xlu1 %3459  ;;  %11456 = vst [vmem:[#allocation99_spill] sm:$0xff] %v9048_v7 }
 0xa21   :  { %11449 = vst [vmem:[#allocation59_spill] sm:$0xff] %v9031_v57  ;;  %4273 = vadd.xlane.f32.xlu0 %v4083_v46  ;;  %v9054_v55 = vpop.eup %5410 }
 0xa22   :  { %11458 = vst [vmem:[#allocation77_spill] sm:$0xff] %v9054_v55  ;;  %v9057_v51 = vpop.eup %5412 }
 0xa23   :  { %3557 = vadd.xlane.f32.xlu2 %v9034_v29  ;;  %v3311_v29 = vmul.f32 1.442695, %v3075_v21  ;;  %v3074_v21 = vsub.f32 %v11460_v0, %v8450_v61  ;;  %v11464_v61 = vld [vmem:[#allocation209_spill] sm:$0xff] }
 0xa24   :  { %v3081_v0 = vsub.f32 %v11464_v61, %v11463_v54  ;;  %v11470_v61 = vld [vmem:[#allocation206_spill] sm:$0xff] }
 0xa25   :  { %3549 = vadd.xlane.f32.xlu1 %v9037_v20  ;;  %5414 = vpow2.f32 %v3311_v29  ;;  %v3309_v48 = vmul.f32 1.442695, %v3074_v21  ;;  %v4092_v21 = vmul.f32 %v8875_v10, %v9041_v31  ;;  %v3080_v10 = vsub.f32 %v11470_v61, %v8467_v32  ;;  %v11474_v32 = vld [vmem:[#allocation217_spill] sm:$0xff] }
 0xa26   :  { %v9046_v46 = vpop.xlane.xlu2 %3473  ;;  %5416 = vpow2.f32 %v3303_v44 }
 0xa27   :  { %11455 = vst [vmem:[#allocation70_spill] sm:$0xff] %v9046_v46  ;;  %v9066_v43 = vpop.xlane.xlu0 %3547 }
 0xa28   :  { %v9052_v3 = vpop.xlane.xlu1 %3465 }
 0xa29   :  { %11457 = vst [vmem:[#allocation74_spill] sm:$0xff] %v9052_v3  ;;  %4279 = vadd.xlane.f32.xlu0 %v4086_v30  ;;  %v3317_v30 = vmul.f32 1.442695, %v3078_v42  ;;  %v3077_v42 = vsub.f32 %v11465_v11, %v8458_v34  ;;  %v11469_v34 = vld [vmem:[#allocation213_spill] sm:$0xff]  ;;  %v4095_v11 = vmul.f32 %v8891_v17, %v9041_v31  ;;  %v11475_v17 = vld [vmem:[#allocation88_spill] sm:$0xff] }
 0xa2a   :  { %v3084_v54 = vsub.f32 %v11469_v34, %v8574_v47  ;;  %v3321_v47 = vmul.f32 1.442695, %v3080_v10 }
 0xa2b   :  { %3563 = vadd.xlane.f32.xlu2 %v9054_v55  ;;  %v9072_v29 = vpop.eup %5414  ;;  %5418 = vpow2.f32 %v3317_v30  ;;  %v3315_v30 = vmul.f32 1.442695, %v3077_v42 }
 0xa2c   :  { %v9075_v44 = vpop.eup %5416  ;;  %5420 = vpow2.f32 %v3309_v48  ;;  %v3329_v42 = vmul.f32 1.442695, %v3084_v54  ;;  %v11476_v54 = vld [vmem:[#allocation210_spill] sm:$0xff] }
 0xa2d   :  { %3555 = vadd.xlane.f32.xlu1 %v9057_v51  ;;  %v3083_v61 = vsub.f32 %v11476_v54, %v11475_v17  ;;  %v11481_v17 = vld [vmem:[#allocation221_spill] sm:$0xff] }
 0xa2e   :  { %v9064_v37 = vpop.xlane.xlu2 %3479  ;;  %v3090_v54 = vsub.f32 %v11481_v17, %v8647_v9 }
 0xa2f   :  { %11461 = vst [vmem:[#allocation220_spill] sm:$0xff] %v9064_v37  ;;  %v3323_v37 = vmul.f32 1.442695, %v3081_v0 }
 0xa30   :  { %v9070_v55 = vpop.xlane.xlu1 %3471 }
 0xa31   :  { %11462 = vst [vmem:[#allocation73_spill] sm:$0xff] %v9070_v55  ;;  %4285 = vadd.xlane.f32.xlu0 %v4089_v40  ;;  %v9084_v40 = vpop.xlane.xlu0 %3553  ;;  %v9090_v55 = vpop.eup %5418  ;;  %5422 = vpow2.f32 %v3323_v37 }
 0xa32   :  { %v9093_v48 = vpop.eup %5420  ;;  %5424 = vpow2.f32 %v3315_v30  ;;  %v3087_v30 = vsub.f32 %v11474_v32, %v8588_v8  ;;  %v3327_v8 = vmul.f32 1.442695, %v3083_v61 }
 0xa33   :  { %3569 = vadd.xlane.f32.xlu2 %v9072_v29  ;;  %11468 = vst [vmem:[#allocation36_spill] sm:$0xff] %v9093_v48  ;;  %5426 = vpow2.f32 %v3329_v42 }
 0xa34   :  { %5428 = vpow2.f32 %v3321_v47  ;;  %v3335_v10 = vmul.f32 1.442695, %v3087_v30  ;;  %v11483_v30 = vld [vmem:[#allocation196_spill] sm:$0xff] }
 0xa35   :  { %3561 = vadd.xlane.f32.xlu1 %v9075_v44 }
 0xa36   :  { %v9082_v7 = vpop.xlane.xlu2 %3485  ;;  %5430 = vpow2.f32 %v3335_v10 }
 0xa37   :  { %11466 = vst [vmem:[#allocation144_spill] sm:$0xff] %v9082_v7  ;;  %v9108_v37 = vpop.eup %5422  ;;  %5432 = vpow2.f32 %v3327_v8 }
 0xa38   :  { %v9088_v46 = vpop.xlane.xlu1 %3477  ;;  %11472 = vst [vmem:[#allocation143_spill] sm:$0xff] %v9108_v37  ;;  %v9111_v34 = vpop.eup %5424 }
 0xa39   :  { %11467 = vst [vmem:[#allocation142_spill] sm:$0xff] %v9088_v46  ;;  %4291 = vadd.xlane.f32.xlu0 %v4092_v21  ;;  %v9106_v46 = vpop.xlane.xlu0 %3559  ;;  %v9125_v42 = vpop.eup %5426 }
 0xa3a   :  { %11473 = vst [vmem:[#allocation167_spill] sm:$0xff] %v9111_v34  ;;  %v9130_v47 = vpop.eup %5428 }
 0xa3b   :  { %3575 = vadd.xlane.f32.xlu2 %v9090_v55  ;;  %11479 = vst [vmem:[#allocation145_spill] sm:$0xff] %v9125_v42 }
 0xa3c   :  { %11480 = vst [vmem:[#allocation152_spill] sm:$0xff] %v9130_v47 }
 0xa3d   :  { %3567 = vadd.xlane.f32.xlu1 %v9093_v48 }
 0xa3e   :  { %v9100_v0 = vpop.xlane.xlu2 %3491 }
 0xa3f   :  { %11471 = vst [vmem:[#allocation109_spill] sm:$0xff] %v9100_v0  ;;  %v9145_v0 = vpop.eup %5430 }
 0xa40   :  { %v9104_v21 = vpop.xlane.xlu1 %3483  ;;  %11487 = vst [vmem:[#allocation187_spill] sm:$0xff] %v9145_v0 }
 0xa41   :  { %4297 = vadd.xlane.f32.xlu0 %v4095_v11  ;;  %v4098_v11 = vmul.f32 %v8909_v14, %v9041_v31  ;;  %v9127_v32 = vpop.xlane.xlu0 %3565 }
 0xa43   :  { %3581 = vadd.xlane.f32.xlu2 %v9108_v37  ;;  %v4002_v37 = vrot.slane %v8652_v16, 5 }
 0xa45   :  { %3573 = vadd.xlane.f32.xlu1 %v9111_v34  ;;  %v9134_v14 = vperm.slane %v4002_v37, 0  ;;  %v11484_v34 = vld [vmem:[#allocation214_spill] sm:$0xff]  ;;  %v9148_v37 = vpop.eup %5432 }
 0xa46   :  { %v9118_v48 = vpop.xlane.xlu2 %3497  ;;  %11488 = vst [vmem:[#allocation150_spill] sm:$0xff] %v9148_v37 }
 0xa47   :  { %11477 = vst [vmem:[#allocation149_spill] sm:$0xff] %v9118_v48  ;;  %v4101_v61 = vmul.f32 %v8927_v41, %v9134_v14  ;;  %v11490_v41 = vld [vmem:[#allocation218_spill] sm:$0xff] }
 0xa48   :  { %v9122_v3 = vpop.xlane.xlu1 %3489  ;;  %11482 = vst [vmem:[#allocation225_spill] sm:$0xff] %v9134_v14  ;;  %v3089_v17 = vsub.f32 %v11490_v41, %v8602_v50  ;;  %v11495_v50 = vld [vmem:[#allocation222_spill] sm:$0xff]  ;;  %v4107_v41 = vmul.f32 %v8966_v23, %v9134_v14  ;;  %v4110_v23 = vmul.f32 %v8984_v45, %v9134_v14  ;;  %v11507_v45 = vld [vmem:[#allocation39_spill] sm:$0xff] }
 0xa49   :  { %11478 = vst [vmem:[#allocation223_spill] sm:$0xff] %v9122_v3  ;;  %4303 = vadd.xlane.f32.xlu0 %v4098_v11  ;;  %v3086_v11 = vsub.f32 %v11484_v34, %v11483_v30  ;;  %v11489_v34 = vld [vmem:[#allocation224_spill] sm:$0xff]  ;;  %v9152_v8 = vpop.xlane.xlu0 %3571  ;;  %v4104_v30 = vmul.f32 %v8946_v24, %v9134_v14  ;;  %v3092_v24 = vsub.f32 %v11495_v50, %v8614_v56  ;;  %v11599_v3 = vld [vmem:[#allocation19_spill] sm:$0xff] }
 0xa4a   :  { %v3093_v10 = vsub.f32 %v11489_v34, %v8670_v12  ;;  %v3339_v12 = vmul.f32 1.442695, %v3089_v17  ;;  %v11502_v50 = vld [vmem:[#allocation96_spill] sm:$0xff] }
 0xa4b   :  { %3587 = vadd.xlane.f32.xlu2 %v9125_v42  ;;  %v3341_v42 = vmul.f32 1.442695, %v3090_v54  ;;  %v3333_v9 = vmul.f32 1.442695, %v3086_v11 }
 0xa4c   :  { %v3347_v11 = vmul.f32 1.442695, %v3093_v10 }
 0xa4d   :  { %3579 = vadd.xlane.f32.xlu1 %v9130_v47  ;;  %5434 = vpow2.f32 %v3341_v42 }
 0xa4e   :  { %v9139_v31 = vpop.xlane.xlu2 %3503  ;;  %5436 = vpow2.f32 %v3333_v9 }
 0xa4f   :  { %11485 = vst [vmem:[#allocation146_spill] sm:$0xff] %v9139_v31  ;;  %5438 = vpow2.f32 %v3347_v11 }
 0xa50   :  { %v9143_v48 = vpop.xlane.xlu1 %3495  ;;  %5440 = vpow2.f32 %v3339_v12 }
 0xa51   :  { %11486 = vst [vmem:[#allocation154_spill] sm:$0xff] %v9143_v48  ;;  %4309 = vadd.xlane.f32.xlu0 %v4101_v61  ;;  %v9168_v9 = vpop.xlane.xlu0 %3577  ;;  %v11547_v48 = vld [vmem:[#allocation233_spill] sm:$0xff] }
 0xa53   :  { %3593 = vadd.xlane.f32.xlu2 %v9145_v0  ;;  %v9163_v42 = vpop.eup %5434 }
 0xa54   :  { %11493 = vst [vmem:[#allocation82_spill] sm:$0xff] %v9163_v42  ;;  %v9166_v34 = vpop.eup %5436 }
 0xa55   :  { %3585 = vadd.xlane.f32.xlu1 %v9148_v37  ;;  %11494 = vst [vmem:[#allocation153_spill] sm:$0xff] %v9166_v34  ;;  %v9179_v17 = vpop.eup %5438 }
 0xa56   :  { %v9157_v54 = vpop.xlane.xlu2 %3509  ;;  %11498 = vst [vmem:[#allocation227_spill] sm:$0xff] %v9179_v17  ;;  %v9182_v11 = vpop.eup %5440 }
 0xa57   :  { %11491 = vst [vmem:[#allocation246_spill] sm:$0xff] %v9157_v54 }
 0xa58   :  { %v9161_v61 = vpop.xlane.xlu1 %3501  ;;  %11499 = vst [vmem:[#allocation155_spill] sm:$0xff] %v9182_v11 }
 0xa59   :  { %11492 = vst [vmem:[#allocation156_spill] sm:$0xff] %v9161_v61  ;;  %4315 = vadd.xlane.f32.xlu0 %v4104_v30 }
 0xa5b   :  { %3599 = vadd.xlane.f32.xlu2 %v9163_v42  ;;  %v3345_v42 = vmul.f32 1.442695, %v3092_v24  ;;  %v4022_v24 = vmul.f32 %v11502_v50, %v8665_v35  ;;  %v11508_v50 = vld [vmem:[#allocation85_spill] sm:$0xff] }
 0xa5d   :  { %3591 = vadd.xlane.f32.xlu1 %v9166_v34  ;;  %v9184_v34 = vpop.xlane.xlu0 %3583  ;;  %5442 = vpow2.f32 %v3345_v42  ;;  %v4113_v42 = vmul.f32 %v9002_v28, %v9134_v14  ;;  %v4003_v28 = vrot.slane %v8652_v16, 6 }
 0xa5e   :  { %v9173_v10 = vpop.xlane.xlu2 %3515 }
 0xa5f   :  { %11496 = vst [vmem:[#allocation191_spill] sm:$0xff] %v9173_v10  ;;  %v11575_v10 = vld [vmem:[#allocation250_spill] sm:$0xff] }
 0xa60   :  { %v9177_v30 = vpop.xlane.xlu1 %3507 }
 0xa61   :  { %11497 = vst [vmem:[#allocation159_spill] sm:$0xff] %v9177_v30  ;;  %4321 = vadd.xlane.f32.xlu0 %v4107_v41 }
 0xa63   :  { %3605 = vadd.xlane.f32.xlu2 %v9179_v17  ;;  %v9195_v41 = vpop.eup %5442 }
 0xa64   :  { %11503 = vst [vmem:[#allocation104_spill] sm:$0xff] %v9195_v41 }
 0xa65   :  { %3597 = vadd.xlane.f32.xlu1 %v9182_v11  ;;  %v9200_v11 = vpop.xlane.xlu0 %3589 }
 0xa66   :  { %v9187_v56 = vpop.xlane.xlu2 %3521  ;;  %11505 = vst [vmem:[#allocation165_spill] sm:$0xff] %v9200_v11 }
 0xa67   :  { %11500 = vst [vmem:[#allocation148_spill] sm:$0xff] %v9187_v56  ;;  %v11562_v56 = vld [vmem:[#allocation240_spill] sm:$0xff] }
 0xa68   :  { %v9191_v12 = vpop.xlane.xlu1 %3513  ;;  %v3936_v7 = vperm.slane %v9106_v46, %v11562_v56 }
 0xa69   :  { %11501 = vst [vmem:[#allocation162_spill] sm:$0xff] %v9191_v12  ;;  %4327 = vadd.xlane.f32.xlu0 %v4110_v23  ;;  %v4025_v23 = vmul.f32 %v11507_v45, %v8665_v35 }
 0xa6b   :  { %4151 = vadd.xlane.f32.xlu2 %v4022_v24  ;;  %v4021_v24 = vmul.f32 %v11508_v50, %v8665_v35 }
 0xa6d   :  { %3603 = vadd.xlane.f32.xlu1 %v9195_v41  ;;  %v4116_v41 = vmul.f32 %v9018_v63, %v9134_v14  ;;  %v9217_v54 = vpop.xlane.xlu0 %3595 }
 0xa6e   :  { %v9198_v17 = vpop.xlane.xlu2 %3527  ;;  %11511 = vst [vmem:[#allocation211_spill] sm:$0xff] %v9217_v54  ;;  %v11544_v54 = vld [vmem:[#allocation125_spill] sm:$0xff] }
 0xa6f   :  { %11504 = vst [vmem:[#allocation157_spill] sm:$0xff] %v9198_v17  ;;  %v11543_v17 = vld [vmem:[#allocation34_spill] sm:$0xff] }
 0xa70   :  { %v9204_v37 = vpop.xlane.xlu1 %3519 }
 0xa71   :  { %11506 = vst [vmem:[#allocation208_spill] sm:$0xff] %v9204_v37  ;;  %4333 = vadd.xlane.f32.xlu0 %v4113_v42  ;;  %v11512_v42 = vld [vmem:[#allocation86_spill] sm:$0xff] }
 0xa72   :  { %v4028_v45 = vmul.f32 %v11512_v42, %v8665_v35  ;;  %v4027_v42 = vmul.f32 %v8493_v22, %v8665_v35  ;;  %v11571_v37 = vld [vmem:[#allocation22_spill] sm:$0xff] }
 0xa73   :  { %4157 = vadd.xlane.f32.xlu2 %v4025_v23  ;;  %v11513_v23 = vld [vmem:[#allocation26_spill] sm:$0xff] }
 0xa74   :  { %v4024_v50 = vmul.f32 %v11513_v23, %v8665_v35 }
 0xa75   :  { %4149 = vadd.xlane.f32.xlu1 %v4021_v24  ;;  %v9223_v24 = vperm.slane %v4003_v28, 0  ;;  %v9233_v31 = vpop.xlane.xlu0 %3601 }
 0xa76   :  { %v9210_v0 = vpop.xlane.xlu2 %3533  ;;  %11517 = vst [vmem:[#allocation103_spill] sm:$0xff] %v9233_v31  ;;  %v11527_v31 = vld [vmem:[#allocation40_spill] sm:$0xff] }
 0xa77   :  { %11509 = vst [vmem:[#allocation160_spill] sm:$0xff] %v9210_v0  ;;  %v4119_v63 = vmul.f32 %v9037_v20, %v9223_v24  ;;  %v11519_v20 = vld [vmem:[#allocation98_spill] sm:$0xff]  ;;  %v4125_v22 = vmul.f32 %v9075_v44, %v9223_v24  ;;  %v11524_v44 = vld [vmem:[#allocation91_spill] sm:$0xff] }
 0xa78   :  { %v9214_v47 = vpop.xlane.xlu1 %3525 }
 0xa79   :  { %11510 = vst [vmem:[#allocation168_spill] sm:$0xff] %v9214_v47  ;;  %4339 = vadd.xlane.f32.xlu0 %v4116_v41  ;;  %v11516_v41 = vld [vmem:[#allocation151_spill] sm:$0xff] }
 0xa7a   :  { %v4031_v0 = vmul.f32 %v11516_v41, %v8665_v35  ;;  %v11546_v47 = vld [vmem:[#allocation239_spill] sm:$0xff] }
 0xa7b   :  { %4163 = vadd.xlane.f32.xlu2 %v4028_v45  ;;  %v4122_v45 = vmul.f32 %v9057_v51, %v9223_v24  ;;  %v4004_v51 = vrot.slane %v8652_v16, 7 }
 0xa7d   :  { %4155 = vadd.xlane.f32.xlu1 %v4024_v50  ;;  %v4034_v50 = vmul.f32 %v11519_v20, %v8665_v35  ;;  %v4033_v20 = vmul.f32 %v8523_v5, %v8665_v35 }
 0xa7e   :  { %v9225_v30 = vpop.xlane.xlu2 %3539 }
 0xa7f   :  { %11514 = vst [vmem:[#allocation163_spill] sm:$0xff] %v9225_v30 }
 0xa80   :  { %v9229_v14 = vpop.xlane.xlu1 %3531 }
 0xa81   :  { %11515 = vst [vmem:[#allocation170_spill] sm:$0xff] %v9229_v14  ;;  %4345 = vadd.xlane.f32.xlu0 %v4119_v63  ;;  %v9243_v63 = vpop.xlane.xlu0 %3607 }
 0xa82   :  { %11520 = vst [vmem:[#allocation173_spill] sm:$0xff] %v9243_v63  ;;  %v2188_v63 = vsub.f32 -inf, %v11524_v44 }
 0xa83   :  { %4169 = vadd.xlane.f32.xlu2 %v4031_v0  ;;  %v4030_v0 = vmul.f32 %v8507_v27, %v8665_v35 }
 0xa84   :  { %v2189_v5 = vmul.f32 1.442695, %v2188_v63 }
 0xa85   :  { %4161 = vadd.xlane.f32.xlu1 %v4027_v42 }
 0xa86   :  { %v3546_v28 = vpop.xlane.xlu2 %3545  ;;  %5444 = vpow2.f32 %v2189_v5  ;;  %v11533_v5 = vld [vmem:[#allocation46_spill] sm:$0xff] }
 0xa88   :  { %v9239_v23 = vpop.xlane.xlu1 %3537 }
 0xa89   :  { %11518 = vst [vmem:[#allocation166_spill] sm:$0xff] %v9239_v23  ;;  %4351 = vadd.xlane.f32.xlu0 %v4122_v45  ;;  %v11522_v45 = vld [vmem:[#allocation41_spill] sm:$0xff]  ;;  %v9258_v27 = vpop.xlane.xlu0 %4153  ;;  %v3923_v23 = vperm.slane %v3546_v28, %v11527_v31 }
 0xa8a   :  { %v4037_v30 = vmul.f32 %v11522_v45, %v8750_v13  ;;  %11523 = vst [vmem:[#allocation169_spill] sm:$0xff] %v9258_v27  ;;  %v11526_v45 = vld [vmem:[#allocation89_spill] sm:$0xff]  ;;  %v11529_v27 = vld [vmem:[#allocation236_spill] sm:$0xff] }
 0xa8b   :  { %4175 = vadd.xlane.f32.xlu2 %v4034_v50  ;;  %v9256_v50 = vperm.slane %v4004_v51, 0  ;;  %v11528_v51 = vld [vmem:[#allocation243_spill] sm:$0xff]  ;;  %v3924_v44 = vperm.slane %v9066_v43, %v11529_v27 }
 0xa8d   :  { %4167 = vadd.xlane.f32.xlu1 %v4030_v0  ;;  %v4136_v63 = vmul.f32 %v8504_v52, %v9256_v50  ;;  %v11535_v52 = vld [vmem:[#allocation100_spill] sm:$0xff] }
 0xa8e   :  { %v3552_v41 = vpop.xlane.xlu2 %3551 }
 0xa90   :  { %v9249_v42 = vpop.xlane.xlu1 %3543 }
 0xa91   :  { %11521 = vst [vmem:[#allocation229_spill] sm:$0xff] %v9249_v42  ;;  %4357 = vadd.xlane.f32.xlu0 %v4125_v22  ;;  %v11525_v42 = vld [vmem:[#allocation66_spill] sm:$0xff] }
 0xa92   :  { %v4133_v16 = vmul.f32 %v11525_v42, %v9256_v50  ;;  %v3925_v42 = vsel %vm1897_vm2, %v3924_v44, %v3923_v23 }
 0xa93   :  { %4181 = vadd.xlane.f32.xlu2 %v4037_v30  ;;  %v4040_v30 = vmul.f32 %v11526_v45, %v8750_v13  ;;  %v11532_v45 = vld [vmem:[#allocation175_spill] sm:$0xff] }
 0xa95   :  { %4173 = vadd.xlane.f32.xlu1 %v4033_v20  ;;  %v4036_v20 = vmul.f32 %v8540_v18, %v8665_v35  ;;  %v9285_v18 = vmul.f32 %v8567_v6, %v8750_v13  ;;  %v11531_v35 = vld [vmem:[#allocation241_spill] sm:$0xff]  ;;  %v9302_v6 = vmul.f32 %v8593_v62, %v8750_v13  ;;  %v9320_v62 = vmul.f32 %v11544_v54, %v8841_v49  ;;  %v11554_v54 = vld [vmem:[#allocation232_spill] sm:$0xff] }
 0xa96   :  { %v9260_v0 = vpop.xlane.xlu2 %3557  ;;  %v3928_v43 = vperm.slane %v3552_v41, %v11531_v35  ;;  %v11538_v41 = vld [vmem:[#allocation21_spill] sm:$0xff] }
 0xa97   :  { %11537 = vst [vmem:[#allocation141_spill] sm:$0xff] %v9302_v6 }
 0xa98   :  { %v3550_v22 = vpop.xlane.xlu1 %3549  ;;  %11545 = vst [vmem:[#allocation192_spill] sm:$0xff] %v9320_v62  ;;  %v3738_v62 = vperm.slane %v11554_v54, %v11529_v27  ;;  %v3737_v54 = vperm.slane %v8686_v60, %v11527_v31  ;;  %v3769_v60 = vperm.slane %v8811_v19, %v11529_v27  ;;  %v11577_v19 = vld [vmem:[#allocation251_spill] sm:$0xff] }
 0xa99   :  { %4373 = vadd.xlane.f32.xlu0 %v4133_v16  ;;  %v3926_v14 = vperm.slane %v3550_v22, %v11528_v51  ;;  %v9276_v16 = vpop.xlane.xlu0 %4159  ;;  %v4039_v22 = vmul.f32 %v8555_v25, %v8750_v13  ;;  %v9298_v25 = vmul.f32 %v11535_v52, %v8750_v13  ;;  %v9316_v52 = vmul.f32 %v11543_v17, %v8750_v13  ;;  %v9336_v17 = vpop.eup %5444 }
 0xa9a   :  { %11530 = vst [vmem:[#allocation181_spill] sm:$0xff] %v9276_v16  ;;  %v11542_v16 = vld [vmem:[#allocation247_spill] sm:$0xff] }
 0xa9b   :  { %4187 = vadd.xlane.f32.xlu2 %v4040_v30  ;;  %v3927_v28 = vsel %vm1901_vm4, %v3926_v14, %v3925_v42  ;;  %v4043_v30 = vmul.f32 %v11532_v45, %v8750_v13  ;;  %v11534_v14 = vld [vmem:[#allocation203_spill] sm:$0xff]  ;;  %11536 = vst [vmem:[#allocation177_spill] sm:$0xff] %v9298_v25  ;;  %v9306_v42 = vmul.f32 %v11538_v41, %v8750_v13  ;;  %v11540_v45 = vld [vmem:[#allocation28_spill] sm:$0xff] }
 0xa9c   :  { %v9294_v44 = vmul.f32 %v11534_v14, %v8750_v13  ;;  %v3929_v14 = vsel %vm1905_vm6, %v3928_v43, %v3927_v28  ;;  %v3930_v41 = vperm.slane %v9084_v40, %v11546_v47  ;;  %v11549_v28 = vld [vmem:[#allocation176_spill] sm:$0xff]  ;;  %11553 = vst [vmem:[#allocation178_spill] sm:$0xff] %v9336_v17  ;;  %v11555_v40 = vld [vmem:[#allocation25_spill] sm:$0xff]  ;;  %v11563_v17 = vld [vmem:[#allocation235_spill] sm:$0xff] }
 0xa9d   :  { %4179 = vadd.xlane.f32.xlu1 %v4036_v20  ;;  %v4046_v20 = vmul.f32 %v11533_v5, %v8750_v13  ;;  %11539 = vst [vmem:[#allocation171_spill] sm:$0xff] %v9306_v42  ;;  %v9310_v5 = vmul.f32 %v11540_v45, %v8841_v49  ;;  %v9326_v45 = vmul.f32 %v11547_v48, %v8841_v49  ;;  %v11557_v48 = vld [vmem:[#allocation52_spill] sm:$0xff]  ;;  %v11568_v42 = vld [vmem:[#allocation23_spill] sm:$0xff] }
 0xa9e   :  { %v9274_v61 = vpop.xlane.xlu2 %3563  ;;  %v9330_v43 = vmul.f32 %v11549_v28, %v8841_v49  ;;  %v11559_v28 = vld [vmem:[#allocation45_spill] sm:$0xff]  ;;  %v11587_v25 = vld [vmem:[#allocation35_spill] sm:$0xff] }
 0xa9f   :  { %11541 = vst [vmem:[#allocation179_spill] sm:$0xff] %v9310_v5  ;;  %v9346_v5 = vmul.f32 %v11557_v48, %v8841_v49 }
 0xaa0   :  { %v3556_v23 = vpop.xlane.xlu1 %3555  ;;  %11548 = vst [vmem:[#allocation174_spill] sm:$0xff] %v9326_v45  ;;  %v11564_v45 = vld [vmem:[#allocation242_spill] sm:$0xff] }
 0xaa1   :  { %4379 = vadd.xlane.f32.xlu0 %v4136_v63  ;;  %v3932_v63 = vperm.slane %v3556_v23, %v11542_v16  ;;  %11550 = vst [vmem:[#allocation182_spill] sm:$0xff] %v9330_v43  ;;  %v11551_v23 = vld [vmem:[#allocation234_spill] sm:$0xff]  ;;  %v9350_v43 = vmul.f32 %v11559_v28, %v8841_v49  ;;  %v3740_v28 = vperm.slane %v8720_v53, %v11528_v51  ;;  %v11572_v53 = vld [vmem:[#allocation24_spill] sm:$0xff]  ;;  %v9387_v11 = vpop.xlane.xlu0 %4165 }
 0xaa2   :  { %v9334_v13 = vmul.f32 %v11551_v23, %v8841_v49  ;;  %11558 = vst [vmem:[#allocation38_spill] sm:$0xff] %v9346_v5  ;;  %v11561_v23 = vld [vmem:[#allocation147_spill] sm:$0xff]  ;;  %v11566_v5 = vld [vmem:[#allocation244_spill] sm:$0xff] }
 0xaa3   :  { %4193 = vadd.xlane.f32.xlu2 %v4043_v30  ;;  %v9342_v30 = vmul.f32 %v11555_v40, %v9256_v50  ;;  %11560 = vst [vmem:[#allocation180_spill] sm:$0xff] %v9350_v43  ;;  %v3931_v40 = vsel %vm10645_vm8, %v3930_v41, %v3929_v14  ;;  %v3768_v43 = vperm.slane %v11568_v42, %v11527_v31  ;;  %v11570_v41 = vld [vmem:[#allocation30_spill] sm:$0xff] }
 0xaa4   :  { %11552 = vst [vmem:[#allocation212_spill] sm:$0xff] %v9334_v13  ;;  %v3744_v13 = vperm.slane %v11561_v23, %v11546_v47  ;;  %v3933_v23 = vsel %vm10644_vm10, %v3932_v63, %v3931_v40  ;;  %v4139_v48 = vmul.f32 %v11570_v41, %v9256_v50  ;;  %v11573_v40 = vld [vmem:[#allocation249_spill] sm:$0xff] }
 0xaa5   :  { %11556 = vst [vmem:[#allocation114_spill] sm:$0xff] %v9342_v30  ;;  %4185 = vadd.xlane.f32.xlu1 %v4039_v22  ;;  %v11569_v22 = vld [vmem:[#allocation245_spill] sm:$0xff]  ;;  %v3773_v30 = vperm.slane %v11571_v37, %v11531_v35 }
 0xaa6   :  { %v9366_v49 = vpop.xlane.xlu2 %3569  ;;  %v3934_v14 = vperm.slane %v9260_v0, %v11569_v22  ;;  %v3739_v0 = vsel %vm1897_vm2, %v3738_v62, %v3737_v54  ;;  %11579 = vst [vmem:[#allocation185_spill] sm:$0xff] %v9387_v11  ;;  %v11580_v37 = vld [vmem:[#allocation53_spill] sm:$0xff]  ;;  %v11592_v62 = vld [vmem:[#allocation83_spill] sm:$0xff] }
 0xaa7   :  { %v11581_v63 = vld [vmem:[#allocation33_spill] sm:$0xff]  ;;  %v3741_v12 = vsel %vm1901_vm4, %v3740_v28, %v3739_v0 }
 0xaa8   :  { %v3562_v57 = vpop.xlane.xlu1 %3561  ;;  %v3935_v41 = vsel %vm10643_vm12, %v3934_v14, %v3933_v23  ;;  %v11584_v11 = vld [vmem:[#allocation69_spill] sm:$0xff]  ;;  %v3770_v14 = vsel %vm1897_vm2, %v3769_v60, %v3768_v43  ;;  %v11595_v60 = vld [vmem:[#allocation92_spill] sm:$0xff] }
 0xaa9   :  { %v3938_v4 = vperm.slane %v3562_v57, %v11580_v37  ;;  %4385 = vadd.xlane.f32.xlu0 %v4139_v48  ;;  %v11586_v57 = vld [vmem:[#allocation61_spill] sm:$0xff]  ;;  %v3937_v54 = vsel %vm11591_vm5, %v3936_v7, %v3935_v41  ;;  %v3775_v7 = vperm.slane %v8829_v2, %v11546_v47  ;;  %v3940_v41 = vperm.slane %v9274_v61, %v11573_v40 }
 0xaaa   :  { %v3742_v48 = vperm.slane %v11586_v57, %v11531_v35  ;;  %v11590_v28 = vld [vmem:[#allocation97_spill] sm:$0xff]  ;;  %v11593_v57 = vld [vmem:[#allocation79_spill] sm:$0xff]  ;;  %vm11604_vm5 = vcmask 720512  }
 0xaab   :  { %4199 = vadd.xlane.f32.xlu2 %v4046_v20  ;;  %v3771_v0 = vperm.slane %v11590_v28, %v11528_v51  ;;  %v3746_v43 = vperm.slane %v11593_v57, %v11542_v16  ;;  %v3939_v20 = vsel %vm11594_vm14, %v3938_v4, %v3937_v54  ;;  %vm11601_vm14 = vcmask 654912  }
 0xaac   :  { %v3743_v6 = vsel %vm1905_vm6, %v3742_v48, %v3741_v12  ;;  %v11596_v12 = vld [vmem:[#allocation102_spill] sm:$0xff]  ;;  %v3941_v42 = vsel %vm11601_vm14, %v3940_v41, %v3939_v20  ;;  %v3942_v54 = vperm.slane %v9127_v32, %v11564_v45  ;;  %vm11607_vm14 = vcmask 786112  }
 0xaad   :  { %4191 = vadd.xlane.f32.xlu1 %v9285_v18  ;;  %v3772_v46 = vsel %vm1901_vm4, %v3771_v0, %v3770_v14  ;;  %v11598_v18 = vld [vmem:[#allocation117_spill] sm:$0xff]  ;;  %v4142_v14 = vmul.f32 %v11599_v3, %v9256_v50  ;;  %v11600_v0 = vld [vmem:[#allocation126_spill] sm:$0xff]  ;;  %v3745_v23 = vsel %vm10645_vm8, %v3744_v13, %v3743_v6  ;;  %v11602_v6 = vld [vmem:[#allocation67_spill] sm:$0xff] }
 0xaae   :  { %v9426_v28 = vpop.xlane.xlu2 %3575  ;;  %v3747_v4 = vsel %vm10644_vm10, %v3746_v43, %v3745_v23  ;;  %v3774_v57 = vsel %vm1905_vm6, %v3773_v30, %v3772_v46  ;;  %v3748_v13 = vperm.slane %v11602_v6, %v11569_v22  ;;  %v11603_v23 = vld [vmem:[#allocation107_spill] sm:$0xff]  ;;  %v9460_v43 = vpop.xlane.xlu0 %4171  ;;  %v3943_v41 = vsel %vm11604_vm5, %v3942_v54, %v3941_v42  ;;  %v11649_v32 = vld [vmem:[#allocation174_spill] sm:$0xff] }
 0xaaf   :  { %v3776_v20 = vsel %vm10645_vm8, %v3775_v7, %v3774_v57  ;;  %v3777_v46 = vperm.slane %v11603_v23, %v11542_v16  ;;  %v11606_v57 = vld [vmem:[#allocation132_spill] sm:$0xff]  ;;  %v3946_v42 = vperm.slane %v9366_v49, %v11575_v10  ;;  %v3948_v49 = vperm.slane %v9152_v8, %v11566_v5  ;;  %v11614_v8 = vld [vmem:[#allocation134_spill] sm:$0xff] }
 0xab0   :  { %v3568_v48 = vpop.xlane.xlu1 %3567  ;;  %v3799_v6 = vperm.slane %v11606_v57, %v11527_v31  ;;  %v11608_v23 = vld [vmem:[#allocation120_spill] sm:$0xff]  ;;  %vm11611_vm5 = vcmask 523712   ;;  %v3804_v54 = vperm.slane %v11614_v8, %v11531_v35  ;;  %v11625_v8 = vperm.slane %v11598_v18, %v11527_v31 }
 0xab1   :  { %v3944_v3 = vperm.slane %v3568_v48, %v11584_v11  ;;  %4391 = vadd.xlane.f32.xlu0 %v4142_v14  ;;  %v3749_v48 = vsel %vm10643_vm12, %v3748_v13, %v3747_v4  ;;  %v11605_v14 = vld [vmem:[#allocation87_spill] sm:$0xff]  ;;  %v3778_v2 = vsel %vm10644_vm10, %v3777_v46, %v3776_v20  ;;  %v3781_v30 = vperm.slane %v11608_v23, %v11562_v56  ;;  %v11615_v4 = vld [vmem:[#allocation78_spill] sm:$0xff]  ;;  %vm11616_vm0 = vmmov %vm11611_vm5 }
 0xab2   :  { %v3752_v7 = vperm.slane %v11605_v14, %v11580_v37  ;;  %v9488_v46 = vmul.f32 %v9090_v55, %v9223_v24  ;;  %v11613_v23 = vperm.slane %v11572_v53, %v11569_v22  ;;  %v3959_v53 = vperm.slane %v9184_v34, %v11531_v35  ;;  %v11633_v18 = vld [vmem:[#allocation144_spill] sm:$0xff] }
 0xab3   :  { %4205 = vadd.xlane.f32.xlu2 %v9294_v44  ;;  %v3945_v61 = vsel %vm11607_vm14, %v3944_v3, %v3943_v41  ;;  %v4129_v44 = vmul.f32 %v9072_v29, %v9223_v24  ;;  %v11609_v3 = vld [vmem:[#allocation130_spill] sm:$0xff]  ;;  %v3954_v29 = vperm.slane %v9168_v9, %v11527_v31  ;;  %vm11612_vm14 = vcmask 589312  }
 0xab4   :  { %v3800_v13 = vperm.slane %v11609_v3, %v11529_v27  ;;  %v3947_v14 = vsel %vm1941_vm3, %v3946_v42, %v3945_v61  ;;  %v3780_v55 = vsel %vm10643_vm12, %v11613_v23, %v3778_v2  ;;  %v3862_v61 = vperm.slane %v9104_v21, %v11529_v27  ;;  %v11617_v2 = vld [vmem:[#allocation115_spill] sm:$0xff]  ;;  %v11642_v23 = vld [vmem:[#allocation114_spill] sm:$0xff] }
 0xab5   :  { %4197 = vadd.xlane.f32.xlu1 %v9316_v52  ;;  %v11610_v52 = vperm.slane %v11563_v17, %v11562_v56  ;;  %v3754_v17 = vperm.slane %v11615_v4, %v11573_v40  ;;  %v3952_v42 = vperm.slane %v9426_v28, %v11577_v19 }
 0xab6   :  { %v9484_v20 = vpop.xlane.xlu2 %3581  ;;  %v3801_v3 = vsel %vm1897_vm2, %v3800_v13, %v3799_v6  ;;  %v3783_v6 = vperm.slane %v11617_v2, %v11580_v37  ;;  %v3949_v13 = vsel %vm1945_vm15, %v3948_v49, %v3947_v14  ;;  %v11622_v49 = vld [vmem:[#allocation60_spill] sm:$0xff] }
 0xab7   :  { %v3751_v41 = vsel %vm11611_vm5, %v11610_v52, %v3749_v48  ;;  %v3782_v48 = vsel %vm11616_vm0, %v3781_v30, %v3780_v55  ;;  %vm11618_vm5 = vcmask 654912   ;;  %v11619_v30 = vperm.slane %v11581_v63, %v11528_v51  ;;  %v11620_v52 = vld [vmem:[#allocation177_spill] sm:$0xff]  ;;  %vm11621_vm0 = vmmov %vm11612_vm14  ;;  %v11624_v55 = vld [vmem:[#allocation123_spill] sm:$0xff] }
 0xab8   :  { %v3753_v57 = vsel %vm11612_vm14, %v3752_v7, %v3751_v41  ;;  %v3574_v9 = vpop.xlane.xlu1 %3573  ;;  %v3784_v41 = vsel %vm11621_vm0, %v3783_v6, %v3782_v48  ;;  %v3833_v14 = vperm.slane %v11622_v49, %v11528_v51  ;;  %v11623_v63 = vld [vmem:[#allocation165_spill] sm:$0xff]  ;;  %v11629_v6 = vld [vmem:[#allocation158_spill] sm:$0xff]  ;;  %vm11631_vm14 = vcmask 720512  }
 0xab9   :  { %v3950_v7 = vperm.slane %v3574_v9, %v11587_v25  ;;  %4365 = vadd.xlane.f32.xlu0 %v4129_v44  ;;  %v3755_v4 = vsel %vm11618_vm5, %v3754_v17, %v3753_v57  ;;  %v3803_v21 = vsel %vm1901_vm4, %v11619_v30, %v3801_v3  ;;  %v3830_v44 = vperm.slane %v8973_v58, %v11527_v31  ;;  %v9540_v3 = vpop.xlane.xlu0 %4177  ;;  %v11627_v48 = vld [vmem:[#allocation141_spill] sm:$0xff]  ;;  %v11632_v30 = vld [vmem:[#allocation128_spill] sm:$0xff]  ;;  %vm11645_vm0 = vmmov %vm11631_vm14 }
 0xaba   :  { %v3805_v28 = vsel %vm1905_vm6, %v3804_v54, %v3803_v21  ;;  %v3806_v58 = vperm.slane %v11624_v55, %v11546_v47  ;;  %v3863_v9 = vsel %vm1897_vm2, %v3862_v61, %v11625_v8  ;;  %v11626_v54 = vld [vmem:[#allocation162_spill] sm:$0xff]  ;;  %v3787_v21 = vperm.slane %v11632_v30, %v11564_v45 }
 0xabb   :  { %v3951_v34 = vsel %vm1949_vm11, %v3950_v7, %v3949_v13  ;;  %4211 = vadd.xlane.f32.xlu2 %v11620_v52  ;;  %v3892_v17 = vperm.slane %v11626_v54, %v11527_v31  ;;  %v11628_v7 = vld [vmem:[#allocation84_spill] sm:$0xff]  ;;  %v11634_v52 = vld [vmem:[#allocation27_spill] sm:$0xff]  ;;  %v11636_v54 = vperm.slane %v11589_v26, %v11529_v27 }
 0xabc   :  { %v9534_v57 = vsel %vm1953_vm1, %v3952_v42, %v3951_v34  ;;  %v11630_v42 = vperm.slane %v11629_v6, %v11564_v45  ;;  %v3864_v34 = vperm.slane %v11633_v18, %v11528_v51  ;;  %v11635_v49 = vperm.slane %v11634_v52, %v11573_v40  ;;  %v11639_v18 = vld [vmem:[#allocation137_spill] sm:$0xff] }
 0xabd   :  { %4203 = vadd.xlane.f32.xlu1 %v11627_v48  ;;  %v3807_v8 = vsel %vm10645_vm8, %v3806_v58, %v3805_v28  ;;  %v11637_v48 = vld [vmem:[#allocation191_spill] sm:$0xff]  ;;  %v3835_v2 = vperm.slane %v11639_v18, %v11531_v35 }
 0xabe   :  { %v3757_v13 = vsel %vm11631_vm14, %v11630_v42, %v3755_v4  ;;  %v9559_v61 = vpop.xlane.xlu2 %3587  ;;  %v3786_v55 = vsel %vm11618_vm5, %v11635_v49, %v3784_v41  ;;  %v3832_v4 = vsel %vm1897_vm2, %v11636_v54, %v3830_v44  ;;  %v3893_v6 = vperm.slane %v11637_v48, %v11529_v27  ;;  %v11638_v42 = vld [vmem:[#allocation44_spill] sm:$0xff]  ;;  %v11640_v28 = vld [vmem:[#allocation223_spill] sm:$0xff] }
 0xabf   :  { %v3810_v30 = vperm.slane %v11638_v42, %v11569_v22  ;;  %v3834_v52 = vsel %vm1901_vm4, %v3833_v14, %v3832_v4  ;;  %v3865_v41 = vsel %vm1901_vm4, %v3864_v34, %v3863_v9  ;;  %v3868_v58 = vperm.slane %v11640_v28, %v11546_v47  ;;  %v11641_v44 = vld [vmem:[#allocation208_spill] sm:$0xff]  ;;  %v11643_v42 = vld [vmem:[#allocation94_spill] sm:$0xff]  ;;  %v11644_v14 = vld [vmem:[#allocation119_spill] sm:$0xff] }
 0xac0   :  { %v3580_v49 = vpop.xlane.xlu1 %3579  ;;  %v3894_v26 = vsel %vm1897_vm2, %v3893_v6, %v3892_v17  ;;  %v3897_v54 = vperm.slane %v11641_v44, %v11531_v35  ;;  %v3758_v18 = vperm.slane %v11643_v42, %v11584_v11  ;;  %v3789_v4 = vperm.slane %v11644_v14, %v11584_v11  ;;  %v11646_v28 = vld [vmem:[#allocation32_spill] sm:$0xff] }
 0xac1   :  { %v3955_v48 = vperm.slane %v3580_v49, %v11529_v27  ;;  %4397 = vadd.xlane.f32.xlu0 %v11642_v23  ;;  %v3788_v9 = vsel %vm11645_vm0, %v3787_v21, %v3786_v55  ;;  %v3957_v34 = vperm.slane %v9484_v20, %v11528_v51  ;;  %v11647_v17 = vperm.slane %v11646_v28, %v11542_v16  ;;  %v11648_v23 = vld [vmem:[#allocation59_spill] sm:$0xff] }
 0xac2   :  { %v3836_v49 = vsel %vm1905_vm6, %v3835_v2, %v3834_v52  ;;  %v3839_v44 = vperm.slane %v11648_v23, %v11542_v16  ;;  %v11650_v21 = vperm.slane %v11600_v0, %v11531_v35  ;;  %v11651_v55 = vperm.slane %v8961_v33, %v11528_v51  ;;  %v11652_v52 = vld [vmem:[#allocation49_spill] sm:$0xff]  ;;  %v11659_v23 = vld [vmem:[#allocation136_spill] sm:$0xff] }
 0xac3   :  { %v3809_v6 = vsel %vm10644_vm10, %v11647_v17, %v3807_v8  ;;  %v3956_v42 = vsel %vm1897_vm2, %v3955_v48, %v3954_v29  ;;  %4217 = vadd.xlane.f32.xlu2 %v11649_v32  ;;  %v3812_v28 = vperm.slane %v11652_v52, %v11562_v56  ;;  %vm11654_vm14 = vcmask 786112   ;;  %v11656_v48 = vld [vmem:[#allocation109_spill] sm:$0xff]  ;;  %v11657_v17 = vld [vmem:[#allocation148_spill] sm:$0xff]  ;;  %v11663_v52 = vld [vmem:[#allocation211_spill] sm:$0xff] }
 0xac4   :  { %v3811_v14 = vsel %vm10643_vm12, %v3810_v30, %v3809_v6  ;;  %v3867_v20 = vsel %vm1905_vm6, %v11650_v21, %v3865_v41  ;;  %v3896_v8 = vsel %vm1901_vm4, %v11651_v55, %v3894_v26  ;;  %v3958_v2 = vsel %vm1901_vm4, %v3957_v34, %v3956_v42  ;;  %v11653_v30 = vld [vmem:[#allocation171_spill] sm:$0xff]  ;;  %v9633_v42 = vpop.xlane.xlu0 %4183  ;;  %v11661_v21 = vld [vmem:[#allocation154_spill] sm:$0xff]  ;;  %vm11664_vm0 = vmmov %vm11654_vm14 }
 0xac5   :  { %v3869_v29 = vsel %vm10645_vm8, %v3868_v58, %v3867_v20  ;;  %v3898_v32 = vsel %vm1905_vm6, %v3897_v54, %v3896_v8  ;;  %4209 = vadd.xlane.f32.xlu1 %v11653_v30  ;;  %v3960_v0 = vsel %vm1905_vm6, %v3959_v53, %v3958_v2  ;;  %v3790_v41 = vsel %vm11654_vm14, %v3789_v4, %v3788_v9  ;;  %v11660_v4 = vld [vmem:[#allocation65_spill] sm:$0xff]  ;;  %v11662_v8 = vld [vmem:[#allocation168_spill] sm:$0xff] }
 0xac6   :  { %v11655_v33 = vperm.slane %v11592_v62, %v11546_v47  ;;  %v3870_v34 = vperm.slane %v11656_v48, %v11542_v16  ;;  %v3899_v6 = vperm.slane %v11657_v17, %v11546_v47  ;;  %v9626_v58 = vpop.xlane.xlu2 %3593  ;;  %vm11658_vm5 = vcmask 523712   ;;  %v11668_v17 = vld [vmem:[#allocation74_spill] sm:$0xff] }
 0xac7   :  { %v3813_v54 = vsel %vm11658_vm5, %v3812_v28, %v3811_v14  ;;  %v3816_v53 = vperm.slane %v11659_v23, %v11573_v40  ;;  %v3841_v9 = vperm.slane %v11660_v4, %v11569_v22  ;;  %v3874_v20 = vperm.slane %v11661_v21, %v11562_v56 }
 0xac8   :  { %v3838_v26 = vsel %vm10645_vm8, %v11655_v33, %v3836_v49  ;;  %v3871_v49 = vsel %vm10644_vm10, %v3870_v34, %v3869_v29  ;;  %v3900_v55 = vsel %vm10645_vm8, %v3899_v6, %v3898_v32  ;;  %v3903_v14 = vperm.slane %v11662_v8, %v11569_v22  ;;  %v3586_v2 = vpop.xlane.xlu1 %3585  ;;  %v11665_v33 = vld [vmem:[#allocation29_spill] sm:$0xff]  ;;  %v11667_v32 = vld [vmem:[#allocation127_spill] sm:$0xff]  ;;  %v11674_v8 = vld [vmem:[#allocation182_spill] sm:$0xff] }
 0xac9   :  { %v3840_v62 = vsel %vm10644_vm10, %v3839_v44, %v3838_v26  ;;  %v3971_v28 = vperm.slane %v11663_v52, %v11573_v40  ;;  %v3759_v30 = vsel %vm11664_vm0, %v3758_v18, %v3757_v13  ;;  %v11666_v48 = vperm.slane %v11665_v33, %v11575_v10  ;;  %4371 = vadd.xlane.f32.xlu0 %v9488_v46  ;;  %v11669_v18 = vld [vmem:[#allocation47_spill] sm:$0xff] }
 0xaca   :  { %v3961_v29 = vperm.slane %v3586_v2, %v11546_v47  ;;  %v3793_v26 = vperm.slane %v11667_v32, %v11566_v5  ;;  %v3842_v34 = vsel %vm10643_vm12, %v3841_v9, %v3840_v62  ;;  %v3845_v6 = vperm.slane %v11668_v17, %v11580_v37  ;;  %v11684_v32 = vld [vmem:[#allocation140_spill] sm:$0xff] }
 0xacb   :  { %v3792_v44 = vsel %vm1941_vm3, %v11666_v48, %v3790_v41  ;;  %v3963_v13 = vperm.slane %v9559_v61, %v11542_v16  ;;  %v11670_v23 = vperm.slane %v11669_v18, %v11580_v37  ;;  %vm11671_vm14 = vcmask 589312   ;;  %4223 = vadd.xlane.f32.xlu2 %v11674_v8  ;;  %v11681_v48 = vld [vmem:[#allocation179_spill] sm:$0xff] }
 0xacc   :  { %v11672_v4 = vperm.slane %v8872_v59, %v11569_v22  ;;  %v11673_v21 = vperm.slane %v8979_v15, %v11542_v16  ;;  %v3962_v62 = vsel %vm10645_vm8, %v3961_v29, %v3960_v0  ;;  %vm11675_vm5 = vcmask 654912   ;;  %v11679_v15 = vld [vmem:[#allocation149_spill] sm:$0xff]  ;;  %v11683_v29 = vld [vmem:[#allocation51_spill] sm:$0xff] }
 0xacd   :  { %v3815_v41 = vsel %vm11671_vm14, %v11670_v23, %v3813_v54  ;;  %vm11676_vm0 = vcmask 523712   ;;  %v3964_v52 = vsel %vm10644_vm10, %v3963_v13, %v3962_v62  ;;  %v11677_v59 = vperm.slane %v11595_v60, %v11562_v56  ;;  %v11680_v0 = vld [vmem:[#allocation157_spill] sm:$0xff]  ;;  %4215 = vadd.xlane.f32.xlu1 %v11681_v48  ;;  %v11687_v23 = vld [vmem:[#allocation156_spill] sm:$0xff] }
 0xace   :  { %v3873_v46 = vsel %vm10643_vm12, %v11672_v4, %v3871_v49  ;;  %v3902_v9 = vsel %vm10644_vm10, %v11673_v21, %v3900_v55  ;;  %v3817_v61 = vsel %vm11675_vm5, %v3816_v53, %v3815_v41  ;;  %vm11678_vm14 = vmmov %vm11676_vm0  ;;  %v3876_v55 = vperm.slane %v11679_v15, %v11580_v37  ;;  %v9695_v13 = vpop.xlane.xlu2 %3599  ;;  %v11688_v4 = vld [vmem:[#allocation170_spill] sm:$0xff]  ;;  %v11690_v21 = vld [vmem:[#allocation105_spill] sm:$0xff] }
 0xacf   :  { %v3875_v2 = vsel %vm11676_vm0, %v3874_v20, %v3873_v46  ;;  %v3904_v54 = vsel %vm10643_vm12, %v3903_v14, %v3902_v9  ;;  %v3844_v49 = vsel %vm11678_vm14, %v11677_v59, %v3842_v34  ;;  %v3905_v33 = vperm.slane %v11680_v0, %v11562_v56  ;;  %v11691_v9 = vld [vmem:[#allocation121_spill] sm:$0xff]  ;;  %v9714_v59 = vpop.xlane.xlu0 %4189 }
 0xad0   :  { %v11682_v53 = vperm.slane %v11623_v63, %v11569_v22  ;;  %v3794_v14 = vsel %vm1945_vm15, %v3793_v26, %v3792_v44  ;;  %v3818_v60 = vperm.slane %v11683_v29, %v11564_v45  ;;  %v3847_v34 = vperm.slane %v11684_v32, %v11573_v40  ;;  %v11700_v29 = vld [vmem:[#allocation54_spill] sm:$0xff] }
 0xad1   :  { %vm11685_vm5 = vcmask 589312   ;;  %v3880_v41 = vperm.slane %v11687_v23, %v11564_v45  ;;  %v3906_v63 = vsel %vm11678_vm14, %v3905_v33, %v3904_v54  ;;  %v3909_v44 = vperm.slane %v11688_v4, %v11573_v40 }
 0xad2   :  { %v3966_v20 = vsel %vm10643_vm12, %v11682_v53, %v3964_v52  ;;  %v3846_v17 = vsel %vm11685_vm5, %v3845_v6, %v3844_v49  ;;  %vm11686_vm0 = vmmov %vm11685_vm5  ;;  %v11689_v26 = vperm.slane %v11628_v7, %v11575_v10  ;;  %v3764_v6 = vperm.slane %v11690_v21, %v11587_v25  ;;  %v11693_v52 = vld [vmem:[#allocation56_spill] sm:$0xff]  ;;  %v11695_v7 = vld [vmem:[#allocation73_spill] sm:$0xff] }
 0xad3   :  { %v3877_v18 = vsel %vm11686_vm0, %v3876_v55, %v3875_v2  ;;  %v3795_v62 = vperm.slane %v11691_v9, %v11587_v25  ;;  %vm11692_vm5 = vcmask 720512   ;;  %v3592_v2 = vpop.xlane.xlu1 %3591  ;;  %v3822_v54 = vperm.slane %v11693_v52, %v11575_v10  ;;  %v11713_v9 = vld [vmem:[#allocation192_spill] sm:$0xff] }
 0xad4   :  { %v3761_v46 = vsel %vm1941_vm3, %v11689_v26, %v3759_v30  ;;  %v3819_v8 = vsel %vm11692_vm5, %v3818_v60, %v3817_v61  ;;  %vm11694_vm0 = vcmask 654912   ;;  %v3851_v15 = vperm.slane %v11695_v7, %v11584_v11 }
 0xad5   :  { %v3848_v49 = vsel %vm11694_vm0, %v3847_v34, %v3846_v17  ;;  %v3967_v30 = vperm.slane %v3592_v2, %v11562_v56  ;;  %v3796_v55 = vsel %vm1949_vm11, %v3795_v62, %v3794_v14  ;;  %v11696_v0 = vperm.slane %v8895_v36, %v11573_v40  ;;  %vm11697_vm14 = vmmov %vm11694_vm0  ;;  %v11706_v17 = vld [vmem:[#allocation38_spill] sm:$0xff]  ;;  %4221 = vadd.xlane.f32.xlu1 %v11713_v9 }
 0xad6   :  { %v11698_v33 = vperm.slane %v8999_v39, %v11580_v37  ;;  %vm11699_vm5 = vcmask 589312   ;;  %v3969_v53 = vperm.slane %v9626_v58, %v11580_v37  ;;  %v11701_v60 = vperm.slane %v11700_v29, %v11584_v11  ;;  %vm11704_vm10 = vmmov %vm11697_vm14  ;;  %4229 = vadd.xlane.f32.xlu2 %v11706_v17  ;;  %v11709_v58 = vld [vmem:[#allocation146_spill] sm:$0xff] }
 0xad7   :  { %v3879_v61 = vsel %vm11697_vm14, %v11696_v0, %v3877_v18  ;;  %vm11702_vm0 = vcmask 786112   ;;  %vm11703_vm12 = vcmask 720512   ;;  %vm11705_vm8 = vcmask 523712   ;;  %v11725_v17 = vld [vmem:[#allocation142_spill] sm:$0xff] }
 0xad8   :  { %v3908_v48 = vsel %vm11699_vm5, %v11698_v33, %v3906_v63  ;;  %v3821_v32 = vsel %vm11702_vm0, %v11701_v60, %v3819_v8  ;;  %v3881_v14 = vsel %vm11703_vm12, %v3880_v41, %v3879_v61  ;;  %v3968_v36 = vsel %vm11705_vm8, %v3967_v30, %v3966_v20  ;;  %vm11708_vm14 = vmmov %vm11703_vm12  ;;  %v11710_v63 = vld [vmem:[#allocation160_spill] sm:$0xff]  ;;  %v11715_v8 = vld [vmem:[#allocation159_spill] sm:$0xff] }
 0xad9   :  { %v3910_v34 = vsel %vm11704_vm10, %v3909_v44, %v3908_v48  ;;  %v11707_v39 = vperm.slane %v11596_v12, %v11564_v45  ;;  %v3882_v23 = vperm.slane %v11709_v58, %v11584_v11  ;;  %v3911_v4 = vperm.slane %v11710_v63, %v11564_v45  ;;  %v11711_v44 = vld [vmem:[#allocation70_spill] sm:$0xff]  ;;  %vm11712_vm8 = vmmov %vm11702_vm0  ;;  %v11718_v30 = vld [vmem:[#allocation93_spill] sm:$0xff] }
 0xada   :  { %v3970_v26 = vsel %vm11699_vm5, %v3969_v53, %v3968_v36  ;;  %v3823_v41 = vsel %vm1941_vm3, %v3822_v54, %v3821_v32  ;;  %v3853_v20 = vperm.slane %v11711_v44, %v11575_v10  ;;  %vm11714_vm12 = vmmov %vm11702_vm0  ;;  %v3886_v2 = vperm.slane %v11715_v8, %v11566_v5  ;;  %v3606_v54 = vpop.xlane.xlu2 %3605  ;;  %v11720_v33 = vld [vmem:[#allocation20_spill] sm:$0xff]  ;;  %v11722_v53 = vld [vmem:[#allocation55_spill] sm:$0xff] }
 0xadb   :  { %v3850_v18 = vsel %vm11708_vm14, %v11707_v39, %v3848_v49  ;;  %v3972_v12 = vsel %vm11704_vm10, %v3971_v28, %v3970_v26  ;;  %v3883_v62 = vsel %vm11714_vm12, %v3882_v23, %v3881_v14  ;;  %vm11716_vm0 = vmmov %vm11708_vm14  ;;  %v11717_v49 = vld [vmem:[#allocation166_spill] sm:$0xff]  ;;  %v3766_v0 = vperm.slane %v11718_v30, %v11577_v19  ;;  %v11723_v32 = vld [vmem:[#allocation31_spill] sm:$0xff] }
 0xadc   :  { %v3852_v21 = vsel %vm11712_vm8, %v3851_v15, %v3850_v18  ;;  %v3912_v52 = vsel %vm11716_vm0, %v3911_v4, %v3910_v34  ;;  %v3915_v7 = vperm.slane %v11717_v49, %v11575_v10  ;;  %v11719_v15 = vld [vmem:[#allocation103_spill] sm:$0xff]  ;;  %v11721_v28 = vperm.slane %v11720_v33, %v11566_v5  ;;  %v3598_v18 = vpop.xlane.xlu1 %3597  ;;  %vm11728_vm14 = vmmov %vm11712_vm8  ;;  %v11729_v4 = vld [vmem:[#allocation62_spill] sm:$0xff] }
 0xadd   :  { %v3977_v61 = vperm.slane %v11719_v15, %v11575_v10  ;;  %v3824_v29 = vperm.slane %v11722_v53, %v11566_v5  ;;  %v11724_v14 = vperm.slane %v11723_v32, %v11577_v19  ;;  %v3854_v36 = vsel %vm1941_vm3, %v3853_v20, %v3852_v21  ;;  %v11730_v21 = vld [vmem:[#allocation108_spill] sm:$0xff]  ;;  %vm11734_vm5 = vmmov %vm11716_vm0 }
 0xade   :  { %v3763_v48 = vsel %vm1945_vm15, %v11721_v28, %v3761_v46  ;;  %v3857_v39 = vperm.slane %v11725_v17, %v11587_v25  ;;  %v11726_v46 = vperm.slane %v8918_v1, %v11575_v10  ;;  %v3828_v26 = vperm.slane %v11729_v4, %v11577_v19  ;;  %v9794_v1 = vpop.xlane.xlu0 %4195  ;;  %v11735_v30 = vld [vmem:[#allocation212_spill] sm:$0xff] }
 0xadf   :  { %v3765_v60 = vsel %vm1949_vm11, %v3764_v6, %v3763_v48  ;;  %v3798_v34 = vsel %vm1953_vm1, %v11724_v14, %v3796_v55  ;;  %v3825_v58 = vsel %vm1945_vm15, %v3824_v29, %v3823_v41  ;;  %v11727_v6 = vperm.slane %v9022_v38, %v11584_v11  ;;  %4235 = vadd.xlane.f32.xlu2 %v11735_v30  ;;  %v11738_v33 = vld [vmem:[#allocation220_spill] sm:$0xff] }
 0xae0   :  { %v3885_v23 = vsel %vm1941_vm3, %v11726_v46, %v3883_v62  ;;  %v3973_v55 = vperm.slane %v3598_v18, %v11564_v45  ;;  %v3975_v41 = vperm.slane %v9695_v13, %v11584_v11  ;;  %v11731_v9 = vperm.slane %v11730_v21, %v11566_v5  ;;  %v11732_v62 = vld [vmem:[#allocation246_spill] sm:$0xff]  ;;  %v11741_v18 = vld [vmem:[#allocation133_spill] sm:$0xff]  ;;  %v11742_v46 = vld [vmem:[#allocation99_spill] sm:$0xff] }
 0xae1   :  { %v3914_v63 = vsel %vm11728_vm14, %v11727_v6, %v3912_v52  ;;  %v3887_v44 = vsel %vm1945_vm15, %v3886_v2, %v3885_v23  ;;  %v3888_v8 = vperm.slane %v11732_v62, %v11587_v25  ;;  %v11733_v52 = vld [vmem:[#allocation163_spill] sm:$0xff]  ;;  %v3859_v28 = vperm.slane %v11738_v33, %v11577_v19 }
 0xae2   :  { %v3916_v20 = vsel %vm1941_vm3, %v3915_v7, %v3914_v63  ;;  %v3856_v38 = vsel %vm1945_vm15, %v11731_v9, %v3854_v36  ;;  %v3917_v49 = vperm.slane %v11733_v52, %v11566_v5  ;;  %v3974_v2 = vsel %vm11734_vm5, %v3973_v55, %v3972_v12  ;;  %v11736_v7 = vld [vmem:[#allocation63_spill] sm:$0xff]  ;;  %v11739_v12 = vld [vmem:[#allocation229_spill] sm:$0xff]  ;;  %v11740_v36 = vld [vmem:[#allocation180_spill] sm:$0xff]  ;;  %v4152_v6 = vpop.xlane.xlu2 %4151 }
 0xae3   :  { %v11737_v13 = vperm.slane %v11736_v7, %v11587_v25  ;;  %v3858_v48 = vsel %vm1949_vm11, %v3857_v39, %v3856_v38  ;;  %v3976_v53 = vsel %vm11712_vm8, %v3975_v41, %v3974_v2  ;;  %v3889_v29 = vsel %vm1949_vm11, %v3888_v8, %v3887_v44  ;;  %4227 = vadd.xlane.f32.xlu1 %v11740_v36  ;;  %v11744_v38 = vld [vmem:[#allocation118_spill] sm:$0xff] }
 0xae4   :  { %v3918_v32 = vsel %vm1945_vm15, %v3917_v49, %v3916_v20  ;;  %v3921_v14 = vperm.slane %v11739_v12, %v11577_v19  ;;  %v3978_v17 = vsel %vm1941_vm3, %v3977_v61, %v3976_v53  ;;  %v3919_v23 = vperm.slane %v11742_v46, %v11587_v25  ;;  %v3604_v61 = vpop.xlane.xlu1 %3603  ;;  %v11747_v2 = vld [vmem:[#allocation50_spill] sm:$0xff] }
 0xae5   :  { %v3827_v15 = vsel %vm1949_vm11, %v11737_v13, %v3825_v58  ;;  %v3890_v58 = vperm.slane %v11741_v18, %v11577_v19  ;;  %v3767_v63 = vsel %vm1953_vm1, %v3766_v0, %v3765_v60  ;;  %v3860_v55 = vsel %vm1953_vm1, %v3859_v28, %v3858_v48  ;;  %v11750_v28 = vld [vmem:[#allocation178_spill] sm:$0xff]  ;;  %v11753_v18 = vld [vmem:[#allocation204_spill] sm:$0xff] }
 0xae6   :  { %v3829_v39 = vsel %vm1953_vm1, %v3828_v26, %v3827_v15  ;;  %v3985_v4 = vsel %vm2172_vm7, %v3798_v34, %v3767_v63  ;;  %v3920_v20 = vsel %vm1949_vm11, %v3919_v23, %v3918_v32  ;;  %vm11743_vm10 = vcmask 1042434   ;;  %v11745_v26 = vld [vmem:[#allocation237_spill] sm:$0xff]  ;;  %v9845_v15 = vpop.xlane.xlu0 %4201 }
 0xae7   :  { %v3891_v44 = vsel %vm1953_vm1, %v3890_v58, %v3889_v29  ;;  %v3986_v41 = vsel %vm11743_vm10, %v3829_v39, %v3985_v4  ;;  %v3922_v21 = vsel %vm1953_vm1, %v3921_v14, %v3920_v20  ;;  %v3979_v9 = vperm.slane %v3604_v61, %v11566_v5  ;;  %v11746_v34 = vld [vmem:[#allocation173_spill] sm:$0xff]  ;;  %v11755_v39 = vld [vmem:[#allocation58_spill] sm:$0xff]  ;;  %v11756_v61 = vld [vmem:[#allocation207_spill] sm:$0xff] }
 0xae8   :  { %v4067_v62 = vmul.f32 %v11745_v26, %v11744_v38  ;;  %v3987_v0 = vsel %vm2176_vm13, %v3860_v55, %v3986_v41  ;;  %v3981_v60 = vperm.slane %v3606_v54, %v11587_v25  ;;  %v3983_v8 = vperm.slane %v11746_v34, %v11577_v19  ;;  %v11754_v58 = vld [vmem:[#allocation169_spill] sm:$0xff] }
 0xae9   :  { %v3988_v52 = vsel %vm2178_vm9, %v3891_v44, %v3987_v0  ;;  %v3980_v49 = vsel %vm1945_vm15, %v3979_v9, %v3978_v17  ;;  %v4063_v30 = vmul.f32 %v11747_v2, %v11744_v38  ;;  %vm11748_vm12 = vcmask 1045509   ;;  %v11752_v17 = vld [vmem:[#allocation135_spill] sm:$0xff]  ;;  %v11757_v9 = vld [vmem:[#allocation181_spill] sm:$0xff] }
 0xaea   :  { %4241 = vadd.xlane.f32.xlu2 %v4067_v62  ;;  %v3989_v7 = vsel %vm11748_vm12, %v3922_v21, %v3988_v52  ;;  %v3982_v13 = vsel %vm1949_vm11, %v3981_v60, %v3980_v49  ;;  %vm11749_vm0 = vcmask 1046534   ;;  %v9851_v48 = vmul.f32 0.0, %v11750_v28  ;;  %v4158_v29 = vpop.xlane.xlu2 %4157 }
 0xaeb   :  { %v3990_v54 = vsel %vm11749_vm0, %v9534_v57, %v3989_v7  ;;  %v3984_v33 = vsel %vm1953_vm1, %v3983_v8, %v3982_v13  ;;  %4233 = vadd.xlane.f32.xlu1 %v4063_v30  ;;  %vm11751_vm14 = vcmask 1047559   ;;  %v4534_v14 = vperm.slane %v4152_v6, %v11529_v27  ;;  %v11761_v30 = vld [vmem:[#allocation101_spill] sm:$0xff] }
 0xaec   :  { %v3991_v53 = vsel %vm11751_vm14, %v3984_v33, %v3990_v54  ;;  %v4150_v12 = vpop.xlane.xlu1 %4149  ;;  %v4070_v57 = vmul.f32 %v11753_v18, %v11752_v17  ;;  %v4536_v46 = vperm.slane %v11754_v58, %v11528_v51  ;;  %v4066_v63 = vmul.f32 %v11755_v39, %v11744_v38  ;;  %v11758_v38 = vld [vmem:[#allocation64_spill] sm:$0xff]  ;;  %v11762_v54 = vld [vmem:[#allocation185_spill] sm:$0xff] }
 0xaed   :  { %v9855_v32 = vadd.f32 %v3991_v53, %v9851_v48  ;;  %v4533_v36 = vperm.slane %v4150_v12, %v11527_v31  ;;  %v4073_v41 = vmul.f32 %v11756_v61, %v11752_v17  ;;  %v4540_v21 = vperm.slane %v4158_v29, %v11546_v47  ;;  %v11764_v53 = vld [vmem:[#allocation75_spill] sm:$0xff]  ;;  %v11767_v58 = vld [vmem:[#allocation188_spill] sm:$0xff] }
 0xaee   :  { %v9867_v44 = vpop.xlane.xlu0 %4207  ;;  %v4542_v26 = vperm.slane %v11757_v9, %v11542_v16  ;;  %v4069_v0 = vmul.f32 %v11758_v38, %v11752_v17  ;;  %vm11759_vm5 = vcmask 326912   ;;  %vm11760_vm8 = vcmask 392512   ;;  %v11772_v38 = vld [vmem:[#allocation226_spill] sm:$0xff] }
 0xaef   :  { %v4535_v23 = vsel %vm1897_vm2, %v4534_v14, %v4533_v36  ;;  %v4076_v7 = vmul.f32 %v11761_v30, %v11752_v17  ;;  %v4548_v33 = vperm.slane %v11762_v54, %v11580_v37  ;;  %vm11763_vm10 = vcmask 458112  }
 0xaf0   :  { %v4537_v55 = vsel %vm1901_vm4, %v4536_v46, %v4535_v23  ;;  %v4072_v29 = vmul.f32 %v11764_v53, %v11752_v17  ;;  %vm11765_vm12 = vcmask 523712   ;;  %vm11766_vm0 = vcmask 589312   ;;  %v11775_v53 = vld [vmem:[#allocation238_spill] sm:$0xff] }
 0xaf1   :  { %v4079_v46 = vmul.f32 %v11767_v58, %v11752_v17  ;;  %v4554_v39 = vperm.slane %v9460_v43, %v11584_v11  ;;  %vm11768_vm14 = vcmask 654912   ;;  %5446 = vrcp.f32 %v9855_v32 }
 0xaf2   :  { %4247 = vadd.xlane.f32.xlu2 %v4070_v57  ;;  %v4164_v4 = vpop.xlane.xlu2 %4163 }
 0xaf3   :  { %4239 = vadd.xlane.f32.xlu1 %v4066_v63  ;;  %v4546_v13 = vperm.slane %v4164_v4, %v11562_v56  ;;  %v11769_v4 = vld [vmem:[#allocation81_spill] sm:$0xff] }
 0xaf4   :  { %v4156_v6 = vpop.xlane.xlu1 %4155 }
 0xaf5   :  { %v4538_v20 = vperm.slane %v4156_v6, %v11531_v35  ;;  %v4075_v6 = vmul.f32 %v11769_v4, %v11752_v17 }
 0xaf6   :  { %v9880_v49 = vpop.xlane.xlu0 %4213 }
 0xaf7   :  { %v4539_v62 = vsel %vm1905_vm6, %v4538_v20, %v4537_v55 }
 0xaf8   :  { %v4541_v60 = vsel %vm11759_vm5, %v4540_v21, %v4539_v62  ;;  %vm11770_vm5 = vcmask 720512   ;;  %v4565_v21 = vperm.slane %v9633_v42, %v11529_v27  ;;  %v11773_v42 = vld [vmem:[#allocation90_spill] sm:$0xff] }
 0xaf9   :  { %v4543_v34 = vsel %vm11760_vm8, %v4542_v26, %v4541_v60  ;;  %vm11771_vm8 = vcmask 786112  }
 0xafa   :  { %4253 = vadd.xlane.f32.xlu2 %v4073_v41  ;;  %v4170_v8 = vpop.xlane.xlu2 %4169 }
 0xafb   :  { %4245 = vadd.xlane.f32.xlu1 %v4069_v0  ;;  %v4552_v23 = vperm.slane %v4170_v8, %v11564_v45  ;;  %v4082_v0 = vmul.f32 %v11772_v38, %v11752_v17  ;;  %v11780_v38 = vld [vmem:[#allocation37_spill] sm:$0xff] }
 0xafc   :  { %v4162_v52 = vpop.xlane.xlu1 %4161 }
 0xafd   :  { %v4544_v2 = vperm.slane %v4162_v52, %v11569_v22  ;;  %v4078_v52 = vmul.f32 %v11773_v42, %v11752_v17 }
 0xafe   :  { %v9899_v63 = vpop.xlane.xlu0 %4219 }
 0xaff   :  { %v4545_v28 = vsel %vm11763_vm10, %v4544_v2, %v4543_v34  ;;  %v4560_v34 = vperm.slane %v9540_v3, %v11587_v25  ;;  %vm11779_vm10 = vcmask 326912  }
 0xb00   :  { %v4547_v12 = vsel %vm11765_vm12, %v4546_v13, %v4545_v28  ;;  %v11774_v28 = vld [vmem:[#allocation200_spill] sm:$0xff]  ;;  %vm11781_vm12 = vcmask 392512  }
 0xb01   :  { %v4549_v14 = vsel %vm11766_vm0, %v4548_v33, %v4547_v12  ;;  %v4085_v3 = vmul.f32 %v11775_v53, %v11774_v28  ;;  %v11776_v12 = vld [vmem:[#allocation95_spill] sm:$0xff]  ;;  %vm11783_vm0 = vcmask 458112  }
 0xb02   :  { %4259 = vadd.xlane.f32.xlu2 %v4076_v7  ;;  %v4176_v36 = vpop.xlane.xlu2 %4175 }
 0xb03   :  { %4251 = vadd.xlane.f32.xlu1 %v4072_v29  ;;  %v4558_v60 = vperm.slane %v4176_v36, %v11566_v5 }
 0xb04   :  { %v4168_v18 = vpop.xlane.xlu1 %4167 }
 0xb05   :  { %v4550_v57 = vperm.slane %v4168_v18, %v11573_v40 }
 0xb06   :  { %v9920_v30 = vpop.xlane.xlu0 %4225 }
 0xb07   :  { %v4551_v55 = vsel %vm11768_vm14, %v4550_v57, %v4549_v14  ;;  %v4081_v14 = vmul.f32 %v11776_v12, %v11752_v17  ;;  %vm11784_vm14 = vcmask 523712   ;;  %v11787_v12 = vld [vmem:[#allocation116_spill] sm:$0xff] }
 0xb08   :  { %v4553_v20 = vsel %vm11770_vm5, %v4552_v23, %v4551_v55  ;;  %v4571_v55 = vperm.slane %v9714_v59, %v11546_v47  ;;  %v4091_v59 = vmul.f32 %v11780_v38, %v11774_v28  ;;  %vm11786_vm5 = vcmask 589312  }
 0xb09   :  { %v4555_v61 = vsel %vm11771_vm8, %v4554_v39, %v4553_v20  ;;  %vm11788_vm8 = vcmask 654912  }
 0xb0a   :  { %4265 = vadd.xlane.f32.xlu2 %v4079_v46  ;;  %v4182_v41 = vpop.xlane.xlu2 %4181  ;;  %v11777_v46 = vld [vmem:[#allocation110_spill] sm:$0xff] }
 0xb0b   :  { %4257 = vadd.xlane.f32.xlu1 %v4075_v6  ;;  %v4564_v9 = vperm.slane %v4182_v41, %v11527_v31  ;;  %v4088_v23 = vmul.f32 %v11777_v46, %v11774_v28  ;;  %v11778_v6 = vld [vmem:[#allocation106_spill] sm:$0xff] }
 0xb0c   :  { %v4174_v43 = vpop.xlane.xlu1 %4173  ;;  %v4084_v20 = vmul.f32 %v11778_v6, %v11752_v17 }
 0xb0d   :  { %v4566_v26 = vsel %vm1897_vm2, %v4565_v21, %v4564_v9  ;;  %v4556_v62 = vperm.slane %v4174_v43, %v11575_v10 }
 0xb0e   :  { %v9931_v18 = vpop.xlane.xlu0 %4231 }
 0xb0f   :  { %v4557_v8 = vsel %vm1941_vm3, %v4556_v62, %v4555_v61 }
 0xb10   :  { %v4559_v2 = vsel %vm1945_vm15, %v4558_v60, %v4557_v8  ;;  %v11782_v60 = vld [vmem:[#allocation112_spill] sm:$0xff] }
 0xb11   :  { %v4561_v7 = vsel %vm1949_vm11, %v4560_v34, %v4559_v2  ;;  %v4087_v34 = vmul.f32 %v11782_v60, %v11774_v28  ;;  %v11794_v60 = vld [vmem:[#allocation124_spill] sm:$0xff] }
 0xb12   :  { %4271 = vadd.xlane.f32.xlu2 %v4082_v0  ;;  %v4188_v13 = vpop.xlane.xlu2 %4187  ;;  %v4577_v0 = vperm.slane %v9794_v1, %v11562_v56 }
 0xb13   :  { %4263 = vadd.xlane.f32.xlu1 %v4078_v52  ;;  %v4569_v39 = vperm.slane %v4188_v13, %v11531_v35  ;;  %v11785_v13 = vld [vmem:[#allocation111_spill] sm:$0xff] }
 0xb14   :  { %v4180_v54 = vpop.xlane.xlu1 %4179 }
 0xb15   :  { %v4562_v33 = vperm.slane %v4180_v54, %v11577_v19  ;;  %v4094_v54 = vmul.f32 %v11785_v13, %v11774_v28  ;;  %v4595_v13 = vperm.slane %v9880_v49, %v11527_v31 }
 0xb16   :  { %v9944_v43 = vpop.xlane.xlu0 %4237 }
 0xb17   :  { %v9927_v29 = vsel %vm1953_vm1, %v4562_v33, %v4561_v7  ;;  %v4583_v33 = vperm.slane %v9845_v15, %v11564_v45 }
 0xb1a   :  { %4277 = vadd.xlane.f32.xlu2 %v4085_v3  ;;  %v4194_v36 = vpop.xlane.xlu2 %4193 }
 0xb1b   :  { %4269 = vadd.xlane.f32.xlu1 %v4081_v14  ;;  %v4090_v14 = vmul.f32 %v11787_v12, %v11774_v28 }
 0xb1c   :  { %v4186_v57 = vpop.xlane.xlu1 %4185 }
 0xb1d   :  { %v4567_v58 = vperm.slane %v4186_v57, %v11528_v51 }
 0xb1e   :  { %v9963_v53 = vpop.xlane.xlu0 %4243 }
 0xb1f   :  { %v4568_v4 = vsel %vm1901_vm4, %v4567_v58, %v4566_v26  ;;  %v4575_v26 = vperm.slane %v4194_v36, %v11569_v22 }
 0xb20   :  { %v4570_v61 = vsel %vm1905_vm6, %v4569_v39, %v4568_v4  ;;  %v11790_v39 = vld [vmem:[#allocation228_spill] sm:$0xff]  ;;  %v4589_v4 = vperm.slane %v9867_v44, %v11566_v5 }
 0xb21   :  { %v4572_v41 = vsel %vm11779_vm10, %v4571_v55, %v4570_v61  ;;  %vm11789_vm10 = vcmask 720512   ;;  %v4097_v15 = vmul.f32 %v11790_v39, %v11774_v28 }
 0xb22   :  { %4283 = vadd.xlane.f32.xlu2 %v4088_v23  ;;  %v4200_v21 = vpop.xlane.xlu2 %4199 }
 0xb23   :  { %4275 = vadd.xlane.f32.xlu1 %v4084_v20  ;;  %v4581_v1 = vperm.slane %v4200_v21, %v11573_v40  ;;  %v11792_v20 = vld [vmem:[#allocation42_spill] sm:$0xff] }
 0xb24   :  { %v4192_v9 = vpop.xlane.xlu1 %4191  ;;  %v4093_v61 = vmul.f32 %v11792_v20, %v11774_v28  ;;  %v11800_v20 = vld [vmem:[#allocation129_spill] sm:$0xff] }
 0xb25   :  { %v4573_v62 = vperm.slane %v4192_v9, %v11542_v16 }
 0xb26   :  { %v9980_v21 = vpop.xlane.xlu0 %4249 }
 0xb27   :  { %v4574_v17 = vsel %vm11781_vm12, %v4573_v62, %v4572_v41  ;;  %vm11791_vm12 = vcmask 786112  }
 0xb28   :  { %v4576_v8 = vsel %vm11783_vm0, %v4575_v26, %v4574_v17  ;;  %v11793_v26 = vld [vmem:[#allocation248_spill] sm:$0xff]  ;;  %vm11801_vm0 = vcmask 392512  }
 0xb29   :  { %v4578_v42 = vsel %vm11784_vm14, %v4577_v0, %v4576_v8  ;;  %v4100_v44 = vmul.f32 %v11793_v26, %v11774_v28  ;;  %vm11802_vm14 = vcmask 458112   ;;  %v11803_v26 = vld [vmem:[#allocation195_spill] sm:$0xff] }
 0xb2a   :  { %4289 = vadd.xlane.f32.xlu2 %v4091_v59  ;;  %v4206_v52 = vpop.xlane.xlu2 %4205 }
 0xb2b   :  { %4281 = vadd.xlane.f32.xlu1 %v4087_v34  ;;  %v4587_v55 = vperm.slane %v4206_v52, %v11575_v10  ;;  %v4096_v34 = vmul.f32 %v11794_v60, %v11774_v28 }
 0xb2c   :  { %v4198_v2 = vpop.xlane.xlu1 %4197 }
 0xb2d   :  { %v4579_v7 = vperm.slane %v4198_v2, %v11580_v37 }
 0xb2e   :  { %v9995_v2 = vpop.xlane.xlu0 %4255 }
 0xb2f   :  { %v4580_v3 = vsel %vm11786_vm5, %v4579_v7, %v4578_v42  ;;  %vm11804_vm5 = vcmask 523712  }
 0xb30   :  { %v4582_v36 = vsel %vm11788_vm8, %v4581_v1, %v4580_v3  ;;  %v11795_v1 = vld [vmem:[#allocation225_spill] sm:$0xff]  ;;  %vm11806_vm8 = vcmask 589312  }
 0xb31   :  { %v4584_v57 = vsel %vm11789_vm10, %v4583_v33, %v4582_v36  ;;  %v11796_v33 = vld [vmem:[#allocation215_spill] sm:$0xff]  ;;  %v11797_v36 = vld [vmem:[#allocation122_spill] sm:$0xff]  ;;  %vm11807_vm10 = vcmask 654912  }
 0xb32   :  { %4295 = vadd.xlane.f32.xlu2 %v4094_v54  ;;  %v4212_v58 = vpop.xlane.xlu2 %4211  ;;  %v4103_v3 = vmul.f32 %v11796_v33, %v11795_v1 }
 0xb33   :  { %4287 = vadd.xlane.f32.xlu1 %v4090_v14  ;;  %v4593_v0 = vperm.slane %v4212_v58, %v11577_v19  ;;  %v4600_v14 = vperm.slane %v9899_v63, %v11531_v35 }
 0xb34   :  { %v4204_v46 = vpop.xlane.xlu1 %4203 }
 0xb35   :  { %v4585_v23 = vperm.slane %v4204_v46, %v11584_v11 }
 0xb36   :  { %v10010_v39 = vpop.xlane.xlu0 %4261 }
 0xb37   :  { %v4586_v6 = vsel %vm11791_vm12, %v4585_v23, %v4584_v57  ;;  %v4099_v57 = vmul.f32 %v11797_v36, %v11774_v28  ;;  %vm11809_vm12 = vcmask 720512   ;;  %v11810_v36 = vld [vmem:[#allocation48_spill] sm:$0xff] }
 0xb38   :  { %v4588_v41 = vsel %vm1941_vm3, %v4587_v55, %v4586_v6  ;;  %v11798_v55 = vld [vmem:[#allocation80_spill] sm:$0xff]  ;;  %v4606_v6 = vperm.slane %v9920_v30, %v11569_v22 }
 0xb39   :  { %v4590_v9 = vsel %vm1945_vm15, %v4589_v4, %v4588_v41  ;;  %v4106_v63 = vmul.f32 %v11798_v55, %v11795_v1 }
 0xb3a   :  { %4301 = vadd.xlane.f32.xlu2 %v4097_v15  ;;  %v4218_v62 = vpop.xlane.xlu2 %4217 }
 0xb3b   :  { %4293 = vadd.xlane.f32.xlu1 %v4093_v61  ;;  %v4598_v12 = vperm.slane %v4218_v62, %v11528_v51  ;;  %v4102_v61 = vmul.f32 %v11800_v20, %v11795_v1  ;;  %v11813_v20 = vld [vmem:[#allocation138_spill] sm:$0xff] }
 0xb3c   :  { %v4210_v38 = vpop.xlane.xlu1 %4209 }
 0xb3d   :  { %v4591_v59 = vperm.slane %v4210_v38, %v11587_v25 }
 0xb3f   :  { %v4592_v17 = vsel %vm1949_vm11, %v4591_v59, %v4590_v9 }
 0xb40   :  { %v4594_v8 = vsel %vm1953_vm1, %v4593_v0, %v4592_v17  ;;  %v4612_v0 = vperm.slane %v9931_v18, %v11573_v40  ;;  %v10029_v17 = vpop.xlane.xlu0 %4267 }
 0xb41   :  { %v9993_v42 = vsel %vm2172_vm7, %v4594_v8, %v9927_v29  ;;  %vm11799_vm7 = vcmask 326912  }
 0xb42   :  { %4307 = vadd.xlane.f32.xlu2 %v4100_v44  ;;  %v4224_v52 = vpop.xlane.xlu2 %4223  ;;  %v4109_v44 = vmul.f32 %v11803_v26, %v11795_v1 }
 0xb43   :  { %4299 = vadd.xlane.f32.xlu1 %v4096_v34  ;;  %v4604_v4 = vperm.slane %v4224_v52, %v11542_v16  ;;  %v11805_v34 = vld [vmem:[#allocation131_spill] sm:$0xff] }
 0xb44   :  { %v4216_v7 = vpop.xlane.xlu1 %4215  ;;  %v4105_v8 = vmul.f32 %v11805_v34, %v11795_v1 }
 0xb45   :  { %v4596_v54 = vperm.slane %v4216_v7, %v11529_v27 }
 0xb47   :  { %v4597_v29 = vsel %vm1897_vm2, %v4596_v54, %v4595_v13 }
 0xb48   :  { %v4599_v58 = vsel %vm1901_vm4, %v4598_v12, %v4597_v29 }
 0xb49   :  { %v4601_v49 = vsel %vm1905_vm6, %v4600_v14, %v4599_v58  ;;  %v4618_v14 = vperm.slane %v9944_v43, %v11575_v10 }
 0xb4a   :  { %4313 = vadd.xlane.f32.xlu2 %v4103_v3  ;;  %v4230_v46 = vpop.xlane.xlu2 %4229  ;;  %v11808_v3 = vld [vmem:[#allocation230_spill] sm:$0xff] }
 0xb4b   :  { %4305 = vadd.xlane.f32.xlu1 %v4099_v57  ;;  %v4610_v30 = vperm.slane %v4230_v46, %v11580_v37  ;;  %v4112_v18 = vmul.f32 %v11808_v3, %v11795_v1  ;;  %v4108_v57 = vmul.f32 %v11810_v36, %v11795_v1  ;;  %v11817_v3 = vld [vmem:[#allocation113_spill] sm:$0xff] }
 0xb4c   :  { %v4222_v23 = vpop.xlane.xlu1 %4221 }
 0xb4d   :  { %v4602_v15 = vperm.slane %v4222_v23, %v11546_v47 }
 0xb4f   :  { %v4603_v28 = vsel %vm11799_vm7, %v4602_v15, %v4601_v49  ;;  %vm11811_vm7 = vcmask 786112   ;;  %v10046_v49 = vpop.xlane.xlu0 %4273 }
 0xb50   :  { %v4605_v41 = vsel %vm11801_vm0, %v4604_v4, %v4603_v28  ;;  %vm11814_vm0 = vcmask 1042434  }
 0xb51   :  { %v4607_v9 = vsel %vm11802_vm14, %v4606_v6, %v4605_v41  ;;  %v4624_v6 = vperm.slane %v9963_v53, %v11577_v19  ;;  %vm11819_vm14 = vcmask 326912  }
 0xb52   :  { %4319 = vadd.xlane.f32.xlu2 %v4106_v63  ;;  %v4236_v62 = vpop.xlane.xlu2 %4235  ;;  %v11812_v63 = vld [vmem:[#allocation71_spill] sm:$0xff] }
 0xb53   :  { %4311 = vadd.xlane.f32.xlu1 %v4102_v61  ;;  %v4616_v12 = vperm.slane %v4236_v62, %v11584_v11  ;;  %v4115_v43 = vmul.f32 %v11812_v63, %v11795_v1  ;;  %v4111_v61 = vmul.f32 %v11813_v20, %v11795_v1  ;;  %v4641_v63 = vperm.slane %v10010_v39, %v11580_v37 }
 0xb56   :  { %v4228_v38 = vpop.xlane.xlu1 %4227 }
 0xb57   :  { %v4608_v59 = vperm.slane %v4228_v38, %v11562_v56 }
 0xb59   :  { %v4609_v60 = vsel %vm11804_vm5, %v4608_v59, %v4607_v9  ;;  %v4280_v59 = vpop.xlane.xlu0 %4279  ;;  %vm11820_vm5 = vcmask 392512  }
 0xb5a   :  { %4325 = vadd.xlane.f32.xlu2 %v4109_v44  ;;  %v4611_v52 = vsel %vm11806_vm8, %v4610_v30, %v4609_v60  ;;  %v11815_v30 = vld [vmem:[#allocation231_spill] sm:$0xff]  ;;  %v4629_v60 = vperm.slane %v9980_v21, %v11528_v51  ;;  %vm11822_vm8 = vcmask 458112  }
 0xb5b   :  { %4317 = vadd.xlane.f32.xlu1 %v4105_v8  ;;  %v4613_v7 = vsel %vm11807_vm10, %v4612_v0, %v4611_v52  ;;  %v4118_v0 = vmul.f32 %v11815_v30, %v9223_v24  ;;  %v11816_v8 = vld [vmem:[#allocation57_spill] sm:$0xff]  ;;  %vm11824_vm10 = vcmask 523712  }
 0xb5c   :  { %v4114_v52 = vmul.f32 %v11816_v8, %v11795_v1  ;;  %v11818_v1 = vld [vmem:[#allocation139_spill] sm:$0xff] }
 0xb5d   :  { %v4242_v13 = vpop.xlane.xlu2 %4241 }
 0xb5e   :  { %v4234_v54 = vpop.xlane.xlu1 %4233  ;;  %v4622_v4 = vperm.slane %v4242_v13, %v11587_v25 }
 0xb5f   :  { %v4614_v33 = vperm.slane %v4234_v54, %v11564_v45 }
 0xb61   :  { %v4615_v29 = vsel %vm11809_vm12, %v4614_v33, %v4613_v7  ;;  %v10074_v54 = vpop.xlane.xlu0 %4285  ;;  %vm11825_vm12 = vcmask 589312  }
 0xb62   :  { %4331 = vadd.xlane.f32.xlu2 %v4112_v18  ;;  %v4617_v58 = vsel %vm11811_vm7, %v4616_v12, %v4615_v29  ;;  %v4121_v18 = vmul.f32 %v11817_v3, %v9223_v24  ;;  %v4635_v12 = vperm.slane %v9995_v2, %v11542_v16  ;;  %v4117_v29 = vmul.f32 %v11818_v1, %v9223_v24 }
 0xb63   :  { %4323 = vadd.xlane.f32.xlu1 %v4108_v57  ;;  %v4619_v46 = vsel %vm1941_vm3, %v4618_v14, %v4617_v58  ;;  %vm11827_vm7 = vcmask 654912  }
 0xb65   :  { %v4248_v23 = vpop.xlane.xlu2 %4247 }
 0xb66   :  { %v4240_v15 = vpop.xlane.xlu1 %4239  ;;  %v4627_v53 = vperm.slane %v4248_v23, %v11529_v27 }
 0xb67   :  { %v4620_v55 = vperm.slane %v4240_v15, %v11566_v5  ;;  %v11821_v15 = vld [vmem:[#allocation161_spill] sm:$0xff] }
 0xb69   :  { %v4621_v28 = vsel %vm1945_vm15, %v4620_v55, %v4619_v46  ;;  %v4124_v55 = vmul.f32 %v11821_v15, %v9223_v24 }
 0xb6a   :  { %4337 = vadd.xlane.f32.xlu2 %v4115_v43  ;;  %v4623_v41 = vsel %vm1949_vm11, %v4622_v4, %v4621_v28  ;;  %v10093_v43 = vpop.xlane.xlu0 %4291 }
 0xb6b   :  { %v4625_v9 = vsel %vm1953_vm1, %v4624_v6, %v4623_v41  ;;  %4329 = vadd.xlane.f32.xlu1 %v4111_v61  ;;  %v11823_v6 = vld [vmem:[#allocation68_spill] sm:$0xff] }
 0xb6c   :  { %v10062_v38 = vsel %vm11814_vm0, %v4625_v9, %v9993_v42  ;;  %v4120_v28 = vmul.f32 %v11823_v6, %v9223_v24  ;;  %vm11829_vm0 = vcmask 720512  }
 0xb6d   :  { %v4254_v62 = vpop.xlane.xlu2 %4253 }
 0xb6e   :  { %v4246_v26 = vpop.xlane.xlu1 %4245  ;;  %v4633_v21 = vperm.slane %v4254_v62, %v11546_v47 }
 0xb6f   :  { %v4626_v44 = vperm.slane %v4246_v26, %v11527_v31  ;;  %v11826_v26 = vld [vmem:[#allocation219_spill] sm:$0xff] }
 0xb70   :  { %v4127_v39 = vmul.f32 %v11826_v26, %v9223_v24 }
 0xb71   :  { %v4628_v34 = vsel %vm1897_vm2, %v4627_v53, %v4626_v44  ;;  %v4647_v44 = vperm.slane %v10029_v17, %v11584_v11 }
 0xb72   :  { %4343 = vadd.xlane.f32.xlu2 %v4118_v0  ;;  %v4630_v42 = vsel %vm1901_vm4, %v4629_v60, %v4628_v34  ;;  %v11828_v0 = vld [vmem:[#allocation76_spill] sm:$0xff]  ;;  %v10110_v8 = vpop.xlane.xlu0 %4297 }
 0xb73   :  { %4335 = vadd.xlane.f32.xlu1 %v4114_v52  ;;  %v4123_v60 = vmul.f32 %v11828_v0, %v9223_v24 }
 0xb75   :  { %v4260_v7 = vpop.xlane.xlu2 %4259 }
 0xb76   :  { %v4252_v13 = vpop.xlane.xlu1 %4251  ;;  %v4639_v2 = vperm.slane %v4260_v7, %v11562_v56  ;;  %v4658_v7 = vperm.slane %v4280_v59, %v11529_v27  ;;  %v11832_v59 = vld [vmem:[#allocation77_spill] sm:$0xff] }
 0xb77   :  { %v4631_v33 = vperm.slane %v4252_v13, %v11531_v35 }
 0xb79   :  { %v4632_v14 = vsel %vm1905_vm6, %v4631_v33, %v4630_v42 }
 0xb7a   :  { %4349 = vadd.xlane.f32.xlu2 %v4121_v18  ;;  %v4634_v36 = vsel %vm11819_vm14, %v4633_v21, %v4632_v14  ;;  %vm11830_vm14 = vcmask 786112   ;;  %v11831_v18 = vld [vmem:[#allocation143_spill] sm:$0xff]  ;;  %v4653_v14 = vperm.slane %v10046_v49, %v11587_v25 }
 0xb7b   :  { %4341 = vadd.xlane.f32.xlu1 %v4117_v29  ;;  %v4636_v57 = vsel %vm11820_vm5, %v4635_v12, %v4634_v36  ;;  %v4135_v21 = vmul.f32 %v11831_v18, %v9256_v50  ;;  %v4126_v29 = vmul.f32 %v11832_v59, %v9223_v24 }
 0xb7d   :  { %v4266_v58 = vpop.xlane.xlu2 %4265 }
 0xb7e   :  { %v4258_v46 = vpop.xlane.xlu1 %4257  ;;  %v4645_v53 = vperm.slane %v4266_v58, %v11564_v45 }
 0xb7f   :  { %v4637_v23 = vperm.slane %v4258_v46, %v11569_v22  ;;  %v4304_v46 = vpop.xlane.xlu0 %4303 }
 0xb81   :  { %v4638_v4 = vsel %vm11822_vm8, %v4637_v23, %v4636_v57 }
 0xb82   :  { %4355 = vadd.xlane.f32.xlu2 %v4124_v55  ;;  %v4640_v20 = vsel %vm11824_vm10, %v4639_v2, %v4638_v4  ;;  %v11833_v55 = vld [vmem:[#allocation145_spill] sm:$0xff] }
 0xb83   :  { %4347 = vadd.xlane.f32.xlu1 %v4120_v28  ;;  %v4642_v61 = vsel %vm11825_vm12, %v4641_v63, %v4640_v20  ;;  %v4138_v2 = vmul.f32 %v11833_v55, %v9256_v50  ;;  %v11834_v63 = vld [vmem:[#allocation152_spill] sm:$0xff] }
 0xb84   :  { %v4134_v4 = vmul.f32 %v11834_v63, %v9256_v50 }
 0xb85   :  { %v4272_v41 = vpop.xlane.xlu2 %4271 }
 0xb86   :  { %v4264_v9 = vpop.xlane.xlu1 %4263  ;;  %v4651_v12 = vperm.slane %v4272_v41, %v11566_v5 }
 0xb87   :  { %v4643_v62 = vperm.slane %v4264_v9, %v11573_v40  ;;  %v11835_v9 = vld [vmem:[#allocation187_spill] sm:$0xff] }
 0xb89   :  { %v4644_v30 = vsel %vm11827_vm7, %v4643_v62, %v4642_v61  ;;  %v10137_v61 = vpop.xlane.xlu0 %4309  ;;  %v4141_v62 = vmul.f32 %v11835_v9, %v9256_v50  ;;  %v4682_v9 = vperm.slane %v4304_v46, %v11566_v5 }
 0xb8a   :  { %4361 = vadd.xlane.f32.xlu2 %v4127_v39  ;;  %v4646_v34 = vsel %vm11829_vm0, %v4645_v53, %v4644_v30  ;;  %v4664_v39 = vperm.slane %v10074_v54, %v11546_v47 }
 0xb8b   :  { %4353 = vadd.xlane.f32.xlu1 %v4123_v60  ;;  %v4648_v52 = vsel %vm11830_vm14, %v4647_v44, %v4646_v34 }
 0xb8d   :  { %v4278_v42 = vpop.xlane.xlu2 %4277 }
 0xb8e   :  { %v4657_v13 = vperm.slane %v4278_v42, %v11527_v31  ;;  %v4270_v33 = vpop.xlane.xlu1 %4269  ;;  %v11838_v42 = vld [vmem:[#allocation155_spill] sm:$0xff] }
 0xb8f   :  { %v4649_v3 = vperm.slane %v4270_v33, %v11575_v10 }
 0xb90   :  { %v4659_v17 = vsel %vm1897_vm2, %v4658_v7, %v4657_v13  ;;  %v4143_v7 = vmul.f32 %v11838_v42, %v9256_v50  ;;  %v4670_v13 = vperm.slane %v10093_v43, %v11562_v56 }
 0xb91   :  { %v4650_v1 = vsel %vm1941_vm3, %v4649_v3, %v4648_v52  ;;  %v4316_v33 = vpop.xlane.xlu0 %4315  ;;  %v11839_v3 = vld [vmem:[#allocation153_spill] sm:$0xff] }
 0xb92   :  { %4377 = vadd.xlane.f32.xlu2 %v4135_v21  ;;  %v4652_v36 = vsel %vm1945_vm15, %v4651_v12, %v4650_v1  ;;  %v4140_v18 = vmul.f32 %v11839_v3, %v9256_v50 }
 0xb93   :  { %4359 = vadd.xlane.f32.xlu1 %v4126_v29  ;;  %v4654_v57 = vsel %vm1949_vm11, %v4653_v14, %v4652_v36  ;;  %v11840_v29 = vld [vmem:[#allocation199_spill] sm:$0xff] }
 0xb94   :  { %v4130_v36 = vmul.f32 %v11840_v29, %v9223_v24  ;;  %v11846_v29 = vld [vmem:[#allocation227_spill] sm:$0xff] }
 0xb95   :  { %v4284_v58 = vpop.xlane.xlu2 %4283 }
 0xb96   :  { %v4276_v23 = vpop.xlane.xlu1 %4275  ;;  %v4662_v26 = vperm.slane %v4284_v58, %v11531_v35 }
 0xb97   :  { %v4655_v15 = vperm.slane %v4276_v23, %v11577_v19  ;;  %v11841_v23 = vld [vmem:[#allocation36_spill] sm:$0xff] }
 0xb99   :  { %v4656_v49 = vsel %vm1953_vm1, %v4655_v15, %v4654_v57  ;;  %v4676_v57 = vperm.slane %v10110_v8, %v11564_v45  ;;  %v4128_v15 = vmul.f32 %v11841_v23, %v9223_v24 }
 0xb9a   :  { %4383 = vadd.xlane.f32.xlu2 %v4138_v2  ;;  %v10135_v6 = vsel %vm2176_vm13, %v4656_v49, %v10062_v38  ;;  %v11836_v38 = vld [vmem:[#allocation150_spill] sm:$0xff]  ;;  %vm11837_vm13 = vcmask 326912   ;;  %v4322_v2 = vpop.xlane.xlu0 %4321 }
 0xb9b   :  { %4375 = vadd.xlane.f32.xlu1 %v4134_v4  ;;  %v4137_v44 = vmul.f32 %v11836_v38, %v9256_v50 }
 0xb9d   :  { %v4290_v28 = vpop.xlane.xlu2 %4289 }
 0xb9e   :  { %v4282_v20 = vpop.xlane.xlu1 %4281  ;;  %v4668_v54 = vperm.slane %v4290_v28, %v11569_v22 }
 0xb9f   :  { %v4660_v41 = vperm.slane %v4282_v20, %v11528_v51  ;;  %v11842_v20 = vld [vmem:[#allocation104_spill] sm:$0xff] }
 0xba1   :  { %v4661_v53 = vsel %vm1901_vm4, %v4660_v41, %v4659_v17  ;;  %v4146_v41 = vmul.f32 %v11842_v20, %v9256_v50 }
 0xba2   :  { %4389 = vadd.xlane.f32.xlu2 %v4141_v62  ;;  %v4663_v30 = vsel %vm1905_vm6, %v4662_v26, %v4661_v53  ;;  %v11843_v26 = vld [vmem:[#allocation82_spill] sm:$0xff] }
 0xba3   :  { %4381 = vadd.xlane.f32.xlu1 %v4137_v44  ;;  %v4665_v0 = vsel %vm11837_vm13, %v4664_v39, %v4663_v30  ;;  %v4144_v39 = vmul.f32 %v11843_v26, %v9256_v50  ;;  %v4328_v30 = vpop.xlane.xlu0 %4327 }
 0xba5   :  { %v4296_v60 = vpop.xlane.xlu2 %4295 }
 0xba6   :  { %v4288_v34 = vpop.xlane.xlu1 %4287  ;;  %v4674_v43 = vperm.slane %v4296_v60, %v11573_v40 }
 0xba7   :  { %v4666_v52 = vperm.slane %v4288_v34, %v11542_v16  ;;  %v11844_v34 = vld [vmem:[#allocation43_spill] sm:$0xff] }
 0xba9   :  { %v4667_v17 = vsel %vm11820_vm5, %v4666_v52, %v4665_v0  ;;  %v4148_v52 = vmul.f32 %v11844_v34, %v9256_v50 }
 0xbaa   :  { %4393 = vadd.xlane.f32.xlu2 %v4143_v7  ;;  %v4669_v21 = vsel %vm11822_vm8, %v4668_v54, %v4667_v17  ;;  %v11845_v7 = vld [vmem:[#allocation167_spill] sm:$0xff] }
 0xbab   :  { %4387 = vadd.xlane.f32.xlu1 %v4140_v18  ;;  %v4671_v12 = vsel %vm11824_vm10, %v4670_v13, %v4669_v21  ;;  %v4131_v54 = vmul.f32 %v11845_v7, %v9223_v24  ;;  %v4688_v21 = vperm.slane %v10137_v61, %v11527_v31 }
 0xbad   :  { %v4302_v14 = vpop.xlane.xlu2 %4301 }
 0xbae   :  { %v4294_v1 = vpop.xlane.xlu1 %4293  ;;  %v4680_v8 = vperm.slane %v4302_v14, %v11575_v10 }
 0xbaf   :  { %v4672_v59 = vperm.slane %v4294_v1, %v11580_v37 }
 0xbb1   :  { %v4673_v58 = vsel %vm11825_vm12, %v4672_v59, %v4671_v12  ;;  %v4334_v12 = vpop.xlane.xlu0 %4333  ;;  %v4693_v59 = vperm.slane %v4316_v33, %v11531_v35 }
 0xbb2   :  { %4367 = vadd.xlane.f32.xlu2 %v4130_v36  ;;  %v4675_v55 = vsel %vm11827_vm7, %v4674_v43, %v4673_v58  ;;  %v4147_v36 = vmul.f32 %v11846_v29, %v9256_v50 }
 0xbb3   :  { %4363 = vadd.xlane.f32.xlu1 %v4128_v15  ;;  %v4677_v49 = vsel %vm11829_vm0, %v4676_v57, %v4675_v55  ;;  %v4699_v15 = vperm.slane %v4322_v2, %v11569_v22 }
 0xbb5   :  { %v4308_v63 = vpop.xlane.xlu2 %4307 }
 0xbb6   :  { %v4300_v4 = vpop.xlane.xlu1 %4299  ;;  %v4686_v46 = vperm.slane %v4308_v63, %v11577_v19 }
 0xbb7   :  { %v4678_v28 = vperm.slane %v4300_v4, %v11584_v11 }
 0xbb9   :  { %v4679_v62 = vsel %vm11830_vm14, %v4678_v28, %v4677_v49  ;;  %v4340_v55 = vpop.xlane.xlu0 %4339 }
 0xbba   :  { %4399 = vadd.xlane.f32.xlu2 %v4146_v41  ;;  %v4681_v53 = vsel %vm1941_vm3, %v4680_v8, %v4679_v62  ;;  %v4705_v41 = vperm.slane %v4328_v30, %v11573_v40 }
 0xbbb   :  { %4395 = vadd.xlane.f32.xlu1 %v4144_v39  ;;  %v4683_v38 = vsel %vm1945_vm15, %v4682_v9, %v4681_v53 }
 0xbbd   :  { %v4314_v44 = vpop.xlane.xlu2 %4313 }
 0xbbe   :  { %v4306_v0 = vpop.xlane.xlu1 %4305  ;;  %v4691_v1 = vperm.slane %v4314_v44, %v11528_v51  ;;  %v4711_v44 = vperm.slane %v4334_v12, %v11575_v10 }
 0xbbf   :  { %v4684_v60 = vperm.slane %v4306_v0, %v11587_v25 }
 0xbc1   :  { %v4685_v42 = vsel %vm1949_vm11, %v4684_v60, %v4683_v38  ;;  %v4346_v2 = vpop.xlane.xlu0 %4345 }
 0xbc2   :  { %4403 = vadd.xlane.f32.xlu2 %v4148_v52  ;;  %v4687_v13 = vsel %vm1953_vm1, %v4686_v46, %v4685_v42 }
 0xbc3   :  { %v4784_v17 = vsel %vm2178_vm9, %v4687_v13, %v10135_v6  ;;  %4369 = vadd.xlane.f32.xlu1 %v4131_v54  ;;  %vm11847_vm9 = vmmov %vm11837_vm13  ;;  %v4717_v54 = vperm.slane %v4340_v55, %v11577_v19 }
 0xbc4   :  { %vm11848_vm13 = vmmov %vm11820_vm5 }
 0xbc5   :  { %v4320_v3 = vpop.xlane.xlu2 %4319  ;;  %vm11849_vm5 = vmmov %vm11822_vm8 }
 0xbc6   :  { %v4312_v18 = vpop.xlane.xlu1 %4311  ;;  %v4697_v23 = vperm.slane %v4320_v3, %v11542_v16  ;;  %vm11850_vm8 = vmmov %vm11824_vm10 }
 0xbc7   :  { %v4689_v14 = vperm.slane %v4312_v18, %v11529_v27  ;;  %vm11851_vm10 = vmmov %vm11825_vm12 }
 0xbc8   :  { %vm11852_vm12 = vmmov %vm11827_vm7 }
 0xbc9   :  { %v4690_v24 = vsel %vm1897_vm2, %v4689_v14, %v4688_v21  ;;  %vm11853_vm7 = vmmov %vm11829_vm0  ;;  %v4352_v52 = vpop.xlane.xlu0 %4351 }
 0xbca   :  { %v4692_v6 = vsel %vm1901_vm4, %v4691_v1, %v4690_v24  ;;  %vm11854_vm0 = vmmov %vm11830_vm14  ;;  %vm11855_vm14 = vcmask 1045509  }
 0xbcb   :  { %4401 = vadd.xlane.f32.xlu1 %v4147_v36  ;;  %v4694_v43 = vsel %vm1905_vm6, %v4693_v59, %v4692_v6 }
 0xbcd   :  { %v4326_v57 = vpop.xlane.xlu2 %4325 }
 0xbce   :  { %v4318_v58 = vpop.xlane.xlu1 %4317  ;;  %v4703_v20 = vperm.slane %v4326_v57, %v11580_v37 }
 0xbcf   :  { %v4695_v61 = vperm.slane %v4318_v58, %v11546_v47 }
 0xbd1   :  { %v4696_v33 = vsel %vm11847_vm9, %v4695_v61, %v4694_v43  ;;  %v4358_v1 = vpop.xlane.xlu0 %4357 }
 0xbd2   :  { %v4698_v49 = vsel %vm11848_vm13, %v4697_v23, %v4696_v33 }
 0xbd3   :  { %v4700_v50 = vsel %vm11849_vm5, %v4699_v15, %v4698_v49 }
 0xbd5   :  { %v4332_v63 = vpop.xlane.xlu2 %4331 }
 0xbd6   :  { %v4324_v4 = vpop.xlane.xlu1 %4323  ;;  %v4709_v38 = vperm.slane %v4332_v63, %v11584_v11 }
 0xbd7   :  { %v4701_v28 = vperm.slane %v4324_v4, %v11562_v56 }
 0xbd9   :  { %v4702_v8 = vsel %vm11850_vm8, %v4701_v28, %v4700_v50  ;;  %v4374_v43 = vpop.xlane.xlu0 %4373  ;;  %v4722_v28 = vperm.slane %v4346_v2, %v11528_v51 }
 0xbda   :  { %v4704_v9 = vsel %vm11851_vm10, %v4703_v20, %v4702_v8 }
 0xbdb   :  { %v4706_v62 = vsel %vm11852_vm12, %v4705_v41, %v4704_v9 }
 0xbdd   :  { %v4338_v26 = vpop.xlane.xlu2 %4337 }
 0xbde   :  { %v4330_v39 = vpop.xlane.xlu1 %4329  ;;  %v4715_v7 = vperm.slane %v4338_v26, %v11587_v25 }
 0xbdf   :  { %v4707_v53 = vperm.slane %v4330_v39, %v11564_v45 }
 0xbe1   :  { %v4708_v0 = vsel %vm11853_vm7, %v4707_v53, %v4706_v62  ;;  %v4380_v61 = vpop.xlane.xlu0 %4379  ;;  %v4750_v62 = vperm.slane %v4374_v43, %v11527_v31  ;;  %vm11860_vm7 = vmmov %vm11850_vm8 }
 0xbe2   :  { %v4710_v60 = vsel %vm11854_vm0, %v4709_v38, %v4708_v0  ;;  %vm11861_vm0 = vcmask 720512  }
 0xbe3   :  { %v4712_v30 = vsel %vm1941_vm3, %v4711_v44, %v4710_v60 }
 0xbe5   :  { %v4344_v34 = vpop.xlane.xlu2 %4343 }
 0xbe6   :  { %v4336_v46 = vpop.xlane.xlu1 %4335  ;;  %v4720_v59 = vperm.slane %v4344_v34, %v11529_v27 }
 0xbe7   :  { %v4713_v42 = vperm.slane %v4336_v46, %v11566_v5 }
 0xbe9   :  { %v4714_v13 = vsel %vm1945_vm15, %v4713_v42, %v4712_v30  ;;  %v4386_v33 = vpop.xlane.xlu0 %4385 }
 0xbea   :  { %v4716_v3 = vsel %vm1949_vm11, %v4715_v7, %v4714_v13 }
 0xbeb   :  { %v4718_v18 = vsel %vm1953_vm1, %v4717_v54, %v4716_v3 }
 0xbec   :  { %v10227_v12 = vsel %vm11855_vm14, %v4718_v18, %v4784_v17  ;;  %vm11862_vm14 = vcmask 786112  }
 0xbed   :  { %v4350_v21 = vpop.xlane.xlu2 %4349 }
 0xbee   :  { %v4342_v14 = vpop.xlane.xlu1 %4341  ;;  %v4726_v53 = vperm.slane %v4350_v21, %v11546_v47 }
 0xbef   :  { %v4719_v24 = vperm.slane %v4342_v14, %v11527_v31  ;;  %v4755_v31 = vperm.slane %v4380_v61, %v11531_v35 }
 0xbf1   :  { %v4721_v29 = vsel %vm1897_vm2, %v4720_v59, %v4719_v24  ;;  %v4392_v63 = vpop.xlane.xlu0 %4391  ;;  %v4761_v59 = vperm.slane %v4386_v33, %v11569_v22 }
 0xbf2   :  { %v4723_v8 = vsel %vm1901_vm4, %v4722_v28, %v4721_v29 }
 0xbf5   :  { %v4356_v36 = vpop.xlane.xlu2 %4355 }
 0xbf6   :  { %v4348_v6 = vpop.xlane.xlu1 %4347  ;;  %v4732_v7 = vperm.slane %v4356_v36, %v11562_v56 }
 0xbf7   :  { %v4724_v4 = vperm.slane %v4348_v6, %v11531_v35  ;;  %v4734_v35 = vperm.slane %v4358_v1, %v11580_v37 }
 0xbf9   :  { %v4725_v26 = vsel %vm1905_vm6, %v4724_v4, %v4723_v8  ;;  %v4366_v39 = vpop.xlane.xlu0 %4365 }
 0xbfa   :  { %v4727_v44 = vsel %vm11847_vm9, %v4726_v53, %v4725_v26 }
 0xbfd   :  { %v4362_v57 = vpop.xlane.xlu2 %4361 }
 0xbfe   :  { %v4354_v58 = vpop.xlane.xlu1 %4353  ;;  %v4738_v43 = vperm.slane %v4362_v57, %v11564_v45 }
 0xbff   :  { %v4730_v0 = vperm.slane %v4354_v58, %v11569_v22  ;;  %v4742_v22 = vperm.slane %v4366_v39, %v11575_v10 }
 0xc01   :  { %v4398_v18 = vpop.xlane.xlu0 %4397 }
 0xc02   :  { %v4773_v26 = vperm.slane %v4398_v18, %v11575_v10 }
 0xc05   :  { %v4378_v23 = vpop.xlane.xlu2 %4377 }
 0xc06   :  { %v4360_v15 = vpop.xlane.xlu1 %4359  ;;  %v4753_v2 = vperm.slane %v4378_v23, %v11528_v51 }
 0xc07   :  { %v4736_v3 = vperm.slane %v4360_v15, %v11573_v40 }
 0xc09   :  { %v4372_v33 = vpop.xlane.xlu0 %4371 }
 0xc0d   :  { %v4384_v55 = vpop.xlane.xlu2 %4383 }
 0xc0e   :  { %v4376_v17 = vpop.xlane.xlu1 %4375 }
 0xc0f   :  { %v4751_v20 = vperm.slane %v4376_v17, %v11529_v27  ;;  %v4728_v27 = vperm.slane %v4352_v52, %v11542_v16 }
 0xc11   :  { %v4752_v38 = vsel %vm1897_vm2, %v4751_v20, %v4750_v62  ;;  %v4729_v34 = vsel %vm11848_vm13, %v4728_v27, %v4727_v44  ;;  %vm11856_vm2 = vmmov %vm11847_vm9  ;;  %v4748_v20 = vperm.slane %v4372_v33, %v11577_v19 }
 0xc12   :  { %v4754_v60 = vsel %vm1901_vm4, %v4753_v2, %v4752_v38  ;;  %v4731_v42 = vsel %vm11849_vm5, %v4730_v0, %v4729_v34  ;;  %vm11857_vm4 = vmmov %vm11848_vm13 }
 0xc13   :  { %v4756_v54 = vsel %vm1905_vm6, %v4755_v31, %v4754_v60  ;;  %v4733_v52 = vsel %vm11850_vm8, %v4732_v7, %v4731_v42  ;;  %vm11858_vm6 = vmmov %vm11852_vm12  ;;  %vm11867_vm8 = vcmask 1046534  }
 0xc14   :  { %v4735_v24 = vsel %vm11851_vm10, %v4734_v35, %v4733_v52  ;;  %vm11859_vm12 = vmmov %vm11849_vm5 }
 0xc15   :  { %v4390_v49 = vpop.xlane.xlu2 %4389  ;;  %v4737_v29 = vsel %vm11858_vm6, %v4736_v3, %v4735_v24  ;;  %vm11863_vm9 = vmmov %vm11851_vm10 }
 0xc16   :  { %v4382_v50 = vpop.xlane.xlu1 %4381  ;;  %v4765_v58 = vperm.slane %v4390_v49, %v11580_v37  ;;  %v4739_v61 = vsel %vm11861_vm0, %v4738_v43, %v4737_v29  ;;  %vm11864_vm13 = vmmov %vm11858_vm6 }
 0xc17   :  { %v4757_v30 = vperm.slane %v4382_v50, %v11546_v47  ;;  %v4759_v47 = vperm.slane %v4384_v55, %v11542_v16  ;;  %v4767_v55 = vperm.slane %v4392_v63, %v11573_v40  ;;  %vm11865_vm5 = vmmov %vm11861_vm0 }
 0xc19   :  { %v4758_v13 = vsel %vm11856_vm2, %v4757_v30, %v4756_v54  ;;  %vm11866_vm2 = vmmov %vm11862_vm14 }
 0xc1a   :  { %v4760_v21 = vsel %vm11857_vm4, %v4759_v47, %v4758_v13  ;;  %vm11868_vm4 = vcmask 1047559  }
 0xc1b   :  { %v4762_v16 = vsel %vm11859_vm12, %v4761_v59, %v4760_v21 }
 0xc1d   :  { %v4394_v9 = vpop.xlane.xlu2 %4393 }
 0xc1e   :  { %v4388_v41 = vpop.xlane.xlu1 %4387  ;;  %v4769_v4 = vperm.slane %v4394_v9, %v11564_v45 }
 0xc1f   :  { %v4763_v14 = vperm.slane %v4388_v41, %v11562_v56 }
 0xc21   :  { %v4764_v1 = vsel %vm11860_vm7, %v4763_v14, %v4762_v16 }
 0xc22   :  { %v4766_v23 = vsel %vm11863_vm9, %v4765_v58, %v4764_v1 }
 0xc23   :  { %v4768_v50 = vsel %vm11864_vm13, %v4767_v55, %v4766_v23 }
 0xc24   :  { %v4770_v40 = vsel %vm11865_vm5, %v4769_v4, %v4768_v50 }
 0xc25   :  { %v4368_v51 = vpop.xlane.xlu2 %4367 }
 0xc26   :  { %v4364_v46 = vpop.xlane.xlu1 %4363  ;;  %v4744_v17 = vperm.slane %v4368_v51, %v11566_v5 }
 0xc27   :  { %v4740_v36 = vperm.slane %v4364_v46, %v11584_v11 }
 0xc29   :  { %v4741_v56 = vsel %vm11862_vm14, %v4740_v36, %v4739_v61 }
 0xc2a   :  { %v4743_v57 = vsel %vm1941_vm3, %v4742_v22, %v4741_v56 }
 0xc2b   :  { %v4745_v41 = vsel %vm1945_vm15, %v4744_v17, %v4743_v57 }
 0xc2d   :  { %v4400_v15 = vpop.xlane.xlu2 %4399 }
 0xc2e   :  { %v4396_v6 = vpop.xlane.xlu1 %4395  ;;  %v4775_v39 = vperm.slane %v4400_v15, %v11566_v5  ;;  %v5447_v5 = vpop.eup %5446 }
 0xc2f   :  { %v4771_v37 = vperm.slane %v4396_v6, %v11584_v11 }
 0xc31   :  { %v4772_v8 = vsel %vm11866_vm2, %v4771_v37, %v4770_v40 }
 0xc32   :  { %v4774_v45 = vsel %vm1941_vm3, %v4773_v26, %v4772_v8 }
 0xc33   :  { %v4776_v0 = vsel %vm1945_vm15, %v4775_v39, %v4774_v45 }
 0xc35   :  { %v4404_v9 = vpop.xlane.xlu2 %4403 }
 0xc36   :  { %v4370_v49 = vpop.xlane.xlu1 %4369  ;;  %v4779_v44 = vperm.slane %v4404_v9, %v11577_v19 }
 0xc37   :  { %v4746_v28 = vperm.slane %v4370_v49, %v11587_v25 }
 0xc39   :  { %v4747_v63 = vsel %vm1949_vm11, %v4746_v28, %v4745_v41 }
 0xc3a   :  { %v4749_v62 = vsel %vm1953_vm1, %v4748_v20, %v4747_v63 }
 0xc3b   :  { %v4786_v11 = vsel %vm11867_vm8, %v4749_v62, %v10227_v12 }
 0xc3e   :  { %v4402_v53 = vpop.xlane.xlu1 %4401 }
 0xc3f   :  { %v4777_v38 = vperm.slane %v4402_v53, %v11587_v25 }
 0xc41   :  { %v4778_v2 = vsel %vm1949_vm11, %v4777_v38, %v4776_v0 }
 0xc42   :  { %v4780_v10 = vsel %vm1953_vm1, %v4779_v44, %v4778_v2 }
 0xc43   :  { %v4787_v12 = vsel %vm11868_vm4, %v4780_v10, %v4786_v11 }
 0xc44   :  { %v4789_v25 = vadd.f32 %v4787_v12, %v9851_v48 }
 0xc46   :  { %v4798_v32 = vmul.f32 %v5447_v5, %v4789_v25 }
 0xc48   :  { %4799 = vst [vmem:[#allocation14] sm:$0xff] %v4798_v32 }
 0xc49   :  { %4810 = dma.vmem_to_hbm [thread:$0]  %s4806_s23, 128, %s4808_s26, [#allocation8]  }
 0xc4a   :  { %5575 = dma.done.wait [#allocation8], 128  }
 0xc4b   :  { %5576 = vsyncadd [#allocation8], 4294967168 }
 0xc4c   :  { %4815 = vsyncpa [#allocation7], 1 }
 0xc4d   :  { %4816 = vsyncpa [#allocation10], 1 }
 0xc4e   :  { %4817 = vsyncpa [#allocation13], 1 }
 0xc4f   :  { %4818 = vsyncpa [#allocation8], 1 }

</bundles_post_ra>
